<compile_context>
chip_gen: v7x
topology: tpu7x:2x2x1
jax: 0.10.0
libtpu: 0.0.40
codegen_flags: <defaults>
</compile_context>

<pallas_src>
import jax
import jax.numpy as jnp
from jax.experimental import pallas as pl
from jax.experimental.pallas import tpu as pltpu

# ----------------------------- hyperparameters -----------------------------
N_NODES_PER_GRAPH = 80          # N
LATENT_CH = 32                  # opt['n_ft_dim']
LATENT_DIM = 32                 # opt['latent_dim']
BLOCK_LATENT_DIM = 20           # opt['block_latent_dim']
T = 3
BATCH = 2
HEAD_OUT_PAD = 128              # decoder-head output padded to 128 lanes
MUVAR_PAD = 128                 # mu|log_var output padded to 128 lanes

# packed-constant ordering shared by pack_params(), the wrapper and the kernel
CONST_NAMES = (
    'relu_mask', 'add0',
    'w_bsh', 'w_bio', 'w_siz', 'w_pos', 'w_x',
    'we1', 'be1', 'we2', 'be2', 'we3', 'be3',
    'wf0', 'wf1', 'wf2', 'wf3', 'bf',
    'w3c', 'd0b',
    'ohd1', 'wd1', 'bd1', 'wd2', 'bd2', 'wd3', 'bd3',
    'wh0', 'bh0', 'wh1d', 'wh1h', 'bh1',
)


# ------------------------------ Pallas kernel -------------------------------

def _fused_kernel(*refs):
    (bshape_ref, biou_ref, size_ref, pos_ref, x_ref, s_ref,
     eps_ref, bsl_ref, bsc_ref,
     relu_mask_ref, add0_ref,
     w_bsh_ref, w_bio_ref, w_siz_ref, w_pos_ref, w_x_ref,
     we1_ref, be1_ref, we2_ref, be2_ref, we3_ref, be3_ref,
     wf0_ref, wf1_ref, wf2_ref, wf3_ref, bf_ref,
     w3c_ref, d0b_ref,
     ohd1_ref, wd1_ref, bd1_ref, wd2_ref, bd2_ref, wd3_ref, bd3_ref,
     wh0_ref, bh0_ref, wh1d_ref, wh1h_ref, bh1_ref,
     out_ref, muvar_ref) = refs

    f32, bf16 = jnp.float32, jnp.bfloat16
    Ng = N_NODES_PER_GRAPH
    S = s_ref[0]                                      # [80, 80] bf16, this graph's block

    # ---- encoder stage-0: packed input linears (one-hot folded into add0) ----
    pre = (jnp.dot(bshape_ref[...], w_bsh_ref[...], preferred_element_type=f32)
           + jnp.dot(size_ref[...], w_siz_ref[...], preferred_element_type=f32)
           + jnp.dot(pos_ref[...], w_pos_ref[...], preferred_element_type=f32)
           + jnp.dot(x_ref[...], w_x_ref[...], preferred_element_type=f32)
           + biou_ref[...] * w_bio_ref[...]
           + add0_ref[...])                           # [80, 64]
    # cols 0:16 (shape|iou features): no relu; cols 16:64 (size|pos|ft): relu
    n0 = pre - relu_mask_ref[...] * jnp.minimum(pre, 0.0)

    def gcn(x, w_ref, b_ref):
        xw = jnp.dot(x.astype(bf16), w_ref[...], preferred_element_type=f32)
        y = jnp.dot(S, xw.astype(bf16), preferred_element_type=f32) + b_ref[...]
        return jnp.maximum(y, 0.0)

    n1 = gcn(n0, we1_ref, be1_ref)
    n2 = gcn(n1, we2_ref, be2_ref)
    n3 = gcn(n2, we3_ref, be3_ref)

    # ---- per-graph mean pool + folded (aggregate -> fc_mu | fc_var) linear ----
    inv_n = 1.0 / Ng
    g0 = jnp.sum(n0, axis=0, keepdims=True) * inv_n   # [1, 64]
    g1 = jnp.sum(n1, axis=0, keepdims=True) * inv_n   # [1, 32]
    g2 = jnp.sum(n2, axis=0, keepdims=True) * inv_n
    g3 = jnp.sum(n3, axis=0, keepdims=True) * inv_n
    muvar = (jnp.dot(g0, wf0_ref[...], preferred_element_type=f32)
             + jnp.dot(g1, wf1_ref[...], preferred_element_type=f32)
             + jnp.dot(g2, wf2_ref[...], preferred_element_type=f32)
             + jnp.dot(g3, wf3_ref[...], preferred_element_type=f32)
             + bf_ref[...])                           # [1, 128] = [mu | log_var | 0-pad]
    muvar_ref[0] = muvar

    # ---- reparameterize ------------------------------------------------------
    mu = muvar[:, 0:LATENT_DIM]
    log_var = muvar[:, LATENT_DIM:2 * LATENT_DIM]
    z = eps_ref[0] * jnp.exp(0.5 * log_var) + mu      # [1, 32]

    # ---- d_ft_init: (z | block_shape | block_scale) -> per-node [80, 32] -----
    # Unrolled rank-1 updates avoid an unsupported (2560,) -> (80, 32) relayout.
    d0 = d0b_ref[...]                                 # bias (+ folded block_scale bias)
    zb = jnp.broadcast_to(z, (Ng, LATENT_DIM))
    for k in range(LATENT_DIM):
        d0 = d0 + zb[:, k:k + 1] * w3c_ref[k]
    sb = jnp.broadcast_to(bsl_ref[0], (Ng, BLOCK_LATENT_DIM))
    for k in range(BLOCK_LATENT_DIM):
        d0 = d0 + sb[:, k:k + 1] * w3c_ref[LATENT_DIM + k]
    cb = jnp.broadcast_to(bsc_ref[0], (Ng, 1))        # raw block_scale_gt scalar
    d0 = d0 + cb * w3c_ref[LATENT_DIM + BLOCK_LATENT_DIM]
    d0 = jnp.maximum(d0, 0.0)                         # relu(d_embd_0), node part

    # ---- decoder GCN chain (one-hot contribution folded into ohd1) -----------
    xw1 = (jnp.dot(d0.astype(bf16), wd1_ref[...], preferred_element_type=f32)
           + ohd1_ref[...])
    d1 = jnp.maximum(jnp.dot(S, xw1.astype(bf16), preferred_element_type=f32)
                     + bd1_ref[...], 0.0)
    d2 = gcn(d1, wd2_ref, bd2_ref)
    d3 = gcn(d2, wd3_ref, bd3_ref)

    # ---- all seven heads fused, single lane-dense [80, 128] store ------------
    h = jnp.maximum(jnp.dot(d3, wh0_ref[...], preferred_element_type=f32)
                    + bh0_ref[...], 0.0)              # [80, 192]
    out_ref[...] = (jnp.dot(d3, wh1d_ref[...], preferred_element_type=f32)
                    + jnp.dot(h, wh1h_ref[...], preferred_element_type=f32)
                    + bh1_ref[...])


# ------------------------------ call wrapper --------------------------------

def fused_forward(S_blocks, node_data, eps, bsl, bsc, pk):
    B = S_blocks.shape[0]
    Ng = N_NODES_PER_GRAPH
    Nn = B * Ng
    b_shape, b_iou, size_org, pos_org, x = node_data

    data_args = (b_shape, b_iou, size_org, pos_org, x, S_blocks, eps, bsl, bsc)
    const_args = tuple(pk[n] for n in CONST_NAMES)

    def node_spec(width):
        return pl.BlockSpec((Ng, width), lambda i: (i, 0))

    def g3_spec(d1, d2):
        return pl.BlockSpec((1, d1, d2), lambda i: (i, 0, 0))

    def const_spec(a):
        zeros = (0,) * a.ndim
        return pl.BlockSpec(a.shape, lambda i, _z=zeros: _z)

    in_specs = ([node_spec(6), node_spec(1), node_spec(2), node_spec(2), node_spec(2),
                 g3_spec(Ng, Ng), g3_spec(1, LATENT_DIM),
                 g3_spec(1, BLOCK_LATENT_DIM), g3_spec(1, 1)]
                + [const_spec(a) for a in const_args])

    out_shape = (jax.ShapeDtypeStruct((Nn, HEAD_OUT_PAD), jnp.float32),
                 jax.ShapeDtypeStruct((B, 1, MUVAR_PAD), jnp.float32))
    out_specs = (pl.BlockSpec((Ng, HEAD_OUT_PAD), lambda i: (i, 0)),
                 pl.BlockSpec((1, 1, MUVAR_PAD), lambda i: (i, 0, 0)))

    return pl.pallas_call(
        _fused_kernel,
        out_shape=out_shape,
        grid=(B,),
        in_specs=in_specs,
        out_specs=out_specs,
        compiler_params=pltpu.CompilerParams(
            dimension_semantics=("parallel",)),
        cost_estimate=pl.CostEstimate(flops=20_000_000, transcendentals=128,
                                      bytes_accessed=1_200_000),
    )(*data_args, *const_args)


# ------------------------------ graph utilities ------------------------------

def gcn_norm_adjacency_blocks(edge_index, batch_size, n_per_graph):
    """Per-graph dense S = D^-1/2 (A + I) D^-1/2 matching PyG GCNConv gcn_norm.

    PyG batching never produces cross-graph edges, so the full S is exactly
    block-diagonal and each graph's 80x80 block can be used independently."""
    num_nodes = batch_size * n_per_graph
    src, dst = edge_index[0], edge_index[1]
    loops = jnp.arange(num_nodes, dtype=edge_index.dtype)
    src = jnp.concatenate([src, loops])
    dst = jnp.concatenate([dst, loops])
    A = jnp.zeros((num_nodes, num_nodes), jnp.float32).at[dst, src].add(1.0)
    deg = A.sum(axis=1)
    dinv = jnp.where(deg > 0, 1.0 / jnp.sqrt(deg), 0.0)
    S = dinv[:, None] * A * dinv[None, :]
    blocks = jnp.stack([S[g * n_per_graph:(g + 1) * n_per_graph,
                          g * n_per_graph:(g + 1) * n_per_graph]
                        for g in range(batch_size)])
    return blocks.astype(jnp.bfloat16)


# ------------------------------ parameter init ------------------------------

def _init_linear(key, fan_in, fan_out):
    kw, kb = jax.random.split(key)
    gain = 2.0 ** 0.5                      # nn.init.calculate_gain('relu')
    limit = gain * (6.0 / (fan_in + fan_out)) ** 0.5
    w = jax.random.uniform(kw, (fan_in, fan_out), jnp.float32, -limit, limit)
    bound = 1.0 / (fan_in ** 0.5)
    b = jax.random.uniform(kb, (fan_out,), jnp.float32, -bound, bound)
    return (w, b)


def init_params(key):
    ch, N, ld = LATENT_CH, N_NODES_PER_GRAPH, LATENT_DIM
    shapes = {
        'enc_shape': (6, ch // 4),
        'enc_iou': (1, ch // 4),
        'pos_init': (2, ch // 2),
        'size_init': (2, ch // 2),
        'ex_init': (2, ch // 4),
        'ft_init': (ch // 4 + N, ch // 2),
        'e_conv1': (2 * ch, ch),
        'e_conv2': (ch, ch),
        'e_conv3': (ch, ch),
        'aggregate': (int(ch * (2.0 + T)), ld),
        'fc_mu': (ld, ld),
        'fc_var': (ld, ld),
        'enc_block_scale': (1, 20),
        'd_ft_init': (ld + 40, ch * N),
        'd_conv1': (ch + N, ch),
        'd_conv2': (ch, ch),
        'd_conv3': (ch, ch),
        'd_exist_1': (ch, 1),
        'd_posx_0': (ch, ch), 'd_posx_1': (ch, 1),
        'd_posy_0': (ch, ch), 'd_posy_1': (ch, 1),
        'd_sizex_0': (ch, ch), 'd_sizex_1': (ch, 1),
        'd_sizey_0': (ch, ch), 'd_sizey_1': (ch, 1),
        'd_shape_0': (ch, ch), 'd_shape_1': (ch, 6),
        'd_iou_0': (ch, ch), 'd_iou_1': (ch, 1),
    }
    keys = jax.random.split(key, len(shapes))
    return {name: _init_linear(k, *sh)
            for k, (name, sh) in zip(keys, shapes.items())}


def pack_params(params):
    """One-time weight packing/folding for the fused kernel."""
    f32, bf16 = jnp.float32, jnp.bfloat16
    ch, N = LATENT_CH, N_NODES_PER_GRAPH
    q, hh = ch // 4, ch // 2                           # 8, 16

    # --- encoder stage-0: per-feature weights padded to the 64 output columns
    w_es, b_es = params['enc_shape']                   # [6, 8]  -> cols 0:8
    w_ei, b_ei = params['enc_iou']                     # [1, 8]  -> cols 8:16
    w_sz, b_sz = params['size_init']                   # [2, 16] -> cols 16:32
    w_ps, b_ps = params['pos_init']                    # [2, 16] -> cols 32:48
    w_ex, b_ex = params['ex_init']                     # [2, 8]
    w_ft, b_ft = params['ft_init']                     # [8 + 80, 16]
    w_exft = w_ex @ w_ft[:q]                           # fold ex_init into ft_init
    b_exft = b_ex @ w_ft[:q] + b_ft

    def pad_cols(w, c0):
        out = jnp.zeros((w.shape[0], 2 * ch), f32)
        return out.at[:, c0:c0 + w.shape[1]].set(w)

    bias0 = jnp.concatenate([b_es, b_ei, b_sz, b_ps, b_exft])           # [64]
    add0 = (jnp.zeros((N, 2 * ch), f32).at[:, 3 * hh:4 * hh].set(w_ft[q:])
            + bias0[None, :])                                            # [80, 64]
    relu_mask = jnp.concatenate([jnp.zeros((hh,), f32),
                                 jnp.ones((3 * hh,), f32)])[None, :]     # [1, 64]

    # --- encoder tail: fold aggregate -> fc_mu|fc_var (no activation between)
    w_agg, b_agg = params['aggregate']                 # [160, 32]
    w_mu, b_mu = params['fc_mu']
    w_var, b_var = params['fc_var']
    w_mv = jnp.concatenate([w_mu, w_var], axis=1)      # [32, 64]
    b_mv = jnp.concatenate([b_mu, b_var])              # [64]
    w_fold = w_agg @ w_mv                              # [160, 64]
    b_fold = b_agg @ w_mv + b_mv

    def pad128(w):
        return jnp.pad(w, ((0, 0), (0, MUVAR_PAD - w.shape[1])))

    # --- d_ft_init with enc_block_scale folded in
    w_dft, b_dft = params['d_ft_init']                 # [72, 2560], [2560]
    w3 = w_dft.reshape(LATENT_DIM + 2 * BLOCK_LATENT_DIM, N, ch)        # [72, 80, 32]
    w_bs, b_bs = params['enc_block_scale']             # [1, 20], [20]
    kz = LATENT_DIM + BLOCK_LATENT_DIM                 # 52
    w3_scale = jnp.tensordot(w_bs[0], w3[kz:], axes=1)                  # [80, 32]
    d0b = b_dft.reshape(N, ch) + jnp.tensordot(b_bs, w3[kz:], axes=1)
    w3c = jnp.concatenate([w3[:kz], w3_scale[None]], axis=0)            # [53, 80, 32]

    # --- decoder conv1: split node part vs one-hot part
    w_d1_full, b_d1 = params['d_conv1']                # [32 + 80, 32]

    # --- decoder heads: stage-0 packed, stage-1 pre-split + lane-dense
    heads0 = ['d_posx_0', 'd_posy_0', 'd_sizex_0', 'd_sizey_0', 'd_shape_0', 'd_iou_0']
    wh0 = jnp.concatenate([params[n][0] for n in heads0], axis=1)       # [32, 192]
    bh0 = jnp.concatenate([params[n][1] for n in heads0])[None, :]      # [1, 192]
    w_e1_, b_e1_ = params['d_exist_1']
    wh1d = jnp.zeros((ch, HEAD_OUT_PAD), f32).at[:, 0:1].set(w_e1_)     # exist reads d3
    wh1h = jnp.zeros((6 * ch, HEAD_OUT_PAD), f32)
    bh1 = jnp.zeros((1, HEAD_OUT_PAD), f32).at[0, 0].set(b_e1_[0])
    specs = [('d_posx_1', 1), ('d_posy_1', 1), ('d_sizex_1', 1), ('d_sizey_1', 1),
             ('d_shape_1', 6), ('d_iou_1', 1)]
    row, col = 0, 1
    for name, width in specs:
        w_, b_ = params[name]
        wh1h = wh1h.at[row:row + ch, col:col + width].set(w_)
        bh1 = bh1.at[0, col:col + width].set(b_)
        row += ch
        col += width

    return {
        'relu_mask': relu_mask, 'add0': add0,
        'w_bsh': pad_cols(w_es, 0), 'w_bio': pad_cols(w_ei, q),
        'w_siz': pad_cols(w_sz, hh), 'w_pos': pad_cols(w_ps, 2 * hh),
        'w_x': pad_cols(w_exft, 3 * hh),
        'we1': params['e_conv1'][0].astype(bf16), 'be1': params['e_conv1'][1][None, :],
        'we2': params['e_conv2'][0].astype(bf16), 'be2': params['e_conv2'][1][None, :],
        'we3': params['e_conv3'][0].astype(bf16), 'be3': params['e_conv3'][1][None, :],
        'wf0': pad128(w_fold[0:2 * ch]), 'wf1': pad128(w_fold[2 * ch:3 * ch]),
        'wf2': pad128(w_fold[3 * ch:4 * ch]), 'wf3': pad128(w_fold[4 * ch:5 * ch]),
        'bf': jnp.pad(b_fold, (0, MUVAR_PAD - b_fold.shape[0]))[None, :],
        'w3c': w3c, 'd0b': d0b,
        'ohd1': w_d1_full[ch:], 'wd1': w_d1_full[:ch].astype(bf16), 'bd1': b_d1[None, :],
        'wd2': params['d_conv2'][0].astype(bf16), 'bd2': params['d_conv2'][1][None, :],
        'wd3': params['d_conv3'][0].astype(bf16), 'bd3': params['d_conv3'][1][None, :],
        'wh0': wh0, 'bh0': bh0, 'wh1d': wh1d, 'wh1h': wh1h, 'bh1': bh1,
    }


# --------------------------------- forward ---------------------------------

@jax.jit
def forward(packed, S_blocks, data, eps_key):
    B = S_blocks.shape[0]
    eps = jax.random.normal(eps_key, (B, 1, LATENT_DIM), jnp.float32)
    bsl = data['blockshape_latent_gt'].reshape(B, 1, BLOCK_LATENT_DIM)
    bsc = data['block_scale_gt'].reshape(B, 1, 1)
    node_data = (data['b_shape'], data['b_iou'], data['org_node_size'],
                 data['org_node_pos'], data['x'])

    out, muvar = fused_forward(S_blocks, node_data, eps, bsl, bsc, packed)

    muvar = muvar.reshape(B, MUVAR_PAD)
    mu = muvar[:, :LATENT_DIM]
    log_var = muvar[:, LATENT_DIM:2 * LATENT_DIM]
    exist = out[:, 0:1]
    pos = out[:, 1:3]
    size = out[:, 3:5]
    b_shape_o = out[:, 5:11]
    b_iou_o = out[:, 11:12]
    return exist, pos, size, mu, log_var, b_shape_o, b_iou_o


# --------------------------------- example ---------------------------------

def build_edge_index(batch_size, n_per_graph):
    # deterministic undirected ring within each graph
    src, dst = [], []
    for g in range(batch_size):
        base = g * n_per_graph
        for i in range(n_per_graph):
            j = (i + 1) % n_per_graph
            src += [base + i, base + j]
            dst += [base + j, base + i]
    return jnp.array([src, dst], dtype=jnp.int32)


if __name__ == "__main__":
    key = jax.random.PRNGKey(0)
    k_param, k_data, k_eps = jax.random.split(key, 3)
    params = init_params(k_param)

    num_nodes = BATCH * N_NODES_PER_GRAPH
    kd = jax.random.split(k_data, 7)
    data = {
        'x': jax.random.normal(kd[0], (num_nodes, 2), jnp.float32),
        'edge_index': build_edge_index(BATCH, N_NODES_PER_GRAPH),
        'b_shape': jax.random.normal(kd[1], (num_nodes, 6), jnp.float32),
        'b_iou': jax.random.uniform(kd[2], (num_nodes, 1), jnp.float32),
        'org_node_pos': jax.random.normal(kd[3], (num_nodes, 2), jnp.float32),
        'org_node_size': jax.random.uniform(kd[4], (num_nodes, 2), jnp.float32),
        'block_scale_gt': jax.random.uniform(kd[5], (BATCH,), jnp.float32),
        'blockshape_latent_gt': jax.random.normal(
            kd[6], (BATCH * BLOCK_LATENT_DIM,), jnp.float32),
        'batch': jnp.repeat(jnp.arange(BATCH, dtype=jnp.int32),
                            N_NODES_PER_GRAPH),
        'ptr': jnp.array([0, N_NODES_PER_GRAPH, 2 * N_NODES_PER_GRAPH],
                         dtype=jnp.int32),
    }

    batch_size = int(data['ptr'].shape[0] - 1)

    # Static graph structure & packed params hoisted out of the forward pass.
    S_blocks = gcn_norm_adjacency_blocks(data['edge_index'], batch_size,
                                         N_NODES_PER_GRAPH)
    packed = pack_params(params)

    outs = forward(packed, S_blocks, data, k_eps)
    outs = jax.block_until_ready(outs)
    exist, pos, size, mu, log_var, b_shape, b_iou = outs
    assert exist.shape == (num_nodes, 1)
    assert pos.shape == (num_nodes, 2) and size.shape == (num_nodes, 2)
    assert mu.shape == (BATCH, LATENT_DIM) and log_var.shape == (BATCH, LATENT_DIM)
    assert b_shape.shape == (num_nodes, 6) and b_iou.shape == (num_nodes, 1)
    assert bool(jnp.all(jnp.isfinite(exist))) and bool(jnp.all(jnp.isfinite(mu)))
    print("KERNEL_OK")
</pallas_src>

<mosaic_0001>
module attributes {stable_mosaic.version = 11 : i64} {
  func.func @_fused_kernel(%arg0: i32, %arg1: memref<80x6xf32, #tpu.memory_space<vmem>>, %arg2: memref<80x1xf32, #tpu.memory_space<vmem>>, %arg3: memref<80x2xf32, #tpu.memory_space<vmem>>, %arg4: memref<80x2xf32, #tpu.memory_space<vmem>>, %arg5: memref<80x2xf32, #tpu.memory_space<vmem>>, %arg6: memref<1x80x80xbf16, #tpu.memory_space<vmem>>, %arg7: memref<1x1x32xf32, #tpu.memory_space<vmem>>, %arg8: memref<1x1x20xf32, #tpu.memory_space<vmem>>, %arg9: memref<1x1x1xf32, #tpu.memory_space<vmem>>, %arg10: memref<1x64xf32, #tpu.memory_space<vmem>>, %arg11: memref<80x64xf32, #tpu.memory_space<vmem>>, %arg12: memref<6x64xf32, #tpu.memory_space<vmem>>, %arg13: memref<1x64xf32, #tpu.memory_space<vmem>>, %arg14: memref<2x64xf32, #tpu.memory_space<vmem>>, %arg15: memref<2x64xf32, #tpu.memory_space<vmem>>, %arg16: memref<2x64xf32, #tpu.memory_space<vmem>>, %arg17: memref<64x32xbf16, #tpu.memory_space<vmem>>, %arg18: memref<1x32xf32, #tpu.memory_space<vmem>>, %arg19: memref<32x32xbf16, #tpu.memory_space<vmem>>, %arg20: memref<1x32xf32, #tpu.memory_space<vmem>>, %arg21: memref<32x32xbf16, #tpu.memory_space<vmem>>, %arg22: memref<1x32xf32, #tpu.memory_space<vmem>>, %arg23: memref<64x128xf32, #tpu.memory_space<vmem>>, %arg24: memref<32x128xf32, #tpu.memory_space<vmem>>, %arg25: memref<32x128xf32, #tpu.memory_space<vmem>>, %arg26: memref<32x128xf32, #tpu.memory_space<vmem>>, %arg27: memref<1x128xf32, #tpu.memory_space<vmem>>, %arg28: memref<53x80x32xf32, #tpu.memory_space<vmem>>, %arg29: memref<80x32xf32, #tpu.memory_space<vmem>>, %arg30: memref<80x32xf32, #tpu.memory_space<vmem>>, %arg31: memref<32x32xbf16, #tpu.memory_space<vmem>>, %arg32: memref<1x32xf32, #tpu.memory_space<vmem>>, %arg33: memref<32x32xbf16, #tpu.memory_space<vmem>>, %arg34: memref<1x32xf32, #tpu.memory_space<vmem>>, %arg35: memref<32x32xbf16, #tpu.memory_space<vmem>>, %arg36: memref<1x32xf32, #tpu.memory_space<vmem>>, %arg37: memref<32x192xf32, #tpu.memory_space<vmem>>, %arg38: memref<1x192xf32, #tpu.memory_space<vmem>>, %arg39: memref<32x128xf32, #tpu.memory_space<vmem>>, %arg40: memref<192x128xf32, #tpu.memory_space<vmem>>, %arg41: memref<1x128xf32, #tpu.memory_space<vmem>>, %arg42: memref<80x128xf32, #tpu.memory_space<vmem>>, %arg43: memref<1x1x128xf32, #tpu.memory_space<vmem>>) attributes {dimension_semantics = [#tpu.dimension_semantics<parallel>], iteration_bounds = array<i64: 2>, scalar_prefetch = 0 : i64, scratch_operands = 0 : i64, tpu.core_type = #tpu.core_type<tc>, window_params = [{transform_indices = @transform_0, window_bounds = array<i64: 80, 6>}, {transform_indices = @transform_1, window_bounds = array<i64: 80, 1>}, {transform_indices = @transform_2, window_bounds = array<i64: 80, 2>}, {transform_indices = @transform_3, window_bounds = array<i64: 80, 2>}, {transform_indices = @transform_4, window_bounds = array<i64: 80, 2>}, {transform_indices = @transform_5, window_bounds = array<i64: 1, 80, 80>}, {transform_indices = @transform_6, window_bounds = array<i64: 1, 1, 32>}, {transform_indices = @transform_7, window_bounds = array<i64: 1, 1, 20>}, {transform_indices = @transform_8, window_bounds = array<i64: 1, 1, 1>}, {pipeline_mode = #tpu.pipeline_mode<synchronous>, transform_indices = @transform_9, window_bounds = array<i64: 1, 64>}, {pipeline_mode = #tpu.pipeline_mode<synchronous>, transform_indices = @transform_10, window_bounds = array<i64: 80, 64>}, {pipeline_mode = #tpu.pipeline_mode<synchronous>, transform_indices = @transform_11, window_bounds = array<i64: 6, 64>}, {pipeline_mode = #tpu.pipeline_mode<synchronous>, transform_indices = @transform_12, window_bounds = array<i64: 1, 64>}, {pipeline_mode = #tpu.pipeline_mode<synchronous>, transform_indices = @transform_13, window_bounds = array<i64: 2, 64>}, {pipeline_mode = #tpu.pipeline_mode<synchronous>, transform_indices = @transform_14, window_bounds = array<i64: 2, 64>}, {pipeline_mode = #tpu.pipeline_mode<synchronous>, transform_indices = @transform_15, window_bounds = array<i64: 2, 64>}, {pipeline_mode = #tpu.pipeline_mode<synchronous>, transform_indices = @transform_16, window_bounds = array<i64: 64, 32>}, {pipeline_mode = #tpu.pipeline_mode<synchronous>, transform_indices = @transform_17, window_bounds = array<i64: 1, 32>}, {pipeline_mode = #tpu.pipeline_mode<synchronous>, transform_indices = @transform_18, window_bounds = array<i64: 32, 32>}, {pipeline_mode = #tpu.pipeline_mode<synchronous>, transform_indices = @transform_19, window_bounds = array<i64: 1, 32>}, {pipeline_mode = #tpu.pipeline_mode<synchronous>, transform_indices = @transform_20, window_bounds = array<i64: 32, 32>}, {pipeline_mode = #tpu.pipeline_mode<synchronous>, transform_indices = @transform_21, window_bounds = array<i64: 1, 32>}, {pipeline_mode = #tpu.pipeline_mode<synchronous>, transform_indices = @transform_22, window_bounds = array<i64: 64, 128>}, {pipeline_mode = #tpu.pipeline_mode<synchronous>, transform_indices = @transform_23, window_bounds = array<i64: 32, 128>}, {pipeline_mode = #tpu.pipeline_mode<synchronous>, transform_indices = @transform_24, window_bounds = array<i64: 32, 128>}, {pipeline_mode = #tpu.pipeline_mode<synchronous>, transform_indices = @transform_25, window_bounds = array<i64: 32, 128>}, {pipeline_mode = #tpu.pipeline_mode<synchronous>, transform_indices = @transform_26, window_bounds = array<i64: 1, 128>}, {pipeline_mode = #tpu.pipeline_mode<synchronous>, transform_indices = @transform_27, window_bounds = array<i64: 53, 80, 32>}, {pipeline_mode = #tpu.pipeline_mode<synchronous>, transform_indices = @transform_28, window_bounds = array<i64: 80, 32>}, {pipeline_mode = #tpu.pipeline_mode<synchronous>, transform_indices = @transform_29, window_bounds = array<i64: 80, 32>}, {pipeline_mode = #tpu.pipeline_mode<synchronous>, transform_indices = @transform_30, window_bounds = array<i64: 32, 32>}, {pipeline_mode = #tpu.pipeline_mode<synchronous>, transform_indices = @transform_31, window_bounds = array<i64: 1, 32>}, {pipeline_mode = #tpu.pipeline_mode<synchronous>, transform_indices = @transform_32, window_bounds = array<i64: 32, 32>}, {pipeline_mode = #tpu.pipeline_mode<synchronous>, transform_indices = @transform_33, window_bounds = array<i64: 1, 32>}, {pipeline_mode = #tpu.pipeline_mode<synchronous>, transform_indices = @transform_34, window_bounds = array<i64: 32, 32>}, {pipeline_mode = #tpu.pipeline_mode<synchronous>, transform_indices = @transform_35, window_bounds = array<i64: 1, 32>}, {pipeline_mode = #tpu.pipeline_mode<synchronous>, transform_indices = @transform_36, window_bounds = array<i64: 32, 192>}, {pipeline_mode = #tpu.pipeline_mode<synchronous>, transform_indices = @transform_37, window_bounds = array<i64: 1, 192>}, {pipeline_mode = #tpu.pipeline_mode<synchronous>, transform_indices = @transform_38, window_bounds = array<i64: 32, 128>}, {pipeline_mode = #tpu.pipeline_mode<synchronous>, transform_indices = @transform_39, window_bounds = array<i64: 192, 128>}, {pipeline_mode = #tpu.pipeline_mode<synchronous>, transform_indices = @transform_40, window_bounds = array<i64: 1, 128>}, {transform_indices = @transform_41, window_bounds = array<i64: 80, 128>}, {transform_indices = @transform_42, window_bounds = array<i64: 1, 1, 128>}]} {
    %c0 = arith.constant 0 : index
    %c0_0 = arith.constant 0 : index
    %c0_1 = arith.constant 0 : index
    %0 = vector.load %arg6[%c0, %c0_0, %c0_1] : memref<1x80x80xbf16, #tpu.memory_space<vmem>>, vector<1x80x80xbf16>
    %1 = vector.shape_cast %0 : vector<1x80x80xbf16> to vector<80x80xbf16>
    %c0_2 = arith.constant 0 : index
    %c0_3 = arith.constant 0 : index
    %2 = vector.load %arg1[%c0_2, %c0_3] : memref<80x6xf32, #tpu.memory_space<vmem>>, vector<80x6xf32>
    %c0_4 = arith.constant 0 : index
    %c0_5 = arith.constant 0 : index
    %3 = vector.load %arg12[%c0_4, %c0_5] : memref<6x64xf32, #tpu.memory_space<vmem>>, vector<6x64xf32>
    %cst = arith.constant dense<0.000000e+00> : vector<80x64xf32>
    %4 = tpu.matmul %2, %3, %cst {dimension_numbers = #tpu.dot_dimension_numbers<[1], [0], [0], [1], [0, 0, 1, 1], [], []>} : vector<80x6xf32>, vector<6x64xf32>, vector<80x64xf32> -> vector<80x64xf32>
    %c0_6 = arith.constant 0 : index
    %c0_7 = arith.constant 0 : index
    %5 = vector.load %arg3[%c0_6, %c0_7] : memref<80x2xf32, #tpu.memory_space<vmem>>, vector<80x2xf32>
    %c0_8 = arith.constant 0 : index
    %c0_9 = arith.constant 0 : index
    %6 = vector.load %arg14[%c0_8, %c0_9] : memref<2x64xf32, #tpu.memory_space<vmem>>, vector<2x64xf32>
    %cst_10 = arith.constant dense<0.000000e+00> : vector<80x64xf32>
    %7 = tpu.matmul %5, %6, %cst_10 {dimension_numbers = #tpu.dot_dimension_numbers<[1], [0], [0], [1], [0, 0, 1, 1], [], []>} : vector<80x2xf32>, vector<2x64xf32>, vector<80x64xf32> -> vector<80x64xf32>
    %8 = arith.addf %4, %7 : vector<80x64xf32>
    %c0_11 = arith.constant 0 : index
    %c0_12 = arith.constant 0 : index
    %9 = vector.load %arg4[%c0_11, %c0_12] : memref<80x2xf32, #tpu.memory_space<vmem>>, vector<80x2xf32>
    %c0_13 = arith.constant 0 : index
    %c0_14 = arith.constant 0 : index
    %10 = vector.load %arg15[%c0_13, %c0_14] : memref<2x64xf32, #tpu.memory_space<vmem>>, vector<2x64xf32>
    %cst_15 = arith.constant dense<0.000000e+00> : vector<80x64xf32>
    %11 = tpu.matmul %9, %10, %cst_15 {dimension_numbers = #tpu.dot_dimension_numbers<[1], [0], [0], [1], [0, 0, 1, 1], [], []>} : vector<80x2xf32>, vector<2x64xf32>, vector<80x64xf32> -> vector<80x64xf32>
    %12 = arith.addf %8, %11 : vector<80x64xf32>
    %c0_16 = arith.constant 0 : index
    %c0_17 = arith.constant 0 : index
    %13 = vector.load %arg5[%c0_16, %c0_17] : memref<80x2xf32, #tpu.memory_space<vmem>>, vector<80x2xf32>
    %c0_18 = arith.constant 0 : index
    %c0_19 = arith.constant 0 : index
    %14 = vector.load %arg16[%c0_18, %c0_19] : memref<2x64xf32, #tpu.memory_space<vmem>>, vector<2x64xf32>
    %cst_20 = arith.constant dense<0.000000e+00> : vector<80x64xf32>
    %15 = tpu.matmul %13, %14, %cst_20 {dimension_numbers = #tpu.dot_dimension_numbers<[1], [0], [0], [1], [0, 0, 1, 1], [], []>} : vector<80x2xf32>, vector<2x64xf32>, vector<80x64xf32> -> vector<80x64xf32>
    %16 = arith.addf %12, %15 : vector<80x64xf32>
    %c0_21 = arith.constant 0 : index
    %c0_22 = arith.constant 0 : index
    %17 = vector.load %arg2[%c0_21, %c0_22] : memref<80x1xf32, #tpu.memory_space<vmem>>, vector<80x1xf32>
    %c0_23 = arith.constant 0 : index
    %c0_24 = arith.constant 0 : index
    %18 = vector.load %arg13[%c0_23, %c0_24] : memref<1x64xf32, #tpu.memory_space<vmem>>, vector<1x64xf32>
    %19 = vector.broadcast %17 : vector<80x1xf32> to vector<80x64xf32>
    %20 = vector.broadcast %18 : vector<1x64xf32> to vector<80x64xf32>
    %21 = arith.mulf %19, %20 : vector<80x64xf32>
    %22 = arith.addf %16, %21 : vector<80x64xf32>
    %c0_25 = arith.constant 0 : index
    %c0_26 = arith.constant 0 : index
    %23 = vector.load %arg11[%c0_25, %c0_26] : memref<80x64xf32, #tpu.memory_space<vmem>>, vector<80x64xf32>
    %24 = arith.addf %22, %23 : vector<80x64xf32>
    %c0_27 = arith.constant 0 : index
    %c0_28 = arith.constant 0 : index
    %25 = vector.load %arg10[%c0_27, %c0_28] : memref<1x64xf32, #tpu.memory_space<vmem>>, vector<1x64xf32>
    %cst_29 = arith.constant 0.000000e+00 : f32
    %26 = vector.broadcast %cst_29 : f32 to vector<80x64xf32>
    %27 = arith.minimumf %24, %26 : vector<80x64xf32>
    %28 = vector.broadcast %25 : vector<1x64xf32> to vector<80x64xf32>
    %29 = arith.mulf %28, %27 : vector<80x64xf32>
    %30 = arith.subf %24, %29 : vector<80x64xf32>
    %31 = arith.truncf %30 : vector<80x64xf32> to vector<80x64xbf16>
    %c0_30 = arith.constant 0 : index
    %c0_31 = arith.constant 0 : index
    %32 = vector.load %arg17[%c0_30, %c0_31] : memref<64x32xbf16, #tpu.memory_space<vmem>>, vector<64x32xbf16>
    %cst_32 = arith.constant dense<0.000000e+00> : vector<80x32xf32>
    %33 = tpu.matmul %31, %32, %cst_32 {dimension_numbers = #tpu.dot_dimension_numbers<[1], [0], [0], [1], [0, 0, 1, 1], [], []>} : vector<80x64xbf16>, vector<64x32xbf16>, vector<80x32xf32> -> vector<80x32xf32>
    %34 = arith.truncf %33 : vector<80x32xf32> to vector<80x32xbf16>
    %cst_33 = arith.constant dense<0.000000e+00> : vector<80x32xf32>
    %35 = tpu.matmul %1, %34, %cst_33 {dimension_numbers = #tpu.dot_dimension_numbers<[1], [0], [0], [1], [0, 0, 1, 1], [], []>} : vector<80x80xbf16>, vector<80x32xbf16>, vector<80x32xf32> -> vector<80x32xf32>
    %c0_34 = arith.constant 0 : index
    %c0_35 = arith.constant 0 : index
    %36 = vector.load %arg18[%c0_34, %c0_35] : memref<1x32xf32, #tpu.memory_space<vmem>>, vector<1x32xf32>
    %37 = vector.broadcast %36 : vector<1x32xf32> to vector<80x32xf32>
    %38 = arith.addf %35, %37 : vector<80x32xf32>
    %cst_36 = arith.constant 0.000000e+00 : f32
    %39 = vector.broadcast %cst_36 : f32 to vector<80x32xf32>
    %40 = arith.maximumf %38, %39 : vector<80x32xf32>
    %41 = arith.truncf %40 : vector<80x32xf32> to vector<80x32xbf16>
    %c0_37 = arith.constant 0 : index
    %c0_38 = arith.constant 0 : index
    %42 = vector.load %arg19[%c0_37, %c0_38] : memref<32x32xbf16, #tpu.memory_space<vmem>>, vector<32x32xbf16>
    %cst_39 = arith.constant dense<0.000000e+00> : vector<80x32xf32>
    %43 = tpu.matmul %41, %42, %cst_39 {dimension_numbers = #tpu.dot_dimension_numbers<[1], [0], [0], [1], [0, 0, 1, 1], [], []>} : vector<80x32xbf16>, vector<32x32xbf16>, vector<80x32xf32> -> vector<80x32xf32>
    %44 = arith.truncf %43 : vector<80x32xf32> to vector<80x32xbf16>
    %cst_40 = arith.constant dense<0.000000e+00> : vector<80x32xf32>
    %45 = tpu.matmul %1, %44, %cst_40 {dimension_numbers = #tpu.dot_dimension_numbers<[1], [0], [0], [1], [0, 0, 1, 1], [], []>} : vector<80x80xbf16>, vector<80x32xbf16>, vector<80x32xf32> -> vector<80x32xf32>
    %c0_41 = arith.constant 0 : index
    %c0_42 = arith.constant 0 : index
    %46 = vector.load %arg20[%c0_41, %c0_42] : memref<1x32xf32, #tpu.memory_space<vmem>>, vector<1x32xf32>
    %47 = vector.broadcast %46 : vector<1x32xf32> to vector<80x32xf32>
    %48 = arith.addf %45, %47 : vector<80x32xf32>
    %cst_43 = arith.constant 0.000000e+00 : f32
    %49 = vector.broadcast %cst_43 : f32 to vector<80x32xf32>
    %50 = arith.maximumf %48, %49 : vector<80x32xf32>
    %51 = arith.truncf %50 : vector<80x32xf32> to vector<80x32xbf16>
    %c0_44 = arith.constant 0 : index
    %c0_45 = arith.constant 0 : index
    %52 = vector.load %arg21[%c0_44, %c0_45] : memref<32x32xbf16, #tpu.memory_space<vmem>>, vector<32x32xbf16>
    %cst_46 = arith.constant dense<0.000000e+00> : vector<80x32xf32>
    %53 = tpu.matmul %51, %52, %cst_46 {dimension_numbers = #tpu.dot_dimension_numbers<[1], [0], [0], [1], [0, 0, 1, 1], [], []>} : vector<80x32xbf16>, vector<32x32xbf16>, vector<80x32xf32> -> vector<80x32xf32>
    %54 = arith.truncf %53 : vector<80x32xf32> to vector<80x32xbf16>
    %cst_47 = arith.constant dense<0.000000e+00> : vector<80x32xf32>
    %55 = tpu.matmul %1, %54, %cst_47 {dimension_numbers = #tpu.dot_dimension_numbers<[1], [0], [0], [1], [0, 0, 1, 1], [], []>} : vector<80x80xbf16>, vector<80x32xbf16>, vector<80x32xf32> -> vector<80x32xf32>
    %c0_48 = arith.constant 0 : index
    %c0_49 = arith.constant 0 : index
    %56 = vector.load %arg22[%c0_48, %c0_49] : memref<1x32xf32, #tpu.memory_space<vmem>>, vector<1x32xf32>
    %57 = vector.broadcast %56 : vector<1x32xf32> to vector<80x32xf32>
    %58 = arith.addf %55, %57 : vector<80x32xf32>
    %cst_50 = arith.constant 0.000000e+00 : f32
    %59 = vector.broadcast %cst_50 : f32 to vector<80x32xf32>
    %60 = arith.maximumf %58, %59 : vector<80x32xf32>
    %cst_51 = arith.constant dense<0.000000e+00> : vector<64xf32>
    %61 = vector.multi_reduction <add>, %30, %cst_51 [0] : vector<80x64xf32> to vector<64xf32>
    %62 = vector.shape_cast %61 : vector<64xf32> to vector<1x64xf32>
    %cst_52 = arith.constant 1.250000e-02 : f32
    %63 = vector.broadcast %cst_52 : f32 to vector<1x64xf32>
    %64 = arith.mulf %62, %63 : vector<1x64xf32>
    %cst_53 = arith.constant dense<0.000000e+00> : vector<32xf32>
    %65 = vector.multi_reduction <add>, %40, %cst_53 [0] : vector<80x32xf32> to vector<32xf32>
    %66 = vector.shape_cast %65 : vector<32xf32> to vector<1x32xf32>
    %cst_54 = arith.constant 1.250000e-02 : f32
    %67 = vector.broadcast %cst_54 : f32 to vector<1x32xf32>
    %68 = arith.mulf %66, %67 : vector<1x32xf32>
    %cst_55 = arith.constant dense<0.000000e+00> : vector<32xf32>
    %69 = vector.multi_reduction <add>, %50, %cst_55 [0] : vector<80x32xf32> to vector<32xf32>
    %70 = vector.shape_cast %69 : vector<32xf32> to vector<1x32xf32>
    %cst_56 = arith.constant 1.250000e-02 : f32
    %71 = vector.broadcast %cst_56 : f32 to vector<1x32xf32>
    %72 = arith.mulf %70, %71 : vector<1x32xf32>
    %cst_57 = arith.constant dense<0.000000e+00> : vector<32xf32>
    %73 = vector.multi_reduction <add>, %60, %cst_57 [0] : vector<80x32xf32> to vector<32xf32>
    %74 = vector.shape_cast %73 : vector<32xf32> to vector<1x32xf32>
    %cst_58 = arith.constant 1.250000e-02 : f32
    %75 = vector.broadcast %cst_58 : f32 to vector<1x32xf32>
    %76 = arith.mulf %74, %75 : vector<1x32xf32>
    %c0_59 = arith.constant 0 : index
    %c0_60 = arith.constant 0 : index
    %77 = vector.load %arg23[%c0_59, %c0_60] : memref<64x128xf32, #tpu.memory_space<vmem>>, vector<64x128xf32>
    %cst_61 = arith.constant dense<0.000000e+00> : vector<1x128xf32>
    %78 = tpu.matmul %64, %77, %cst_61 {dimension_numbers = #tpu.dot_dimension_numbers<[1], [0], [0], [1], [0, 0, 1, 1], [], []>} : vector<1x64xf32>, vector<64x128xf32>, vector<1x128xf32> -> vector<1x128xf32>
    %c0_62 = arith.constant 0 : index
    %c0_63 = arith.constant 0 : index
    %79 = vector.load %arg24[%c0_62, %c0_63] : memref<32x128xf32, #tpu.memory_space<vmem>>, vector<32x128xf32>
    %cst_64 = arith.constant dense<0.000000e+00> : vector<1x128xf32>
    %80 = tpu.matmul %68, %79, %cst_64 {dimension_numbers = #tpu.dot_dimension_numbers<[1], [0], [0], [1], [0, 0, 1, 1], [], []>} : vector<1x32xf32>, vector<32x128xf32>, vector<1x128xf32> -> vector<1x128xf32>
    %81 = arith.addf %78, %80 : vector<1x128xf32>
    %c0_65 = arith.constant 0 : index
    %c0_66 = arith.constant 0 : index
    %82 = vector.load %arg25[%c0_65, %c0_66] : memref<32x128xf32, #tpu.memory_space<vmem>>, vector<32x128xf32>
    %cst_67 = arith.constant dense<0.000000e+00> : vector<1x128xf32>
    %83 = tpu.matmul %72, %82, %cst_67 {dimension_numbers = #tpu.dot_dimension_numbers<[1], [0], [0], [1], [0, 0, 1, 1], [], []>} : vector<1x32xf32>, vector<32x128xf32>, vector<1x128xf32> -> vector<1x128xf32>
    %84 = arith.addf %81, %83 : vector<1x128xf32>
    %c0_68 = arith.constant 0 : index
    %c0_69 = arith.constant 0 : index
    %85 = vector.load %arg26[%c0_68, %c0_69] : memref<32x128xf32, #tpu.memory_space<vmem>>, vector<32x128xf32>
    %cst_70 = arith.constant dense<0.000000e+00> : vector<1x128xf32>
    %86 = tpu.matmul %76, %85, %cst_70 {dimension_numbers = #tpu.dot_dimension_numbers<[1], [0], [0], [1], [0, 0, 1, 1], [], []>} : vector<1x32xf32>, vector<32x128xf32>, vector<1x128xf32> -> vector<1x128xf32>
    %87 = arith.addf %84, %86 : vector<1x128xf32>
    %c0_71 = arith.constant 0 : index
    %c0_72 = arith.constant 0 : index
    %88 = vector.load %arg27[%c0_71, %c0_72] : memref<1x128xf32, #tpu.memory_space<vmem>>, vector<1x128xf32>
    %89 = arith.addf %87, %88 : vector<1x128xf32>
    %c0_73 = arith.constant 0 : index
    %c0_74 = arith.constant 0 : index
    %c0_75 = arith.constant 0 : index
    %90 = vector.load %arg43[%c0_73, %c0_74, %c0_75] : memref<1x1x128xf32, #tpu.memory_space<vmem>>, vector<1x1x128xf32>
    %91 = vector.shape_cast %90 : vector<1x1x128xf32> to vector<1x128xf32>
    %92 = vector.shape_cast %89 : vector<1x128xf32> to vector<1x1x128xf32>
    tpu.vector_store %arg43[%c0_73, %c0_74, %c0_75], %92 {strides = array<i32>} : memref<1x1x128xf32, #tpu.memory_space<vmem>>, vector<1x1x128xf32>,
    %93 = vector.extract_strided_slice %89 {offsets = [0, 0], sizes = [1, 32], strides = [1, 1]} : vector<1x128xf32> to vector<1x32xf32>
    %94 = vector.extract_strided_slice %89 {offsets = [0, 32], sizes = [1, 32], strides = [1, 1]} : vector<1x128xf32> to vector<1x32xf32>
    %c0_76 = arith.constant 0 : index
    %c0_77 = arith.constant 0 : index
    %c0_78 = arith.constant 0 : index
    %95 = vector.load %arg7[%c0_76, %c0_77, %c0_78] : memref<1x1x32xf32, #tpu.memory_space<vmem>>, vector<1x1x32xf32>
    %96 = vector.shape_cast %95 : vector<1x1x32xf32> to vector<1x32xf32>
    %cst_79 = arith.constant 5.000000e-01 : f32
    %97 = vector.broadcast %cst_79 : f32 to vector<1x32xf32>
    %98 = arith.mulf %97, %94 : vector<1x32xf32>
    %99 = math.exp %98 : vector<1x32xf32>
    %100 = arith.mulf %96, %99 : vector<1x32xf32>
    %101 = arith.addf %100, %93 : vector<1x32xf32>
    %c0_80 = arith.constant 0 : index
    %c0_81 = arith.constant 0 : index
    %102 = vector.load %arg29[%c0_80, %c0_81] : memref<80x32xf32, #tpu.memory_space<vmem>>, vector<80x32xf32>
    %103 = vector.shape_cast %101 : vector<1x32xf32> to vector<1x32xf32>
    %104 = vector.broadcast %103 : vector<1x32xf32> to vector<80x32xf32>
    %105 = vector.extract_strided_slice %104 {offsets = [0, 0], sizes = [80, 1], strides = [1, 1]} : vector<80x32xf32> to vector<80x1xf32>
    %c0_82 = arith.constant 0 : index
    %c0_83 = arith.constant 0 : index
    %c0_84 = arith.constant 0 : index
    %106 = vector.load %arg28[%c0_82, %c0_83, %c0_84] : memref<53x80x32xf32, #tpu.memory_space<vmem>>, vector<1x80x32xf32>
    %107 = vector.shape_cast %106 : vector<1x80x32xf32> to vector<80x32xf32>
    %108 = vector.broadcast %105 : vector<80x1xf32> to vector<80x32xf32>
    %109 = arith.mulf %108, %107 : vector<80x32xf32>
    %110 = arith.addf %102, %109 : vector<80x32xf32>
    %111 = vector.extract_strided_slice %104 {offsets = [0, 1], sizes = [80, 1], strides = [1, 1]} : vector<80x32xf32> to vector<80x1xf32>
    %c1 = arith.constant 1 : index
    %c0_85 = arith.constant 0 : index
    %c0_86 = arith.constant 0 : index
    %112 = vector.load %arg28[%c1, %c0_85, %c0_86] : memref<53x80x32xf32, #tpu.memory_space<vmem>>, vector<1x80x32xf32>
    %113 = vector.shape_cast %112 : vector<1x80x32xf32> to vector<80x32xf32>
    %114 = vector.broadcast %111 : vector<80x1xf32> to vector<80x32xf32>
    %115 = arith.mulf %114, %113 : vector<80x32xf32>
    %116 = arith.addf %110, %115 : vector<80x32xf32>
    %117 = vector.extract_strided_slice %104 {offsets = [0, 2], sizes = [80, 1], strides = [1, 1]} : vector<80x32xf32> to vector<80x1xf32>
    %c2 = arith.constant 2 : index
    %c0_87 = arith.constant 0 : index
    %c0_88 = arith.constant 0 : index
    %118 = vector.load %arg28[%c2, %c0_87, %c0_88] : memref<53x80x32xf32, #tpu.memory_space<vmem>>, vector<1x80x32xf32>
    %119 = vector.shape_cast %118 : vector<1x80x32xf32> to vector<80x32xf32>
    %120 = vector.broadcast %117 : vector<80x1xf32> to vector<80x32xf32>
    %121 = arith.mulf %120, %119 : vector<80x32xf32>
    %122 = arith.addf %116, %121 : vector<80x32xf32>
    %123 = vector.extract_strided_slice %104 {offsets = [0, 3], sizes = [80, 1], strides = [1, 1]} : vector<80x32xf32> to vector<80x1xf32>
    %c3 = arith.constant 3 : index
    %c0_89 = arith.constant 0 : index
    %c0_90 = arith.constant 0 : index
    %124 = vector.load %arg28[%c3, %c0_89, %c0_90] : memref<53x80x32xf32, #tpu.memory_space<vmem>>, vector<1x80x32xf32>
    %125 = vector.shape_cast %124 : vector<1x80x32xf32> to vector<80x32xf32>
    %126 = vector.broadcast %123 : vector<80x1xf32> to vector<80x32xf32>
    %127 = arith.mulf %126, %125 : vector<80x32xf32>
    %128 = arith.addf %122, %127 : vector<80x32xf32>
    %129 = vector.extract_strided_slice %104 {offsets = [0, 4], sizes = [80, 1], strides = [1, 1]} : vector<80x32xf32> to vector<80x1xf32>
    %c4 = arith.constant 4 : index
    %c0_91 = arith.constant 0 : index
    %c0_92 = arith.constant 0 : index
    %130 = vector.load %arg28[%c4, %c0_91, %c0_92] : memref<53x80x32xf32, #tpu.memory_space<vmem>>, vector<1x80x32xf32>
    %131 = vector.shape_cast %130 : vector<1x80x32xf32> to vector<80x32xf32>
    %132 = vector.broadcast %129 : vector<80x1xf32> to vector<80x32xf32>
    %133 = arith.mulf %132, %131 : vector<80x32xf32>
    %134 = arith.addf %128, %133 : vector<80x32xf32>
    %135 = vector.extract_strided_slice %104 {offsets = [0, 5], sizes = [80, 1], strides = [1, 1]} : vector<80x32xf32> to vector<80x1xf32>
    %c5 = arith.constant 5 : index
    %c0_93 = arith.constant 0 : index
    %c0_94 = arith.constant 0 : index
    %136 = vector.load %arg28[%c5, %c0_93, %c0_94] : memref<53x80x32xf32, #tpu.memory_space<vmem>>, vector<1x80x32xf32>
    %137 = vector.shape_cast %136 : vector<1x80x32xf32> to vector<80x32xf32>
    %138 = vector.broadcast %135 : vector<80x1xf32> to vector<80x32xf32>
    %139 = arith.mulf %138, %137 : vector<80x32xf32>
    %140 = arith.addf %134, %139 : vector<80x32xf32>
    %141 = vector.extract_strided_slice %104 {offsets = [0, 6], sizes = [80, 1], strides = [1, 1]} : vector<80x32xf32> to vector<80x1xf32>
    %c6 = arith.constant 6 : index
    %c0_95 = arith.constant 0 : index
    %c0_96 = arith.constant 0 : index
    %142 = vector.load %arg28[%c6, %c0_95, %c0_96] : memref<53x80x32xf32, #tpu.memory_space<vmem>>, vector<1x80x32xf32>
    %143 = vector.shape_cast %142 : vector<1x80x32xf32> to vector<80x32xf32>
    %144 = vector.broadcast %141 : vector<80x1xf32> to vector<80x32xf32>
    %145 = arith.mulf %144, %143 : vector<80x32xf32>
    %146 = arith.addf %140, %145 : vector<80x32xf32>
    %147 = vector.extract_strided_slice %104 {offsets = [0, 7], sizes = [80, 1], strides = [1, 1]} : vector<80x32xf32> to vector<80x1xf32>
    %c7 = arith.constant 7 : index
    %c0_97 = arith.constant 0 : index
    %c0_98 = arith.constant 0 : index
    %148 = vector.load %arg28[%c7, %c0_97, %c0_98] : memref<53x80x32xf32, #tpu.memory_space<vmem>>, vector<1x80x32xf32>
    %149 = vector.shape_cast %148 : vector<1x80x32xf32> to vector<80x32xf32>
    %150 = vector.broadcast %147 : vector<80x1xf32> to vector<80x32xf32>
    %151 = arith.mulf %150, %149 : vector<80x32xf32>
    %152 = arith.addf %146, %151 : vector<80x32xf32>
    %153 = vector.extract_strided_slice %104 {offsets = [0, 8], sizes = [80, 1], strides = [1, 1]} : vector<80x32xf32> to vector<80x1xf32>
    %c8 = arith.constant 8 : index
    %c0_99 = arith.constant 0 : index
    %c0_100 = arith.constant 0 : index
    %154 = vector.load %arg28[%c8, %c0_99, %c0_100] : memref<53x80x32xf32, #tpu.memory_space<vmem>>, vector<1x80x32xf32>
    %155 = vector.shape_cast %154 : vector<1x80x32xf32> to vector<80x32xf32>
    %156 = vector.broadcast %153 : vector<80x1xf32> to vector<80x32xf32>
    %157 = arith.mulf %156, %155 : vector<80x32xf32>
    %158 = arith.addf %152, %157 : vector<80x32xf32>
    %159 = vector.extract_strided_slice %104 {offsets = [0, 9], sizes = [80, 1], strides = [1, 1]} : vector<80x32xf32> to vector<80x1xf32>
    %c9 = arith.constant 9 : index
    %c0_101 = arith.constant 0 : index
    %c0_102 = arith.constant 0 : index
    %160 = vector.load %arg28[%c9, %c0_101, %c0_102] : memref<53x80x32xf32, #tpu.memory_space<vmem>>, vector<1x80x32xf32>
    %161 = vector.shape_cast %160 : vector<1x80x32xf32> to vector<80x32xf32>
    %162 = vector.broadcast %159 : vector<80x1xf32> to vector<80x32xf32>
    %163 = arith.mulf %162, %161 : vector<80x32xf32>
    %164 = arith.addf %158, %163 : vector<80x32xf32>
    %165 = vector.extract_strided_slice %104 {offsets = [0, 10], sizes = [80, 1], strides = [1, 1]} : vector<80x32xf32> to vector<80x1xf32>
    %c10 = arith.constant 10 : index
    %c0_103 = arith.constant 0 : index
    %c0_104 = arith.constant 0 : index
    %166 = vector.load %arg28[%c10, %c0_103, %c0_104] : memref<53x80x32xf32, #tpu.memory_space<vmem>>, vector<1x80x32xf32>
    %167 = vector.shape_cast %166 : vector<1x80x32xf32> to vector<80x32xf32>
    %168 = vector.broadcast %165 : vector<80x1xf32> to vector<80x32xf32>
    %169 = arith.mulf %168, %167 : vector<80x32xf32>
    %170 = arith.addf %164, %169 : vector<80x32xf32>
    %171 = vector.extract_strided_slice %104 {offsets = [0, 11], sizes = [80, 1], strides = [1, 1]} : vector<80x32xf32> to vector<80x1xf32>
    %c11 = arith.constant 11 : index
    %c0_105 = arith.constant 0 : index
    %c0_106 = arith.constant 0 : index
    %172 = vector.load %arg28[%c11, %c0_105, %c0_106] : memref<53x80x32xf32, #tpu.memory_space<vmem>>, vector<1x80x32xf32>
    %173 = vector.shape_cast %172 : vector<1x80x32xf32> to vector<80x32xf32>
    %174 = vector.broadcast %171 : vector<80x1xf32> to vector<80x32xf32>
    %175 = arith.mulf %174, %173 : vector<80x32xf32>
    %176 = arith.addf %170, %175 : vector<80x32xf32>
    %177 = vector.extract_strided_slice %104 {offsets = [0, 12], sizes = [80, 1], strides = [1, 1]} : vector<80x32xf32> to vector<80x1xf32>
    %c12 = arith.constant 12 : index
    %c0_107 = arith.constant 0 : index
    %c0_108 = arith.constant 0 : index
    %178 = vector.load %arg28[%c12, %c0_107, %c0_108] : memref<53x80x32xf32, #tpu.memory_space<vmem>>, vector<1x80x32xf32>
    %179 = vector.shape_cast %178 : vector<1x80x32xf32> to vector<80x32xf32>
    %180 = vector.broadcast %177 : vector<80x1xf32> to vector<80x32xf32>
    %181 = arith.mulf %180, %179 : vector<80x32xf32>
    %182 = arith.addf %176, %181 : vector<80x32xf32>
    %183 = vector.extract_strided_slice %104 {offsets = [0, 13], sizes = [80, 1], strides = [1, 1]} : vector<80x32xf32> to vector<80x1xf32>
    %c13 = arith.constant 13 : index
    %c0_109 = arith.constant 0 : index
    %c0_110 = arith.constant 0 : index
    %184 = vector.load %arg28[%c13, %c0_109, %c0_110] : memref<53x80x32xf32, #tpu.memory_space<vmem>>, vector<1x80x32xf32>
    %185 = vector.shape_cast %184 : vector<1x80x32xf32> to vector<80x32xf32>
    %186 = vector.broadcast %183 : vector<80x1xf32> to vector<80x32xf32>
    %187 = arith.mulf %186, %185 : vector<80x32xf32>
    %188 = arith.addf %182, %187 : vector<80x32xf32>
    %189 = vector.extract_strided_slice %104 {offsets = [0, 14], sizes = [80, 1], strides = [1, 1]} : vector<80x32xf32> to vector<80x1xf32>
    %c14 = arith.constant 14 : index
    %c0_111 = arith.constant 0 : index
    %c0_112 = arith.constant 0 : index
    %190 = vector.load %arg28[%c14, %c0_111, %c0_112] : memref<53x80x32xf32, #tpu.memory_space<vmem>>, vector<1x80x32xf32>
    %191 = vector.shape_cast %190 : vector<1x80x32xf32> to vector<80x32xf32>
    %192 = vector.broadcast %189 : vector<80x1xf32> to vector<80x32xf32>
    %193 = arith.mulf %192, %191 : vector<80x32xf32>
    %194 = arith.addf %188, %193 : vector<80x32xf32>
    %195 = vector.extract_strided_slice %104 {offsets = [0, 15], sizes = [80, 1], strides = [1, 1]} : vector<80x32xf32> to vector<80x1xf32>
    %c15 = arith.constant 15 : index
    %c0_113 = arith.constant 0 : index
    %c0_114 = arith.constant 0 : index
    %196 = vector.load %arg28[%c15, %c0_113, %c0_114] : memref<53x80x32xf32, #tpu.memory_space<vmem>>, vector<1x80x32xf32>
    %197 = vector.shape_cast %196 : vector<1x80x32xf32> to vector<80x32xf32>
    %198 = vector.broadcast %195 : vector<80x1xf32> to vector<80x32xf32>
    %199 = arith.mulf %198, %197 : vector<80x32xf32>
    %200 = arith.addf %194, %199 : vector<80x32xf32>
    %201 = vector.extract_strided_slice %104 {offsets = [0, 16], sizes = [80, 1], strides = [1, 1]} : vector<80x32xf32> to vector<80x1xf32>
    %c16 = arith.constant 16 : index
    %c0_115 = arith.constant 0 : index
    %c0_116 = arith.constant 0 : index
    %202 = vector.load %arg28[%c16, %c0_115, %c0_116] : memref<53x80x32xf32, #tpu.memory_space<vmem>>, vector<1x80x32xf32>
    %203 = vector.shape_cast %202 : vector<1x80x32xf32> to vector<80x32xf32>
    %204 = vector.broadcast %201 : vector<80x1xf32> to vector<80x32xf32>
    %205 = arith.mulf %204, %203 : vector<80x32xf32>
    %206 = arith.addf %200, %205 : vector<80x32xf32>
    %207 = vector.extract_strided_slice %104 {offsets = [0, 17], sizes = [80, 1], strides = [1, 1]} : vector<80x32xf32> to vector<80x1xf32>
    %c17 = arith.constant 17 : index
    %c0_117 = arith.constant 0 : index
    %c0_118 = arith.constant 0 : index
    %208 = vector.load %arg28[%c17, %c0_117, %c0_118] : memref<53x80x32xf32, #tpu.memory_space<vmem>>, vector<1x80x32xf32>
    %209 = vector.shape_cast %208 : vector<1x80x32xf32> to vector<80x32xf32>
    %210 = vector.broadcast %207 : vector<80x1xf32> to vector<80x32xf32>
    %211 = arith.mulf %210, %209 : vector<80x32xf32>
    %212 = arith.addf %206, %211 : vector<80x32xf32>
    %213 = vector.extract_strided_slice %104 {offsets = [0, 18], sizes = [80, 1], strides = [1, 1]} : vector<80x32xf32> to vector<80x1xf32>
    %c18 = arith.constant 18 : index
    %c0_119 = arith.constant 0 : index
    %c0_120 = arith.constant 0 : index
    %214 = vector.load %arg28[%c18, %c0_119, %c0_120] : memref<53x80x32xf32, #tpu.memory_space<vmem>>, vector<1x80x32xf32>
    %215 = vector.shape_cast %214 : vector<1x80x32xf32> to vector<80x32xf32>
    %216 = vector.broadcast %213 : vector<80x1xf32> to vector<80x32xf32>
    %217 = arith.mulf %216, %215 : vector<80x32xf32>
    %218 = arith.addf %212, %217 : vector<80x32xf32>
    %219 = vector.extract_strided_slice %104 {offsets = [0, 19], sizes = [80, 1], strides = [1, 1]} : vector<80x32xf32> to vector<80x1xf32>
    %c19 = arith.constant 19 : index
    %c0_121 = arith.constant 0 : index
    %c0_122 = arith.constant 0 : index
    %220 = vector.load %arg28[%c19, %c0_121, %c0_122] : memref<53x80x32xf32, #tpu.memory_space<vmem>>, vector<1x80x32xf32>
    %221 = vector.shape_cast %220 : vector<1x80x32xf32> to vector<80x32xf32>
    %222 = vector.broadcast %219 : vector<80x1xf32> to vector<80x32xf32>
    %223 = arith.mulf %222, %221 : vector<80x32xf32>
    %224 = arith.addf %218, %223 : vector<80x32xf32>
    %225 = vector.extract_strided_slice %104 {offsets = [0, 20], sizes = [80, 1], strides = [1, 1]} : vector<80x32xf32> to vector<80x1xf32>
    %c20 = arith.constant 20 : index
    %c0_123 = arith.constant 0 : index
    %c0_124 = arith.constant 0 : index
    %226 = vector.load %arg28[%c20, %c0_123, %c0_124] : memref<53x80x32xf32, #tpu.memory_space<vmem>>, vector<1x80x32xf32>
    %227 = vector.shape_cast %226 : vector<1x80x32xf32> to vector<80x32xf32>
    %228 = vector.broadcast %225 : vector<80x1xf32> to vector<80x32xf32>
    %229 = arith.mulf %228, %227 : vector<80x32xf32>
    %230 = arith.addf %224, %229 : vector<80x32xf32>
    %231 = vector.extract_strided_slice %104 {offsets = [0, 21], sizes = [80, 1], strides = [1, 1]} : vector<80x32xf32> to vector<80x1xf32>
    %c21 = arith.constant 21 : index
    %c0_125 = arith.constant 0 : index
    %c0_126 = arith.constant 0 : index
    %232 = vector.load %arg28[%c21, %c0_125, %c0_126] : memref<53x80x32xf32, #tpu.memory_space<vmem>>, vector<1x80x32xf32>
    %233 = vector.shape_cast %232 : vector<1x80x32xf32> to vector<80x32xf32>
    %234 = vector.broadcast %231 : vector<80x1xf32> to vector<80x32xf32>
    %235 = arith.mulf %234, %233 : vector<80x32xf32>
    %236 = arith.addf %230, %235 : vector<80x32xf32>
    %237 = vector.extract_strided_slice %104 {offsets = [0, 22], sizes = [80, 1], strides = [1, 1]} : vector<80x32xf32> to vector<80x1xf32>
    %c22 = arith.constant 22 : index
    %c0_127 = arith.constant 0 : index
    %c0_128 = arith.constant 0 : index
    %238 = vector.load %arg28[%c22, %c0_127, %c0_128] : memref<53x80x32xf32, #tpu.memory_space<vmem>>, vector<1x80x32xf32>
    %239 = vector.shape_cast %238 : vector<1x80x32xf32> to vector<80x32xf32>
    %240 = vector.broadcast %237 : vector<80x1xf32> to vector<80x32xf32>
    %241 = arith.mulf %240, %239 : vector<80x32xf32>
    %242 = arith.addf %236, %241 : vector<80x32xf32>
    %243 = vector.extract_strided_slice %104 {offsets = [0, 23], sizes = [80, 1], strides = [1, 1]} : vector<80x32xf32> to vector<80x1xf32>
    %c23 = arith.constant 23 : index
    %c0_129 = arith.constant 0 : index
    %c0_130 = arith.constant 0 : index
    %244 = vector.load %arg28[%c23, %c0_129, %c0_130] : memref<53x80x32xf32, #tpu.memory_space<vmem>>, vector<1x80x32xf32>
    %245 = vector.shape_cast %244 : vector<1x80x32xf32> to vector<80x32xf32>
    %246 = vector.broadcast %243 : vector<80x1xf32> to vector<80x32xf32>
    %247 = arith.mulf %246, %245 : vector<80x32xf32>
    %248 = arith.addf %242, %247 : vector<80x32xf32>
    %249 = vector.extract_strided_slice %104 {offsets = [0, 24], sizes = [80, 1], strides = [1, 1]} : vector<80x32xf32> to vector<80x1xf32>
    %c24 = arith.constant 24 : index
    %c0_131 = arith.constant 0 : index
    %c0_132 = arith.constant 0 : index
    %250 = vector.load %arg28[%c24, %c0_131, %c0_132] : memref<53x80x32xf32, #tpu.memory_space<vmem>>, vector<1x80x32xf32>
    %251 = vector.shape_cast %250 : vector<1x80x32xf32> to vector<80x32xf32>
    %252 = vector.broadcast %249 : vector<80x1xf32> to vector<80x32xf32>
    %253 = arith.mulf %252, %251 : vector<80x32xf32>
    %254 = arith.addf %248, %253 : vector<80x32xf32>
    %255 = vector.extract_strided_slice %104 {offsets = [0, 25], sizes = [80, 1], strides = [1, 1]} : vector<80x32xf32> to vector<80x1xf32>
    %c25 = arith.constant 25 : index
    %c0_133 = arith.constant 0 : index
    %c0_134 = arith.constant 0 : index
    %256 = vector.load %arg28[%c25, %c0_133, %c0_134] : memref<53x80x32xf32, #tpu.memory_space<vmem>>, vector<1x80x32xf32>
    %257 = vector.shape_cast %256 : vector<1x80x32xf32> to vector<80x32xf32>
    %258 = vector.broadcast %255 : vector<80x1xf32> to vector<80x32xf32>
    %259 = arith.mulf %258, %257 : vector<80x32xf32>
    %260 = arith.addf %254, %259 : vector<80x32xf32>
    %261 = vector.extract_strided_slice %104 {offsets = [0, 26], sizes = [80, 1], strides = [1, 1]} : vector<80x32xf32> to vector<80x1xf32>
    %c26 = arith.constant 26 : index
    %c0_135 = arith.constant 0 : index
    %c0_136 = arith.constant 0 : index
    %262 = vector.load %arg28[%c26, %c0_135, %c0_136] : memref<53x80x32xf32, #tpu.memory_space<vmem>>, vector<1x80x32xf32>
    %263 = vector.shape_cast %262 : vector<1x80x32xf32> to vector<80x32xf32>
    %264 = vector.broadcast %261 : vector<80x1xf32> to vector<80x32xf32>
    %265 = arith.mulf %264, %263 : vector<80x32xf32>
    %266 = arith.addf %260, %265 : vector<80x32xf32>
    %267 = vector.extract_strided_slice %104 {offsets = [0, 27], sizes = [80, 1], strides = [1, 1]} : vector<80x32xf32> to vector<80x1xf32>
    %c27 = arith.constant 27 : index
    %c0_137 = arith.constant 0 : index
    %c0_138 = arith.constant 0 : index
    %268 = vector.load %arg28[%c27, %c0_137, %c0_138] : memref<53x80x32xf32, #tpu.memory_space<vmem>>, vector<1x80x32xf32>
    %269 = vector.shape_cast %268 : vector<1x80x32xf32> to vector<80x32xf32>
    %270 = vector.broadcast %267 : vector<80x1xf32> to vector<80x32xf32>
    %271 = arith.mulf %270, %269 : vector<80x32xf32>
    %272 = arith.addf %266, %271 : vector<80x32xf32>
    %273 = vector.extract_strided_slice %104 {offsets = [0, 28], sizes = [80, 1], strides = [1, 1]} : vector<80x32xf32> to vector<80x1xf32>
    %c28 = arith.constant 28 : index
    %c0_139 = arith.constant 0 : index
    %c0_140 = arith.constant 0 : index
    %274 = vector.load %arg28[%c28, %c0_139, %c0_140] : memref<53x80x32xf32, #tpu.memory_space<vmem>>, vector<1x80x32xf32>
    %275 = vector.shape_cast %274 : vector<1x80x32xf32> to vector<80x32xf32>
    %276 = vector.broadcast %273 : vector<80x1xf32> to vector<80x32xf32>
    %277 = arith.mulf %276, %275 : vector<80x32xf32>
    %278 = arith.addf %272, %277 : vector<80x32xf32>
    %279 = vector.extract_strided_slice %104 {offsets = [0, 29], sizes = [80, 1], strides = [1, 1]} : vector<80x32xf32> to vector<80x1xf32>
    %c29 = arith.constant 29 : index
    %c0_141 = arith.constant 0 : index
    %c0_142 = arith.constant 0 : index
    %280 = vector.load %arg28[%c29, %c0_141, %c0_142] : memref<53x80x32xf32, #tpu.memory_space<vmem>>, vector<1x80x32xf32>
    %281 = vector.shape_cast %280 : vector<1x80x32xf32> to vector<80x32xf32>
    %282 = vector.broadcast %279 : vector<80x1xf32> to vector<80x32xf32>
    %283 = arith.mulf %282, %281 : vector<80x32xf32>
    %284 = arith.addf %278, %283 : vector<80x32xf32>
    %285 = vector.extract_strided_slice %104 {offsets = [0, 30], sizes = [80, 1], strides = [1, 1]} : vector<80x32xf32> to vector<80x1xf32>
    %c30 = arith.constant 30 : index
    %c0_143 = arith.constant 0 : index
    %c0_144 = arith.constant 0 : index
    %286 = vector.load %arg28[%c30, %c0_143, %c0_144] : memref<53x80x32xf32, #tpu.memory_space<vmem>>, vector<1x80x32xf32>
    %287 = vector.shape_cast %286 : vector<1x80x32xf32> to vector<80x32xf32>
    %288 = vector.broadcast %285 : vector<80x1xf32> to vector<80x32xf32>
    %289 = arith.mulf %288, %287 : vector<80x32xf32>
    %290 = arith.addf %284, %289 : vector<80x32xf32>
    %291 = vector.extract_strided_slice %104 {offsets = [0, 31], sizes = [80, 1], strides = [1, 1]} : vector<80x32xf32> to vector<80x1xf32>
    %c31 = arith.constant 31 : index
    %c0_145 = arith.constant 0 : index
    %c0_146 = arith.constant 0 : index
    %292 = vector.load %arg28[%c31, %c0_145, %c0_146] : memref<53x80x32xf32, #tpu.memory_space<vmem>>, vector<1x80x32xf32>
    %293 = vector.shape_cast %292 : vector<1x80x32xf32> to vector<80x32xf32>
    %294 = vector.broadcast %291 : vector<80x1xf32> to vector<80x32xf32>
    %295 = arith.mulf %294, %293 : vector<80x32xf32>
    %296 = arith.addf %290, %295 : vector<80x32xf32>
    %c0_147 = arith.constant 0 : index
    %c0_148 = arith.constant 0 : index
    %c0_149 = arith.constant 0 : index
    %297 = vector.load %arg8[%c0_147, %c0_148, %c0_149] : memref<1x1x20xf32, #tpu.memory_space<vmem>>, vector<1x1x20xf32>
    %298 = vector.shape_cast %297 : vector<1x1x20xf32> to vector<1x20xf32>
    %299 = vector.shape_cast %298 : vector<1x20xf32> to vector<1x20xf32>
    %300 = vector.broadcast %299 : vector<1x20xf32> to vector<80x20xf32>
    %301 = vector.extract_strided_slice %300 {offsets = [0, 0], sizes = [80, 1], strides = [1, 1]} : vector<80x20xf32> to vector<80x1xf32>
    %c32 = arith.constant 32 : index
    %c0_150 = arith.constant 0 : index
    %c0_151 = arith.constant 0 : index
    %302 = vector.load %arg28[%c32, %c0_150, %c0_151] : memref<53x80x32xf32, #tpu.memory_space<vmem>>, vector<1x80x32xf32>
    %303 = vector.shape_cast %302 : vector<1x80x32xf32> to vector<80x32xf32>
    %304 = vector.broadcast %301 : vector<80x1xf32> to vector<80x32xf32>
    %305 = arith.mulf %304, %303 : vector<80x32xf32>
    %306 = arith.addf %296, %305 : vector<80x32xf32>
    %307 = vector.extract_strided_slice %300 {offsets = [0, 1], sizes = [80, 1], strides = [1, 1]} : vector<80x20xf32> to vector<80x1xf32>
    %c33 = arith.constant 33 : index
    %c0_152 = arith.constant 0 : index
    %c0_153 = arith.constant 0 : index
    %308 = vector.load %arg28[%c33, %c0_152, %c0_153] : memref<53x80x32xf32, #tpu.memory_space<vmem>>, vector<1x80x32xf32>
    %309 = vector.shape_cast %308 : vector<1x80x32xf32> to vector<80x32xf32>
    %310 = vector.broadcast %307 : vector<80x1xf32> to vector<80x32xf32>
    %311 = arith.mulf %310, %309 : vector<80x32xf32>
    %312 = arith.addf %306, %311 : vector<80x32xf32>
    %313 = vector.extract_strided_slice %300 {offsets = [0, 2], sizes = [80, 1], strides = [1, 1]} : vector<80x20xf32> to vector<80x1xf32>
    %c34 = arith.constant 34 : index
    %c0_154 = arith.constant 0 : index
    %c0_155 = arith.constant 0 : index
    %314 = vector.load %arg28[%c34, %c0_154, %c0_155] : memref<53x80x32xf32, #tpu.memory_space<vmem>>, vector<1x80x32xf32>
    %315 = vector.shape_cast %314 : vector<1x80x32xf32> to vector<80x32xf32>
    %316 = vector.broadcast %313 : vector<80x1xf32> to vector<80x32xf32>
    %317 = arith.mulf %316, %315 : vector<80x32xf32>
    %318 = arith.addf %312, %317 : vector<80x32xf32>
    %319 = vector.extract_strided_slice %300 {offsets = [0, 3], sizes = [80, 1], strides = [1, 1]} : vector<80x20xf32> to vector<80x1xf32>
    %c35 = arith.constant 35 : index
    %c0_156 = arith.constant 0 : index
    %c0_157 = arith.constant 0 : index
    %320 = vector.load %arg28[%c35, %c0_156, %c0_157] : memref<53x80x32xf32, #tpu.memory_space<vmem>>, vector<1x80x32xf32>
    %321 = vector.shape_cast %320 : vector<1x80x32xf32> to vector<80x32xf32>
    %322 = vector.broadcast %319 : vector<80x1xf32> to vector<80x32xf32>
    %323 = arith.mulf %322, %321 : vector<80x32xf32>
    %324 = arith.addf %318, %323 : vector<80x32xf32>
    %325 = vector.extract_strided_slice %300 {offsets = [0, 4], sizes = [80, 1], strides = [1, 1]} : vector<80x20xf32> to vector<80x1xf32>
    %c36 = arith.constant 36 : index
    %c0_158 = arith.constant 0 : index
    %c0_159 = arith.constant 0 : index
    %326 = vector.load %arg28[%c36, %c0_158, %c0_159] : memref<53x80x32xf32, #tpu.memory_space<vmem>>, vector<1x80x32xf32>
    %327 = vector.shape_cast %326 : vector<1x80x32xf32> to vector<80x32xf32>
    %328 = vector.broadcast %325 : vector<80x1xf32> to vector<80x32xf32>
    %329 = arith.mulf %328, %327 : vector<80x32xf32>
    %330 = arith.addf %324, %329 : vector<80x32xf32>
    %331 = vector.extract_strided_slice %300 {offsets = [0, 5], sizes = [80, 1], strides = [1, 1]} : vector<80x20xf32> to vector<80x1xf32>
    %c37 = arith.constant 37 : index
    %c0_160 = arith.constant 0 : index
    %c0_161 = arith.constant 0 : index
    %332 = vector.load %arg28[%c37, %c0_160, %c0_161] : memref<53x80x32xf32, #tpu.memory_space<vmem>>, vector<1x80x32xf32>
    %333 = vector.shape_cast %332 : vector<1x80x32xf32> to vector<80x32xf32>
    %334 = vector.broadcast %331 : vector<80x1xf32> to vector<80x32xf32>
    %335 = arith.mulf %334, %333 : vector<80x32xf32>
    %336 = arith.addf %330, %335 : vector<80x32xf32>
    %337 = vector.extract_strided_slice %300 {offsets = [0, 6], sizes = [80, 1], strides = [1, 1]} : vector<80x20xf32> to vector<80x1xf32>
    %c38 = arith.constant 38 : index
    %c0_162 = arith.constant 0 : index
    %c0_163 = arith.constant 0 : index
    %338 = vector.load %arg28[%c38, %c0_162, %c0_163] : memref<53x80x32xf32, #tpu.memory_space<vmem>>, vector<1x80x32xf32>
    %339 = vector.shape_cast %338 : vector<1x80x32xf32> to vector<80x32xf32>
    %340 = vector.broadcast %337 : vector<80x1xf32> to vector<80x32xf32>
    %341 = arith.mulf %340, %339 : vector<80x32xf32>
    %342 = arith.addf %336, %341 : vector<80x32xf32>
    %343 = vector.extract_strided_slice %300 {offsets = [0, 7], sizes = [80, 1], strides = [1, 1]} : vector<80x20xf32> to vector<80x1xf32>
    %c39 = arith.constant 39 : index
    %c0_164 = arith.constant 0 : index
    %c0_165 = arith.constant 0 : index
    %344 = vector.load %arg28[%c39, %c0_164, %c0_165] : memref<53x80x32xf32, #tpu.memory_space<vmem>>, vector<1x80x32xf32>
    %345 = vector.shape_cast %344 : vector<1x80x32xf32> to vector<80x32xf32>
    %346 = vector.broadcast %343 : vector<80x1xf32> to vector<80x32xf32>
    %347 = arith.mulf %346, %345 : vector<80x32xf32>
    %348 = arith.addf %342, %347 : vector<80x32xf32>
    %349 = vector.extract_strided_slice %300 {offsets = [0, 8], sizes = [80, 1], strides = [1, 1]} : vector<80x20xf32> to vector<80x1xf32>
    %c40 = arith.constant 40 : index
    %c0_166 = arith.constant 0 : index
    %c0_167 = arith.constant 0 : index
    %350 = vector.load %arg28[%c40, %c0_166, %c0_167] : memref<53x80x32xf32, #tpu.memory_space<vmem>>, vector<1x80x32xf32>
    %351 = vector.shape_cast %350 : vector<1x80x32xf32> to vector<80x32xf32>
    %352 = vector.broadcast %349 : vector<80x1xf32> to vector<80x32xf32>
    %353 = arith.mulf %352, %351 : vector<80x32xf32>
    %354 = arith.addf %348, %353 : vector<80x32xf32>
    %355 = vector.extract_strided_slice %300 {offsets = [0, 9], sizes = [80, 1], strides = [1, 1]} : vector<80x20xf32> to vector<80x1xf32>
    %c41 = arith.constant 41 : index
    %c0_168 = arith.constant 0 : index
    %c0_169 = arith.constant 0 : index
    %356 = vector.load %arg28[%c41, %c0_168, %c0_169] : memref<53x80x32xf32, #tpu.memory_space<vmem>>, vector<1x80x32xf32>
    %357 = vector.shape_cast %356 : vector<1x80x32xf32> to vector<80x32xf32>
    %358 = vector.broadcast %355 : vector<80x1xf32> to vector<80x32xf32>
    %359 = arith.mulf %358, %357 : vector<80x32xf32>
    %360 = arith.addf %354, %359 : vector<80x32xf32>
    %361 = vector.extract_strided_slice %300 {offsets = [0, 10], sizes = [80, 1], strides = [1, 1]} : vector<80x20xf32> to vector<80x1xf32>
    %c42 = arith.constant 42 : index
    %c0_170 = arith.constant 0 : index
    %c0_171 = arith.constant 0 : index
    %362 = vector.load %arg28[%c42, %c0_170, %c0_171] : memref<53x80x32xf32, #tpu.memory_space<vmem>>, vector<1x80x32xf32>
    %363 = vector.shape_cast %362 : vector<1x80x32xf32> to vector<80x32xf32>
    %364 = vector.broadcast %361 : vector<80x1xf32> to vector<80x32xf32>
    %365 = arith.mulf %364, %363 : vector<80x32xf32>
    %366 = arith.addf %360, %365 : vector<80x32xf32>
    %367 = vector.extract_strided_slice %300 {offsets = [0, 11], sizes = [80, 1], strides = [1, 1]} : vector<80x20xf32> to vector<80x1xf32>
    %c43 = arith.constant 43 : index
    %c0_172 = arith.constant 0 : index
    %c0_173 = arith.constant 0 : index
    %368 = vector.load %arg28[%c43, %c0_172, %c0_173] : memref<53x80x32xf32, #tpu.memory_space<vmem>>, vector<1x80x32xf32>
    %369 = vector.shape_cast %368 : vector<1x80x32xf32> to vector<80x32xf32>
    %370 = vector.broadcast %367 : vector<80x1xf32> to vector<80x32xf32>
    %371 = arith.mulf %370, %369 : vector<80x32xf32>
    %372 = arith.addf %366, %371 : vector<80x32xf32>
    %373 = vector.extract_strided_slice %300 {offsets = [0, 12], sizes = [80, 1], strides = [1, 1]} : vector<80x20xf32> to vector<80x1xf32>
    %c44 = arith.constant 44 : index
    %c0_174 = arith.constant 0 : index
    %c0_175 = arith.constant 0 : index
    %374 = vector.load %arg28[%c44, %c0_174, %c0_175] : memref<53x80x32xf32, #tpu.memory_space<vmem>>, vector<1x80x32xf32>
    %375 = vector.shape_cast %374 : vector<1x80x32xf32> to vector<80x32xf32>
    %376 = vector.broadcast %373 : vector<80x1xf32> to vector<80x32xf32>
    %377 = arith.mulf %376, %375 : vector<80x32xf32>
    %378 = arith.addf %372, %377 : vector<80x32xf32>
    %379 = vector.extract_strided_slice %300 {offsets = [0, 13], sizes = [80, 1], strides = [1, 1]} : vector<80x20xf32> to vector<80x1xf32>
    %c45 = arith.constant 45 : index
    %c0_176 = arith.constant 0 : index
    %c0_177 = arith.constant 0 : index
    %380 = vector.load %arg28[%c45, %c0_176, %c0_177] : memref<53x80x32xf32, #tpu.memory_space<vmem>>, vector<1x80x32xf32>
    %381 = vector.shape_cast %380 : vector<1x80x32xf32> to vector<80x32xf32>
    %382 = vector.broadcast %379 : vector<80x1xf32> to vector<80x32xf32>
    %383 = arith.mulf %382, %381 : vector<80x32xf32>
    %384 = arith.addf %378, %383 : vector<80x32xf32>
    %385 = vector.extract_strided_slice %300 {offsets = [0, 14], sizes = [80, 1], strides = [1, 1]} : vector<80x20xf32> to vector<80x1xf32>
    %c46 = arith.constant 46 : index
    %c0_178 = arith.constant 0 : index
    %c0_179 = arith.constant 0 : index
    %386 = vector.load %arg28[%c46, %c0_178, %c0_179] : memref<53x80x32xf32, #tpu.memory_space<vmem>>, vector<1x80x32xf32>
    %387 = vector.shape_cast %386 : vector<1x80x32xf32> to vector<80x32xf32>
    %388 = vector.broadcast %385 : vector<80x1xf32> to vector<80x32xf32>
    %389 = arith.mulf %388, %387 : vector<80x32xf32>
    %390 = arith.addf %384, %389 : vector<80x32xf32>
    %391 = vector.extract_strided_slice %300 {offsets = [0, 15], sizes = [80, 1], strides = [1, 1]} : vector<80x20xf32> to vector<80x1xf32>
    %c47 = arith.constant 47 : index
    %c0_180 = arith.constant 0 : index
    %c0_181 = arith.constant 0 : index
    %392 = vector.load %arg28[%c47, %c0_180, %c0_181] : memref<53x80x32xf32, #tpu.memory_space<vmem>>, vector<1x80x32xf32>
    %393 = vector.shape_cast %392 : vector<1x80x32xf32> to vector<80x32xf32>
    %394 = vector.broadcast %391 : vector<80x1xf32> to vector<80x32xf32>
    %395 = arith.mulf %394, %393 : vector<80x32xf32>
    %396 = arith.addf %390, %395 : vector<80x32xf32>
    %397 = vector.extract_strided_slice %300 {offsets = [0, 16], sizes = [80, 1], strides = [1, 1]} : vector<80x20xf32> to vector<80x1xf32>
    %c48 = arith.constant 48 : index
    %c0_182 = arith.constant 0 : index
    %c0_183 = arith.constant 0 : index
    %398 = vector.load %arg28[%c48, %c0_182, %c0_183] : memref<53x80x32xf32, #tpu.memory_space<vmem>>, vector<1x80x32xf32>
    %399 = vector.shape_cast %398 : vector<1x80x32xf32> to vector<80x32xf32>
    %400 = vector.broadcast %397 : vector<80x1xf32> to vector<80x32xf32>
    %401 = arith.mulf %400, %399 : vector<80x32xf32>
    %402 = arith.addf %396, %401 : vector<80x32xf32>
    %403 = vector.extract_strided_slice %300 {offsets = [0, 17], sizes = [80, 1], strides = [1, 1]} : vector<80x20xf32> to vector<80x1xf32>
    %c49 = arith.constant 49 : index
    %c0_184 = arith.constant 0 : index
    %c0_185 = arith.constant 0 : index
    %404 = vector.load %arg28[%c49, %c0_184, %c0_185] : memref<53x80x32xf32, #tpu.memory_space<vmem>>, vector<1x80x32xf32>
    %405 = vector.shape_cast %404 : vector<1x80x32xf32> to vector<80x32xf32>
    %406 = vector.broadcast %403 : vector<80x1xf32> to vector<80x32xf32>
    %407 = arith.mulf %406, %405 : vector<80x32xf32>
    %408 = arith.addf %402, %407 : vector<80x32xf32>
    %409 = vector.extract_strided_slice %300 {offsets = [0, 18], sizes = [80, 1], strides = [1, 1]} : vector<80x20xf32> to vector<80x1xf32>
    %c50 = arith.constant 50 : index
    %c0_186 = arith.constant 0 : index
    %c0_187 = arith.constant 0 : index
    %410 = vector.load %arg28[%c50, %c0_186, %c0_187] : memref<53x80x32xf32, #tpu.memory_space<vmem>>, vector<1x80x32xf32>
    %411 = vector.shape_cast %410 : vector<1x80x32xf32> to vector<80x32xf32>
    %412 = vector.broadcast %409 : vector<80x1xf32> to vector<80x32xf32>
    %413 = arith.mulf %412, %411 : vector<80x32xf32>
    %414 = arith.addf %408, %413 : vector<80x32xf32>
    %415 = vector.extract_strided_slice %300 {offsets = [0, 19], sizes = [80, 1], strides = [1, 1]} : vector<80x20xf32> to vector<80x1xf32>
    %c51 = arith.constant 51 : index
    %c0_188 = arith.constant 0 : index
    %c0_189 = arith.constant 0 : index
    %416 = vector.load %arg28[%c51, %c0_188, %c0_189] : memref<53x80x32xf32, #tpu.memory_space<vmem>>, vector<1x80x32xf32>
    %417 = vector.shape_cast %416 : vector<1x80x32xf32> to vector<80x32xf32>
    %418 = vector.broadcast %415 : vector<80x1xf32> to vector<80x32xf32>
    %419 = arith.mulf %418, %417 : vector<80x32xf32>
    %420 = arith.addf %414, %419 : vector<80x32xf32>
    %c0_190 = arith.constant 0 : index
    %c0_191 = arith.constant 0 : index
    %c0_192 = arith.constant 0 : index
    %421 = vector.load %arg9[%c0_190, %c0_191, %c0_192] : memref<1x1x1xf32, #tpu.memory_space<vmem>>, vector<1x1x1xf32>
    %422 = vector.shape_cast %421 : vector<1x1x1xf32> to vector<1x1xf32>
    %423 = vector.shape_cast %422 : vector<1x1xf32> to vector<1x1xf32>
    %424 = vector.broadcast %423 : vector<1x1xf32> to vector<80x1xf32>
    %c52 = arith.constant 52 : index
    %c0_193 = arith.constant 0 : index
    %c0_194 = arith.constant 0 : index
    %425 = vector.load %arg28[%c52, %c0_193, %c0_194] : memref<53x80x32xf32, #tpu.memory_space<vmem>>, vector<1x80x32xf32>
    %426 = vector.shape_cast %425 : vector<1x80x32xf32> to vector<80x32xf32>
    %427 = vector.broadcast %424 : vector<80x1xf32> to vector<80x32xf32>
    %428 = arith.mulf %427, %426 : vector<80x32xf32>
    %429 = arith.addf %420, %428 : vector<80x32xf32>
    %cst_195 = arith.constant 0.000000e+00 : f32
    %430 = vector.broadcast %cst_195 : f32 to vector<80x32xf32>
    %431 = arith.maximumf %429, %430 : vector<80x32xf32>
    %432 = arith.truncf %431 : vector<80x32xf32> to vector<80x32xbf16>
    %c0_196 = arith.constant 0 : index
    %c0_197 = arith.constant 0 : index
    %433 = vector.load %arg31[%c0_196, %c0_197] : memref<32x32xbf16, #tpu.memory_space<vmem>>, vector<32x32xbf16>
    %cst_198 = arith.constant dense<0.000000e+00> : vector<80x32xf32>
    %434 = tpu.matmul %432, %433, %cst_198 {dimension_numbers = #tpu.dot_dimension_numbers<[1], [0], [0], [1], [0, 0, 1, 1], [], []>} : vector<80x32xbf16>, vector<32x32xbf16>, vector<80x32xf32> -> vector<80x32xf32>
    %c0_199 = arith.constant 0 : index
    %c0_200 = arith.constant 0 : index
    %435 = vector.load %arg30[%c0_199, %c0_200] : memref<80x32xf32, #tpu.memory_space<vmem>>, vector<80x32xf32>
    %436 = arith.addf %434, %435 : vector<80x32xf32>
    %437 = arith.truncf %436 : vector<80x32xf32> to vector<80x32xbf16>
    %cst_201 = arith.constant dense<0.000000e+00> : vector<80x32xf32>
    %438 = tpu.matmul %1, %437, %cst_201 {dimension_numbers = #tpu.dot_dimension_numbers<[1], [0], [0], [1], [0, 0, 1, 1], [], []>} : vector<80x80xbf16>, vector<80x32xbf16>, vector<80x32xf32> -> vector<80x32xf32>
    %c0_202 = arith.constant 0 : index
    %c0_203 = arith.constant 0 : index
    %439 = vector.load %arg32[%c0_202, %c0_203] : memref<1x32xf32, #tpu.memory_space<vmem>>, vector<1x32xf32>
    %440 = vector.broadcast %439 : vector<1x32xf32> to vector<80x32xf32>
    %441 = arith.addf %438, %440 : vector<80x32xf32>
    %cst_204 = arith.constant 0.000000e+00 : f32
    %442 = vector.broadcast %cst_204 : f32 to vector<80x32xf32>
    %443 = arith.maximumf %441, %442 : vector<80x32xf32>
    %444 = arith.truncf %443 : vector<80x32xf32> to vector<80x32xbf16>
    %c0_205 = arith.constant 0 : index
    %c0_206 = arith.constant 0 : index
    %445 = vector.load %arg33[%c0_205, %c0_206] : memref<32x32xbf16, #tpu.memory_space<vmem>>, vector<32x32xbf16>
    %cst_207 = arith.constant dense<0.000000e+00> : vector<80x32xf32>
    %446 = tpu.matmul %444, %445, %cst_207 {dimension_numbers = #tpu.dot_dimension_numbers<[1], [0], [0], [1], [0, 0, 1, 1], [], []>} : vector<80x32xbf16>, vector<32x32xbf16>, vector<80x32xf32> -> vector<80x32xf32>
    %447 = arith.truncf %446 : vector<80x32xf32> to vector<80x32xbf16>
    %cst_208 = arith.constant dense<0.000000e+00> : vector<80x32xf32>
    %448 = tpu.matmul %1, %447, %cst_208 {dimension_numbers = #tpu.dot_dimension_numbers<[1], [0], [0], [1], [0, 0, 1, 1], [], []>} : vector<80x80xbf16>, vector<80x32xbf16>, vector<80x32xf32> -> vector<80x32xf32>
    %c0_209 = arith.constant 0 : index
    %c0_210 = arith.constant 0 : index
    %449 = vector.load %arg34[%c0_209, %c0_210] : memref<1x32xf32, #tpu.memory_space<vmem>>, vector<1x32xf32>
    %450 = vector.broadcast %449 : vector<1x32xf32> to vector<80x32xf32>
    %451 = arith.addf %448, %450 : vector<80x32xf32>
    %cst_211 = arith.constant 0.000000e+00 : f32
    %452 = vector.broadcast %cst_211 : f32 to vector<80x32xf32>
    %453 = arith.maximumf %451, %452 : vector<80x32xf32>
    %454 = arith.truncf %453 : vector<80x32xf32> to vector<80x32xbf16>
    %c0_212 = arith.constant 0 : index
    %c0_213 = arith.constant 0 : index
    %455 = vector.load %arg35[%c0_212, %c0_213] : memref<32x32xbf16, #tpu.memory_space<vmem>>, vector<32x32xbf16>
    %cst_214 = arith.constant dense<0.000000e+00> : vector<80x32xf32>
    %456 = tpu.matmul %454, %455, %cst_214 {dimension_numbers = #tpu.dot_dimension_numbers<[1], [0], [0], [1], [0, 0, 1, 1], [], []>} : vector<80x32xbf16>, vector<32x32xbf16>, vector<80x32xf32> -> vector<80x32xf32>
    %457 = arith.truncf %456 : vector<80x32xf32> to vector<80x32xbf16>
    %cst_215 = arith.constant dense<0.000000e+00> : vector<80x32xf32>
    %458 = tpu.matmul %1, %457, %cst_215 {dimension_numbers = #tpu.dot_dimension_numbers<[1], [0], [0], [1], [0, 0, 1, 1], [], []>} : vector<80x80xbf16>, vector<80x32xbf16>, vector<80x32xf32> -> vector<80x32xf32>
    %c0_216 = arith.constant 0 : index
    %c0_217 = arith.constant 0 : index
    %459 = vector.load %arg36[%c0_216, %c0_217] : memref<1x32xf32, #tpu.memory_space<vmem>>, vector<1x32xf32>
    %460 = vector.broadcast %459 : vector<1x32xf32> to vector<80x32xf32>
    %461 = arith.addf %458, %460 : vector<80x32xf32>
    %cst_218 = arith.constant 0.000000e+00 : f32
    %462 = vector.broadcast %cst_218 : f32 to vector<80x32xf32>
    %463 = arith.maximumf %461, %462 : vector<80x32xf32>
    %c0_219 = arith.constant 0 : index
    %c0_220 = arith.constant 0 : index
    %464 = vector.load %arg37[%c0_219, %c0_220] : memref<32x192xf32, #tpu.memory_space<vmem>>, vector<32x192xf32>
    %cst_221 = arith.constant dense<0.000000e+00> : vector<80x192xf32>
    %465 = tpu.matmul %463, %464, %cst_221 {dimension_numbers = #tpu.dot_dimension_numbers<[1], [0], [0], [1], [0, 0, 1, 1], [], []>} : vector<80x32xf32>, vector<32x192xf32>, vector<80x192xf32> -> vector<80x192xf32>
    %c0_222 = arith.constant 0 : index
    %c0_223 = arith.constant 0 : index
    %466 = vector.load %arg38[%c0_222, %c0_223] : memref<1x192xf32, #tpu.memory_space<vmem>>, vector<1x192xf32>
    %467 = vector.broadcast %466 : vector<1x192xf32> to vector<80x192xf32>
    %468 = arith.addf %465, %467 : vector<80x192xf32>
    %cst_224 = arith.constant 0.000000e+00 : f32
    %469 = vector.broadcast %cst_224 : f32 to vector<80x192xf32>
    %470 = arith.maximumf %468, %469 : vector<80x192xf32>
    %c0_225 = arith.constant 0 : index
    %c0_226 = arith.constant 0 : index
    %471 = vector.load %arg39[%c0_225, %c0_226] : memref<32x128xf32, #tpu.memory_space<vmem>>, vector<32x128xf32>
    %cst_227 = arith.constant dense<0.000000e+00> : vector<80x128xf32>
    %472 = tpu.matmul %463, %471, %cst_227 {dimension_numbers = #tpu.dot_dimension_numbers<[1], [0], [0], [1], [0, 0, 1, 1], [], []>} : vector<80x32xf32>, vector<32x128xf32>, vector<80x128xf32> -> vector<80x128xf32>
    %c0_228 = arith.constant 0 : index
    %c0_229 = arith.constant 0 : index
    %473 = vector.load %arg40[%c0_228, %c0_229] : memref<192x128xf32, #tpu.memory_space<vmem>>, vector<192x128xf32>
    %cst_230 = arith.constant dense<0.000000e+00> : vector<80x128xf32>
    %474 = tpu.matmul %470, %473, %cst_230 {dimension_numbers = #tpu.dot_dimension_numbers<[1], [0], [0], [1], [0, 0, 1, 1], [], []>} : vector<80x192xf32>, vector<192x128xf32>, vector<80x128xf32> -> vector<80x128xf32>
    %475 = arith.addf %472, %474 : vector<80x128xf32>
    %c0_231 = arith.constant 0 : index
    %c0_232 = arith.constant 0 : index
    %476 = vector.load %arg41[%c0_231, %c0_232] : memref<1x128xf32, #tpu.memory_space<vmem>>, vector<1x128xf32>
    %477 = vector.broadcast %476 : vector<1x128xf32> to vector<80x128xf32>
    %478 = arith.addf %475, %477 : vector<80x128xf32>
    %c0_233 = arith.constant 0 : index
    %c0_234 = arith.constant 0 : index
    %479 = vector.load %arg42[%c0_233, %c0_234] : memref<80x128xf32, #tpu.memory_space<vmem>>, vector<80x128xf32>
    tpu.vector_store %arg42[%c0_233, %c0_234], %478 {strides = array<i32>} : memref<80x128xf32, #tpu.memory_space<vmem>>, vector<80x128xf32>,
    return
  }
  func.func @transform_0(%arg0: i32) -> (i32, i32) {
    %c0_i32 = arith.constant 0 : i32
    %c0_i32_0 = arith.constant 0 : i32
    return %arg0, %c0_i32 : i32, i32
  }
  func.func @transform_1(%arg0: i32) -> (i32, i32) {
    %c0_i32 = arith.constant 0 : i32
    %c0_i32_0 = arith.constant 0 : i32
    return %arg0, %c0_i32 : i32, i32
  }
  func.func @transform_2(%arg0: i32) -> (i32, i32) {
    %c0_i32 = arith.constant 0 : i32
    %c0_i32_0 = arith.constant 0 : i32
    return %arg0, %c0_i32 : i32, i32
  }
  func.func @transform_3(%arg0: i32) -> (i32, i32) {
    %c0_i32 = arith.constant 0 : i32
    %c0_i32_0 = arith.constant 0 : i32
    return %arg0, %c0_i32 : i32, i32
  }
  func.func @transform_4(%arg0: i32) -> (i32, i32) {
    %c0_i32 = arith.constant 0 : i32
    %c0_i32_0 = arith.constant 0 : i32
    return %arg0, %c0_i32 : i32, i32
  }
  func.func @transform_5(%arg0: i32) -> (i32, i32, i32) {
    %c0_i32 = arith.constant 0 : i32
    %c0_i32_0 = arith.constant 0 : i32
    %c0_i32_1 = arith.constant 0 : i32
    return %arg0, %c0_i32, %c0_i32_0 : i32, i32, i32
  }
  func.func @transform_6(%arg0: i32) -> (i32, i32, i32) {
    %c0_i32 = arith.constant 0 : i32
    %c0_i32_0 = arith.constant 0 : i32
    %c0_i32_1 = arith.constant 0 : i32
    return %arg0, %c0_i32, %c0_i32_0 : i32, i32, i32
  }
  func.func @transform_7(%arg0: i32) -> (i32, i32, i32) {
    %c0_i32 = arith.constant 0 : i32
    %c0_i32_0 = arith.constant 0 : i32
    %c0_i32_1 = arith.constant 0 : i32
    return %arg0, %c0_i32, %c0_i32_0 : i32, i32, i32
  }
  func.func @transform_8(%arg0: i32) -> (i32, i32, i32) {
    %c0_i32 = arith.constant 0 : i32
    %c0_i32_0 = arith.constant 0 : i32
    %c0_i32_1 = arith.constant 0 : i32
    return %arg0, %c0_i32, %c0_i32_0 : i32, i32, i32
  }
  func.func @transform_9(%arg0: i32) -> (i32, i32) {
    %c0_i32 = arith.constant 0 : i32
    %c0_i32_0 = arith.constant 0 : i32
    %c0_i32_1 = arith.constant 0 : i32
    return %c0_i32, %c0_i32_0 : i32, i32
  }
  func.func @transform_10(%arg0: i32) -> (i32, i32) {
    %c0_i32 = arith.constant 0 : i32
    %c0_i32_0 = arith.constant 0 : i32
    %c0_i32_1 = arith.constant 0 : i32
    return %c0_i32, %c0_i32_0 : i32, i32
  }
  func.func @transform_11(%arg0: i32) -> (i32, i32) {
    %c0_i32 = arith.constant 0 : i32
    %c0_i32_0 = arith.constant 0 : i32
    %c0_i32_1 = arith.constant 0 : i32
    return %c0_i32, %c0_i32_0 : i32, i32
  }
  func.func @transform_12(%arg0: i32) -> (i32, i32) {
    %c0_i32 = arith.constant 0 : i32
    %c0_i32_0 = arith.constant 0 : i32
    %c0_i32_1 = arith.constant 0 : i32
    return %c0_i32, %c0_i32_0 : i32, i32
  }
  func.func @transform_13(%arg0: i32) -> (i32, i32) {
    %c0_i32 = arith.constant 0 : i32
    %c0_i32_0 = arith.constant 0 : i32
    %c0_i32_1 = arith.constant 0 : i32
    return %c0_i32, %c0_i32_0 : i32, i32
  }
  func.func @transform_14(%arg0: i32) -> (i32, i32) {
    %c0_i32 = arith.constant 0 : i32
    %c0_i32_0 = arith.constant 0 : i32
    %c0_i32_1 = arith.constant 0 : i32
    return %c0_i32, %c0_i32_0 : i32, i32
  }
  func.func @transform_15(%arg0: i32) -> (i32, i32) {
    %c0_i32 = arith.constant 0 : i32
    %c0_i32_0 = arith.constant 0 : i32
    %c0_i32_1 = arith.constant 0 : i32
    return %c0_i32, %c0_i32_0 : i32, i32
  }
  func.func @transform_16(%arg0: i32) -> (i32, i32) {
    %c0_i32 = arith.constant 0 : i32
    %c0_i32_0 = arith.constant 0 : i32
    %c0_i32_1 = arith.constant 0 : i32
    return %c0_i32, %c0_i32_0 : i32, i32
  }
  func.func @transform_17(%arg0: i32) -> (i32, i32) {
    %c0_i32 = arith.constant 0 : i32
    %c0_i32_0 = arith.constant 0 : i32
    %c0_i32_1 = arith.constant 0 : i32
    return %c0_i32, %c0_i32_0 : i32, i32
  }
  func.func @transform_18(%arg0: i32) -> (i32, i32) {
    %c0_i32 = arith.constant 0 : i32
    %c0_i32_0 = arith.constant 0 : i32
    %c0_i32_1 = arith.constant 0 : i32
    return %c0_i32, %c0_i32_0 : i32, i32
  }
  func.func @transform_19(%arg0: i32) -> (i32, i32) {
    %c0_i32 = arith.constant 0 : i32
    %c0_i32_0 = arith.constant 0 : i32
    %c0_i32_1 = arith.constant 0 : i32
    return %c0_i32, %c0_i32_0 : i32, i32
  }
  func.func @transform_20(%arg0: i32) -> (i32, i32) {
    %c0_i32 = arith.constant 0 : i32
    %c0_i32_0 = arith.constant 0 : i32
    %c0_i32_1 = arith.constant 0 : i32
    return %c0_i32, %c0_i32_0 : i32, i32
  }
  func.func @transform_21(%arg0: i32) -> (i32, i32) {
    %c0_i32 = arith.constant 0 : i32
    %c0_i32_0 = arith.constant 0 : i32
    %c0_i32_1 = arith.constant 0 : i32
    return %c0_i32, %c0_i32_0 : i32, i32
  }
  func.func @transform_22(%arg0: i32) -> (i32, i32) {
    %c0_i32 = arith.constant 0 : i32
    %c0_i32_0 = arith.constant 0 : i32
    %c0_i32_1 = arith.constant 0 : i32
    return %c0_i32, %c0_i32_0 : i32, i32
  }
  func.func @transform_23(%arg0: i32) -> (i32, i32) {
    %c0_i32 = arith.constant 0 : i32
    %c0_i32_0 = arith.constant 0 : i32
    %c0_i32_1 = arith.constant 0 : i32
    return %c0_i32, %c0_i32_0 : i32, i32
  }
  func.func @transform_24(%arg0: i32) -> (i32, i32) {
    %c0_i32 = arith.constant 0 : i32
    %c0_i32_0 = arith.constant 0 : i32
    %c0_i32_1 = arith.constant 0 : i32
    return %c0_i32, %c0_i32_0 : i32, i32
  }
  func.func @transform_25(%arg0: i32) -> (i32, i32) {
    %c0_i32 = arith.constant 0 : i32
    %c0_i32_0 = arith.constant 0 : i32
    %c0_i32_1 = arith.constant 0 : i32
    return %c0_i32, %c0_i32_0 : i32, i32
  }
  func.func @transform_26(%arg0: i32) -> (i32, i32) {
    %c0_i32 = arith.constant 0 : i32
    %c0_i32_0 = arith.constant 0 : i32
    %c0_i32_1 = arith.constant 0 : i32
    return %c0_i32, %c0_i32_0 : i32, i32
  }
  func.func @transform_27(%arg0: i32) -> (i32, i32, i32) {
    %c0_i32 = arith.constant 0 : i32
    %c0_i32_0 = arith.constant 0 : i32
    %c0_i32_1 = arith.constant 0 : i32
    %c0_i32_2 = arith.constant 0 : i32
    return %c0_i32, %c0_i32_0, %c0_i32_1 : i32, i32, i32
  }
  func.func @transform_28(%arg0: i32) -> (i32, i32) {
    %c0_i32 = arith.constant 0 : i32
    %c0_i32_0 = arith.constant 0 : i32
    %c0_i32_1 = arith.constant 0 : i32
    return %c0_i32, %c0_i32_0 : i32, i32
  }
  func.func @transform_29(%arg0: i32) -> (i32, i32) {
    %c0_i32 = arith.constant 0 : i32
    %c0_i32_0 = arith.constant 0 : i32
    %c0_i32_1 = arith.constant 0 : i32
    return %c0_i32, %c0_i32_0 : i32, i32
  }
  func.func @transform_30(%arg0: i32) -> (i32, i32) {
    %c0_i32 = arith.constant 0 : i32
    %c0_i32_0 = arith.constant 0 : i32
    %c0_i32_1 = arith.constant 0 : i32
    return %c0_i32, %c0_i32_0 : i32, i32
  }
  func.func @transform_31(%arg0: i32) -> (i32, i32) {
    %c0_i32 = arith.constant 0 : i32
    %c0_i32_0 = arith.constant 0 : i32
    %c0_i32_1 = arith.constant 0 : i32
    return %c0_i32, %c0_i32_0 : i32, i32
  }
  func.func @transform_32(%arg0: i32) -> (i32, i32) {
    %c0_i32 = arith.constant 0 : i32
    %c0_i32_0 = arith.constant 0 : i32
    %c0_i32_1 = arith.constant 0 : i32
    return %c0_i32, %c0_i32_0 : i32, i32
  }
  func.func @transform_33(%arg0: i32) -> (i32, i32) {
    %c0_i32 = arith.constant 0 : i32
    %c0_i32_0 = arith.constant 0 : i32
    %c0_i32_1 = arith.constant 0 : i32
    return %c0_i32, %c0_i32_0 : i32, i32
  }
  func.func @transform_34(%arg0: i32) -> (i32, i32) {
    %c0_i32 = arith.constant 0 : i32
    %c0_i32_0 = arith.constant 0 : i32
    %c0_i32_1 = arith.constant 0 : i32
    return %c0_i32, %c0_i32_0 : i32, i32
  }
  func.func @transform_35(%arg0: i32) -> (i32, i32) {
    %c0_i32 = arith.constant 0 : i32
    %c0_i32_0 = arith.constant 0 : i32
    %c0_i32_1 = arith.constant 0 : i32
    return %c0_i32, %c0_i32_0 : i32, i32
  }
  func.func @transform_36(%arg0: i32) -> (i32, i32) {
    %c0_i32 = arith.constant 0 : i32
    %c0_i32_0 = arith.constant 0 : i32
    %c0_i32_1 = arith.constant 0 : i32
    return %c0_i32, %c0_i32_0 : i32, i32
  }
  func.func @transform_37(%arg0: i32) -> (i32, i32) {
    %c0_i32 = arith.constant 0 : i32
    %c0_i32_0 = arith.constant 0 : i32
    %c0_i32_1 = arith.constant 0 : i32
    return %c0_i32, %c0_i32_0 : i32, i32
  }
  func.func @transform_38(%arg0: i32) -> (i32, i32) {
    %c0_i32 = arith.constant 0 : i32
    %c0_i32_0 = arith.constant 0 : i32
    %c0_i32_1 = arith.constant 0 : i32
    return %c0_i32, %c0_i32_0 : i32, i32
  }
  func.func @transform_39(%arg0: i32) -> (i32, i32) {
    %c0_i32 = arith.constant 0 : i32
    %c0_i32_0 = arith.constant 0 : i32
    %c0_i32_1 = arith.constant 0 : i32
    return %c0_i32, %c0_i32_0 : i32, i32
  }
  func.func @transform_40(%arg0: i32) -> (i32, i32) {
    %c0_i32 = arith.constant 0 : i32
    %c0_i32_0 = arith.constant 0 : i32
    %c0_i32_1 = arith.constant 0 : i32
    return %c0_i32, %c0_i32_0 : i32, i32
  }
  func.func @transform_41(%arg0: i32) -> (i32, i32) {
    %c0_i32 = arith.constant 0 : i32
    %c0_i32_0 = arith.constant 0 : i32
    return %arg0, %c0_i32 : i32, i32
  }
  func.func @transform_42(%arg0: i32) -> (i32, i32, i32) {
    %c0_i32 = arith.constant 0 : i32
    %c0_i32_0 = arith.constant 0 : i32
    %c0_i32_1 = arith.constant 0 : i32
    return %arg0, %c0_i32, %c0_i32_0 : i32, i32, i32
  }
}

</mosaic_0001>

<bundles_post_ra>
// kernel: forward.1
= control target key start
LH: loop header
LB: loop body
LE: loop exit
PB: predicated region body
PF: predicated region fallthrough
CT: control target
= control target key end

     0   :  { %s8241_s6 = smov 1   ;;  %s8242_s10 = smov 2   ;;  %s10732_s0 = inlined_call_operand.smem [shape: u32[43], index: -1, kind: input, shape index: {}] }
   0x1   :  { %s8328_s5 = sld [smem:[%s10732_s0]]   ;;  %s8243_s14 = smov 3  }
   0x2   :  { %s8333_s9 = sld [smem:[%s10732_s0 + %s8241_s6]]   ;;  %s8244_s18 = smov 4  }
   0x3   :  { %s8338_s13 = sld [smem:[%s10732_s0 + %s8242_s10]]   ;;  %s8245_s22 = smov 5  }
   0x4   :  { %s8343_s17 = sld [smem:[%s10732_s0 + %s8243_s14]]   ;;  %s8246_s26 = smov 6  }
   0x5   :  { %s8348_s21 = sld [smem:[%s10732_s0 + %s8244_s18]]   ;;  %s8247_s30 = smov 7  }
   0x6   :  { %s8353_s25 = sld [smem:[%s10732_s0 + %s8245_s22]]   ;;  %s8248_s4 = smov 8  }
   0x7   :  { %s8358_s29 = sld [smem:[%s10732_s0 + %s8246_s26]]   ;;  %s8249_s10 = smov 9  }
   0x8   :  { %s8363_s3 = sld [smem:[%s10732_s0 + %s8247_s30]]   ;;  %s8250_s15 = smov 10  }
   0x9   :  { %s8368_s8 = sld [smem:[%s10732_s0 + %s8248_s4]]   ;;  %s8251_s20 = smov 11  }
   0xa   :  { %s8373_s14 = sld [smem:[%s10732_s0 + %s8249_s10]]   ;;  %s8252_s26 = smov 12  }
   0xb   :  { %s8378_s19 = sld [smem:[%s10732_s0 + %s8250_s15]]   ;;  %s8253_s1 = smov 13  }
   0xc   :  { %10768 = sst [smem:[#allocation2_spill]] %s8353_s25  ;;  %s8254_s7 = smov 14  }
   0xd   :  { %10769 = sst [smem:[#allocation3_spill]] %s8358_s29  ;;  %s8255_s15 = smov 15  }
   0xe   :  { %s8383_s24 = sld [smem:[%s10732_s0 + %s8251_s20]]   ;;  %s8256_s22 = smov 16  }
   0xf   :  { %10770 = sst [smem:[#allocation4_spill]] %s8368_s8  ;;  %s8257_s28 = smov 17  }
  0x10   :  { %s8388_s30 = sld [smem:[%s10732_s0 + %s8252_s26]]  }
  0x11   :  { %s8393_s6 = sld [smem:[%s10732_s0 + %s8253_s1]]  }
  0x12   :  { %s8398_s12 = sld [smem:[%s10732_s0 + %s8254_s7]]   ;;  %s8258_s7 = smov 18  }
  0x13   :  { %s8403_s20 = sld [smem:[%s10732_s0 + %s8255_s15]]   ;;  %s8259_s15 = smov 19  }
  0x14   :  { %s8408_s27 = sld [smem:[%s10732_s0 + %s8256_s22]]   ;;  %s8260_s22 = smov 20  }
  0x15   :  { %s8413_s4 = sld [smem:[%s10732_s0 + %s8257_s28]]   ;;  %s8261_s28 = smov 21  }
  0x16   :  { %s8418_s8 = sld [smem:[%s10732_s0 + %s8258_s7]]   ;;  %s8262_s7 = smov 22  }
  0x17   :  { %s8423_s29 = sld [smem:[%s10732_s0 + %s8259_s15]]   ;;  %s8263_s15 = smov 23  }
  0x18   :  { %s8428_s25 = sld [smem:[%s10732_s0 + %s8260_s22]]   ;;  %s8264_s22 = smov 24  }
  0x1b   :  { %10771 = sst [smem:[#allocation5_spill]] %s8413_s4 }
  0x1c   :  { %10772 = sst [smem:[#allocation6_spill]] %s8418_s8 }
  0x1d   :  { %10773 = sst [smem:[#allocation7_spill]] %s8423_s29 }
  0x1e   :  { %10774 = sst [smem:[#allocation8_spill]] %s8428_s25 }
  0x1f   :  { %s8433_s4 = sld [smem:[%s10732_s0 + %s8261_s28]]   ;;  %s8265_s28 = smov 25  }
  0x20   :  { %s8438_s8 = sld [smem:[%s10732_s0 + %s8262_s7]]   ;;  %s8266_s7 = smov 26  }
  0x21   :  { %s8443_s29 = sld [smem:[%s10732_s0 + %s8263_s15]]   ;;  %s8267_s15 = smov 27  }
  0x22   :  { %s8448_s25 = sld [smem:[%s10732_s0 + %s8264_s22]]   ;;  %s8268_s22 = smov 28  }
  0x25   :  { %10775 = sst [smem:[#allocation9_spill]] %s8433_s4 }
  0x26   :  { %10776 = sst [smem:[#allocation10_spill]] %s8438_s8 }
  0x27   :  { %10777 = sst [smem:[#allocation11_spill]] %s8443_s29 }
  0x28   :  { %10778 = sst [smem:[#allocation12_spill]] %s8448_s25 }
  0x29   :  { %s8453_s4 = sld [smem:[%s10732_s0 + %s8265_s28]]   ;;  %s8269_s28 = smov 29  }
  0x2a   :  { %s8458_s8 = sld [smem:[%s10732_s0 + %s8266_s7]]   ;;  %s8270_s7 = smov 30  }
  0x2b   :  { %s8463_s29 = sld [smem:[%s10732_s0 + %s8267_s15]]   ;;  %s8271_s15 = smov 31  }
  0x2c   :  { %s8468_s25 = sld [smem:[%s10732_s0 + %s8268_s22]]   ;;  %s8272_s22 = smov 32  }
  0x2f   :  { %10779 = sst [smem:[#allocation13_spill]] %s8453_s4 }
  0x30   :  { %10780 = sst [smem:[#allocation14_spill]] %s8458_s8 }
  0x31   :  { %10781 = sst [smem:[#allocation15_spill]] %s8463_s29 }
  0x32   :  { %10782 = sst [smem:[#allocation16_spill]] %s8468_s25 }
  0x33   :  { %s8473_s4 = sld [smem:[%s10732_s0 + %s8269_s28]]   ;;  %s8273_s28 = smov 33  }
  0x34   :  { %s8478_s8 = sld [smem:[%s10732_s0 + %s8270_s7]]   ;;  %s8274_s7 = smov 34  }
  0x35   :  { %s8483_s29 = sld [smem:[%s10732_s0 + %s8271_s15]]   ;;  %s8275_s15 = smov 35  }
  0x36   :  { %s8488_s25 = sld [smem:[%s10732_s0 + %s8272_s22]]   ;;  %s8276_s22 = smov 36  }
  0x39   :  { %10783 = sst [smem:[#allocation17_spill]] %s8473_s4 }
  0x3a   :  { %10784 = sst [smem:[#allocation18_spill]] %s8478_s8 }
  0x3b   :  { %10785 = sst [smem:[#allocation19_spill]] %s8483_s29 }
  0x3c   :  { %10786 = sst [smem:[#allocation20_spill]] %s8488_s25 }
  0x3d   :  { %s8493_s4 = sld [smem:[%s10732_s0 + %s8273_s28]]   ;;  %s8277_s28 = smov 37  }
  0x3e   :  { %s8498_s8 = sld [smem:[%s10732_s0 + %s8274_s7]]   ;;  %s8278_s7 = smov 38  }
  0x3f   :  { %s8503_s29 = sld [smem:[%s10732_s0 + %s8275_s15]]   ;;  %s8279_s15 = smov 39  }
  0x40   :  { %s8508_s25 = sld [smem:[%s10732_s0 + %s8276_s22]]   ;;  %s8280_s22 = smov 40  }
  0x43   :  { %10787 = sst [smem:[#allocation21_spill]] %s8493_s4 }
  0x44   :  { %10788 = sst [smem:[#allocation22_spill]] %s8498_s8 }
  0x45   :  { %10789 = sst [smem:[#allocation23_spill]] %s8503_s29 }
  0x46   :  { %10790 = sst [smem:[#allocation24_spill]] %s8508_s25 }
  0x47   :  { %s8513_s4 = sld [smem:[%s10732_s0 + %s8277_s28]]   ;;  %s8281_s28 = smov 41  }
  0x48   :  { %s8518_s8 = sld [smem:[%s10732_s0 + %s8278_s7]]   ;;  %s8282_s7 = smov 42  }
  0x49   :  { %s8523_s29 = sld [smem:[%s10732_s0 + %s8279_s15]]   ;;  %s8540_s15 = smov 0  }
  0x4a   :  { %s8528_s25 = sld [smem:[%s10732_s0 + %s8280_s22]]  }
  0x4d   :  { %10791 = sst [smem:[#allocation25_spill]] %s8513_s4 }
  0x4e   :  { %10792 = sst [smem:[#allocation26_spill]] %s8518_s8 }
  0x4f   :  { %s8533_s4 = sld [smem:[%s10732_s0 + %s8281_s28]]  }
  0x50   :  { %s8538_s8 = sld [smem:[%s10732_s0 + %s8282_s7]]  }
  0x51 LB: > { %s8546_s16 = sadd.s32 4294967295, %s8239_s15   ;;  %p6597_p0 = scmp.ge.s32.totalorder %s8239_s15, 1  ;;  %s8239_s15 = sphi %s8540_s15, %s96_s15  }
  0x52   : > { %p1237_p1 = scmp.lt.s32.totalorder %s8239_s15, 3 }
  0x54   : > { %p1238_p2 = pnand %p6597_p0, %p1237_p1 }
  0x56   : > { %1241 = sbr.rel (%p1238_p2) target bundleno = 4457 (0x1169), region = 184 }
  0x5d   : > { %v1461_v0 = vld [vmem:[%s8393_s6] sm:$0x3]  ;;  %vm1493_vm0 = vcmask 1041408   ;;  %s1376_s0 = smul.u32 10, %s8546_s16  ;;  %vm1643_vm1 = vcmask 1045504   ;;  %v8283_v2 = vmov 0  }
  0x5e   : > { %7481 = vmatprep.subr.msk.mxu0 %vm1493_vm0, %v1461_v0  ;;  %v1450_v1 = vld [vmem:[%s8383_s24] sm:$0x3f]  ;;  %8152 = vset.pattern.permute.xlu0 %v8283_v2  ;;  %vm1462_vm2 = vcmask 15360   ;;  %vm1612_vm3 = vcmask 48128   ;;  %p1406_p4 = scmp.lt.s32.totalorder %s8546_s16, 1  ;;  %v10751_v34 = vmov 0.0  }
  0x5f   : > { %7482 = vmatpush3.msk.msra.mxu0 %vm1493_vm0, %v1461_v0  ;;  %p1377_p3 = scmp.lt.s32.totalorder %s1376_s0, 19  ;;  %8153 = vset.pattern.permute.xlu1 %v8283_v2  ;;  %v1772_v6 = vld [vmem:[%s8398_s12] sm:$0x3]  ;;  %v8207_v58 = vld [vmem:[%s8408_s27 + $0x8] sm:$0xff]   ;;  %v8208_v59 = vld [vmem:[%s8408_s27 + $0x10] sm:$0xff]   ;;  %vm8285_vm4 = vmmov 0  }
  0x60   : > { %7498 = vmatprep.subr.msk.mxu0 %vm1643_vm1, %v1450_v1  ;;  %v1941_v22 = vld [vmem:[%s8403_s20] sm:$0x3]  ;;  %s10989_s16 = smov (!%p1406_p4, %s8546_s16), 1  ;;  %7549 = vmatprep.subr.bf16.mxu1 %v10751_v34  ;;  %v8209_v60 = vld [vmem:[%s8408_s27 + $0x18] sm:$0xff]   ;;  %vm2281_vm5 = vcmask 523264   ;;  %s10793_s7 = sld [smem:[#allocation2_spill]] }
  0x61   : > { %s10987_s0 = smov (!%p1377_p3, %s1376_s0), 19  ;;  %s8615_s28 = scalar_lea.vmem %s8363_s3, %s10989_s16  ;;  %v8206_v32 = vld [vmem:[%s8408_s27] sm:$0xff]   ;;  %7557 = vmatprep.mubr.msk.bf16.mxu1 %vm8285_vm4, %v10751_v34  ;;  %vm2407_vm6 = vcmask 654336   ;;  %vm2527_vm7 = vcmask 261120  }
  0x62   : > { %s8558_s18 = sshll.u32 %s10987_s0, 3  ;;  %7550 = vmatpush3.bf16.msra.mxu1 %v8206_v32  ;;  %v7021_v36 = vld [vmem:[%s8615_s28] ss:$0 sm:$0xff]  ;;  %s10794_s10 = sld [smem:[#allocation6_spill]] }
  0x63   : > { %s1392_s22 = scalar_lea.vmem %s8338_s13, %s8558_s18  ;;  %s8573_s23 = scalar_lea.vmem %s8333_s9, %s8558_s18  ;;  %7551 = vmatprep.subr.bf16.mxu1 %v10751_v34  ;;  %v8665_v0 = vld [vmem:[%s8388_s30] ss:$0 sm:$0xff] }
  0x64   : > { %v1451_v3 = vld [vmem:[%s1392_s22] sm:$0xff]  ;;  %v1452_v4 = vld [vmem:[%s1392_s22 + $0x8] sm:$0xff]  ;;  %v1453_v5 = vld [vmem:[%s1392_s22 + $0x10] sm:$0xff]  ;;  %s8578_s26 = scalar_lea.vmem %s8328_s5, %s8558_s18  ;;  %s1398_s1 = scalar_lea.vmem %s8343_s17, %s8558_s18 }
  0x65   : > { %7483 = vmatprep.mubr.msk.f32.mxu0 %vm1462_vm2, %v1451_v3  ;;  %v1454_v7 = vld [vmem:[%s1392_s22 + $0x18] sm:$0xff]  ;;  %v1455_v8 = vld [vmem:[%s1392_s22 + $0x20] sm:$0xff]  ;;  %v1456_v9 = vld [vmem:[%s1392_s22 + $0x28] sm:$0xff]  ;;  %s1404_s2 = scalar_lea.vmem %s8348_s21, %s8558_s18  ;;  %s8064_s11 = smul.u32 40, %s10989_s16 }
  0x66   : > { %7484 = vmatmul.mubr.msk.f32.vlgmr.msra.gmra.mrb[0].mxu0 %vm1462_vm2, %v1452_v4  ;;  %v1457_v10 = vld [vmem:[%s1392_s22 + $0x30] sm:$0xff]  ;;  %v1458_v11 = vld [vmem:[%s1392_s22 + $0x38] sm:$0xff]  ;;  %v1459_v12 = vld [vmem:[%s1392_s22 + $0x40] sm:$0xff]  ;;  %7552 = vmatpush3.bf16.msra.mxu1 %v8207_v58 }
  0x67   : > { %7486 = vmatprep.mubr.msk.f32.mxu0 %vm1462_vm2, %v1453_v5  ;;  %7499 = vmatpush3.msk.msra.mxu0 %vm1643_vm1, %v1450_v1  ;;  %v2100_v13 = vld [vmem:[%s8573_s23] sm:$0xff]  ;;  %v2102_v14 = vld [vmem:[%s8573_s23 + $0x10] sm:$0xff]  ;;  %v1460_v15 = vld [vmem:[%s1392_s22 + $0x48] sm:$0xff]  ;;  %s8729_s0 = scalar_lea.vmem %s10793_s7, %s8064_s11  ;;  %s10795_s22 = sld [smem:[#allocation5_spill]] }
  0x68   : > { %7515 = vmatprep.subr.msk.mxu0 %vm1493_vm0, %v1772_v6  ;;  %2113 = vperm.xlu0 %8152, %v2100_v13   ;;  %v2101_v16 = vld [vmem:[%s8573_s23 + $0x8] sm:$0xff]  ;;  %v1440_v17 = vld [vmem:[%s8578_s26] sm:$0xff]  ;;  %v2103_v18 = vld [vmem:[%s8573_s23 + $0x18] sm:$0xff]  ;;  %s10800_s7 = sld [smem:[#allocation10_spill]]  ;;  %s10801_s11 = sld [smem:[#allocation13_spill]] }
  0x69   : > { %2123 = vperm.xlu1 %8153, %v2102_v14   ;;  %v1441_v19 = vld [vmem:[%s8578_s26 + $0x8] sm:$0xff]  ;;  %v2104_v20 = vld [vmem:[%s8573_s23 + $0x20] sm:$0xff]  ;;  %v1442_v21 = vld [vmem:[%s8578_s26 + $0x10] sm:$0xff]  ;;  %7553 = vmatprep.subr.bf16.mxu1 %v10751_v34 }
  0x6a   : > { %7487 = vmatmul.mubr.msk.f32.gmra.mrb[2].mxu0 %vm1462_vm2, %v1454_v7  ;;  %v2105_v23 = vld [vmem:[%s8573_s23 + $0x28] sm:$0xff]  ;;  %v1443_v24 = vld [vmem:[%s8578_s26 + $0x18] sm:$0xff]  ;;  %v2106_v25 = vld [vmem:[%s8573_s23 + $0x30] sm:$0xff]  ;;  %7554 = vmatpush3.bf16.msra.mxu1 %v8208_v59 }
  0x6b   : > { %7489 = vmatprep.mubr.msk.f32.mxu0 %vm1462_vm2, %v1455_v8  ;;  %v1444_v26 = vld [vmem:[%s8578_s26 + $0x20] sm:$0xff]  ;;  %v2107_v27 = vld [vmem:[%s8573_s23 + $0x38] sm:$0xff]  ;;  %v1445_v28 = vld [vmem:[%s8578_s26 + $0x28] sm:$0xff]  ;;  %7555 = vmatprep.subr.bf16.mxu1 %v10751_v34 }
  0x6c   : > { %2118 = vperm.xlu0 %8152, %v2101_v16   ;;  %v2108_v29 = vld [vmem:[%s8573_s23 + $0x40] sm:$0xff]  ;;  %v1446_v30 = vld [vmem:[%s8578_s26 + $0x30] sm:$0xff]  ;;  %v2109_v31 = vld [vmem:[%s8573_s23 + $0x48] sm:$0xff]  ;;  %s10796_s23 = sld [smem:[#allocation8_spill]] }
  0x6d   : > { %2128 = vperm.xlu1 %8153, %v2103_v18   ;;  %v1447_v33 = vld [vmem:[%s8578_s26 + $0x38] sm:$0xff]  ;;  %v1448_v35 = vld [vmem:[%s8578_s26 + $0x40] sm:$0xff]  ;;  %v1449_v37 = vld [vmem:[%s8578_s26 + $0x48] sm:$0xff]  ;;  %s10797_s26 = sld [smem:[#allocation7_spill]] }
  0x6e   : > { %7490 = vmatmul.mubr.msk.f32.gmra.mrb[4].mxu0 %vm1462_vm2, %v1456_v9  ;;  %v1762_v38 = vld [vmem:[%s1398_s1] sm:$0xff]  ;;  %v1763_v39 = vld [vmem:[%s1398_s1 + $0x8] sm:$0xff]  ;;  %v1764_v40 = vld [vmem:[%s1398_s1 + $0x10] sm:$0xff]  ;;  %7556 = vmatpush3.bf16.msra.mxu1 %v8209_v60 }
  0x6f   : > { %7492 = vmatprep.mubr.msk.f32.mxu0 %vm1462_vm2, %v1457_v10  ;;  %v1765_v41 = vld [vmem:[%s1398_s1 + $0x18] sm:$0xff]  ;;  %v1766_v42 = vld [vmem:[%s1398_s1 + $0x20] sm:$0xff]  ;;  %v1767_v43 = vld [vmem:[%s1398_s1 + $0x28] sm:$0xff]  ;;  %7577 = vmatprep.subr.bf16.mxu1 %v10751_v34 }
  0x70   : > { %2133 = vperm.xlu0 %8152, %v2104_v20   ;;  %v1768_v44 = vld [vmem:[%s1398_s1 + $0x30] sm:$0xff]  ;;  %v1769_v45 = vld [vmem:[%s1398_s1 + $0x38] sm:$0xff]  ;;  %v1770_v46 = vld [vmem:[%s1398_s1 + $0x40] sm:$0xff] }
  0x71   : > { %2138 = vperm.xlu1 %8153, %v2105_v23   ;;  %v1771_v47 = vld [vmem:[%s1398_s1 + $0x48] sm:$0xff]  ;;  %v1931_v48 = vld [vmem:[%s1404_s2] sm:$0xff]  ;;  %v1933_v50 = vld [vmem:[%s1404_s2 + $0x10] sm:$0xff]  ;;  %s10798_s1 = sld [smem:[#allocation11_spill]] }
  0x72   : > { %7493 = vmatmul.mubr.msk.f32.gmra.mrb[6].mxu0 %vm1462_vm2, %v1458_v11  ;;  %v1932_v49 = vld [vmem:[%s1404_s2 + $0x8] sm:$0xff]  ;;  %v1934_v51 = vld [vmem:[%s1404_s2 + $0x18] sm:$0xff]  ;;  %v1935_v52 = vld [vmem:[%s1404_s2 + $0x20] sm:$0xff] }
  0x73   : > { %7495 = vmatprep.mubr.msk.f32.mxu0 %vm1462_vm2, %v1459_v12  ;;  %v1936_v53 = vld [vmem:[%s1404_s2 + $0x28] sm:$0xff]  ;;  %v1937_v54 = vld [vmem:[%s1404_s2 + $0x30] sm:$0xff]  ;;  %v1938_v55 = vld [vmem:[%s1404_s2 + $0x38] sm:$0xff] }
  0x74   : > { %2143 = vperm.xlu0 %8152, %v2106_v25   ;;  %v1939_v56 = vld [vmem:[%s1404_s2 + $0x40] sm:$0xff]  ;;  %v1940_v57 = vld [vmem:[%s1404_s2 + $0x48] sm:$0xff]  ;;  %v2189_v23 = vld [vmem:[%s8378_s19 + $0x10] sm:$0xff]  ;;  %s10799_s2 = sld [smem:[#allocation12_spill]] }
  0x75   : > { %2148 = vperm.xlu1 %8153, %v2107_v27   ;;  %v2188_v7 = vld [vmem:[%s8378_s19 + $0x8] sm:$0xff]  ;;  %v2187_v11 = vld [vmem:[%s8378_s19] sm:$0xff] }
  0x76   : > { %7496 = vmatmul.mubr.msk.f32.gmra.mrb[8].mxu0 %vm1462_vm2, %v1460_v15  ;;  %v8674_v16 = vld [vmem:[%s8373_s14] ss:$0 sm:$0xff] }
  0x77   : > { %7500 = vmatprep.mubr.msk.f32.mxu0 %vm1612_vm3, %v1440_v17 }
  0x78   : > { %2153 = vperm.xlu0 %8152, %v2108_v29  }
  0x79   : > { %2158 = vperm.xlu1 %8153, %v2109_v31  }
  0x7a   : > { %7501 = vmatmul.mubr.msk.f32.vlgmr.msra.gmra.mrb[0].mxu0 %vm1612_vm3, %v1441_v19  ;;  %v2190_v19 = vld [vmem:[%s8378_s19 + $0x18] sm:$0xff] }
  0x7b   : > { %7503 = vmatprep.mubr.msk.f32.mxu0 %vm1612_vm3, %v1442_v21  ;;  %7516 = vmatpush3.msk.msra.mxu0 %vm1493_vm0, %v1772_v6 }
  0x7c   : > { %7532 = vmatprep.subr.msk.mxu0 %vm1493_vm0, %v1941_v22 }
  0x7d   : > { %4512 = vperm.xlu1 %8153, %v7021_v36   ;;  %v2192_v36 = vld [vmem:[%s8378_s19 + $0x28] sm:$0xff] }
  0x7e   : > { %7504 = vmatmul.mubr.msk.f32.gmra.mrb[2].mxu0 %vm1612_vm3, %v1443_v24 }
  0x7f   : > { %7506 = vmatprep.mubr.msk.f32.mxu0 %vm1612_vm3, %v1444_v26 }
  0x82   : > { %7507 = vmatmul.mubr.msk.f32.gmra.mrb[4].mxu0 %vm1612_vm3, %v1445_v28 }
  0x83   : > { %7509 = vmatprep.mubr.msk.f32.mxu0 %vm1612_vm3, %v1446_v30 }
  0x86   : > { %7510 = vmatmul.mubr.msk.f32.gmra.mrb[6].mxu0 %vm1612_vm3, %v1447_v33 }
  0x87   : > { %7512 = vmatprep.mubr.msk.f32.mxu0 %vm1612_vm3, %v1448_v35 }
  0x8a   : > { %7513 = vmatmul.mubr.msk.f32.gmra.mrb[8].mxu0 %vm1612_vm3, %v1449_v37 }
  0x8b   : > { %7517 = vmatprep.mubr.msk.f32.mxu0 %vm1462_vm2, %v1762_v38 }
  0x8e   : > { %7518 = vmatmul.mubr.msk.f32.vlgmr.msra.gmra.mrb[0].mxu0 %vm1462_vm2, %v1763_v39 }
  0x8f   : > { %7520 = vmatprep.mubr.msk.f32.mxu0 %vm1462_vm2, %v1764_v40  ;;  %7533 = vmatpush3.msk.msra.mxu0 %vm1493_vm0, %v1941_v22 }
  0x90   : > { %7607 = vmatprep.subr.bf16.mxu0 %v10751_v34 }
  0x92   : > { %7521 = vmatmul.mubr.msk.f32.gmra.mrb[2].mxu0 %vm1462_vm2, %v1765_v41  ;;  %v2191_v41 = vld [vmem:[%s8378_s19 + $0x20] sm:$0xff] }
  0x93   : > { %7523 = vmatprep.mubr.msk.f32.mxu0 %vm1462_vm2, %v1766_v42 }
  0x96   : > { %7524 = vmatmul.mubr.msk.f32.gmra.mrb[4].mxu0 %vm1462_vm2, %v1767_v43 }
  0x97   : > { %7526 = vmatprep.mubr.msk.f32.mxu0 %vm1462_vm2, %v1768_v44 }
  0x9a   : > { %7527 = vmatmul.mubr.msk.f32.gmra.mrb[6].mxu0 %vm1462_vm2, %v1769_v45 }
  0x9b   : > { %7529 = vmatprep.mubr.msk.f32.mxu0 %vm1462_vm2, %v1770_v46 }
  0x9e   : > { %7530 = vmatmul.mubr.msk.f32.gmra.mrb[8].mxu0 %vm1462_vm2, %v1771_v47 }
  0x9f   : > { %7534 = vmatprep.mubr.msk.f32.mxu0 %vm1462_vm2, %v1931_v48 }
  0xa2   : > { %7535 = vmatmul.mubr.msk.f32.vlgmr.msra.gmra.mrb[0].mxu0 %vm1462_vm2, %v1932_v49 }
  0xa3   : > { %7537 = vmatprep.mubr.msk.f32.mxu0 %vm1462_vm2, %v1933_v50 }
  0xa6   : > { %7538 = vmatmul.mubr.msk.f32.gmra.mrb[2].mxu0 %vm1462_vm2, %v1934_v51 }
  0xa7   : > { %7540 = vmatprep.mubr.msk.f32.mxu0 %vm1462_vm2, %v1935_v52 }
  0xaa   : > { %7541 = vmatmul.mubr.msk.f32.gmra.mrb[4].mxu0 %vm1462_vm2, %v1936_v53 }
  0xab   : > { %7543 = vmatprep.mubr.msk.f32.mxu0 %vm1462_vm2, %v1937_v54 }
  0xae   : > { %7544 = vmatmul.mubr.msk.f32.gmra.mrb[6].mxu0 %vm1462_vm2, %v1938_v55 }
  0xaf   : > { %7546 = vmatprep.mubr.msk.f32.mxu0 %vm1462_vm2, %v1939_v56  ;;  %v2194_v56 = vld [vmem:[%s8378_s19 + $0x38] sm:$0xff] }
  0xb2   : > { %7547 = vmatmul.mubr.msk.f32.gmra.mrb[8].mxu0 %vm1462_vm2, %v1940_v57 }
  0xb3   : > { %7611 = vmatprep.mubr.msk.bf16.mxu0 %vm8285_vm4, %v10751_v34 }
  0xe7   : > { %v2114_v61 = vpop.permute.xlu0 %2113 }
  0xe8   : > { %v2124_v62 = vpop.permute.xlu1 %2123  ;;  %v2167_v4 = vmul.f32 %v8665_v0, %v2114_v61 }
  0xe9   : > { %v2169_v12 = vmul.f32 %v8665_v0, %v2124_v62  ;;  %v2193_v62 = vld [vmem:[%s8378_s19 + $0x30] sm:$0xff] }
  0xeb   : > { %v2119_v63 = vpop.permute.xlu0 %2118 }
  0xec   : > { %v2129_v1 = vpop.permute.xlu1 %2128  ;;  %v2168_v3 = vmul.f32 %v8665_v0, %v2119_v63 }
  0xed   : > { %v2170_v8 = vmul.f32 %v8665_v0, %v2129_v1 }
  0xef   : > { %v2134_v5 = vpop.permute.xlu0 %2133 }
  0xf0   : > { %v2139_v13 = vpop.permute.xlu1 %2138  ;;  %v2171_v30 = vmul.f32 %v8665_v0, %v2134_v5 }
  0xf1   : > { %v2172_v27 = vmul.f32 %v8665_v0, %v2139_v13 }
  0xf3   : > { %v2144_v24 = vpop.permute.xlu0 %2143 }
  0xf4   : > { %v2149_v31 = vpop.permute.xlu1 %2148  ;;  %v2173_v42 = vmul.f32 %v8665_v0, %v2144_v24 }
  0xf5   : > { %v2174_v46 = vmul.f32 %v8665_v0, %v2149_v31 }
  0xf7   : > { %v2154_v50 = vpop.permute.xlu0 %2153 }
  0xf8   : > { %v2159_v63 = vpop.permute.xlu1 %2158  ;;  %v2175_v5 = vmul.f32 %v8665_v0, %v2154_v50 }
 0x175   : > { %v7536_v6 = vpop.f32.mrb[0].mxu0 }
 0x176   : > { %v2178_v9 = vadd.f32 %v7536_v6, %v2168_v3  ;;  %v2041_v10 = vpop.f32.mrb[1].mxu0  ;;  %v2176_v6 = vmul.f32 %v8665_v0, %v2159_v63  ;;  %v2195_v0 = vld [vmem:[%s8378_s19 + $0x40] sm:$0xff] }
 0x177   : > { %v2177_v14 = vadd.f32 %v2167_v4, %v2041_v10 }
 0x178   : > { %v2198_v15 = vadd.f32 %v2188_v7, %v2178_v9 }
 0x179   : > { %v2197_v17 = vadd.f32 %v2187_v11, %v2177_v14  ;;  %v7539_v18 = vpop.f32.mrb[2].mxu0  ;;  %v2196_v14 = vld [vmem:[%s8378_s19 + $0x48] sm:$0xff] }
 0x17a   : > { %v2209_v20 = vmin.f32 %v2198_v15, 0.0  ;;  %v2180_v21 = vadd.f32 %v7539_v18, %v2170_v8  ;;  %v2051_v22 = vpop.f32.mrb[3].mxu0 }
 0x17b   : > { %v2208_v25 = vmin.f32 %v2197_v17, 0.0  ;;  %v2179_v26 = vadd.f32 %v2169_v12, %v2051_v22 }
 0x17c   : > { %v2225_v28 = vmul.f32 %v8674_v16, %v2209_v20  ;;  %v2200_v29 = vadd.f32 %v2190_v19, %v2180_v21 }
 0x17d   : > { %v2224_v32 = vmul.f32 %v8674_v16, %v2208_v25  ;;  %v2199_v33 = vadd.f32 %v2189_v23, %v2179_v26  ;;  %v7542_v35 = vpop.f32.mrb[4].mxu0 }
 0x17e   : > { %v2235_v37 = vsub.f32 %v2198_v15, %v2225_v28  ;;  %v2211_v38 = vmin.f32 %v2200_v29, 0.0  ;;  %v2182_v39 = vadd.f32 %v7542_v35, %v2172_v27  ;;  %v2061_v40 = vpop.f32.mrb[5].mxu0 }
 0x17f   : > { %v2234_v43 = vsub.f32 %v2197_v17, %v2224_v32  ;;  %v2210_v44 = vmin.f32 %v2199_v33, 0.0  ;;  %v2181_v45 = vadd.f32 %v2171_v30, %v2061_v40 }
 0x180   : > { %v2916_v47 = vsel %vm2281_vm5, %v2235_v37, 0.0  ;;  %v2227_v48 = vmul.f32 %v8674_v16, %v2211_v38  ;;  %v2202_v49 = vadd.f32 %v2192_v36, %v2182_v39 }
 0x181   : > { %v2244_v51 = vpack.c.bf16 %v2235_v37, %v2234_v43  ;;  %v2915_v52 = vsel %vm2281_vm5, %v2234_v43, 0.0  ;;  %v2226_v53 = vmul.f32 %v8674_v16, %v2210_v44  ;;  %v2201_v54 = vadd.f32 %v2191_v41, %v2181_v45  ;;  %v7545_v55 = vpop.f32.mrb[6].mxu0 }
 0x182   : > { %v2917_v57 = vadd.f32 %v2916_v47, %v2915_v52  ;;  %v2237_v58 = vsub.f32 %v2200_v29, %v2227_v48  ;;  %v2213_v59 = vmin.f32 %v2202_v49, 0.0  ;;  %v2184_v60 = vadd.f32 %v7545_v55, %v2174_v46  ;;  %v2071_v61 = vpop.f32.mrb[7].mxu0 }
 0x183   : > { %v2236_v1 = vsub.f32 %v2199_v33, %v2226_v53  ;;  %v2212_v3 = vmin.f32 %v2201_v54, 0.0  ;;  %v2183_v4 = vadd.f32 %v2173_v42, %v2071_v61  ;;  %7558 = vmatmul.mubr.msk.bf16.vlgmr.msra.gmra.mrb[0].mxu1 %vm2281_vm5, %v2244_v51 }
 0x184   : > { %v2229_v7 = vmul.f32 %v8674_v16, %v2213_v59  ;;  %v2204_v8 = vadd.f32 %v2194_v56, %v2184_v60  ;;  %7561 = vmatprep.mubr.msk.bf16.mxu1 %vm8285_vm4, %v10751_v34  ;;  %v2920_v21 = vsel %vm2281_vm5, %v2237_v58, 0.0 }
 0x185   : > { %v2245_v9 = vpack.c.bf16 %v2237_v58, %v2236_v1  ;;  %v2918_v10 = vsel %vm2281_vm5, %v2236_v1, 0.0  ;;  %v2228_v11 = vmul.f32 %v8674_v16, %v2212_v3  ;;  %v2203_v12 = vadd.f32 %v2193_v62, %v2183_v4  ;;  %v7548_v13 = vpop.f32.mrb[8].mxu0 }
 0x186   : > { %v2919_v15 = vadd.f32 %v2918_v10, %v2917_v57  ;;  %v2239_v17 = vsub.f32 %v2202_v49, %v2229_v7  ;;  %v2215_v18 = vmin.f32 %v2204_v8, 0.0  ;;  %v2186_v19 = vadd.f32 %v7548_v13, %v2176_v6  ;;  %v2081_v20 = vpop.f32.mrb[9].mxu0 }
 0x187   : > { %v2238_v22 = vsub.f32 %v2201_v54, %v2228_v11  ;;  %v2214_v23 = vmin.f32 %v2203_v12, 0.0  ;;  %v2185_v24 = vadd.f32 %v2175_v5, %v2081_v20  ;;  %v8753_v20 = vld [vmem:[%s8729_s0 + $0x10] sm:$0xff]  }
 0x188   : > { %v2921_v25 = vadd.f32 %v2920_v21, %v2919_v15  ;;  %v2231_v26 = vmul.f32 %v8674_v16, %v2215_v18  ;;  %v2206_v27 = vadd.f32 %v2196_v14, %v2186_v19  ;;  %v2924_v36 = vsel %vm2281_vm5, %v2239_v17, 0.0  ;;  %v8738_v18 = vld [vmem:[%s8729_s0] sm:$0xff]   ;;  %v8746_v19 = vld [vmem:[%s8729_s0 + $0x8] sm:$0xff]  }
 0x189   : > { %v2246_v28 = vpack.c.bf16 %v2239_v17, %v2238_v22  ;;  %v2922_v29 = vsel %vm2281_vm5, %v2238_v22, 0.0  ;;  %v2230_v30 = vmul.f32 %v8674_v16, %v2214_v23  ;;  %v2205_v31 = vadd.f32 %v2195_v0, %v2185_v24  ;;  %v8760_v0 = vld [vmem:[%s8729_s0 + $0x18] sm:$0xff]   ;;  %v8767_v21 = vld [vmem:[%s8729_s0 + $0x20] sm:$0xff]   ;;  %v8216_v22 = vld [vmem:[%s10794_s10 + $0x8] sm:$0xff]  }
 0x18a   : > { %v2923_v32 = vadd.f32 %v2922_v29, %v2921_v25  ;;  %v2241_v33 = vsub.f32 %v2204_v8, %v2231_v26  ;;  %v2217_v35 = vmin.f32 %v2206_v27, 0.0  ;;  %v8776_v23 = vld [vmem:[%s10795_s22] ss:$0 sm:$0xff]  ;;  %s10802_s22 = sld [smem:[#allocation9_spill]] }
 0x18b   : > { %v2240_v37 = vsub.f32 %v2203_v12, %v2230_v30  ;;  %v2216_v38 = vmin.f32 %v2205_v31, 0.0  ;;  %7562 = vmatmul.mubr.msk.bf16.gmra.mrb[4].mxu1 %vm2281_vm5, %v2245_v9 }
 0x18c   : > { %v2925_v39 = vadd.f32 %v2924_v36, %v2923_v32  ;;  %v2233_v40 = vmul.f32 %v8674_v16, %v2217_v35  ;;  %7565 = vmatprep.mubr.msk.bf16.mxu1 %vm8285_vm4, %v10751_v34  ;;  %v2928_v46 = vsel %vm2281_vm5, %v2241_v33, 0.0 }
 0x18d   : > { %v2247_v41 = vpack.c.bf16 %v2241_v33, %v2240_v37  ;;  %v2926_v42 = vsel %vm2281_vm5, %v2240_v37, 0.0  ;;  %v2232_v43 = vmul.f32 %v8674_v16, %v2216_v38  ;;  %v8215_v16 = vld [vmem:[%s10794_s10] sm:$0xff]  }
 0x18e   : > { %v2927_v44 = vadd.f32 %v2926_v42, %v2925_v39  ;;  %v2243_v45 = vsub.f32 %v2206_v27, %v2233_v40  ;;  %7608 = vmatpush3.bf16.msra.mxu0 %v8215_v16 }
 0x18f   : > { %v2242_v47 = vsub.f32 %v2205_v31, %v2232_v43  ;;  %7609 = vmatprep.subr.bf16.mxu0 %v10751_v34 }
 0x190   : > { %v2929_v48 = vadd.f32 %v2928_v46, %v2927_v44  ;;  %v2932_v52 = vsel %vm2281_vm5, %v2243_v45, 0.0 }
 0x191   : > { %v2248_v49 = vpack.c.bf16 %v2243_v45, %v2242_v47  ;;  %v2930_v50 = vsel %vm2281_vm5, %v2242_v47, 0.0 }
 0x192   : > { %v2931_v51 = vadd.f32 %v2930_v50, %v2929_v48  ;;  %7610 = vmatpush3.bf16.msra.mxu0 %v8216_v22 }
 0x193   : > { %7566 = vmatmul.mubr.msk.bf16.gmra.mrb[8].mxu1 %vm2281_vm5, %v2246_v28  ;;  %7661 = vmatprep.subr.bf16.mxu0 %v10751_v34 }
 0x194   : > { %v8717_v53 = vadd.f32 %v2932_v52, %v2931_v51  ;;  %7569 = vmatprep.mubr.msk.bf16.mxu1 %vm8285_vm4, %v10751_v34 }
 0x19b   : > { %7570 = vmatmul.mubr.msk.bf16.gmra.mrb[12].mxu1 %vm2281_vm5, %v2247_v41 }
 0x19c   : > { %7573 = vmatprep.mubr.msk.bf16.mxu1 %vm8285_vm4, %v10751_v34 }
 0x1a3   : > { %7574 = vmatmul.mubr.msk.bf16.gmra.mrb[16].mxu1 %vm2281_vm5, %v2248_v49 }
 0x1a4   : > { %7587 = vmatprep.mubr.msk.bf16.mxu1 %vm8285_vm4, %v10751_v34 }
 0x256   : > { %v2331_v54 = vpop.f32.mrb[0].mxu1 }
 0x257   : > { %v7559_v55 = vpop.f32.mrb[1].mxu1 }
 0x258   : > { %v2334_v56 = vpop.f32.mrb[2].mxu1 }
 0x259   : > { %v2370_v57 = vpack.c.bf16 %v2334_v56, %v2331_v54  ;;  %v7560_v58 = vpop.f32.mrb[3].mxu1 }
 0x25b   : > { %7578 = vmatpush3.bf16.msra.mxu1 %v2370_v57 }
 0x25c   : > { %7579 = vmatprep.subr.bf16.mxu1 %v10751_v34 }
 0x25e   : > { %v2339_v59 = vpop.f32.mrb[4].mxu1 }
 0x25f   : > { %v7563_v60 = vpop.f32.mrb[5].mxu1 }
 0x260   : > { %v2342_v61 = vpop.f32.mrb[6].mxu1 }
 0x261   : > { %v2371_v62 = vpack.c.bf16 %v2342_v61, %v2339_v59  ;;  %v7564_v63 = vpop.f32.mrb[7].mxu1 }
 0x263   : > { %7580 = vmatpush3.bf16.msra.mxu1 %v2371_v62 }
 0x264   : > { %7581 = vmatprep.subr.bf16.mxu1 %v10751_v34 }
 0x266   : > { %v2347_v1 = vpop.f32.mrb[8].mxu1 }
 0x267   : > { %v7567_v3 = vpop.f32.mrb[9].mxu1 }
 0x268   : > { %v2350_v4 = vpop.f32.mrb[10].mxu1 }
 0x269   : > { %v2372_v5 = vpack.c.bf16 %v2350_v4, %v2347_v1  ;;  %v7568_v6 = vpop.f32.mrb[11].mxu1 }
 0x26b   : > { %7582 = vmatpush3.bf16.msra.mxu1 %v2372_v5 }
 0x26c   : > { %7583 = vmatprep.subr.bf16.mxu1 %v10751_v34 }
 0x26e   : > { %v2355_v7 = vpop.f32.mrb[12].mxu1 }
 0x26f   : > { %v7571_v8 = vpop.f32.mrb[13].mxu1 }
 0x270   : > { %v2358_v9 = vpop.f32.mrb[14].mxu1 }
 0x271   : > { %v2373_v10 = vpack.c.bf16 %v2358_v9, %v2355_v7  ;;  %v7572_v11 = vpop.f32.mrb[15].mxu1 }
 0x273   : > { %7584 = vmatpush3.bf16.msra.mxu1 %v2373_v10 }
 0x274   : > { %7585 = vmatprep.subr.bf16.mxu1 %v10751_v34 }
 0x276   : > { %v2363_v12 = vpop.f32.mrb[16].mxu1 }
 0x277   : > { %v7575_v13 = vpop.f32.mrb[17].mxu1 }
 0x278   : > { %v2366_v14 = vpop.f32.mrb[18].mxu1 }
 0x279   : > { %v2374_v15 = vpack.c.bf16 %v2366_v14, %v2363_v12  ;;  %v7576_v17 = vpop.f32.mrb[19].mxu1 }
 0x27b   : > { %7586 = vmatpush3.bf16.msra.mxu1 %v2374_v15 }
 0x27c   : > { %7631 = vmatprep.subr.bf16.mxu1 %v10751_v34 }
 0x27e   : > { %7588 = vmatmul.mubr.msk.bf16.vlgmr.msra.gmra.mrb[20].mxu1 %vm2407_vm6, %v8738_v18 }
 0x27f   : > { %7591 = vmatprep.mubr.msk.bf16.mxu1 %vm8285_vm4, %v10751_v34 }
 0x286   : > { %7592 = vmatmul.mubr.msk.bf16.gmra.mrb[24].mxu1 %vm2407_vm6, %v8746_v19 }
 0x287   : > { %7595 = vmatprep.mubr.msk.bf16.mxu1 %vm8285_vm4, %v10751_v34 }
 0x28e   : > { %7596 = vmatmul.mubr.msk.bf16.gmra.mrb[28].mxu1 %vm2407_vm6, %v8753_v20 }
 0x28f   : > { %7599 = vmatprep.mubr.msk.bf16.mxu1 %vm8285_vm4, %v10751_v34 }
 0x296   : > { %7600 = vmatmul.mubr.msk.bf16.gmra.mrb[32].mxu1 %vm2407_vm6, %v8760_v0 }
 0x297   : > { %7603 = vmatprep.mubr.msk.bf16.mxu1 %vm8285_vm4, %v10751_v34 }
 0x29e   : > { %7604 = vmatmul.mubr.msk.bf16.gmra.mrb[36].mxu1 %vm2407_vm6, %v8767_v21 }
 0x29f   : > { %7641 = vmatprep.mubr.msk.bf16.mxu1 %vm8285_vm4, %v10751_v34 }
 0x351   : > { %v2457_v24 = vpop.f32.mrb[20].mxu1 }
 0x352   : > { %v2458_v25 = vadd.f32 %v8776_v23, %v2457_v24  ;;  %v7589_v26 = vpop.f32.mrb[21].mxu1 }
 0x353   : > { %v2460_v27 = vpop.f32.mrb[22].mxu1 }
 0x354   : > { %v2496_v28 = vmax.f32 %v2458_v25, 0.0  ;;  %v2461_v29 = vadd.f32 %v8776_v23, %v2460_v27  ;;  %v7590_v30 = vpop.f32.mrb[23].mxu1 }
 0x356   : > { %v2497_v31 = vmax.f32 %v2461_v29, 0.0  ;;  %v2941_v32 = vsel %vm2527_vm7, %v2496_v28, 0.0 }
 0x358   : > { %v2506_v33 = vpack.c.bf16 %v2497_v31, %v2496_v28  ;;  %v2942_v35 = vsel %vm2527_vm7, %v2497_v31, 0.0 }
 0x359   : > { %v2943_v36 = vadd.f32 %v2942_v35, %v2941_v32  ;;  %v2465_v37 = vpop.f32.mrb[24].mxu1  ;;  %v8218_v35 = vld [vmem:[%s10796_s23 + $0x8] sm:$0xff]  }
 0x35a   : > { %v2466_v38 = vadd.f32 %v8776_v23, %v2465_v37  ;;  %v7593_v39 = vpop.f32.mrb[25].mxu1  ;;  %7612 = vmatmul.mubr.msk.bf16.vlgmr.msra.gmra.mrb[12].mxu0 %vm2527_vm7, %v2506_v33  ;;  %v8217_v33 = vld [vmem:[%s10796_s23] sm:$0xff]  }
 0x35b   : > { %v2468_v40 = vpop.f32.mrb[26].mxu1  ;;  %7615 = vmatprep.mubr.msk.bf16.mxu0 %vm8285_vm4, %v10751_v34  ;;  %7662 = vmatpush3.bf16.msra.mxu0 %v8217_v33 }
 0x35c   : > { %v2498_v41 = vmax.f32 %v2466_v38, 0.0  ;;  %v2469_v42 = vadd.f32 %v8776_v23, %v2468_v40  ;;  %v7594_v43 = vpop.f32.mrb[27].mxu1  ;;  %7663 = vmatprep.subr.bf16.mxu0 %v10751_v34 }
 0x35e   : > { %v2944_v44 = vsel %vm2527_vm7, %v2498_v41, 0.0  ;;  %v2499_v45 = vmax.f32 %v2469_v42, 0.0 }
 0x35f   : > { %v2945_v46 = vadd.f32 %v2944_v44, %v2943_v36  ;;  %7664 = vmatpush3.bf16.msra.mxu0 %v8218_v35 }
 0x360   : > { %v2507_v47 = vpack.c.bf16 %v2499_v45, %v2498_v41  ;;  %v2946_v48 = vsel %vm2527_vm7, %v2499_v45, 0.0 }
 0x361   : > { %v2947_v49 = vadd.f32 %v2946_v48, %v2945_v46  ;;  %v2473_v50 = vpop.f32.mrb[28].mxu1 }
 0x362   : > { %v2474_v51 = vadd.f32 %v8776_v23, %v2473_v50  ;;  %v7597_v52 = vpop.f32.mrb[29].mxu1  ;;  %7616 = vmatmul.mubr.msk.bf16.gmra.mrb[16].mxu0 %vm2527_vm7, %v2507_v47 }
 0x363   : > { %v2476_v16 = vpop.f32.mrb[30].mxu1  ;;  %7619 = vmatprep.mubr.msk.bf16.mxu0 %vm8285_vm4, %v10751_v34 }
 0x364   : > { %v2500_v54 = vmax.f32 %v2474_v51, 0.0  ;;  %v2477_v55 = vadd.f32 %v8776_v23, %v2476_v16  ;;  %v7598_v56 = vpop.f32.mrb[31].mxu1 }
 0x366   : > { %v2948_v57 = vsel %vm2527_vm7, %v2500_v54, 0.0  ;;  %v2501_v58 = vmax.f32 %v2477_v55, 0.0 }
 0x367   : > { %v2949_v59 = vadd.f32 %v2948_v57, %v2947_v49 }
 0x368   : > { %v2508_v60 = vpack.c.bf16 %v2501_v58, %v2500_v54  ;;  %v2950_v61 = vsel %vm2527_vm7, %v2501_v58, 0.0 }
 0x369   : > { %v2951_v62 = vadd.f32 %v2950_v61, %v2949_v59  ;;  %v2481_v63 = vpop.f32.mrb[32].mxu1  ;;  %v8845_v61 = vld [vmem:[%s10797_s26] ss:$0 sm:$0xff]  ;;  %s10803_s26 = sld [smem:[#allocation14_spill]] }
 0x36a   : > { %v2482_v1 = vadd.f32 %v8776_v23, %v2481_v63  ;;  %v7601_v3 = vpop.f32.mrb[33].mxu1  ;;  %7620 = vmatmul.mubr.msk.bf16.gmra.mrb[20].mxu0 %vm2527_vm7, %v2508_v60  ;;  %v10749_v60 = vmov 0.0|0.0  }
 0x36b   : > { %v2484_v4 = vpop.f32.mrb[34].mxu1  ;;  %7623 = vmatprep.mubr.msk.bf16.mxu0 %vm8285_vm4, %v10751_v34  ;;  %7952 = vmatprep.subr.bf16.mxu0 %v10749_v60 }
 0x36c   : > { %v2502_v5 = vmax.f32 %v2482_v1, 0.0  ;;  %v2485_v6 = vadd.f32 %v8776_v23, %v2484_v4  ;;  %v7602_v7 = vpop.f32.mrb[35].mxu1 }
 0x36d   : > { %v3027_v7 = vld [vmem:[%s10798_s1] sm:$0xff] }
 0x36e   : > { %v2952_v8 = vsel %vm2527_vm7, %v2502_v5, 0.0  ;;  %v2503_v9 = vmax.f32 %v2485_v6, 0.0 }
 0x36f   : > { %v2953_v10 = vadd.f32 %v2952_v8, %v2951_v62  ;;  %v3028_v8 = vld [vmem:[%s10798_s1 + $0x8] sm:$0xff] }
 0x370   : > { %v2509_v11 = vpack.c.bf16 %v2503_v9, %v2502_v5  ;;  %v2954_v12 = vsel %vm2527_vm7, %v2503_v9, 0.0 }
 0x371   : > { %v2955_v13 = vadd.f32 %v2954_v12, %v2953_v10  ;;  %v2489_v14 = vpop.f32.mrb[36].mxu1  ;;  %v7953_v10 = vpack.c.bf16 %v3028_v8, %v3027_v7 }
 0x372   : > { %v2490_v15 = vadd.f32 %v8776_v23, %v2489_v14  ;;  %v7605_v17 = vpop.f32.mrb[37].mxu1  ;;  %7624 = vmatmul.mubr.msk.bf16.gmra.mrb[24].mxu0 %vm2527_vm7, %v2509_v11  ;;  %v3029_v14 = vld [vmem:[%s10798_s1 + $0x10] sm:$0xff] }
 0x373   : > { %v2492_v22 = vpop.f32.mrb[38].mxu1  ;;  %7627 = vmatprep.mubr.msk.bf16.mxu0 %vm8285_vm4, %v10751_v34 }
 0x374   : > { %v2504_v24 = vmax.f32 %v2490_v15, 0.0  ;;  %v2493_v25 = vadd.f32 %v8776_v23, %v2492_v22  ;;  %v7606_v26 = vpop.f32.mrb[39].mxu1  ;;  %v3030_v15 = vld [vmem:[%s10798_s1 + $0x18] sm:$0xff]  ;;  %s10804_s1 = sld [smem:[#allocation3_spill]] }
 0x376   : > { %v2956_v27 = vsel %vm2527_vm7, %v2504_v24, 0.0  ;;  %v2505_v28 = vmax.f32 %v2493_v25, 0.0 }
 0x377   : > { %v2957_v29 = vadd.f32 %v2956_v27, %v2955_v13  ;;  %v7956_v27 = vpack.c.bf16 %v3030_v15, %v3029_v14 }
 0x378   : > { %v2510_v30 = vpack.c.bf16 %v2505_v28, %v2504_v24  ;;  %v2958_v31 = vsel %vm2527_vm7, %v2505_v28, 0.0 }
 0x379   : > { %v8810_v32 = vadd.f32 %v2958_v31, %v2957_v29 }
 0x37a   : > { %7628 = vmatmul.mubr.msk.bf16.gmra.mrb[28].mxu0 %vm2527_vm7, %v2510_v30 }
 0x37b   : > { %7665 = vmatprep.mubr.msk.bf16.mxu0 %vm8285_vm4, %v10751_v34 }
 0x42d   : > { %v2577_v23 = vpop.f32.mrb[12].mxu0 }
 0x42e   : > { %v7613_v36 = vpop.f32.mrb[13].mxu0 }
 0x42f   : > { %v2580_v37 = vpop.f32.mrb[14].mxu0 }
 0x430   : > { %v2616_v38 = vpack.c.bf16 %v2580_v37, %v2577_v23  ;;  %v7614_v39 = vpop.f32.mrb[15].mxu0 }
 0x432   : > { %7632 = vmatpush3.bf16.msra.mxu1 %v2616_v38 }
 0x433   : > { %7633 = vmatprep.subr.bf16.mxu1 %v10751_v34 }
 0x435   : > { %v2585_v40 = vpop.f32.mrb[16].mxu0 }
 0x436   : > { %v7617_v41 = vpop.f32.mrb[17].mxu0 }
 0x437   : > { %v2588_v42 = vpop.f32.mrb[18].mxu0 }
 0x438   : > { %v2617_v43 = vpack.c.bf16 %v2588_v42, %v2585_v40  ;;  %v7618_v44 = vpop.f32.mrb[19].mxu0 }
 0x43a   : > { %7634 = vmatpush3.bf16.msra.mxu1 %v2617_v43 }
 0x43b   : > { %7635 = vmatprep.subr.bf16.mxu1 %v10751_v34 }
 0x43d   : > { %v2593_v45 = vpop.f32.mrb[20].mxu0 }
 0x43e   : > { %v7621_v46 = vpop.f32.mrb[21].mxu0 }
 0x43f   : > { %v2596_v47 = vpop.f32.mrb[22].mxu0 }
 0x440   : > { %v2618_v48 = vpack.c.bf16 %v2596_v47, %v2593_v45  ;;  %v7622_v49 = vpop.f32.mrb[23].mxu0 }
 0x442   : > { %7636 = vmatpush3.bf16.msra.mxu1 %v2618_v48  ;;  %v2960_v48 = vrot.slane %v8810_v32, 4 }
 0x443   : > { %7637 = vmatprep.subr.bf16.mxu1 %v10751_v34 }
 0x445   : > { %v2601_v50 = vpop.f32.mrb[24].mxu0 }
 0x446   : > { %v7625_v51 = vpop.f32.mrb[25].mxu0 }
 0x447   : > { %v2604_v52 = vpop.f32.mrb[26].mxu0 }
 0x448   : > { %v2619_v16 = vpack.c.bf16 %v2604_v52, %v2601_v50  ;;  %v7626_v54 = vpop.f32.mrb[27].mxu0 }
 0x44a   : > { %7638 = vmatpush3.bf16.msra.mxu1 %v2619_v16 }
 0x44b   : > { %7639 = vmatprep.subr.bf16.mxu1 %v10751_v34 }
 0x44d   : > { %v2609_v55 = vpop.f32.mrb[28].mxu0 }
 0x44e   : > { %v7629_v56 = vpop.f32.mrb[29].mxu0 }
 0x44f   : > { %v2612_v57 = vpop.f32.mrb[30].mxu0  ;;  %v2961_v56 = vadd.f32 %v2960_v48, %v8810_v32 }
 0x450   : > { %v2620_v58 = vpack.c.bf16 %v2612_v57, %v2609_v55  ;;  %v7630_v59 = vpop.f32.mrb[31].mxu0 }
 0x452   : > { %7640 = vmatpush3.bf16.msra.mxu1 %v2620_v58 }
 0x453   : > { %7685 = vmatprep.subr.bf16.mxu1 %v10751_v34 }
 0x455   : > { %7642 = vmatmul.mubr.msk.bf16.vlgmr.msra.gmra.mrb[40].mxu1 %vm2407_vm6, %v8738_v18 }
 0x456   : > { %7645 = vmatprep.mubr.msk.bf16.mxu1 %vm8285_vm4, %v10751_v34 }
 0x45d   : > { %7646 = vmatmul.mubr.msk.bf16.gmra.mrb[44].mxu1 %vm2407_vm6, %v8746_v19 }
 0x45e   : > { %7649 = vmatprep.mubr.msk.bf16.mxu1 %vm8285_vm4, %v10751_v34 }
 0x465   : > { %7650 = vmatmul.mubr.msk.bf16.gmra.mrb[48].mxu1 %vm2407_vm6, %v8753_v20 }
 0x466   : > { %7653 = vmatprep.mubr.msk.bf16.mxu1 %vm8285_vm4, %v10751_v34 }
 0x46d   : > { %7654 = vmatmul.mubr.msk.bf16.gmra.mrb[52].mxu1 %vm2407_vm6, %v8760_v0 }
 0x46e   : > { %7657 = vmatprep.mubr.msk.bf16.mxu1 %vm8285_vm4, %v10751_v34 }
 0x475   : > { %7658 = vmatmul.mubr.msk.bf16.gmra.mrb[56].mxu1 %vm2407_vm6, %v8767_v21 }
 0x476   : > { %7695 = vmatprep.mubr.msk.bf16.mxu1 %vm8285_vm4, %v10751_v34 }
 0x528   : > { %v2662_v62 = vpop.f32.mrb[40].mxu1 }
 0x529   : > { %v2663_v63 = vadd.f32 %v8845_v61, %v2662_v62  ;;  %v7643_v1 = vpop.f32.mrb[41].mxu1 }
 0x52a   : > { %v2665_v3 = vpop.f32.mrb[42].mxu1 }
 0x52b   : > { %v2701_v4 = vmax.f32 %v2663_v63, 0.0  ;;  %v2666_v5 = vadd.f32 %v8845_v61, %v2665_v3  ;;  %v7644_v6 = vpop.f32.mrb[43].mxu1  ;;  %v2962_v3 = vrot.slane %v2961_v56, 2 }
 0x52d   : > { %v2702_v9 = vmax.f32 %v2666_v5, 0.0  ;;  %v2967_v11 = vsel %vm2527_vm7, %v2701_v4, 0.0 }
 0x52f   : > { %v2711_v12 = vpack.c.bf16 %v2702_v9, %v2701_v4  ;;  %v2968_v13 = vsel %vm2527_vm7, %v2702_v9, 0.0 }
 0x530   : > { %v2969_v17 = vadd.f32 %v2968_v13, %v2967_v11  ;;  %v2670_v22 = vpop.f32.mrb[44].mxu1 }
 0x531   : > { %v2671_v24 = vadd.f32 %v8845_v61, %v2670_v22  ;;  %v7647_v25 = vpop.f32.mrb[45].mxu1  ;;  %7666 = vmatmul.mubr.msk.bf16.vlgmr.msra.gmra.mrb[32].mxu0 %vm2527_vm7, %v2711_v12 }
 0x532   : > { %v2673_v26 = vpop.f32.mrb[46].mxu1  ;;  %7669 = vmatprep.mubr.msk.bf16.mxu0 %vm8285_vm4, %v10751_v34  ;;  %7954 = vmatpush3.bf16.msra.mxu0 %v7953_v10  ;;  %v2963_v10 = vadd.f32 %v2962_v3, %v2961_v56 }
 0x533   : > { %v2703_v28 = vmax.f32 %v2671_v24, 0.0  ;;  %v2674_v29 = vadd.f32 %v8845_v61, %v2673_v26  ;;  %v7648_v30 = vpop.f32.mrb[47].mxu1  ;;  %7955 = vmatprep.subr.bf16.mxu0 %v10749_v60 }
 0x534   : > { %v2964_v22 = vrot.slane %v2963_v10, 1 }
 0x535   : > { %v2970_v31 = vsel %vm2527_vm7, %v2703_v28, 0.0  ;;  %v2704_v33 = vmax.f32 %v2674_v29, 0.0  ;;  %v3178_v29 = vld [vmem:[%s10799_s2 + $0x8] sm:$0xff] }
 0x536   : > { %v2971_v35 = vadd.f32 %v2970_v31, %v2969_v17  ;;  %7957 = vmatpush3.bf16.msra.mxu0 %v7956_v27 }
 0x537   : > { %v2712_v23 = vpack.c.bf16 %v2704_v33, %v2703_v28  ;;  %v2972_v36 = vsel %vm2527_vm7, %v2704_v33, 0.0  ;;  %7970 = vmatprep.subr.bf16.mxu0 %v10749_v60  ;;  %v2965_v28 = vadd.f32 %v2964_v22, %v2963_v10  ;;  %v3022_v10 = vld [vmem:[%s10800_s7 + $0x18] sm:$0xff]  ;;  %v3025_v22 = vld [vmem:[%s10800_s7 + $0x30] sm:$0xff] }
 0x538   : > { %v2973_v37 = vadd.f32 %v2972_v36, %v2971_v35  ;;  %v2678_v38 = vpop.f32.mrb[48].mxu1  ;;  %v3180_v36 = vld [vmem:[%s10799_s2 + $0x18] sm:$0xff] }
 0x539   : > { %v2679_v39 = vadd.f32 %v8845_v61, %v2678_v38  ;;  %v7651_v40 = vpop.f32.mrb[49].mxu1  ;;  %7670 = vmatmul.mubr.msk.bf16.gmra.mrb[36].mxu0 %vm2527_vm7, %v2712_v23  ;;  %v2966_v35 = vmul.f32 0.0125, %v2965_v28  ;;  %v3179_v23 = vld [vmem:[%s10799_s2 + $0x10] sm:$0xff] }
 0x53a   : > { %v2681_v41 = vpop.f32.mrb[50].mxu1  ;;  %7673 = vmatprep.mubr.msk.bf16.mxu0 %vm8285_vm4, %v10751_v34 }
 0x53b   : > { %v2705_v42 = vmax.f32 %v2679_v39, 0.0  ;;  %v2682_v43 = vadd.f32 %v8845_v61, %v2681_v41  ;;  %v7652_v44 = vpop.f32.mrb[51].mxu1  ;;  %v7974_v39 = vpack.c.bf16 %v3180_v36, %v3179_v23  ;;  %v6691_v23 = vld [vmem:[%s10802_s22] ss:$0 sm:$0xff]  ;;  %s1428_s22 = scalar_lea.vmem %s8538_s8, %s10989_s16 }
 0x53d   : > { %v2974_v45 = vsel %vm2527_vm7, %v2705_v42, 0.0  ;;  %v2706_v46 = vmax.f32 %v2682_v43, 0.0 }
 0x53e   : > { %v2975_v47 = vadd.f32 %v2974_v45, %v2973_v37 }
 0x53f   : > { %v2713_v49 = vpack.c.bf16 %v2706_v46, %v2705_v42  ;;  %v2976_v50 = vsel %vm2527_vm7, %v2706_v46, 0.0 }
 0x540   : > { %v2977_v51 = vadd.f32 %v2976_v50, %v2975_v47  ;;  %v2686_v52 = vpop.f32.mrb[52].mxu1 }
 0x541   : > { %v2687_v16 = vadd.f32 %v8845_v61, %v2686_v52  ;;  %v7655_v54 = vpop.f32.mrb[53].mxu1  ;;  %7674 = vmatmul.mubr.msk.bf16.gmra.mrb[40].mxu0 %vm2527_vm7, %v2713_v49 }
 0x542   : > { %v2689_v55 = vpop.f32.mrb[54].mxu1  ;;  %7677 = vmatprep.mubr.msk.bf16.mxu0 %vm8285_vm4, %v10751_v34 }
 0x543   : > { %v2707_v57 = vmax.f32 %v2687_v16, 0.0  ;;  %v2690_v58 = vadd.f32 %v8845_v61, %v2689_v55  ;;  %v7656_v59 = vpop.f32.mrb[55].mxu1 }
 0x545   : > { %v2978_v62 = vsel %vm2527_vm7, %v2707_v57, 0.0  ;;  %v2708_v63 = vmax.f32 %v2690_v58, 0.0 }
 0x546   : > { %v2979_v1 = vadd.f32 %v2978_v62, %v2977_v51 }
 0x547   : > { %v2714_v4 = vpack.c.bf16 %v2708_v63, %v2707_v57  ;;  %v2980_v5 = vsel %vm2527_vm7, %v2708_v63, 0.0 }
 0x548   : > { %v2981_v6 = vadd.f32 %v2980_v5, %v2979_v1  ;;  %v2694_v7 = vpop.f32.mrb[56].mxu1  ;;  %v3019_v5 = vld [vmem:[%s10800_s7] sm:$0xff] }
 0x549   : > { %v2695_v8 = vadd.f32 %v8845_v61, %v2694_v7  ;;  %v7659_v9 = vpop.f32.mrb[57].mxu1  ;;  %7678 = vmatmul.mubr.msk.bf16.gmra.mrb[44].mxu0 %vm2527_vm7, %v2714_v4 }
 0x54a   : > { %v2697_v32 = vpop.f32.mrb[58].mxu1  ;;  %7681 = vmatprep.mubr.msk.bf16.mxu0 %vm8285_vm4, %v10751_v34 }
 0x54b   : > { %v2709_v11 = vmax.f32 %v2695_v8, 0.0  ;;  %v2698_v12 = vadd.f32 %v8845_v61, %v2697_v32  ;;  %v7660_v13 = vpop.f32.mrb[59].mxu1  ;;  %v3177_v61 = vld [vmem:[%s10799_s2] sm:$0xff]  ;;  %v3021_v32 = vld [vmem:[%s10800_s7 + $0x10] sm:$0xff] }
 0x54c   : > { %v7971_v33 = vpack.c.bf16 %v3178_v29, %v3177_v61  ;;  %v7962_v13 = vpack.c.bf16 %v3022_v10, %v3021_v32 }
 0x54d   : > { %v2982_v14 = vsel %vm2527_vm7, %v2709_v11, 0.0  ;;  %v2710_v15 = vmax.f32 %v2698_v12, 0.0 }
 0x54e   : > { %v2983_v17 = vadd.f32 %v2982_v14, %v2981_v6  ;;  %v3020_v6 = vld [vmem:[%s10800_s7 + $0x8] sm:$0xff]  ;;  %v3023_v14 = vld [vmem:[%s10800_s7 + $0x20] sm:$0xff] }
 0x54f   : > { %v2715_v24 = vpack.c.bf16 %v2710_v15, %v2709_v11  ;;  %v2984_v25 = vsel %vm2527_vm7, %v2710_v15, 0.0  ;;  %v7959_v9 = vpack.c.bf16 %v3020_v6, %v3019_v5  ;;  %v3024_v15 = vld [vmem:[%s10800_s7 + $0x28] sm:$0xff] }
 0x550   : > { %v2985_v26 = vadd.f32 %v2984_v25, %v2983_v17  ;;  %v7965_v17 = vpack.c.bf16 %v3024_v15, %v3023_v14 }
 0x551   : > { %7682 = vmatmul.mubr.msk.bf16.gmra.mrb[48].mxu0 %vm2527_vm7, %v2715_v24  ;;  %v3026_v24 = vld [vmem:[%s10800_s7 + $0x38] sm:$0xff] }
 0x552   : > { %v2986_v27 = vrot.slane %v2985_v26, 4  ;;  %7723 = vmatprep.mubr.msk.f32.mxu0 %vm8285_vm4, %v10751_v34 }
 0x554   : > { %v2987_v30 = vadd.f32 %v2986_v27, %v2985_v26  ;;  %v7968_v26 = vpack.c.bf16 %v3026_v24, %v3025_v22  ;;  %v2934_v27 = vrot.slane %v8717_v53, 4 }
 0x556   : > { %v2988_v31 = vrot.slane %v2987_v30, 2 }
 0x558   : > { %v2989_v37 = vadd.f32 %v2988_v31, %v2987_v30  ;;  %v3256_v30 = vld [vmem:[%s10801_s11 + $0x8] sm:$0xff] }
 0x559   : > { %7724 = vmatmul.mubr.msk.f32.vlgmr.msra.gmra.mrb[10].mxu0 %vm2527_vm7, %v2966_v35  ;;  %v3258_v35 = vld [vmem:[%s10801_s11 + $0x18] sm:$0xff] }
 0x55a   : > { %v2990_v38 = vrot.slane %v2989_v37, 1  ;;  %7972 = vmatpush3.bf16.msra.mxu0 %v7971_v33  ;;  %7753 = vmatprep.mubr.msk.f32.mxu0 %vm8285_vm4, %v10751_v34  ;;  %v3257_v33 = vld [vmem:[%s10801_s11 + $0x10] sm:$0xff] }
 0x55b   : > { %7973 = vmatprep.subr.bf16.mxu0 %v10749_v60 }
 0x55c   : > { %v2991_v40 = vadd.f32 %v2990_v38, %v2989_v37 }
 0x55e   : > { %v2992_v41 = vmul.f32 0.0125, %v2991_v40  ;;  %7975 = vmatpush3.bf16.msra.mxu0 %v7974_v39 }
 0x55f   : > { %7976 = vmatprep.subr.bf16.mxu0 %v10749_v60 }
 0x561   : > { %7754 = vmatmul.mubr.msk.f32.vlgmr.msra.gmra.mrb[52].mxu0 %vm2527_vm7, %v2992_v41 }
 0x562   : > { %7764 = vmatprep.mubr.msk.f32.mxu0 %vm8285_vm4, %v10751_v34 }
 0x604   : > { %v2781_v42 = vpop.f32.mrb[32].mxu0 }
 0x605   : > { %v7667_v43 = vpop.f32.mrb[33].mxu0 }
 0x606   : > { %v2784_v44 = vpop.f32.mrb[34].mxu0 }
 0x607   : > { %v2820_v45 = vpack.c.bf16 %v2784_v44, %v2781_v42  ;;  %v7668_v46 = vpop.f32.mrb[35].mxu0 }
 0x609   : > { %7686 = vmatpush3.bf16.msra.mxu1 %v2820_v45 }
 0x60a   : > { %7687 = vmatprep.subr.bf16.mxu1 %v10751_v34 }
 0x60c   : > { %v2789_v47 = vpop.f32.mrb[36].mxu0 }
 0x60d   : > { %v7671_v48 = vpop.f32.mrb[37].mxu0 }
 0x60e   : > { %v2792_v49 = vpop.f32.mrb[38].mxu0 }
 0x60f   : > { %v2821_v50 = vpack.c.bf16 %v2792_v49, %v2789_v47  ;;  %v7672_v51 = vpop.f32.mrb[39].mxu0 }
 0x611   : > { %7688 = vmatpush3.bf16.msra.mxu1 %v2821_v50 }
 0x612   : > { %7689 = vmatprep.subr.bf16.mxu1 %v10751_v34 }
 0x614   : > { %v2797_v52 = vpop.f32.mrb[40].mxu0 }
 0x615   : > { %v7675_v16 = vpop.f32.mrb[41].mxu0 }
 0x616   : > { %v2800_v54 = vpop.f32.mrb[42].mxu0 }
 0x617   : > { %v2822_v55 = vpack.c.bf16 %v2800_v54, %v2797_v52  ;;  %v7676_v56 = vpop.f32.mrb[43].mxu0 }
 0x619   : > { %7690 = vmatpush3.bf16.msra.mxu1 %v2822_v55 }
 0x61a   : > { %7691 = vmatprep.subr.bf16.mxu1 %v10751_v34 }
 0x61c   : > { %v2805_v57 = vpop.f32.mrb[44].mxu0 }
 0x61d   : > { %v7679_v58 = vpop.f32.mrb[45].mxu0 }
 0x61e   : > { %v2808_v59 = vpop.f32.mrb[46].mxu0 }
 0x61f   : > { %v2823_v62 = vpack.c.bf16 %v2808_v59, %v2805_v57  ;;  %v7680_v63 = vpop.f32.mrb[47].mxu0 }
 0x621   : > { %7692 = vmatpush3.bf16.msra.mxu1 %v2823_v62 }
 0x622   : > { %7693 = vmatprep.subr.bf16.mxu1 %v10751_v34 }
 0x624   : > { %v2813_v1 = vpop.f32.mrb[48].mxu0 }
 0x625   : > { %v7683_v3 = vpop.f32.mrb[49].mxu0 }
 0x626   : > { %v2816_v4 = vpop.f32.mrb[50].mxu0 }
 0x627   : > { %v2824_v7 = vpack.c.bf16 %v2816_v4, %v2813_v1  ;;  %v7684_v8 = vpop.f32.mrb[51].mxu0 }
 0x629   : > { %7694 = vmatpush3.bf16.msra.mxu1 %v2824_v7 }
 0x62a   : > { %7958 = vmatprep.subr.bf16.mxu1 %v10749_v60 }
 0x62c   : > { %7696 = vmatmul.mubr.msk.bf16.vlgmr.msra.gmra.mrb[60].mxu1 %vm2407_vm6, %v8738_v18  ;;  %v8913_v11 = vpop.f32.mrb[10].mxu0 }
 0x62d   : > { %v7725_v12 = vpop.f32.mrb[11].mxu0  ;;  %7699 = vmatprep.mubr.msk.bf16.mxu1 %vm8285_vm4, %v10751_v34  ;;  %7960 = vmatpush3.bf16.msra.mxu1 %v7959_v9 }
 0x62e   : > { %7961 = vmatprep.subr.bf16.mxu1 %v10749_v60 }
 0x631   : > { %7963 = vmatpush3.bf16.msra.mxu1 %v7962_v13 }
 0x632   : > { %7964 = vmatprep.subr.bf16.mxu1 %v10749_v60 }
 0x634   : > { %v8923_v25 = vpop.f32.mrb[52].mxu0  ;;  %7700 = vmatmul.mubr.msk.bf16.gmra.mrb[64].mxu1 %vm2407_vm6, %v8746_v19  ;;  %v2935_v19 = vadd.f32 %v2934_v27, %v8717_v53 }
 0x635   : > { %v7755_v18 = vpop.f32.mrb[53].mxu0  ;;  %7703 = vmatprep.mubr.msk.bf16.mxu1 %vm8285_vm4, %v10751_v34  ;;  %7966 = vmatpush3.bf16.msra.mxu1 %v7965_v17 }
 0x636   : > { %7967 = vmatprep.subr.bf16.mxu1 %v10749_v60  ;;  %v2936_v28 = vrot.slane %v2935_v19, 2 }
 0x638   : > { %v2937_v61 = vadd.f32 %v2936_v28, %v2935_v19 }
 0x639   : > { %7969 = vmatpush3.bf16.msra.mxu1 %v7968_v26 }
 0x63a   : > { %7767 = vmatprep.subr.bf16.mxu1 %v10751_v34  ;;  %v2938_v29 = vrot.slane %v2937_v61, 1 }
 0x63c   : > { %7704 = vmatmul.mubr.msk.bf16.gmra.mrb[68].mxu1 %vm2407_vm6, %v8753_v20  ;;  %v2939_v20 = vadd.f32 %v2938_v29, %v2937_v61 }
 0x63d   : > { %7707 = vmatprep.mubr.msk.bf16.mxu1 %vm8285_vm4, %v10751_v34 }
 0x63e   : > { %v2940_v53 = vmul.f32 0.0125, %v2939_v20 }
 0x644   : > { %7708 = vmatmul.mubr.msk.bf16.gmra.mrb[72].mxu1 %vm2407_vm6, %v8760_v0  ;;  %v3255_v0 = vld [vmem:[%s10801_s11] sm:$0xff] }
 0x645   : > { %7711 = vmatprep.mubr.msk.bf16.mxu1 %vm8285_vm4, %v10751_v34  ;;  %v7977_v31 = vpack.c.bf16 %v3256_v30, %v3255_v0 }
 0x647   : > { %7978 = vmatpush3.bf16.msra.mxu0 %v7977_v31 }
 0x648   : > { %7979 = vmatprep.subr.bf16.mxu0 %v10749_v60 }
 0x64c   : > { %7712 = vmatmul.mubr.msk.bf16.gmra.mrb[76].mxu1 %vm2407_vm6, %v8767_v21  ;;  %v7980_v21 = vpack.c.bf16 %v3258_v35, %v3257_v33 }
 0x64d   : > { %7742 = vmatprep.mubr.msk.f32.mxu1 %vm8285_vm4, %v10751_v34 }
 0x64e   : > { %7981 = vmatpush3.bf16.msra.mxu0 %v7980_v21 }
 0x64f   : > { %7791 = vmatprep.subr.bf16.mxu0 %v10751_v34 }
 0x654   : > { %7743 = vmatmul.mubr.msk.f32.vlgmr.msra.gmra.mrb[80].mxu1 %vm2281_vm5, %v2940_v53 }
 0x655   : > { %7771 = vmatprep.mubr.msk.bf16.mxu1 %vm8285_vm4, %v10751_v34 }
 0x6ff   : > { %v2866_v36 = vpop.f32.mrb[60].mxu1 }
 0x700   : > { %v2867_v37 = vadd.f32 %v6691_v23, %v2866_v36  ;;  %v7697_v38 = vpop.f32.mrb[61].mxu1 }
 0x701   : > { %v2869_v39 = vpop.f32.mrb[62].mxu1 }
 0x702   : > { %v2905_v40 = vmax.f32 %v2867_v37, 0.0  ;;  %v2870_v41 = vadd.f32 %v6691_v23, %v2869_v39  ;;  %v7698_v42 = vpop.f32.mrb[63].mxu1 }
 0x704   : > { %v2906_v43 = vmax.f32 %v2870_v41, 0.0  ;;  %v2993_v44 = vsel %vm2527_vm7, %v2905_v40, 0.0 }
 0x706   : > { %v2994_v45 = vsel %vm2527_vm7, %v2906_v43, 0.0 }
 0x707   : > { %v2995_v46 = vadd.f32 %v2994_v45, %v2993_v44  ;;  %v2874_v47 = vpop.f32.mrb[64].mxu1 }
 0x708   : > { %v2875_v48 = vadd.f32 %v6691_v23, %v2874_v47  ;;  %v7701_v49 = vpop.f32.mrb[65].mxu1  ;;  %v8287_v47 = vmov 1  }
 0x709   : > { %v2877_v50 = vpop.f32.mrb[66].mxu1  ;;  %8154 = vset.pattern.permute.xlu1 %v8287_v47 }
 0x70a   : > { %v2907_v51 = vmax.f32 %v2875_v48, 0.0  ;;  %v2878_v52 = vadd.f32 %v6691_v23, %v2877_v50  ;;  %v7702_v16 = vpop.f32.mrb[67].mxu1  ;;  %v3333_v48 = vld [vmem:[%s10803_s26] sm:$0x1]  ;;  %s1413_s26 = scalar_lea.vmem %s10804_s1, %s10989_s16  ;;  %s10806_s1 = sld [smem:[#allocation4_spill]] }
 0x70c   : > { %v2996_v54 = vsel %vm2527_vm7, %v2907_v51, 0.0  ;;  %v2908_v55 = vmax.f32 %v2878_v52, 0.0 }
 0x70d   : > { %v2997_v56 = vadd.f32 %v2996_v54, %v2995_v46  ;;  %v8288_v54 = vmov 1966171168  }
 0x70e   : > { %v2998_v57 = vsel %vm2527_vm7, %v2908_v55, 0.0  ;;  %v3342_v55 = vunpack.c.l.s4 %v8288_v54 }
 0x70f   : > { %v2999_v58 = vadd.f32 %v2998_v57, %v2997_v56  ;;  %v2882_v59 = vpop.f32.mrb[68].mxu1  ;;  %v3344_v56 = vlaneseq }
 0x710   : > { %v2883_v62 = vadd.f32 %v6691_v23, %v2882_v59  ;;  %v7705_v63 = vpop.f32.mrb[69].mxu1  ;;  %v3343_v57 = vunpack.c.0.s8 %v3342_v55  ;;  %v8289_v59 = vmov 3  }
 0x711   : > { %v2885_v1 = vpop.f32.mrb[70].mxu1 }
 0x712   : > { %v2909_v3 = vmax.f32 %v2883_v62, 0.0  ;;  %v2886_v4 = vadd.f32 %v6691_v23, %v2885_v1  ;;  %v7706_v5 = vpop.f32.mrb[71].mxu1  ;;  %v8290_v62 = vmov 2  }
 0x713   : > { %8155 = vset.pattern.permute.xlu0 %v8290_v62  ;;  %v3336_v5 = vld [vmem:[%s1413_s26] sm:$0x1]  ;;  %s10865_s26 = sld [smem:[#allocation18_spill]] }
 0x714   : > { %v3000_v6 = vsel %vm2527_vm7, %v2909_v3, 0.0  ;;  %v2910_v7 = vmax.f32 %v2886_v4, 0.0 }
 0x715   : > { %v3001_v8 = vadd.f32 %v3000_v6, %v2999_v58  ;;  %v8977_v58 = vshrl.u32 %v3344_v56, 7 }
 0x716   : > { %v3002_v9 = vsel %vm2527_vm7, %v2910_v7, 0.0 }
 0x717   : > { %v3003_v32 = vadd.f32 %v3002_v9, %v3001_v8  ;;  %v2890_v10 = vpop.f32.mrb[72].mxu1  ;;  %10805 = vst [vmem:[#allocation27_spill] sm:$0xff] %v8977_v58  ;;  %v3346_v63 = vsub.s32 %v3343_v57, %v8977_v58  ;;  %v10748_v7 = vsub.s32 0, %v8977_v58 }
 0x718   : > { %v2891_v12 = vadd.f32 %v6691_v23, %v2890_v10  ;;  %v7709_v13 = vpop.f32.mrb[73].mxu1  ;;  %v8292_v10 = vmov 4  }
 0x719   : > { %v2893_v14 = vpop.f32.mrb[74].mxu1  ;;  %v8294_v13 = vmov 10  }
 0x71a   : > { %v2911_v15 = vmax.f32 %v2891_v12, 0.0  ;;  %v2894_v17 = vadd.f32 %v6691_v23, %v2893_v14  ;;  %v7710_v22 = vpop.f32.mrb[75].mxu1  ;;  %v8293_v12 = vmov 7   ;;  %v8295_v14 = vmov 5  }
 0x71b   : > { %v10755_v22 = vmov 16  }
 0x71c   : > { %v3004_v24 = vsel %vm2527_vm7, %v2911_v15, 0.0  ;;  %v2912_v18 = vmax.f32 %v2894_v17, 0.0  ;;  %v10757_v15 = vmov 13   ;;  %v8297_v17 = vmov 6  }
 0x71d   : > { %v3005_v26 = vadd.f32 %v3004_v24, %v3003_v32  ;;  %v8299_v24 = vmov 8  }
 0x71e   : > { %v3006_v27 = vsel %vm2527_vm7, %v2912_v18, 0.0  ;;  %v10753_v18 = vmov 19  }
 0x71f   : > { %v3007_v19 = vadd.f32 %v3006_v27, %v3005_v26  ;;  %v2898_v28 = vpop.f32.mrb[76].mxu1  ;;  %v8301_v26 = vmov 9   ;;  %v8302_v27 = vmov 22  }
 0x720   : > { %v2899_v61 = vadd.f32 %v6691_v23, %v2898_v28  ;;  %v7713_v29 = vpop.f32.mrb[77].mxu1  ;;  %v8304_v28 = vmov 25  }
 0x721   : > { %v2901_v20 = vpop.f32.mrb[78].mxu1  ;;  %v8306_v29 = vmov 28  }
 0x722   : > { %v2913_v53 = vmax.f32 %v2899_v61, 0.0  ;;  %v2902_v0 = vadd.f32 %v6691_v23, %v2901_v20  ;;  %v7714_v30 = vpop.f32.mrb[79].mxu1  ;;  %v10758_v61 = vmov 12   ;;  %v8307_v20 = vmov 14  }
 0x723   : > { %v8310_v30 = vmov 17  }
 0x724   : > { %v3008_v31 = vsel %vm2527_vm7, %v2913_v53, 0.0  ;;  %v2914_v33 = vmax.f32 %v2902_v0, 0.0  ;;  %v8308_v53 = vmov 31   ;;  %v10756_v0 = vmov 15  }
 0x725   : > { %v3009_v35 = vadd.f32 %v3008_v31, %v3007_v19  ;;  %v8303_v19 = vmov 11   ;;  %v10754_v31 = vmov 18  }
 0x726   : > { %v3010_v21 = vsel %vm2527_vm7, %v2914_v33, 0.0  ;;  %v8312_v33 = vmov 20  }
 0x727   : > { %v3011_v36 = vadd.f32 %v3010_v21, %v3009_v35  ;;  %v3173_v37 = vpop.f32.mrb[80].mxu1  ;;  %v8313_v35 = vmov 21   ;;  %v8314_v21 = vmov 23  }
 0x728   : > { %v3174_v38 = vadd.f32 %v3173_v37, %v8913_v11  ;;  %v7744_v39 = vpop.f32.mrb[81].mxu1  ;;  %v8971_v11 = vld [vmem:[%s8615_s28] ss:$0 sm:$0xff]  ;;  %s8291_s28 = smov 96   ;;  %v8315_v37 = vmov 24  }
 0x729   : > { %v3012_v40 = vrot.slane %v3011_v36, 4  ;;  %4547 = vperm.xlu1 %8154, %v8971_v11   ;;  %v8317_v39 = vmov 27  }
 0x72a   : > { %v3254_v41 = vadd.f32 %v8923_v25, %v3174_v38  ;;  %v8316_v38 = vmov 26  }
 0x72b   : > { %v3013_v42 = vadd.f32 %v3012_v40, %v3011_v36  ;;  %v8318_v40 = vmov 29  }
 0x72d   : > { %v3014_v23 = vrot.slane %v3013_v42, 2  ;;  %8156 = vset.pattern.permute.xlu1 %v8289_v59 }
 0x72e   : > { %4617 = vperm.xlu1 %8156, %v8971_v11  }
 0x72f   : > { %v3015_v43 = vadd.f32 %v3014_v23, %v3013_v42 }
 0x731   : > { %v3016_v44 = vrot.slane %v3015_v43, 1 }
 0x732   : > { %8157 = vset.pattern.permute.xlu1 %v8283_v2 }
 0x733   : > { %v3017_v45 = vadd.f32 %v3016_v44, %v3015_v43 }
 0x735   : > { %v3018_v46 = vmul.f32 0.0125, %v3017_v45 }
 0x737   : > { %7765 = vmatmul.mubr.msk.f32.vlgmr.msra.gmra.mrb[54].mxu0 %vm2527_vm7, %v3018_v46 }
 0x738   : > { %7801 = vmatprep.mubr.msk.bf16.mxu0 %vm8285_vm4, %v10751_v34 }
 0x80a   : > { %v3328_v25 = vpop.f32.mrb[54].mxu0 }
 0x80b   : > { %v3332_v49 = vadd.f32 %v3328_v25, %v3254_v41  ;;  %v7766_v50 = vpop.f32.mrb[55].mxu0  ;;  %v4513_v41 = vpop.permute.xlu1 %4512 }
 0x80d   : > { %v3334_v51 = vadd.f32 %v3333_v48, %v3332_v49 }
 0x80f   : > { %3335 = vst [vmem:[%s1428_s22] sm:$0x1] %v3334_v51  ;;  %v3337_v52 = vmul.f32 0.5, %v3334_v51  ;;  %s1419_s22 = scalar_lea.vmem %s10806_s1, %s10989_s16  ;;  %v4548_v46 = vpop.permute.xlu1 %4547  ;;  %s10826_s16 = sld [smem:[#allocation16_spill]] }
 0x810   : > { %v7222_v36 = vld [vmem:[%s1419_s22] ss:$0 sm:$0xff]  ;;  %s10974_s1 = sld [smem:[#allocation20_spill]]  ;;  %s10975_s22 = sld [smem:[#allocation17_spill]] }
 0x811   : > { %v3338_v16 = vmul.f32 1.442695, %v3337_v52 }
 0x813   : > { %8225 = vpow2.f32 %v3338_v16 }
 0x81d   : > { %v8226_v1 = vpop.eup %8225 }
 0x81e   : > { %v3347_v3 = vrot.slane %v8226_v1, %v3346_v63 }
 0x820   : > { %v3354_v4 = vrot.slane %v3347_v3, %v3346_v63 }
 0x822   : > { %3355 = vrot.lane.b32.xlu0 %v3354_v4, %s8291_s28  ;;  %s10807_s28 = sld [smem:[#allocation15_spill]] }
 0x826   : > { %4582 = vperm.xlu0 %8155, %v8971_v11  }
 0x828   : > { %v7011_v42 = vld [vmem:[%s10807_s28 + $0xa00] sm:$0xff]  ;;  %v7012_v23 = vld [vmem:[%s10807_s28 + $0xa08] sm:$0xff]  ;;  %v7013_v43 = vld [vmem:[%s10807_s28 + $0xa10] sm:$0xff] }
 0x829   : > { %v7014_v44 = vld [vmem:[%s10807_s28 + $0xa18] sm:$0xff]  ;;  %v7015_v45 = vld [vmem:[%s10807_s28 + $0xa20] sm:$0xff]  ;;  %v7017_v25 = vld [vmem:[%s10807_s28 + $0xa30] sm:$0xff]  ;;  %v9070_v3 = vmul.f32 %v7012_v23, %v4513_v41  ;;  %v9072_v4 = vmul.f32 %v7013_v43, %v4513_v41 }
 0x82a   : > { %8158 = vset.pattern.permute.xlu0 %v8287_v47  ;;  %v7016_v47 = vld [vmem:[%s10807_s28 + $0xa28] sm:$0xff]  ;;  %v7018_v48 = vld [vmem:[%s10807_s28 + $0xa38] sm:$0xff]  ;;  %v7019_v49 = vld [vmem:[%s10807_s28 + $0xa40] sm:$0xff] }
 0x82b   : > { %v7020_v50 = vld [vmem:[%s10807_s28 + $0xa48] sm:$0xff]  ;;  %v7023_v52 = vld [vmem:[%s10807_s28 + $0xa58] sm:$0xff]  ;;  %v7024_v16 = vld [vmem:[%s10807_s28 + $0xa60] sm:$0xff]  ;;  %10809 = vst [vmem:[#allocation29_spill] sm:$0xff] %v9070_v3 }
 0x82c   : > { %v7025_v54 = vld [vmem:[%s10807_s28 + $0xa68] sm:$0xff]  ;;  %v7026_v55 = vld [vmem:[%s10807_s28 + $0xa70] sm:$0xff]  ;;  %v7027_v56 = vld [vmem:[%s10807_s28 + $0xa78] sm:$0xff]  ;;  %10810 = vst [vmem:[#allocation30_spill] sm:$0xff] %v9072_v4 }
 0x82d   : > { %v7028_v57 = vld [vmem:[%s10807_s28 + $0xa80] sm:$0xff]  ;;  %v7030_v63 = vld [vmem:[%s10807_s28 + $0xa90] sm:$0xff]  ;;  %v7031_v1 = vld [vmem:[%s10807_s28 + $0xa98] sm:$0xff] }
 0x82e   : > { %v9121_v23 = vmul.f32 %v7031_v1, %v4548_v46  ;;  %v3363_v1 = vld [vmem:[%s10826_s16 + $0x18] sm:$0xff]  ;;  %v3379_v60 = vld [vmem:[%s10807_s28 + $0x48] sm:$0xff] }
 0x830   : > { %10829 = vst [vmem:[#allocation48_spill] sm:$0xff] %v9121_v23 }
 0x894   : > { %v3356_v6 = vpop.permute.xlu0 %3355 }
 0x895   : > { %v3358_v8 = vmul.f32 %v3356_v6, %v3336_v5  ;;  %v9074_v5 = vmul.f32 %v7014_v44, %v4513_v41  ;;  %v9076_v6 = vmul.f32 %v7015_v45, %v4513_v41  ;;  %v7040_v44 = vld [vmem:[%s10807_s28 + $0xae0] sm:$0xff] }
 0x897   : > { %v3359_v9 = vadd.f32 %v3358_v8, %v3334_v51  ;;  %v7022_v51 = vld [vmem:[%s10807_s28 + $0xa50] sm:$0xff]  ;;  %10811 = vst [vmem:[#allocation31_spill] sm:$0xff] %v9074_v5  ;;  %10812 = vst [vmem:[#allocation32_spill] sm:$0xff] %v9076_v6  ;;  %v6860_v6 = vld [vmem:[%s10807_s28 + $0x548] sm:$0xff] }
 0x898   : > { %v7042_v8 = vld [vmem:[%s10807_s28 + $0xaf0] sm:$0xff]  ;;  %v6784_v5 = vld [vmem:[%s10807_s28 + $0x2e8] sm:$0xff] }
 0x899   : > { %v8988_v32 = vrot.slane %v3359_v9, %v10748_v7  ;;  %v7043_v9 = vld [vmem:[%s10807_s28 + $0xaf8] sm:$0xff]  ;;  %v3378_v7 = vld [vmem:[%s10807_s28 + $0x40] sm:$0xff] }
 0x89b   : > { %3421 = vperm.xlu0 %8158, %v8988_v32   ;;  %3386 = vperm.xlu1 %8157, %v8988_v32  }
 0x89f   : > { %8161 = vset.pattern.permute.xlu0 %v8292_v10  ;;  %8159 = vset.pattern.permute.xlu1 %v8290_v62  ;;  %v7029_v62 = vld [vmem:[%s10807_s28 + $0xa88] sm:$0xff] }
 0x8a0   : > { %3526 = vperm.xlu0 %8161, %v8988_v32   ;;  %3456 = vperm.xlu1 %8159, %v8988_v32  }
 0x8a4   : > { %8164 = vset.pattern.permute.xlu0 %v8293_v12  ;;  %8160 = vset.pattern.permute.xlu1 %v8289_v59  ;;  %v9064_v59 = vmul.f32 %v7011_v42, %v4513_v41  ;;  %v9119_v42 = vmul.f32 %v7030_v63, %v4548_v46  ;;  %v3362_v63 = vld [vmem:[%s10826_s16 + $0x10] sm:$0xff] }
 0x8a5   : > { %3631 = vperm.xlu0 %8164, %v8988_v32   ;;  %3491 = vperm.xlu1 %8160, %v8988_v32   ;;  %v9127_v45 = vpop.permute.xlu0 %4582 }
 0x8a6   : > { %10808 = vst [vmem:[#allocation28_spill] sm:$0xff] %v9064_v59  ;;  %10828 = vst [vmem:[#allocation47_spill] sm:$0xff] %v9119_v42  ;;  %v6762_v42 = vld [vmem:[%s10807_s28 + $0x238] sm:$0xff] }
 0x8a7   : > { %10831 = vst [vmem:[#allocation50_spill] sm:$0xff] %v9127_v45 }
 0x8a9   : > { %8167 = vset.pattern.permute.xlu0 %v8294_v13  ;;  %8162 = vset.pattern.permute.xlu1 %v8295_v14 }
 0x8aa   : > { %3736 = vperm.xlu0 %8167, %v8988_v32   ;;  %3561 = vperm.xlu1 %8162, %v8988_v32  }
 0x8ae   : > { %8170 = vset.pattern.permute.xlu0 %v10757_v15  ;;  %8163 = vset.pattern.permute.xlu1 %v8297_v17  ;;  %v3369_v15 = vld [vmem:[%s10826_s16 + $0x48] sm:$0xff] }
 0x8af   : > { %3841 = vperm.xlu0 %8170, %v8988_v32   ;;  %3596 = vperm.xlu1 %8163, %v8988_v32  }
 0x8b3   : > { %8173 = vset.pattern.permute.xlu0 %v10755_v22  ;;  %8165 = vset.pattern.permute.xlu1 %v8299_v24  ;;  %v3368_v22 = vld [vmem:[%s10826_s16 + $0x40] sm:$0xff] }
 0x8b4   : > { %3946 = vperm.xlu0 %8173, %v8988_v32   ;;  %3666 = vperm.xlu1 %8165, %v8988_v32  }
 0x8b8   : > { %8176 = vset.pattern.permute.xlu0 %v10753_v18  ;;  %8166 = vset.pattern.permute.xlu1 %v8301_v26  ;;  %v3366_v18 = vld [vmem:[%s10826_s16 + $0x30] sm:$0xff] }
 0x8b9   : > { %4051 = vperm.xlu0 %8176, %v8988_v32   ;;  %3701 = vperm.xlu1 %8166, %v8988_v32  }
 0x8bd   : > { %8179 = vset.pattern.permute.xlu0 %v8302_v27  ;;  %8168 = vset.pattern.permute.xlu1 %v8303_v19  ;;  %v7032_v27 = vld [vmem:[%s10807_s28 + $0xaa0] sm:$0xff] }
 0x8be   : > { %4156 = vperm.xlu0 %8179, %v8988_v32   ;;  %3771 = vperm.xlu1 %8168, %v8988_v32  }
 0x8c2   : > { %8182 = vset.pattern.permute.xlu0 %v8304_v28  ;;  %8169 = vset.pattern.permute.xlu1 %v10758_v61  ;;  %v9095_v28 = vmul.f32 %v7020_v50, %v4513_v41  ;;  %v9142_v50 = vmul.f32 %v7032_v27, %v9127_v45 }
 0x8c3   : > { %4261 = vperm.xlu0 %8182, %v8988_v32   ;;  %3806 = vperm.xlu1 %8169, %v8988_v32  }
 0x8c4   : > { %10818 = vst [vmem:[#allocation38_spill] sm:$0xff] %v9095_v28  ;;  %10835 = vst [vmem:[#allocation54_spill] sm:$0xff] %v9142_v50  ;;  %v6761_v50 = vld [vmem:[%s10807_s28 + $0x230] sm:$0xff] }
 0x8c7   : > { %8185 = vset.pattern.permute.xlu0 %v8306_v29  ;;  %8171 = vset.pattern.permute.xlu1 %v8307_v20  ;;  %v9097_v29 = vmul.f32 %v7022_v51, %v4548_v46  ;;  %v3361_v51 = vld [vmem:[%s10826_s16 + $0x8] sm:$0xff] }
 0x8c8   : > { %4366 = vperm.xlu0 %8185, %v8988_v32   ;;  %3876 = vperm.xlu1 %8171, %v8988_v32  }
 0x8c9   : > { %10819 = vst [vmem:[#allocation39_spill] sm:$0xff] %v9097_v29 }
 0x8cc   : > { %8189 = vset.pattern.permute.xlu0 %v8308_v53  ;;  %8172 = vset.pattern.permute.xlu1 %v10756_v0  ;;  %v9101_v53 = vmul.f32 %v7024_v16, %v4548_v46  ;;  %v3373_v16 = vld [vmem:[%s10807_s28 + $0x18] sm:$0xff] }
 0x8cd   : > { %4471 = vperm.xlu0 %8189, %v8988_v32   ;;  %3911 = vperm.xlu1 %8172, %v8988_v32  }
 0x8ce   : > { %10821 = vst [vmem:[#allocation41_spill] sm:$0xff] %v9101_v53 }
 0x8d1   : > { %8174 = vset.pattern.permute.xlu1 %v8310_v30  ;;  %8190 = vset.pattern.permute.xlu0 %v8295_v14  ;;  %v9086_v14 = vmul.f32 %v7018_v48, %v4513_v41 }
 0x8d2   : > { %3981 = vperm.xlu1 %8174, %v8988_v32   ;;  %4687 = vperm.xlu0 %8190, %v8971_v11  }
 0x8d3   : > { %10815 = vst [vmem:[#allocation35_spill] sm:$0xff] %v9086_v14  ;;  %v6826_v14 = vld [vmem:[%s10807_s28 + $0x438] sm:$0xff] }
 0x8d6   : > { %8175 = vset.pattern.permute.xlu1 %v10754_v31  ;;  %8193 = vset.pattern.permute.xlu0 %v8299_v24  ;;  %v7045_v24 = vld [vmem:[%s10807_s28 + $0xb08] sm:$0xff]  ;;  %v3367_v31 = vld [vmem:[%s10826_s16 + $0x38] sm:$0xff] }
 0x8d7   : > { %4016 = vperm.xlu1 %8175, %v8988_v32   ;;  %4792 = vperm.xlu0 %8193, %v8971_v11  }
 0x8db   : > { %8177 = vset.pattern.permute.xlu1 %v8312_v33  ;;  %8196 = vset.pattern.permute.xlu0 %v8303_v19  ;;  %v7033_v19 = vld [vmem:[%s10807_s28 + $0xaa8] sm:$0xff]  ;;  %v7035_v33 = vld [vmem:[%s10807_s28 + $0xab8] sm:$0xff] }
 0x8dc   : > { %4086 = vperm.xlu1 %8177, %v8988_v32   ;;  %4897 = vperm.xlu0 %8196, %v8971_v11  }
 0x8e0   : > { %8178 = vset.pattern.permute.xlu1 %v8313_v35  ;;  %8199 = vset.pattern.permute.xlu0 %v8307_v20  ;;  %v9099_v20 = vmul.f32 %v7023_v52, %v4548_v46  ;;  %v7036_v35 = vld [vmem:[%s10807_s28 + $0xac0] sm:$0xff]  ;;  %v3372_v52 = vld [vmem:[%s10807_s28 + $0x10] sm:$0xff] }
 0x8e1   : > { %4121 = vperm.xlu1 %8178, %v8988_v32   ;;  %5002 = vperm.xlu0 %8199, %v8971_v11  }
 0x8e2   : > { %10820 = vst [vmem:[#allocation40_spill] sm:$0xff] %v9099_v20 }
 0x8e5   : > { %8180 = vset.pattern.permute.xlu1 %v8314_v21  ;;  %8202 = vset.pattern.permute.xlu0 %v8310_v30  ;;  %v7034_v30 = vld [vmem:[%s10807_s28 + $0xab0] sm:$0xff]  ;;  %v9106_v21 = vmul.f32 %v7025_v54, %v4548_v46  ;;  %v3374_v54 = vld [vmem:[%s10807_s28 + $0x20] sm:$0xff] }
 0x8e6   : > { %4191 = vperm.xlu1 %8180, %v8988_v32   ;;  %5107 = vperm.xlu0 %8202, %v8971_v11  }
 0x8e7   : > { %10822 = vst [vmem:[#allocation42_spill] sm:$0xff] %v9106_v21  ;;  %v10848_v21 = vmov 18  }
 0x8ea   : > { %8181 = vset.pattern.permute.xlu1 %v8315_v37  ;;  %8205 = vset.pattern.permute.xlu0 %v8283_v2  ;;  %v8319_v2 = vmov 30   ;;  %v9110_v37 = vmul.f32 %v7027_v56, %v4548_v46  ;;  %v9154_v56 = vmul.f32 %v7034_v30, %v9127_v45 }
 0x8eb   : > { %4226 = vperm.xlu1 %8181, %v8988_v32   ;;  %5218 = vperm.xlu0 %8205, %v7222_v36   ;;  %v9108_v36 = vmul.f32 %v7026_v55, %v4548_v46  ;;  %v9151_v55 = vmul.f32 %v7033_v19, %v9127_v45 }
 0x8ec   : > { %10824 = vst [vmem:[#allocation44_spill] sm:$0xff] %v9110_v37  ;;  %10837 = vst [vmem:[#allocation56_spill] sm:$0xff] %v9154_v56  ;;  %v6723_v56 = vld [vmem:[%s10807_s28 + $0x100] sm:$0xff] }
 0x8ed   : > { %10823 = vst [vmem:[#allocation43_spill] sm:$0xff] %v9108_v36  ;;  %10836 = vst [vmem:[#allocation55_spill] sm:$0xff] %v9151_v55  ;;  %v6724_v55 = vld [vmem:[%s10807_s28 + $0x108] sm:$0xff] }
 0x8ef   : > { %8183 = vset.pattern.permute.xlu1 %v8316_v38  ;;  %v9112_v38 = vmul.f32 %v7028_v57, %v4548_v46  ;;  %v9157_v57 = vmul.f32 %v7035_v33, %v9127_v45  ;;  %v9178_v33 = vmul.f32 %v7040_v44, %v9127_v45 }
 0x8f0   : > { %4296 = vperm.xlu1 %8183, %v8988_v32  }
 0x8f1   : > { %10825 = vst [vmem:[#allocation45_spill] sm:$0xff] %v9112_v38  ;;  %10838 = vst [vmem:[#allocation57_spill] sm:$0xff] %v9157_v57  ;;  %v6766_v38 = vld [vmem:[%s10807_s28 + $0x258] sm:$0xff] }
 0x8f2   : > { %10843 = vst [vmem:[#allocation62_spill] sm:$0xff] %v9178_v33 }
 0x8f4   : > { %8184 = vset.pattern.permute.xlu1 %v8317_v39  ;;  %v7037_v39 = vld [vmem:[%s10807_s28 + $0xac8] sm:$0xff] }
 0x8f5   : > { %4331 = vperm.xlu1 %8184, %v8988_v32   ;;  %v9169_v27 = vmul.f32 %v7037_v39, %v9127_v45 }
 0x8f7   : > { %10840 = vst [vmem:[#allocation59_spill] sm:$0xff] %v9169_v27  ;;  %v6706_v27 = vld [vmem:[%s10807_s28 + $0x78] sm:$0xff] }
 0x8f9   : > { %8186 = vset.pattern.permute.xlu1 %v8318_v40  ;;  %v7038_v40 = vld [vmem:[%s10807_s28 + $0xad0] sm:$0xff] }
 0x8fa   : > { %4401 = vperm.xlu1 %8186, %v8988_v32   ;;  %v9172_v19 = vmul.f32 %v7038_v40, %v9127_v45 }
 0x8fc   : > { %10841 = vst [vmem:[#allocation60_spill] sm:$0xff] %v9172_v19 }
 0x8fe   : > { %8187 = vset.pattern.permute.xlu1 %v8319_v2  ;;  %v7039_v2 = vld [vmem:[%s10807_s28 + $0xad8] sm:$0xff] }
 0x8ff   : > { %4436 = vperm.xlu1 %8187, %v8988_v32   ;;  %v7044_v32 = vld [vmem:[%s10807_s28 + $0xb00] sm:$0xff]  ;;  %v9175_v30 = vmul.f32 %v7039_v2, %v9127_v45 }
 0x901   : > { %10842 = vst [vmem:[#allocation61_spill] sm:$0xff] %v9175_v30 }
 0x903   : > { %8188 = vset.pattern.permute.xlu1 %v8292_v10  ;;  %v9082_v10 = vmul.f32 %v7016_v47, %v4513_v41  ;;  %v3370_v47 = vld [vmem:[%s10807_s28] sm:$0xff] }
 0x904   : > { %4652 = vperm.xlu1 %8188, %v8971_v11  }
 0x905   : > { %10813 = vst [vmem:[#allocation33_spill] sm:$0xff] %v9082_v10 }
 0x908   : > { %8191 = vset.pattern.permute.xlu1 %v8297_v17  ;;  %v9088_v17 = vmul.f32 %v7019_v49, %v4513_v41 }
 0x909   : > { %4722 = vperm.xlu1 %8191, %v8971_v11  }
 0x90a   : > { %10816 = vst [vmem:[#allocation36_spill] sm:$0xff] %v9088_v17  ;;  %v6823_v17 = vld [vmem:[%s10807_s28 + $0x420] sm:$0xff] }
 0x90d   : > { %8192 = vset.pattern.permute.xlu1 %v8293_v12  ;;  %v9084_v12 = vmul.f32 %v7017_v25, %v4513_v41  ;;  %v9117_v41 = vmul.f32 %v7029_v62, %v4548_v46  ;;  %v3371_v25 = vld [vmem:[%s10807_s28 + $0x8] sm:$0xff]  ;;  %v9160_v62 = vmul.f32 %v7036_v35, %v9127_v45 }
 0x90e   : > { %4757 = vperm.xlu1 %8192, %v8971_v11   ;;  %v3365_v35 = vld [vmem:[%s10826_s16 + $0x28] sm:$0xff] }
 0x90f   : > { %10814 = vst [vmem:[#allocation34_spill] sm:$0xff] %v9084_v12  ;;  %10827 = vst [vmem:[#allocation46_spill] sm:$0xff] %v9117_v41  ;;  %v6828_v12 = vld [vmem:[%s10807_s28 + $0x448] sm:$0xff] }
 0x910   : > { %10839 = vst [vmem:[#allocation58_spill] sm:$0xff] %v9160_v62  ;;  %v6707_v62 = vld [vmem:[%s10807_s28 + $0x80] sm:$0xff] }
 0x912   : > { %8194 = vset.pattern.permute.xlu1 %v8301_v26  ;;  %v9091_v26 = vpop.permute.xlu1 %4617 }
 0x913   : > { %4827 = vperm.xlu1 %8194, %v8971_v11   ;;  %10817 = vst [vmem:[#allocation37_spill] sm:$0xff] %v9091_v26  ;;  %v9124_v43 = vmul.f32 %v7042_v8, %v9091_v26  ;;  %v9133_v48 = vmul.f32 %v7043_v9, %v9091_v26  ;;  %v9136_v46 = vmul.f32 %v7044_v32, %v9091_v26  ;;  %v3364_v8 = vld [vmem:[%s10826_s16 + $0x20] sm:$0xff]  ;;  %v3375_v9 = vld [vmem:[%s10807_s28 + $0x28] sm:$0xff]  ;;  %v3376_v32 = vld [vmem:[%s10807_s28 + $0x30] sm:$0xff] }
 0x914   : > { %v9139_v49 = vmul.f32 %v7045_v24, %v9091_v26  ;;  %v3377_v24 = vld [vmem:[%s10807_s28 + $0x38] sm:$0xff]  ;;  %v6703_v26 = vld [vmem:[%s10807_s28 + $0x60] sm:$0xff] }
 0x915   : > { %10830 = vst [vmem:[#allocation49_spill] sm:$0xff] %v9124_v43  ;;  %10832 = vst [vmem:[#allocation51_spill] sm:$0xff] %v9133_v48  ;;  %v6702_v48 = vld [vmem:[%s10807_s28 + $0x58] sm:$0xff]  ;;  %v10844_v43 = vmov 12  }
 0x916   : > { %10833 = vst [vmem:[#allocation52_spill] sm:$0xff] %v9136_v46  ;;  %10834 = vst [vmem:[#allocation53_spill] sm:$0xff] %v9139_v49  ;;  %v6701_v46 = vld [vmem:[%s10807_s28 + $0x50] sm:$0xff] }
 0x917   : > { %8195 = vset.pattern.permute.xlu1 %v8294_v13  ;;  %v3360_v13 = vld [vmem:[%s10826_s16] sm:$0xff] }
 0x918   : > { %4862 = vperm.xlu1 %8195, %v8971_v11  }
 0x91a   : > { %v3387_v34 = vpop.permute.xlu1 %3386 }
 0x91b   : > { %v3389_v39 = vmul.f32 %v3387_v34, %v3370_v47  ;;  %v3390_v0 = vmul.f32 %v3387_v34, %v3371_v25  ;;  %v3391_v40 = vmul.f32 %v3387_v34, %v3372_v52  ;;  %v3392_v2 = vmul.f32 %v3387_v34, %v3373_v16  ;;  %v6704_v52 = vld [vmem:[%s10807_s28 + $0x68] sm:$0xff]  ;;  %v6705_v16 = vld [vmem:[%s10807_s28 + $0x70] sm:$0xff] }
 0x91c   : > { %v3393_v61 = vmul.f32 %v3387_v34, %v3374_v54  ;;  %v3394_v44 = vmul.f32 %v3387_v34, %v3375_v9  ;;  %v3395_v58 = vmul.f32 %v3387_v34, %v3376_v32  ;;  %v3396_v49 = vmul.f32 %v3387_v34, %v3377_v24  ;;  %8197 = vset.pattern.permute.xlu1 %v10844_v43  ;;  %v3422_v54 = vpop.permute.xlu0 %3421  ;;  %v6708_v43 = vld [vmem:[%s10807_s28 + $0x88] sm:$0xff] }
 0x91d   : > { %v3397_v33 = vmul.f32 %v3387_v34, %v3378_v7  ;;  %v3398_v47 = vmul.f32 %v3387_v34, %v3379_v60  ;;  %v3399_v30 = vadd.f32 %v3389_v39, %v3360_v13  ;;  %v3400_v25 = vadd.f32 %v3390_v0, %v3361_v51  ;;  %4932 = vperm.xlu1 %8197, %v8971_v11   ;;  %v6709_v13 = vld [vmem:[%s10807_s28 + $0x90] sm:$0xff]  ;;  %v6710_v51 = vld [vmem:[%s10807_s28 + $0x98] sm:$0xff] }
 0x91e   : > { %v3401_v9 = vadd.f32 %v3391_v40, %v3362_v63  ;;  %v3402_v32 = vadd.f32 %v3392_v2, %v3363_v1  ;;  %v3403_v24 = vadd.f32 %v3393_v61, %v3364_v8  ;;  %v3404_v19 = vadd.f32 %v3394_v44, %v3365_v35  ;;  %v6711_v2 = vld [vmem:[%s10807_s28 + $0xa0] sm:$0xff]  ;;  %v6712_v44 = vld [vmem:[%s10807_s28 + $0xa8] sm:$0xff] }
 0x91f   : > { %v3405_v34 = vadd.f32 %v3395_v58, %v3366_v18  ;;  %v3406_v60 = vadd.f32 %v3396_v49, %v3367_v31  ;;  %v3407_v7 = vadd.f32 %v3397_v33, %v3368_v22  ;;  %v3408_v0 = vadd.f32 %v3398_v47, %v3369_v15  ;;  %v3457_v49 = vpop.permute.xlu1 %3456 }
 0x920   : > { %v3424_v39 = vmul.f32 %v6701_v46, %v3422_v54  ;;  %v3425_v57 = vmul.f32 %v6702_v48, %v3422_v54  ;;  %v3426_v63 = vmul.f32 %v6703_v26, %v3422_v54  ;;  %v3427_v1 = vmul.f32 %v6704_v52, %v3422_v54  ;;  %v6713_v46 = vld [vmem:[%s10807_s28 + $0xb0] sm:$0xff]  ;;  %v6714_v48 = vld [vmem:[%s10807_s28 + $0xb8] sm:$0xff]  ;;  %v6715_v26 = vld [vmem:[%s10807_s28 + $0xc0] sm:$0xff] }
 0x921   : > { %v3428_v61 = vmul.f32 %v6705_v16, %v3422_v54  ;;  %v3429_v8 = vmul.f32 %v6706_v27, %v3422_v54  ;;  %v3430_v35 = vmul.f32 %v6707_v62, %v3422_v54  ;;  %v3431_v40 = vmul.f32 %v6708_v43, %v3422_v54  ;;  %v6716_v52 = vld [vmem:[%s10807_s28 + $0xc8] sm:$0xff]  ;;  %v6717_v16 = vld [vmem:[%s10807_s28 + $0xd0] sm:$0xff]  ;;  %v6718_v43 = vld [vmem:[%s10807_s28 + $0xd8] sm:$0xff] }
 0x922   : > { %v10845_v58 = vmov 13   ;;  %v3432_v15 = vmul.f32 %v6709_v13, %v3422_v54  ;;  %v3433_v22 = vmul.f32 %v6710_v51, %v3422_v54  ;;  %v3434_v18 = vadd.f32 %v3424_v39, %v3399_v30  ;;  %v6719_v13 = vld [vmem:[%s10807_s28 + $0xe0] sm:$0xff]  ;;  %v6720_v51 = vld [vmem:[%s10807_s28 + $0xe8] sm:$0xff] }
 0x923   : > { %8198 = vset.pattern.permute.xlu1 %v10845_v58  ;;  %v3435_v31 = vadd.f32 %v3425_v57, %v3400_v25  ;;  %v3436_v62 = vadd.f32 %v3426_v63, %v3401_v9  ;;  %v3437_v27 = vadd.f32 %v3427_v1, %v3402_v32  ;;  %v3438_v33 = vadd.f32 %v3428_v61, %v3403_v24  ;;  %v6731_v24 = vld [vmem:[%s10807_s28 + $0x140] sm:$0xff] }
 0x924   : > { %4967 = vperm.xlu1 %8198, %v8971_v11   ;;  %v3439_v47 = vadd.f32 %v3429_v8, %v3404_v19  ;;  %v3440_v54 = vadd.f32 %v3430_v35, %v3405_v34  ;;  %v3441_v57 = vadd.f32 %v3431_v40, %v3406_v60  ;;  %v3442_v30 = vadd.f32 %v3432_v15, %v3407_v7  ;;  %v6732_v19 = vld [vmem:[%s10807_s28 + $0x148] sm:$0xff]  ;;  %v6733_v60 = vld [vmem:[%s10807_s28 + $0x150] sm:$0xff]  ;;  %v6734_v8 = vld [vmem:[%s10807_s28 + $0x158] sm:$0xff] }
 0x925   : > { %v3443_v25 = vadd.f32 %v3433_v22, %v3408_v0  ;;  %v3459_v39 = vmul.f32 %v6711_v2, %v3457_v49  ;;  %v3460_v58 = vmul.f32 %v6712_v44, %v3457_v49  ;;  %v3461_v9 = vmul.f32 %v6713_v46, %v3457_v49  ;;  %v6735_v7 = vld [vmem:[%s10807_s28 + $0x160] sm:$0xff]  ;;  %v6736_v15 = vld [vmem:[%s10807_s28 + $0x168] sm:$0xff]  ;;  %v6737_v22 = vld [vmem:[%s10807_s28 + $0x170] sm:$0xff] }
 0x926   : > { %v3462_v32 = vmul.f32 %v6714_v48, %v3457_v49  ;;  %v3463_v63 = vmul.f32 %v6715_v26, %v3457_v49  ;;  %v3464_v1 = vmul.f32 %v6716_v52, %v3457_v49  ;;  %v3465_v34 = vmul.f32 %v6717_v16, %v3457_v49  ;;  %v6738_v46 = vld [vmem:[%s10807_s28 + $0x178] sm:$0xff]  ;;  %v3527_v48 = vpop.permute.xlu0 %3526 }
 0x927   : > { %v3466_v61 = vmul.f32 %v6718_v43, %v3457_v49  ;;  %v10846_v0 = vmov 15   ;;  %v3467_v35 = vmul.f32 %v6719_v13, %v3457_v49  ;;  %v3468_v40 = vmul.f32 %v6720_v51, %v3457_v49  ;;  %v6740_v13 = vld [vmem:[%s10807_s28 + $0x188] sm:$0xff] }
 0x928   : > { %8200 = vset.pattern.permute.xlu1 %v10846_v0  ;;  %v3469_v2 = vadd.f32 %v3459_v39, %v3434_v18  ;;  %v3470_v44 = vadd.f32 %v3460_v58, %v3435_v31  ;;  %v3471_v26 = vadd.f32 %v3461_v9, %v3436_v62  ;;  %v3472_v52 = vadd.f32 %v3462_v32, %v3437_v27  ;;  %v6739_v0 = vld [vmem:[%s10807_s28 + $0x180] sm:$0xff]  ;;  %v6721_v18 = vld [vmem:[%s10807_s28 + $0xf0] sm:$0xff]  ;;  %v6722_v58 = vld [vmem:[%s10807_s28 + $0xf8] sm:$0xff]  ;;  %v3492_v62 = vpop.permute.xlu1 %3491 }
 0x929   : > { %5037 = vperm.xlu1 %8200, %v8971_v11   ;;  %v3473_v16 = vadd.f32 %v3463_v63, %v3438_v33  ;;  %v3474_v43 = vadd.f32 %v3464_v1, %v3439_v47  ;;  %v3475_v31 = vadd.f32 %v3465_v34, %v3440_v54  ;;  %v3476_v49 = vadd.f32 %v3466_v61, %v3441_v57  ;;  %v6725_v32 = vld [vmem:[%s10807_s28 + $0x110] sm:$0xff]  ;;  %v6726_v54 = vld [vmem:[%s10807_s28 + $0x118] sm:$0xff]  ;;  %v6727_v57 = vld [vmem:[%s10807_s28 + $0x120] sm:$0xff] }
 0x92a   : > { %v3477_v51 = vadd.f32 %v3467_v35, %v3442_v30  ;;  %v3478_v39 = vadd.f32 %v3468_v40, %v3443_v25  ;;  %v9227_v27 = vmul.f32 %v6731_v24, %v3527_v48  ;;  %v9229_v33 = vmul.f32 %v6732_v19, %v3527_v48  ;;  %v6728_v24 = vld [vmem:[%s10807_s28 + $0x128] sm:$0xff]  ;;  %v6729_v34 = vld [vmem:[%s10807_s28 + $0x130] sm:$0xff]  ;;  %v6730_v19 = vld [vmem:[%s10807_s28 + $0x138] sm:$0xff] }
 0x92b   : > { %v9231_v47 = vmul.f32 %v6733_v60, %v3527_v48  ;;  %v9233_v9 = vmul.f32 %v6734_v8, %v3527_v48  ;;  %v9238_v30 = vmul.f32 %v6735_v7, %v3527_v48  ;;  %v9240_v25 = vmul.f32 %v6736_v15, %v3527_v48 }
 0x92c   : > { %v9242_v63 = vmul.f32 %v6737_v22, %v3527_v48  ;;  %v9244_v1 = vmul.f32 %v6738_v46, %v3527_v48  ;;  %v10847_v61 = vmov 16   ;;  %v9250_v60 = vmul.f32 %v6739_v0, %v3527_v48 }
 0x92d   : > { %8201 = vset.pattern.permute.xlu1 %v10847_v61  ;;  %v9252_v8 = vmul.f32 %v6740_v13, %v3527_v48  ;;  %v3494_v7 = vmul.f32 %v6721_v18, %v3492_v62  ;;  %v3495_v35 = vmul.f32 %v6722_v58, %v3492_v62  ;;  %v3496_v40 = vmul.f32 %v6723_v56, %v3492_v62  ;;  %v6763_v48 = vld [vmem:[%s10807_s28 + $0x240] sm:$0xff]  ;;  %v6764_v13 = vld [vmem:[%s10807_s28 + $0x248] sm:$0xff]  ;;  %v3632_v18 = vpop.permute.xlu0 %3631 }
 0x92e   : > { %5072 = vperm.xlu1 %8201, %v8971_v11   ;;  %v3497_v15 = vmul.f32 %v6724_v55, %v3492_v62  ;;  %v3498_v22 = vmul.f32 %v6725_v32, %v3492_v62  ;;  %v3499_v46 = vmul.f32 %v6726_v54, %v3492_v62  ;;  %v3500_v45 = vmul.f32 %v6727_v57, %v3492_v62  ;;  %v6765_v32 = vld [vmem:[%s10807_s28 + $0x250] sm:$0xff]  ;;  %v6767_v54 = vld [vmem:[%s10807_s28 + $0x260] sm:$0xff] }
 0x92f   : > { %v3501_v61 = vmul.f32 %v6728_v24, %v3492_v62  ;;  %v3502_v23 = vmul.f32 %v6729_v34, %v3492_v62  ;;  %v3503_v0 = vmul.f32 %v6730_v19, %v3492_v62  ;;  %v3504_v58 = vadd.f32 %v3494_v7, %v3469_v2  ;;  %v6768_v62 = vld [vmem:[%s10807_s28 + $0x268] sm:$0xff]  ;;  %v6769_v34 = vld [vmem:[%s10807_s28 + $0x270] sm:$0xff]  ;;  %v6770_v19 = vld [vmem:[%s10807_s28 + $0x278] sm:$0xff]  ;;  %v3562_v7 = vpop.permute.xlu1 %3561 }
 0x930   : > { %v3505_v56 = vadd.f32 %v3495_v35, %v3470_v44  ;;  %v3506_v55 = vadd.f32 %v3496_v40, %v3471_v26  ;;  %v3507_v41 = vadd.f32 %v3497_v15, %v3472_v52  ;;  %v3508_v37 = vadd.f32 %v3498_v22, %v3473_v16  ;;  %v6745_v35 = vld [vmem:[%s10807_s28 + $0x1b0] sm:$0xff]  ;;  %v6746_v40 = vld [vmem:[%s10807_s28 + $0x1b8] sm:$0xff] }
 0x931   : > { %v3509_v36 = vadd.f32 %v3499_v46, %v3474_v43  ;;  %v3510_v57 = vadd.f32 %v3500_v45, %v3475_v31  ;;  %v3511_v24 = vadd.f32 %v3501_v61, %v3476_v49  ;;  %v3512_v53 = vadd.f32 %v3502_v23, %v3477_v51  ;;  %v6741_v23 = vld [vmem:[%s10807_s28 + $0x190] sm:$0xff]  ;;  %v6742_v49 = vld [vmem:[%s10807_s28 + $0x198] sm:$0xff]  ;;  %v6743_v51 = vld [vmem:[%s10807_s28 + $0x1a0] sm:$0xff] }
 0x932   : > { %8203 = vset.pattern.permute.xlu1 %v10848_v21  ;;  %v3513_v2 = vadd.f32 %v3503_v0, %v3478_v39  ;;  %v9266_v44 = vmul.f32 %v6761_v50, %v3632_v18  ;;  %v9268_v26 = vmul.f32 %v6762_v42, %v3632_v18  ;;  %v9271_v45 = vmul.f32 %v6763_v48, %v3632_v18  ;;  %v6744_v39 = vld [vmem:[%s10807_s28 + $0x1a8] sm:$0xff]  ;;  %v6749_v48 = vld [vmem:[%s10807_s28 + $0x1d0] sm:$0xff] }
 0x933   : > { %5142 = vperm.xlu1 %8203, %v8971_v11   ;;  %v9273_v52 = vmul.f32 %v6764_v13, %v3632_v18  ;;  %v9275_v16 = vmul.f32 %v6765_v32, %v3632_v18  ;;  %v9277_v21 = vmul.f32 %v6766_v38, %v3632_v18  ;;  %v9280_v43 = vmul.f32 %v6767_v54, %v3632_v18  ;;  %v6747_v38 = vld [vmem:[%s10807_s28 + $0x1c0] sm:$0xff]  ;;  %v6748_v0 = vld [vmem:[%s10807_s28 + $0x1c8] sm:$0xff]  ;;  %v6750_v13 = vld [vmem:[%s10807_s28 + $0x1d8] sm:$0xff] }
 0x934   : > { %v9282_v50 = vmul.f32 %v6768_v62, %v3632_v18  ;;  %v9284_v42 = vmul.f32 %v6769_v34, %v3632_v18  ;;  %v9286_v31 = vmul.f32 %v6770_v19, %v3632_v18  ;;  %v3539_v15 = vadd.f32 %v9227_v27, %v3504_v58  ;;  %v3737_v62 = vpop.permute.xlu0 %3736 }
 0x935   : > { %v3540_v22 = vadd.f32 %v9229_v33, %v3505_v56  ;;  %v3541_v46 = vadd.f32 %v9231_v47, %v3506_v55  ;;  %v3542_v61 = vadd.f32 %v9233_v9, %v3507_v41  ;;  %v3543_v18 = vadd.f32 %v9238_v30, %v3508_v37  ;;  %v6793_v56 = vld [vmem:[%s10807_s28 + $0x330] sm:$0xff] }
 0x936   : > { %v3544_v32 = vadd.f32 %v9240_v25, %v3509_v36  ;;  %v3545_v54 = vadd.f32 %v9242_v63, %v3510_v57  ;;  %v3546_v27 = vadd.f32 %v9244_v1, %v3511_v24  ;;  %v10849_v58 = vmov 19   ;;  %v6791_v63 = vld [vmem:[%s10807_s28 + $0x320] sm:$0xff]  ;;  %v6792_v1 = vld [vmem:[%s10807_s28 + $0x328] sm:$0xff]  ;;  %v6794_v57 = vld [vmem:[%s10807_s28 + $0x338] sm:$0xff] }
 0x937   : > { %8204 = vset.pattern.permute.xlu1 %v10849_v58  ;;  %v3547_v33 = vadd.f32 %v9250_v60, %v3512_v53  ;;  %v3548_v41 = vadd.f32 %v9252_v8, %v3513_v2  ;;  %v3564_v47 = vmul.f32 %v6741_v23, %v3562_v7  ;;  %v3565_v9 = vmul.f32 %v6742_v49, %v3562_v7  ;;  %v6795_v24 = vld [vmem:[%s10807_s28 + $0x340] sm:$0xff]  ;;  %v6797_v49 = vld [vmem:[%s10807_s28 + $0x350] sm:$0xff] }
 0x938   : > { %5177 = vperm.xlu1 %8204, %v8971_v11   ;;  %v3566_v37 = vmul.f32 %v6743_v51, %v3562_v7  ;;  %v3567_v30 = vmul.f32 %v6744_v39, %v3562_v7  ;;  %v3568_v36 = vmul.f32 %v6745_v35, %v3562_v7  ;;  %v3569_v25 = vmul.f32 %v6746_v40, %v3562_v7  ;;  %v6796_v11 = vld [vmem:[%s10807_s28 + $0x348] sm:$0xff]  ;;  %v6798_v51 = vld [vmem:[%s10807_s28 + $0x358] sm:$0xff]  ;;  %v6799_v39 = vld [vmem:[%s10807_s28 + $0x360] sm:$0xff] }
 0x939   : > { %v3570_v53 = vmul.f32 %v6747_v38, %v3562_v7  ;;  %v3571_v60 = vmul.f32 %v6748_v0, %v3562_v7  ;;  %v3572_v55 = vmul.f32 %v6749_v48, %v3562_v7  ;;  %v3573_v8 = vmul.f32 %v6750_v13, %v3562_v7  ;;  %v6800_v0 = vld [vmem:[%s10807_s28 + $0x368] sm:$0xff]  ;;  %v6751_v48 = vld [vmem:[%s10807_s28 + $0x1e0] sm:$0xff]  ;;  %v6753_v58 = vld [vmem:[%s10807_s28 + $0x1f0] sm:$0xff] }
 0x93a   : > { %v3574_v34 = vadd.f32 %v3564_v47, %v3539_v15  ;;  %v3575_v19 = vadd.f32 %v3565_v9, %v3540_v22  ;;  %v3576_v2 = vadd.f32 %v3566_v37, %v3541_v46  ;;  %v3577_v23 = vadd.f32 %v3567_v30, %v3542_v61  ;;  %v6752_v13 = vld [vmem:[%s10807_s28 + $0x1e8] sm:$0xff]  ;;  %v6754_v47 = vld [vmem:[%s10807_s28 + $0x1f8] sm:$0xff] }
 0x93b   : > { %v3578_v35 = vadd.f32 %v3568_v36, %v3543_v18  ;;  %v3579_v40 = vadd.f32 %v3569_v25, %v3544_v32  ;;  %v3580_v7 = vadd.f32 %v3570_v53, %v3545_v54  ;;  %v3581_v38 = vadd.f32 %v3571_v60, %v3546_v27  ;;  %v6755_v18 = vld [vmem:[%s10807_s28 + $0x200] sm:$0xff]  ;;  %v3597_v32 = vpop.permute.xlu1 %3596  ;;  %v6758_v30 = vld [vmem:[%s10807_s28 + $0x218] sm:$0xff]  ;;  %v6760_v53 = vld [vmem:[%s10807_s28 + $0x228] sm:$0xff] }
 0x93c   : > { %v3582_v15 = vadd.f32 %v3572_v55, %v3547_v33  ;;  %v3583_v22 = vadd.f32 %v3573_v8, %v3548_v41  ;;  %v9321_v46 = vmul.f32 %v6791_v63, %v3737_v62  ;;  %v9323_v61 = vmul.f32 %v6792_v1, %v3737_v62  ;;  %v6756_v33 = vld [vmem:[%s10807_s28 + $0x208] sm:$0xff]  ;;  %v6757_v41 = vld [vmem:[%s10807_s28 + $0x210] sm:$0xff] }
 0x93d   : > { %v9328_v54 = vmul.f32 %v6793_v56, %v3737_v62  ;;  %v9330_v27 = vmul.f32 %v6794_v57, %v3737_v62  ;;  %v9332_v9 = vmul.f32 %v6795_v24, %v3737_v62  ;;  %v9334_v37 = vmul.f32 %v6796_v11, %v3737_v62  ;;  %v6759_v56 = vld [vmem:[%s10807_s28 + $0x220] sm:$0xff] }
 0x93e   : > { %v9339_v36 = vmul.f32 %v6797_v49, %v3737_v62  ;;  %v9341_v25 = vmul.f32 %v6798_v51, %v3737_v62  ;;  %v9343_v63 = vmul.f32 %v6799_v39, %v3737_v62  ;;  %v9345_v1 = vmul.f32 %v6800_v0, %v3737_v62  ;;  %v6821_v51 = vld [vmem:[%s10807_s28 + $0x410] sm:$0xff]  ;;  %v6822_v39 = vld [vmem:[%s10807_s28 + $0x418] sm:$0xff] }
 0x93f   : > { %v3599_v60 = vmul.f32 %v6751_v48, %v3597_v32  ;;  %v3600_v55 = vmul.f32 %v6752_v13, %v3597_v32  ;;  %v3601_v8 = vmul.f32 %v6753_v58, %v3597_v32  ;;  %v3602_v57 = vmul.f32 %v6754_v47, %v3597_v32  ;;  %v6824_v48 = vld [vmem:[%s10807_s28 + $0x428] sm:$0xff]  ;;  %v6825_v13 = vld [vmem:[%s10807_s28 + $0x430] sm:$0xff]  ;;  %v3842_v58 = vpop.permute.xlu0 %3841 }
 0x940   : > { %v3603_v24 = vmul.f32 %v6755_v18, %v3597_v32  ;;  %v3604_v11 = vmul.f32 %v6756_v33, %v3597_v32  ;;  %v3605_v20 = vmul.f32 %v6757_v41, %v3597_v32  ;;  %v3606_v49 = vmul.f32 %v6758_v30, %v3597_v32  ;;  %v6827_v30 = vld [vmem:[%s10807_s28 + $0x440] sm:$0xff] }
 0x941   : > { %v3607_v62 = vmul.f32 %v6759_v56, %v3597_v32  ;;  %v3608_v0 = vmul.f32 %v6760_v53, %v3597_v32  ;;  %v3609_v29 = vadd.f32 %v3599_v60, %v3574_v34  ;;  %v3610_v28 = vadd.f32 %v3600_v55, %v3575_v19  ;;  %v6829_v19 = vld [vmem:[%s10807_s28 + $0x450] sm:$0xff]  ;;  %v6830_v53 = vld [vmem:[%s10807_s28 + $0x458] sm:$0xff] }
 0x942   : > { %v3611_v47 = vadd.f32 %v3601_v8, %v3576_v2  ;;  %v3612_v18 = vadd.f32 %v3602_v57, %v3577_v23  ;;  %v3613_v33 = vadd.f32 %v3603_v24, %v3578_v35  ;;  %v3614_v41 = vadd.f32 %v3604_v11, %v3579_v40  ;;  %v6773_v8 = vld [vmem:[%s10807_s28 + $0x290] sm:$0xff]  ;;  %v6774_v57 = vld [vmem:[%s10807_s28 + $0x298] sm:$0xff]  ;;  %v6775_v24 = vld [vmem:[%s10807_s28 + $0x2a0] sm:$0xff]  ;;  %v3667_v11 = vpop.permute.xlu1 %3666 }
 0x943   : > { %v3615_v10 = vadd.f32 %v3605_v20, %v3580_v7  ;;  %v3616_v56 = vadd.f32 %v3606_v49, %v3581_v38  ;;  %v3617_v32 = vadd.f32 %v3607_v62, %v3582_v15  ;;  %v3618_v34 = vadd.f32 %v3608_v0, %v3583_v22  ;;  %v6771_v15 = vld [vmem:[%s10807_s28 + $0x280] sm:$0xff]  ;;  %v6772_v22 = vld [vmem:[%s10807_s28 + $0x288] sm:$0xff] }
 0x944   : > { %v9359_v60 = vmul.f32 %v6821_v51, %v3842_v58  ;;  %v9361_v2 = vmul.f32 %v6822_v39, %v3842_v58  ;;  %v9363_v23 = vmul.f32 %v6823_v17, %v3842_v58  ;;  %v9365_v35 = vmul.f32 %v6824_v48, %v3842_v58  ;;  %v6776_v51 = vld [vmem:[%s10807_s28 + $0x2a8] sm:$0xff]  ;;  %v6777_v39 = vld [vmem:[%s10807_s28 + $0x2b0] sm:$0xff] }
 0x945   : > { %v9367_v40 = vmul.f32 %v6825_v13, %v3842_v58  ;;  %v9369_v20 = vmul.f32 %v6826_v14, %v3842_v58  ;;  %v9371_v7 = vmul.f32 %v6827_v30, %v3842_v58  ;;  %v9373_v38 = vmul.f32 %v6828_v12, %v3842_v58  ;;  %v6778_v12 = vld [vmem:[%s10807_s28 + $0x2b8] sm:$0xff]  ;;  %v6780_v30 = vld [vmem:[%s10807_s28 + $0x2c8] sm:$0xff] }
 0x946   : > { %v9377_v55 = vmul.f32 %v6829_v19, %v3842_v58  ;;  %v9379_v17 = vmul.f32 %v6830_v53, %v3842_v58  ;;  %v3644_v49 = vadd.f32 %v9266_v44, %v3609_v29  ;;  %v3645_v14 = vadd.f32 %v9268_v26, %v3610_v28  ;;  %v6779_v58 = vld [vmem:[%s10807_s28 + $0x2c0] sm:$0xff]  ;;  %v6856_v53 = vld [vmem:[%s10807_s28 + $0x528] sm:$0xff] }
 0x947   : > { %v3646_v62 = vadd.f32 %v9271_v45, %v3611_v47  ;;  %v3647_v0 = vadd.f32 %v9273_v52, %v3612_v18  ;;  %v3648_v48 = vadd.f32 %v9275_v16, %v3613_v33  ;;  %v3649_v13 = vadd.f32 %v9277_v21, %v3614_v41  ;;  %v6851_v21 = vld [vmem:[%s10807_s28 + $0x500] sm:$0xff]  ;;  %v6852_v18 = vld [vmem:[%s10807_s28 + $0x508] sm:$0xff] }
 0x948   : > { %v3650_v29 = vadd.f32 %v9280_v43, %v3615_v10  ;;  %v3651_v28 = vadd.f32 %v9282_v50, %v3616_v56  ;;  %v3652_v44 = vadd.f32 %v9284_v42, %v3617_v32  ;;  %v3653_v26 = vadd.f32 %v9286_v31, %v3618_v34  ;;  %v6853_v43 = vld [vmem:[%s10807_s28 + $0x510] sm:$0xff]  ;;  %v6854_v50 = vld [vmem:[%s10807_s28 + $0x518] sm:$0xff]  ;;  %v6855_v42 = vld [vmem:[%s10807_s28 + $0x520] sm:$0xff] }
 0x949   : > { %v3669_v45 = vmul.f32 %v6771_v15, %v3667_v11  ;;  %v3670_v47 = vmul.f32 %v6772_v22, %v3667_v11  ;;  %v3671_v52 = vmul.f32 %v6773_v8, %v3667_v11  ;;  %v3672_v16 = vmul.f32 %v6774_v57, %v3667_v11  ;;  %v6857_v15 = vld [vmem:[%s10807_s28 + $0x530] sm:$0xff]  ;;  %v6858_v22 = vld [vmem:[%s10807_s28 + $0x538] sm:$0xff]  ;;  %v3947_v8 = vpop.permute.xlu0 %3946 }
 0x94a   : > { %v3673_v33 = vmul.f32 %v6775_v24, %v3667_v11  ;;  %v3674_v41 = vmul.f32 %v6776_v51, %v3667_v11  ;;  %v3675_v19 = vmul.f32 %v6777_v39, %v3667_v11  ;;  %v3676_v10 = vmul.f32 %v6778_v12, %v3667_v11  ;;  %v6859_v12 = vld [vmem:[%s10807_s28 + $0x540] sm:$0xff] }
 0x94b   : > { %v3677_v31 = vmul.f32 %v6779_v58, %v3667_v11  ;;  %v3678_v56 = vmul.f32 %v6780_v30, %v3667_v11  ;;  %v3679_v32 = vadd.f32 %v3669_v45, %v3644_v49  ;;  %v3680_v34 = vadd.f32 %v3670_v47, %v3645_v14  ;;  %v6781_v58 = vld [vmem:[%s10807_s28 + $0x2d0] sm:$0xff]  ;;  %v6782_v45 = vld [vmem:[%s10807_s28 + $0x2d8] sm:$0xff]  ;;  %v6783_v47 = vld [vmem:[%s10807_s28 + $0x2e0] sm:$0xff] }
 0x94c   : > { %v3681_v57 = vadd.f32 %v3671_v52, %v3646_v62  ;;  %v3682_v24 = vadd.f32 %v3672_v16, %v3647_v0  ;;  %v3683_v51 = vadd.f32 %v3673_v33, %v3648_v48  ;;  %v3684_v39 = vadd.f32 %v3674_v41, %v3649_v13  ;;  %v3702_v62 = vpop.permute.xlu1 %3701  ;;  %v6785_v16 = vld [vmem:[%s10807_s28 + $0x2f0] sm:$0xff] }
 0x94d   : > { %v3685_v11 = vadd.f32 %v3675_v19, %v3650_v29  ;;  %v3686_v49 = vadd.f32 %v3676_v10, %v3651_v28  ;;  %v3687_v14 = vadd.f32 %v3677_v31, %v3652_v44  ;;  %v3688_v30 = vadd.f32 %v3678_v56, %v3653_v26  ;;  %v6786_v29 = vld [vmem:[%s10807_s28 + $0x2f8] sm:$0xff]  ;;  %v6787_v28 = vld [vmem:[%s10807_s28 + $0x300] sm:$0xff] }
 0x94e   : > { %v9413_v0 = vmul.f32 %v6851_v21, %v3947_v8  ;;  %v9415_v48 = vmul.f32 %v6852_v18, %v3947_v8  ;;  %v9417_v13 = vmul.f32 %v6853_v43, %v3947_v8  ;;  %v9419_v52 = vmul.f32 %v6854_v50, %v3947_v8  ;;  %v6788_v21 = vld [vmem:[%s10807_s28 + $0x308] sm:$0xff]  ;;  %v6789_v18 = vld [vmem:[%s10807_s28 + $0x310] sm:$0xff]  ;;  %v6790_v19 = vld [vmem:[%s10807_s28 + $0x318] sm:$0xff] }
 0x94f   : > { %v9424_v44 = vmul.f32 %v6855_v42, %v3947_v8  ;;  %v9426_v26 = vmul.f32 %v6856_v53, %v3947_v8  ;;  %v9428_v33 = vmul.f32 %v6857_v15, %v3947_v8  ;;  %v9430_v41 = vmul.f32 %v6858_v22, %v3947_v8  ;;  %v6881_v22 = vld [vmem:[%s10807_s28 + $0x5f0] sm:$0xff] }
 0x950   : > { %10850 = vst [vmem:[#allocation63_spill] sm:$0xff] %v9419_v52  ;;  %v9435_v10 = vmul.f32 %v6859_v12, %v3947_v8  ;;  %v9437_v43 = vmul.f32 %v6860_v6, %v3947_v8  ;;  %v3704_v50 = vmul.f32 %v6781_v58, %v3702_v62  ;;  %v3705_v31 = vmul.f32 %v6782_v45, %v3702_v62  ;;  %v6883_v12 = vld [vmem:[%s10807_s28 + $0x600] sm:$0xff]  ;;  %v6884_v6 = vld [vmem:[%s10807_s28 + $0x608] sm:$0xff]  ;;  %v4052_v8 = vpop.permute.xlu0 %4051 }
 0x951   : > { %10851 = vst [vmem:[#allocation64_spill] sm:$0xff] %v9424_v44  ;;  %10852 = vst [vmem:[#allocation65_spill] sm:$0xff] %v9426_v26  ;;  %v3706_v42 = vmul.f32 %v6783_v47, %v3702_v62  ;;  %v3707_v56 = vmul.f32 %v6784_v5, %v3702_v62  ;;  %v3708_v53 = vmul.f32 %v6785_v16, %v3702_v62  ;;  %v6885_v16 = vld [vmem:[%s10807_s28 + $0x610] sm:$0xff]  ;;  %v6890_v26 = vld [vmem:[%s10807_s28 + $0x638] sm:$0xff] }
 0x952   : > { %10853 = vst [vmem:[#allocation66_spill] sm:$0xff] %v9428_v33  ;;  %10854 = vst [vmem:[#allocation67_spill] sm:$0xff] %v9430_v41  ;;  %v3709_v15 = vmul.f32 %v6786_v29, %v3702_v62  ;;  %v3710_v4 = vmul.f32 %v6787_v28, %v3702_v62  ;;  %v3711_v3 = vmul.f32 %v6788_v21, %v3702_v62  ;;  %v6882_v33 = vld [vmem:[%s10807_s28 + $0x5f8] sm:$0xff]  ;;  %v6887_v29 = vld [vmem:[%s10807_s28 + $0x620] sm:$0xff] }
 0x953   : > { %10855 = vst [vmem:[#allocation68_spill] sm:$0xff] %v9435_v10  ;;  %10856 = vst [vmem:[#allocation69_spill] sm:$0xff] %v9437_v43  ;;  %v3712_v59 = vmul.f32 %v6789_v18, %v3702_v62  ;;  %v3713_v41 = vmul.f32 %v6790_v19, %v3702_v62  ;;  %v3714_v58 = vadd.f32 %v3704_v50, %v3679_v32  ;;  %v6886_v43 = vld [vmem:[%s10807_s28 + $0x618] sm:$0xff]  ;;  %v6888_v62 = vld [vmem:[%s10807_s28 + $0x628] sm:$0xff] }
 0x954   : > { %v3715_v45 = vadd.f32 %v3705_v31, %v3680_v34  ;;  %v3716_v5 = vadd.f32 %v3706_v42, %v3681_v57  ;;  %v3717_v47 = vadd.f32 %v3707_v56, %v3682_v24  ;;  %v3718_v10 = vadd.f32 %v3708_v53, %v3683_v51  ;;  %v6889_v19 = vld [vmem:[%s10807_s28 + $0x630] sm:$0xff]  ;;  %v6806_v31 = vld [vmem:[%s10807_s28 + $0x398] sm:$0xff] }
 0x955   : > { %v3719_v28 = vadd.f32 %v3709_v15, %v3684_v39  ;;  %v3720_v21 = vadd.f32 %v3710_v4, %v3685_v11  ;;  %v3721_v18 = vadd.f32 %v3711_v3, %v3686_v49  ;;  %v3722_v44 = vadd.f32 %v3712_v59, %v3687_v14  ;;  %v6801_v51 = vld [vmem:[%s10807_s28 + $0x370] sm:$0xff]  ;;  %v6802_v14 = vld [vmem:[%s10807_s28 + $0x378] sm:$0xff] }
 0x956   : > { %v3723_v52 = vadd.f32 %v3713_v41, %v3688_v30  ;;  %v9449_v32 = vmul.f32 %v6881_v22, %v4052_v8  ;;  %v9451_v34 = vmul.f32 %v6882_v33, %v4052_v8  ;;  %v9453_v57 = vmul.f32 %v6883_v12, %v4052_v8  ;;  %v6803_v30 = vld [vmem:[%s10807_s28 + $0x380] sm:$0xff]  ;;  %v6804_v33 = vld [vmem:[%s10807_s28 + $0x388] sm:$0xff]  ;;  %v3772_v41 = vpop.permute.xlu1 %3771  ;;  %v6805_v50 = vld [vmem:[%s10807_s28 + $0x390] sm:$0xff] }
 0x957   : > { %v9455_v24 = vmul.f32 %v6884_v6, %v4052_v8  ;;  %v9457_v3 = vmul.f32 %v6885_v16, %v4052_v8  ;;  %v9459_v4 = vmul.f32 %v6886_v43, %v4052_v8  ;;  %v9462_v39 = vmul.f32 %v6887_v29, %v4052_v8  ;;  %v6807_v43 = vld [vmem:[%s10807_s28 + $0x3a0] sm:$0xff]  ;;  %v6808_v22 = vld [vmem:[%s10807_s28 + $0x3a8] sm:$0xff]  ;;  %v6810_v12 = vld [vmem:[%s10807_s28 + $0x3b8] sm:$0xff] }
 0x958   : > { %v9464_v59 = vmul.f32 %v6888_v62, %v4052_v8  ;;  %v9466_v11 = vmul.f32 %v6889_v19, %v4052_v8  ;;  %v9468_v49 = vmul.f32 %v6890_v26, %v4052_v8  ;;  %v3749_v42 = vadd.f32 %v9321_v46, %v3714_v58  ;;  %v6809_v26 = vld [vmem:[%s10807_s28 + $0x3b0] sm:$0xff] }
 0x959   : > { %v3750_v56 = vadd.f32 %v9323_v61, %v3715_v45  ;;  %v3751_v53 = vadd.f32 %v9328_v54, %v3716_v5  ;;  %v3752_v15 = vadd.f32 %v9330_v27, %v3717_v47  ;;  %v3753_v6 = vadd.f32 %v9332_v9, %v3718_v10  ;;  %v6911_v9 = vld [vmem:[%s10807_s28 + $0x6e0] sm:$0xff] }
 0x95a   : > { %v3754_v8 = vadd.f32 %v9334_v37, %v3719_v28  ;;  %v3755_v16 = vadd.f32 %v9339_v36, %v3720_v21  ;;  %v3756_v46 = vadd.f32 %v9341_v25, %v3721_v18  ;;  %v3757_v61 = vadd.f32 %v9343_v63, %v3722_v44  ;;  %v6912_v37 = vld [vmem:[%s10807_s28 + $0x6e8] sm:$0xff]  ;;  %v6913_v36 = vld [vmem:[%s10807_s28 + $0x6f0] sm:$0xff]  ;;  %v6914_v44 = vld [vmem:[%s10807_s28 + $0x6f8] sm:$0xff]  ;;  %v4157_v21 = vpop.permute.xlu0 %4156 }
 0x95b   : > { %v3758_v54 = vadd.f32 %v9345_v1, %v3723_v52  ;;  %v3774_v27 = vmul.f32 %v6801_v51, %v3772_v41  ;;  %v3775_v58 = vmul.f32 %v6802_v14, %v3772_v41  ;;  %v3776_v45 = vmul.f32 %v6803_v30, %v3772_v41  ;;  %v6915_v1 = vld [vmem:[%s10807_s28 + $0x700] sm:$0xff]  ;;  %v6916_v52 = vld [vmem:[%s10807_s28 + $0x708] sm:$0xff]  ;;  %v6917_v14 = vld [vmem:[%s10807_s28 + $0x710] sm:$0xff] }
 0x95c   : > { %v3777_v5 = vmul.f32 %v6804_v33, %v3772_v41  ;;  %v3778_v47 = vmul.f32 %v6805_v50, %v3772_v41  ;;  %v3779_v29 = vmul.f32 %v6806_v31, %v3772_v41  ;;  %v3780_v25 = vmul.f32 %v6807_v43, %v3772_v41  ;;  %v6918_v30 = vld [vmem:[%s10807_s28 + $0x718] sm:$0xff]  ;;  %v6919_v33 = vld [vmem:[%s10807_s28 + $0x720] sm:$0xff] }
 0x95d   : > { %v3781_v10 = vmul.f32 %v6808_v22, %v3772_v41  ;;  %v3782_v28 = vmul.f32 %v6809_v26, %v3772_v41  ;;  %v3783_v63 = vmul.f32 %v6810_v12, %v3772_v41  ;;  %v3784_v18 = vadd.f32 %v3774_v27, %v3749_v42  ;;  %v6920_v22 = vld [vmem:[%s10807_s28 + $0x728] sm:$0xff]  ;;  %v6811_v26 = vld [vmem:[%s10807_s28 + $0x3c0] sm:$0xff]  ;;  %v6813_v27 = vld [vmem:[%s10807_s28 + $0x3d0] sm:$0xff] }
 0x95e   : > { %v3785_v62 = vadd.f32 %v3775_v58, %v3750_v56  ;;  %v3786_v19 = vadd.f32 %v3776_v45, %v3751_v53  ;;  %v3787_v51 = vadd.f32 %v3777_v5, %v3752_v15  ;;  %v3788_v50 = vadd.f32 %v3778_v47, %v3753_v6  ;;  %v6812_v12 = vld [vmem:[%s10807_s28 + $0x3c8] sm:$0xff]  ;;  %v6814_v58 = vld [vmem:[%s10807_s28 + $0x3d8] sm:$0xff]  ;;  %v6815_v6 = vld [vmem:[%s10807_s28 + $0x3e0] sm:$0xff] }
 0x95f   : > { %v3789_v31 = vadd.f32 %v3779_v29, %v3754_v8  ;;  %v3790_v41 = vadd.f32 %v3780_v25, %v3755_v16  ;;  %v3791_v43 = vadd.f32 %v3781_v10, %v3756_v46  ;;  %v3792_v42 = vadd.f32 %v3782_v28, %v3757_v61  ;;  %v3807_v8 = vpop.permute.xlu1 %3806  ;;  %v6816_v61 = vld [vmem:[%s10807_s28 + $0x3e8] sm:$0xff]  ;;  %v6818_v47 = vld [vmem:[%s10807_s28 + $0x3f8] sm:$0xff] }
 0x960   : > { %v3793_v56 = vadd.f32 %v3783_v63, %v3758_v54  ;;  %v9501_v53 = vmul.f32 %v6911_v9, %v4157_v21  ;;  %v9503_v15 = vmul.f32 %v6912_v37, %v4157_v21  ;;  %v9508_v16 = vmul.f32 %v6913_v36, %v4157_v21  ;;  %v6817_v54 = vld [vmem:[%s10807_s28 + $0x3f0] sm:$0xff]  ;;  %v6819_v36 = vld [vmem:[%s10807_s28 + $0x400] sm:$0xff]  ;;  %v6820_v10 = vld [vmem:[%s10807_s28 + $0x408] sm:$0xff] }
 0x961   : > { %v9510_v46 = vmul.f32 %v6914_v44, %v4157_v21  ;;  %v9512_v45 = vmul.f32 %v6915_v1, %v4157_v21  ;;  %v9514_v5 = vmul.f32 %v6916_v52, %v4157_v21  ;;  %v9519_v29 = vmul.f32 %v6917_v14, %v4157_v21 }
 0x962   : > { %10857 = vst [vmem:[#allocation70_spill] sm:$0xff] %v9508_v16  ;;  %v9521_v9 = vmul.f32 %v6918_v30, %v4157_v21  ;;  %v9523_v37 = vmul.f32 %v6919_v33, %v4157_v21  ;;  %v9525_v25 = vmul.f32 %v6920_v22, %v4157_v21  ;;  %v3809_v28 = vmul.f32 %v6811_v26, %v3807_v8  ;;  %v6941_v30 = vld [vmem:[%s10807_s28 + $0x7d0] sm:$0xff]  ;;  %v6942_v33 = vld [vmem:[%s10807_s28 + $0x7d8] sm:$0xff]  ;;  %v6944_v26 = vld [vmem:[%s10807_s28 + $0x7e8] sm:$0xff] }
 0x963   : > { %10858 = vst [vmem:[#allocation71_spill] sm:$0xff] %v9510_v46  ;;  %10859 = vst [vmem:[#allocation72_spill] sm:$0xff] %v9512_v45  ;;  %v3810_v63 = vmul.f32 %v6812_v12, %v3807_v8  ;;  %v3811_v44 = vmul.f32 %v6813_v27, %v3807_v8  ;;  %v3812_v1 = vmul.f32 %v6814_v58, %v3807_v8  ;;  %v6945_v12 = vld [vmem:[%s10807_s28 + $0x7f0] sm:$0xff]  ;;  %v4262_v27 = vpop.permute.xlu0 %4261  ;;  %v6948_v46 = vld [vmem:[%s10807_s28 + $0x808] sm:$0xff]  ;;  %v3877_v16 = vpop.permute.xlu1 %3876 }
 0x964   : > { %10860 = vst [vmem:[#allocation73_spill] sm:$0xff] %v9514_v5  ;;  %10861 = vst [vmem:[#allocation74_spill] sm:$0xff] %v9519_v29  ;;  %v3813_v52 = vmul.f32 %v6815_v6, %v3807_v8  ;;  %v3814_v5 = vmul.f32 %v6816_v61, %v3807_v8  ;;  %v3815_v45 = vmul.f32 %v6817_v54, %v3807_v8  ;;  %v6946_v29 = vld [vmem:[%s10807_s28 + $0x7f8] sm:$0xff] }
 0x965   : > { %10862 = vst [vmem:[#allocation75_spill] sm:$0xff] %v9521_v9  ;;  %10863 = vst [vmem:[#allocation76_spill] sm:$0xff] %v9523_v37  ;;  %v3816_v14 = vmul.f32 %v6818_v47, %v3807_v8  ;;  %v3817_v21 = vmul.f32 %v6819_v36, %v3807_v8  ;;  %v3818_v22 = vmul.f32 %v6820_v10, %v3807_v8  ;;  %v6943_v9 = vld [vmem:[%s10807_s28 + $0x7e0] sm:$0xff]  ;;  %v6949_v10 = vld [vmem:[%s10807_s28 + $0x810] sm:$0xff] }
 0x966   : > { %10864 = vst [vmem:[#allocation77_spill] sm:$0xff] %v9525_v25  ;;  %v3819_v25 = vadd.f32 %v3809_v28, %v3784_v18  ;;  %v3820_v37 = vadd.f32 %v3810_v63, %v3785_v62  ;;  %v3821_v58 = vadd.f32 %v3811_v44, %v3786_v19  ;;  %v3822_v6 = vadd.f32 %v3812_v1, %v3787_v51  ;;  %v6947_v47 = vld [vmem:[%s10807_s28 + $0x800] sm:$0xff]  ;;  %v6950_v28 = vld [vmem:[%s10807_s28 + $0x818] sm:$0xff] }
 0x967   : > { %v3823_v61 = vadd.f32 %v3813_v52, %v3788_v50  ;;  %v3824_v54 = vadd.f32 %v3814_v5, %v3789_v31  ;;  %v3825_v36 = vadd.f32 %v3815_v45, %v3790_v41  ;;  %v3826_v18 = vadd.f32 %v3816_v14, %v3791_v43  ;;  %v6832_v45 = vld [vmem:[%s10807_s28 + $0x468] sm:$0xff]  ;;  %v6833_v5 = vld [vmem:[%s10807_s28 + $0x470] sm:$0xff]  ;;  %v6834_v1 = vld [vmem:[%s10807_s28 + $0x478] sm:$0xff] }
 0x968   : > { %v3827_v62 = vadd.f32 %v3817_v21, %v3792_v42  ;;  %v3828_v8 = vadd.f32 %v3818_v22, %v3793_v56  ;;  %v9539_v63 = vmul.f32 %v6941_v30, %v4262_v27  ;;  %v9541_v19 = vmul.f32 %v6942_v33, %v4262_v27  ;;  %v6831_v56 = vld [vmem:[%s10807_s28 + $0x460] sm:$0xff]  ;;  %v6836_v33 = vld [vmem:[%s10807_s28 + $0x488] sm:$0xff]  ;;  %v6838_v21 = vld [vmem:[%s10807_s28 + $0x498] sm:$0xff] }
 0x969   : > { %v9543_v51 = vmul.f32 %v6943_v9, %v4262_v27  ;;  %v9545_v50 = vmul.f32 %v6944_v26, %v4262_v27  ;;  %v9547_v31 = vmul.f32 %v6945_v12, %v4262_v27  ;;  %v9549_v41 = vmul.f32 %v6946_v29, %v4262_v27  ;;  %v6835_v52 = vld [vmem:[%s10807_s28 + $0x480] sm:$0xff] }
 0x96a   : > { %v9551_v43 = vmul.f32 %v6947_v47, %v4262_v27  ;;  %v9553_v42 = vmul.f32 %v6948_v46, %v4262_v27  ;;  %v9558_v9 = vmul.f32 %v6949_v10, %v4262_v27  ;;  %v9560_v44 = vmul.f32 %v6950_v28, %v4262_v27  ;;  %v8219_v30 = vld [vmem:[%s10865_s26] sm:$0xff]   ;;  %v6837_v46 = vld [vmem:[%s10807_s28 + $0x490] sm:$0xff]  ;;  %v6840_v10 = vld [vmem:[%s10807_s28 + $0x4a8] sm:$0xff] }
 0x96b   : > { %10866 = vst [vmem:[#allocation78_spill] sm:$0xff] %v9549_v41  ;;  %v3854_v14 = vadd.f32 %v9359_v60, %v3819_v25  ;;  %v3855_v29 = vadd.f32 %v9361_v2, %v3820_v37  ;;  %v3856_v22 = vadd.f32 %v9363_v23, %v3821_v58  ;;  %v3857_v26 = vadd.f32 %v9365_v35, %v3822_v6  ;;  %v6839_v47 = vld [vmem:[%s10807_s28 + $0x4a0] sm:$0xff]  ;;  %v9580_v23 = vpop.permute.xlu1 %3911  ;;  %v8220_v35 = vld [vmem:[%s10865_s26 + $0x8] sm:$0xff]   ;;  %v6841_v41 = vld [vmem:[%s10807_s28 + $0x4b0] sm:$0xff] }
 0x96c   : > { %10867 = vst [vmem:[#allocation79_spill] sm:$0xff] %v9551_v43  ;;  %10868 = vst [vmem:[#allocation80_spill] sm:$0xff] %v9553_v42  ;;  %v3858_v12 = vadd.f32 %v9367_v40, %v3823_v61  ;;  %v3859_v27 = vadd.f32 %v9369_v20, %v3824_v54  ;;  %v3860_v60 = vadd.f32 %v9371_v7, %v3825_v36  ;;  %7768 = vmatpush3.bf16.msra.mxu1 %v8219_v30  ;;  %v6971_v7 = vld [vmem:[%s10807_s28 + $0x8c0] sm:$0xff]  ;;  %v10871_v61 = vmov 0.0   ;;  %v6977_v30 = vld [vmem:[%s10807_s28 + $0x8f0] sm:$0xff] }
 0x96d   : > { %10869 = vst [vmem:[#allocation81_spill] sm:$0xff] %v9558_v9  ;;  %10870 = vst [vmem:[#allocation82_spill] sm:$0xff] %v9560_v44  ;;  %v3861_v2 = vadd.f32 %v9373_v38, %v3826_v18  ;;  %v3862_v37 = vadd.f32 %v9377_v55, %v3827_v62  ;;  %v3863_v25 = vadd.f32 %v9379_v17, %v3828_v8  ;;  %v6972_v38 = vld [vmem:[%s10807_s28 + $0x8c8] sm:$0xff]  ;;  %7769 = vmatprep.subr.bf16.mxu1 %v10871_v61  ;;  %v6973_v18 = vld [vmem:[%s10807_s28 + $0x8d0] sm:$0xff] }
 0x96e   : > { %v3879_v40 = vmul.f32 %v6831_v56, %v3877_v16  ;;  %v3880_v58 = vmul.f32 %v6832_v45, %v3877_v16  ;;  %v3881_v20 = vmul.f32 %v6833_v5, %v3877_v16  ;;  %v3882_v6 = vmul.f32 %v6834_v1, %v3877_v16  ;;  %v6974_v62 = vld [vmem:[%s10807_s28 + $0x8d8] sm:$0xff]  ;;  %v6975_v8 = vld [vmem:[%s10807_s28 + $0x8e0] sm:$0xff]  ;;  %v6976_v1 = vld [vmem:[%s10807_s28 + $0x8e8] sm:$0xff] }
 0x96f   : > { %v3883_v55 = vmul.f32 %v6835_v52, %v3877_v16  ;;  %v3884_v54 = vmul.f32 %v6836_v33, %v3877_v16  ;;  %v3885_v17 = vmul.f32 %v6837_v46, %v3877_v16  ;;  %v3886_v36 = vmul.f32 %v6838_v21, %v3877_v16  ;;  %v6978_v44 = vld [vmem:[%s10807_s28 + $0x8f8] sm:$0xff]  ;;  %v4367_v52 = vpop.permute.xlu0 %4366  ;;  %v6979_v42 = vld [vmem:[%s10807_s28 + $0x900] sm:$0xff]  ;;  %v6980_v43 = vld [vmem:[%s10807_s28 + $0x908] sm:$0xff] }
 0x970   : > { %v3887_v28 = vmul.f32 %v6839_v47, %v3877_v16  ;;  %v3888_v56 = vmul.f32 %v6840_v10, %v3877_v16  ;;  %v3889_v45 = vadd.f32 %v3879_v40, %v3854_v14  ;;  %v3890_v5 = vadd.f32 %v3880_v58, %v3855_v29  ;;  %7770 = vmatpush3.bf16.msra.mxu1 %v8220_v35  ;;  %v6842_v10 = vld [vmem:[%s10807_s28 + $0x4b8] sm:$0xff]  ;;  %v6843_v40 = vld [vmem:[%s10807_s28 + $0x4c0] sm:$0xff]  ;;  %v6844_v58 = vld [vmem:[%s10807_s28 + $0x4c8] sm:$0xff] }
 0x971   : > { %v3891_v33 = vadd.f32 %v3881_v20, %v3856_v22  ;;  %v3892_v46 = vadd.f32 %v3882_v6, %v3857_v26  ;;  %v3893_v21 = vadd.f32 %v3883_v55, %v3858_v12  ;;  %v3894_v9 = vadd.f32 %v3884_v54, %v3859_v27  ;;  %7821 = vmatprep.subr.bf16.mxu1 %v10871_v61  ;;  %v6849_v55 = vld [vmem:[%s10807_s28 + $0x4f0] sm:$0xff]  ;;  %v6850_v54 = vld [vmem:[%s10807_s28 + $0x4f8] sm:$0xff] }
 0x972   : > { %v3895_v16 = vadd.f32 %v3885_v17, %v3860_v60  ;;  %v3896_v14 = vadd.f32 %v3886_v36, %v3861_v2  ;;  %v3897_v29 = vadd.f32 %v3887_v28, %v3862_v37  ;;  %v3898_v47 = vadd.f32 %v3888_v56, %v3863_v25  ;;  %v6845_v60 = vld [vmem:[%s10807_s28 + $0x4d0] sm:$0xff]  ;;  %v6846_v2 = vld [vmem:[%s10807_s28 + $0x4d8] sm:$0xff]  ;;  %v6847_v37 = vld [vmem:[%s10807_s28 + $0x4e0] sm:$0xff]  ;;  %v9610_v25 = vpop.permute.xlu1 %3981 }
 0x973   : > { %v9599_v22 = vmul.f32 %v6971_v7, %v4367_v52  ;;  %v9601_v26 = vmul.f32 %v6972_v38, %v4367_v52  ;;  %v9603_v12 = vmul.f32 %v6973_v18, %v4367_v52  ;;  %v9605_v27 = vmul.f32 %v6974_v62, %v4367_v52  ;;  %v6848_v38 = vld [vmem:[%s10807_s28 + $0x4e8] sm:$0xff] }
 0x974   : > { %v9612_v35 = vmul.f32 %v6975_v8, %v4367_v52  ;;  %v9614_v20 = vmul.f32 %v6976_v1, %v4367_v52  ;;  %v9616_v6 = vmul.f32 %v6977_v30, %v4367_v52  ;;  %v9618_v7 = vmul.f32 %v6978_v44, %v4367_v52  ;;  %v7001_v1 = vld [vmem:[%s10807_s28 + $0x9b0] sm:$0xff] }
 0x975   : > { %10872 = vst [vmem:[#allocation83_spill] sm:$0xff] %v9605_v27  ;;  %v9623_v17 = vmul.f32 %v6979_v42, %v4367_v52  ;;  %v9625_v36 = vmul.f32 %v6980_v43, %v4367_v52  ;;  %v3914_v18 = vmul.f32 %v6841_v41, %v9580_v23  ;;  %v3915_v62 = vmul.f32 %v6842_v10, %v9580_v23  ;;  %v7002_v52 = vld [vmem:[%s10807_s28 + $0x9b8] sm:$0xff]  ;;  %v7003_v10 = vld [vmem:[%s10807_s28 + $0x9c0] sm:$0xff] }
 0x976   : > { %10873 = vst [vmem:[#allocation84_spill] sm:$0xff] %v9612_v35  ;;  %10874 = vst [vmem:[#allocation85_spill] sm:$0xff] %v9614_v20  ;;  %v3916_v8 = vmul.f32 %v6843_v40, %v9580_v23  ;;  %v3917_v28 = vmul.f32 %v6844_v58, %v9580_v23  ;;  %v3918_v44 = vmul.f32 %v6845_v60, %v9580_v23  ;;  %v7004_v40 = vld [vmem:[%s10807_s28 + $0x9c8] sm:$0xff]  ;;  %v4472_v58 = vpop.permute.xlu0 %4471  ;;  %v7010_v35 = vld [vmem:[%s10807_s28 + $0x9f8] sm:$0xff]  ;;  %v9647_v27 = vpop.permute.xlu1 %4016 }
 0x977   : > { %10875 = vst [vmem:[#allocation86_spill] sm:$0xff] %v9616_v6  ;;  %10876 = vst [vmem:[#allocation87_spill] sm:$0xff] %v9618_v7  ;;  %v3919_v56 = vmul.f32 %v6846_v2, %v9580_v23  ;;  %v3920_v42 = vmul.f32 %v6847_v37, %v9580_v23  ;;  %v3921_v43 = vmul.f32 %v6848_v38, %v9580_v23  ;;  %v7006_v7 = vld [vmem:[%s10807_s28 + $0x9d8] sm:$0xff]  ;;  %v7007_v37 = vld [vmem:[%s10807_s28 + $0x9e0] sm:$0xff] }
 0x978   : > { %10877 = vst [vmem:[#allocation88_spill] sm:$0xff] %v9623_v17  ;;  %10878 = vst [vmem:[#allocation89_spill] sm:$0xff] %v9625_v36  ;;  %v3922_v41 = vmul.f32 %v6849_v55, %v9580_v23  ;;  %v3923_v30 = vmul.f32 %v6850_v54, %v9580_v23  ;;  %v3924_v60 = vadd.f32 %v3914_v18, %v3889_v45  ;;  %v7005_v17 = vld [vmem:[%s10807_s28 + $0x9d0] sm:$0xff]  ;;  %v7008_v23 = vld [vmem:[%s10807_s28 + $0x9e8] sm:$0xff] }
 0x979   : > { %v3925_v61 = vadd.f32 %v3915_v62, %v3890_v5  ;;  %v3926_v2 = vadd.f32 %v3916_v8, %v3891_v33  ;;  %v3927_v36 = vadd.f32 %v3917_v28, %v3892_v46  ;;  %v3928_v6 = vadd.f32 %v3918_v44, %v3893_v21  ;;  %v7009_v54 = vld [vmem:[%s10807_s28 + $0x9f0] sm:$0xff]  ;;  %v6862_v28 = vld [vmem:[%s10807_s28 + $0x558] sm:$0xff]  ;;  %v6863_v44 = vld [vmem:[%s10807_s28 + $0x560] sm:$0xff] }
 0x97a   : > { %v3929_v38 = vadd.f32 %v3919_v56, %v3894_v9  ;;  %v3930_v55 = vadd.f32 %v3920_v42, %v3895_v16  ;;  %v3931_v20 = vadd.f32 %v3921_v43, %v3896_v14  ;;  %v3932_v45 = vadd.f32 %v3922_v41, %v3897_v29  ;;  %v6861_v18 = vld [vmem:[%s10807_s28 + $0x550] sm:$0xff]  ;;  %v6864_v56 = vld [vmem:[%s10807_s28 + $0x568] sm:$0xff]  ;;  %v6867_v42 = vld [vmem:[%s10807_s28 + $0x580] sm:$0xff] }
 0x97b   : > { %v3933_v5 = vadd.f32 %v3923_v30, %v3898_v47  ;;  %v9649_v33 = vmul.f32 %v7001_v1, %v4472_v58  ;;  %v9651_v46 = vmul.f32 %v7002_v52, %v4472_v58  ;;  %v9653_v9 = vmul.f32 %v7003_v10, %v4472_v58  ;;  %v6865_v1 = vld [vmem:[%s10807_s28 + $0x570] sm:$0xff]  ;;  %v10889_v30 = vld [vmem:[#allocation63_spill] sm:$0xff]  ;;  %v6868_v10 = vld [vmem:[%s10807_s28 + $0x588] sm:$0xff] }
 0x97c   : > { %v9655_v21 = vmul.f32 %v7004_v40, %v4472_v58  ;;  %v9657_v16 = vmul.f32 %v7005_v17, %v4472_v58  ;;  %v9659_v14 = vmul.f32 %v7006_v7, %v4472_v58  ;;  %v9662_v29 = vmul.f32 %v7007_v37, %v4472_v58  ;;  %v6866_v17 = vld [vmem:[%s10807_s28 + $0x578] sm:$0xff]  ;;  %v6869_v40 = vld [vmem:[%s10807_s28 + $0x590] sm:$0xff] }
 0x97d   : > { %10879 = vst [vmem:[#allocation90_spill] sm:$0xff] %v9649_v33  ;;  %10880 = vst [vmem:[#allocation91_spill] sm:$0xff] %v9651_v46  ;;  %v9664_v47 = vmul.f32 %v7008_v23, %v4472_v58  ;;  %v9666_v62 = vmul.f32 %v7009_v54, %v4472_v58  ;;  %v9668_v8 = vmul.f32 %v7010_v35, %v4472_v58  ;;  %v6870_v37 = vld [vmem:[%s10807_s28 + $0x598] sm:$0xff]  ;;  %v10890_v35 = vld [vmem:[#allocation64_spill] sm:$0xff] }
 0x97e   : > { %10881 = vst [vmem:[#allocation92_spill] sm:$0xff] %v9653_v9  ;;  %10882 = vst [vmem:[#allocation93_spill] sm:$0xff] %v9655_v21  ;;  %v3959_v7 = vadd.f32 %v9413_v0, %v3924_v60  ;;  %v3960_v43 = vadd.f32 %v9415_v48, %v3925_v61  ;;  %v3961_v41 = vadd.f32 %v9417_v13, %v3926_v2  ;;  %v10891_v23 = vld [vmem:[#allocation65_spill] sm:$0xff]  ;;  %v10894_v0 = vld [vmem:[#allocation68_spill] sm:$0xff]  ;;  %v9691_v2 = vpop.permute.xlu1 %4086 }
 0x97f   : > { %10883 = vst [vmem:[#allocation94_spill] sm:$0xff] %v9657_v16  ;;  %10884 = vst [vmem:[#allocation95_spill] sm:$0xff] %v9659_v14  ;;  %v3962_v52 = vadd.f32 %v10889_v30, %v3927_v36  ;;  %v3963_v58 = vadd.f32 %v10890_v35, %v3928_v6  ;;  %v3964_v54 = vadd.f32 %v10891_v23, %v3929_v38  ;;  %v10895_v61 = vld [vmem:[#allocation69_spill] sm:$0xff]  ;;  %v6879_v21 = vld [vmem:[%s10807_s28 + $0x5e0] sm:$0xff] }
 0x980   : > { %10885 = vst [vmem:[#allocation96_spill] sm:$0xff] %v9662_v29  ;;  %10886 = vst [vmem:[#allocation97_spill] sm:$0xff] %v9664_v47  ;;  %v10893_v47 = vld [vmem:[#allocation67_spill] sm:$0xff]  ;;  %v3967_v48 = vadd.f32 %v10894_v0, %v3932_v45  ;;  %v3968_v13 = vadd.f32 %v10895_v61, %v3933_v5  ;;  %v3984_v36 = vmul.f32 %v6861_v18, %v9610_v25  ;;  %v6876_v0 = vld [vmem:[%s10807_s28 + $0x5c8] sm:$0xff] }
 0x981   : > { %10887 = vst [vmem:[#allocation98_spill] sm:$0xff] %v9666_v62  ;;  %10888 = vst [vmem:[#allocation99_spill] sm:$0xff] %v9668_v8  ;;  %v10892_v8 = vld [vmem:[#allocation66_spill] sm:$0xff]  ;;  %v3966_v29 = vadd.f32 %v10893_v47, %v3931_v20  ;;  %v3985_v60 = vmul.f32 %v6862_v28, %v9610_v25  ;;  %v3986_v6 = vmul.f32 %v6863_v44, %v9610_v25  ;;  %v6871_v45 = vld [vmem:[%s10807_s28 + $0x5a0] sm:$0xff] }
 0x982   : > { %v3965_v62 = vadd.f32 %v10892_v8, %v3930_v55  ;;  %v3987_v38 = vmul.f32 %v6864_v56, %v9610_v25  ;;  %v3988_v20 = vmul.f32 %v6865_v1, %v9610_v25  ;;  %v3989_v55 = vmul.f32 %v6866_v17, %v9610_v25  ;;  %v6872_v28 = vld [vmem:[%s10807_s28 + $0x5a8] sm:$0xff]  ;;  %v6873_v44 = vld [vmem:[%s10807_s28 + $0x5b0] sm:$0xff]  ;;  %v6874_v56 = vld [vmem:[%s10807_s28 + $0x5b8] sm:$0xff] }
 0x983   : > { %v3990_v5 = vmul.f32 %v6867_v42, %v9610_v25  ;;  %v3991_v18 = vmul.f32 %v6868_v10, %v9610_v25  ;;  %v3992_v47 = vmul.f32 %v6869_v40, %v9610_v25  ;;  %v3993_v8 = vmul.f32 %v6870_v37, %v9610_v25  ;;  %v6875_v17 = vld [vmem:[%s10807_s28 + $0x5c0] sm:$0xff]  ;;  %v6877_v61 = vld [vmem:[%s10807_s28 + $0x5d0] sm:$0xff]  ;;  %v6878_v40 = vld [vmem:[%s10807_s28 + $0x5d8] sm:$0xff] }
 0x984   : > { %v3994_v30 = vadd.f32 %v3984_v36, %v3959_v7  ;;  %v3995_v1 = vadd.f32 %v3985_v60, %v3960_v43  ;;  %v3996_v35 = vadd.f32 %v3986_v6, %v3961_v41  ;;  %v3997_v23 = vadd.f32 %v3987_v38, %v3962_v52  ;;  %v6880_v9 = vld [vmem:[%s10807_s28 + $0x5e8] sm:$0xff] }
 0x985   : > { %v3998_v42 = vadd.f32 %v3988_v20, %v3963_v58  ;;  %v3999_v14 = vadd.f32 %v3989_v55, %v3964_v54  ;;  %v4000_v10 = vadd.f32 %v3990_v5, %v3965_v62  ;;  %v4001_v16 = vadd.f32 %v3991_v18, %v3966_v29  ;;  %v9717_v29 = vpop.permute.xlu1 %4121  ;;  %v6891_v5 = vld [vmem:[%s10807_s28 + $0x640] sm:$0xff]  ;;  %v6892_v18 = vld [vmem:[%s10807_s28 + $0x648] sm:$0xff] }
 0x986   : > { %v4002_v25 = vadd.f32 %v3992_v47, %v3967_v48  ;;  %v4003_v37 = vadd.f32 %v3993_v8, %v3968_v13  ;;  %v4019_v46 = vmul.f32 %v6871_v45, %v9647_v27  ;;  %v4020_v33 = vmul.f32 %v6872_v28, %v9647_v27  ;;  %v6893_v8 = vld [vmem:[%s10807_s28 + $0x650] sm:$0xff]  ;;  %v6894_v28 = vld [vmem:[%s10807_s28 + $0x658] sm:$0xff] }
 0x987   : > { %v4021_v7 = vmul.f32 %v6873_v44, %v9647_v27  ;;  %v4022_v43 = vmul.f32 %v6874_v56, %v9647_v27  ;;  %v4023_v41 = vmul.f32 %v6875_v17, %v9647_v27  ;;  %v4024_v62 = vmul.f32 %v6876_v0, %v9647_v27  ;;  %v6897_v44 = vld [vmem:[%s10807_s28 + $0x670] sm:$0xff]  ;;  %v6898_v56 = vld [vmem:[%s10807_s28 + $0x678] sm:$0xff] }
 0x988   : > { %v4025_v52 = vmul.f32 %v6877_v61, %v9647_v27  ;;  %v4026_v58 = vmul.f32 %v6878_v40, %v9647_v27  ;;  %v4027_v54 = vmul.f32 %v6879_v21, %v9647_v27  ;;  %v4028_v48 = vmul.f32 %v6880_v9, %v9647_v27  ;;  %v6895_v27 = vld [vmem:[%s10807_s28 + $0x660] sm:$0xff]  ;;  %v6896_v9 = vld [vmem:[%s10807_s28 + $0x668] sm:$0xff] }
 0x989   : > { %v4029_v13 = vadd.f32 %v4019_v46, %v3994_v30  ;;  %v4030_v36 = vadd.f32 %v4020_v33, %v3995_v1  ;;  %v4031_v60 = vadd.f32 %v4021_v7, %v3996_v35  ;;  %v4032_v6 = vadd.f32 %v4022_v43, %v3997_v23  ;;  %v6899_v35 = vld [vmem:[%s10807_s28 + $0x680] sm:$0xff]  ;;  %v6900_v23 = vld [vmem:[%s10807_s28 + $0x688] sm:$0xff] }
 0x98a   : > { %v4033_v38 = vadd.f32 %v4023_v41, %v3998_v42  ;;  %v4034_v20 = vadd.f32 %v4024_v62, %v3999_v14  ;;  %v4035_v55 = vadd.f32 %v4025_v52, %v4000_v10  ;;  %v4036_v45 = vadd.f32 %v4026_v58, %v4001_v16  ;;  %v6901_v42 = vld [vmem:[%s10807_s28 + $0x690] sm:$0xff]  ;;  %v6902_v10 = vld [vmem:[%s10807_s28 + $0x698] sm:$0xff]  ;;  %v6903_v43 = vld [vmem:[%s10807_s28 + $0x6a0] sm:$0xff] }
 0x98b   : > { %v4037_v47 = vadd.f32 %v4027_v54, %v4002_v25  ;;  %v4038_v21 = vadd.f32 %v4028_v48, %v4003_v37  ;;  %v4064_v33 = vadd.f32 %v9449_v32, %v4029_v13  ;;  %v4065_v46 = vadd.f32 %v9451_v34, %v4030_v36  ;;  %v6904_v41 = vld [vmem:[%s10807_s28 + $0x6a8] sm:$0xff]  ;;  %v6905_v62 = vld [vmem:[%s10807_s28 + $0x6b0] sm:$0xff]  ;;  %v6906_v13 = vld [vmem:[%s10807_s28 + $0x6b8] sm:$0xff] }
 0x98c   : > { %v4066_v14 = vadd.f32 %v9453_v57, %v4031_v60  ;;  %v4067_v16 = vadd.f32 %v9455_v24, %v4032_v6  ;;  %v4068_v30 = vadd.f32 %v9457_v3, %v4033_v38  ;;  %v4069_v1 = vadd.f32 %v9459_v4, %v4034_v20  ;;  %v9743_v57 = vpop.permute.xlu1 %4191  ;;  %v6907_v36 = vld [vmem:[%s10807_s28 + $0x6c0] sm:$0xff]  ;;  %v6908_v60 = vld [vmem:[%s10807_s28 + $0x6c8] sm:$0xff] }
 0x98d   : > { %v4070_v17 = vadd.f32 %v9462_v39, %v4035_v55  ;;  %v4071_v32 = vadd.f32 %v9464_v59, %v4036_v45  ;;  %v4072_v34 = vadd.f32 %v9466_v11, %v4037_v47  ;;  %v4073_v0 = vadd.f32 %v9468_v49, %v4038_v21  ;;  %v6909_v45 = vld [vmem:[%s10807_s28 + $0x6d0] sm:$0xff] }
 0x98e   : > { %v4089_v24 = vmul.f32 %v6891_v5, %v9691_v2  ;;  %v4090_v3 = vmul.f32 %v6892_v18, %v9691_v2  ;;  %v4091_v4 = vmul.f32 %v6893_v8, %v9691_v2  ;;  %v4092_v61 = vmul.f32 %v6894_v28, %v9691_v2 }
 0x98f   : > { %v4093_v39 = vmul.f32 %v6895_v27, %v9691_v2  ;;  %v4094_v59 = vmul.f32 %v6896_v9, %v9691_v2  ;;  %v4095_v11 = vmul.f32 %v6897_v44, %v9691_v2  ;;  %v4096_v49 = vmul.f32 %v6898_v56, %v9691_v2 }
 0x990   : > { %v4097_v40 = vmul.f32 %v6899_v35, %v9691_v2  ;;  %v4098_v25 = vmul.f32 %v6900_v23, %v9691_v2  ;;  %v4099_v37 = vadd.f32 %v4089_v24, %v4064_v33  ;;  %v4100_v7 = vadd.f32 %v4090_v3, %v4065_v46  ;;  %v6910_v2 = vld [vmem:[%s10807_s28 + $0x6d8] sm:$0xff]  ;;  %v9769_v8 = vpop.permute.xlu1 %4226  ;;  %v6921_v23 = vld [vmem:[%s10807_s28 + $0x730] sm:$0xff]  ;;  %v6923_v3 = vld [vmem:[%s10807_s28 + $0x740] sm:$0xff] }
 0x991   : > { %v4101_v52 = vadd.f32 %v4091_v4, %v4066_v14  ;;  %v4102_v58 = vadd.f32 %v4092_v61, %v4067_v16  ;;  %v4103_v54 = vadd.f32 %v4093_v39, %v4068_v30  ;;  %v4104_v48 = vadd.f32 %v4094_v59, %v4069_v1  ;;  %v6922_v24 = vld [vmem:[%s10807_s28 + $0x738] sm:$0xff]  ;;  %v6924_v4 = vld [vmem:[%s10807_s28 + $0x748] sm:$0xff]  ;;  %v6927_v39 = vld [vmem:[%s10807_s28 + $0x760] sm:$0xff] }
 0x992   : > { %v4105_v6 = vadd.f32 %v4095_v11, %v4070_v17  ;;  %v4106_v38 = vadd.f32 %v4096_v49, %v4071_v32  ;;  %v4107_v20 = vadd.f32 %v4097_v40, %v4072_v34  ;;  %v4108_v55 = vadd.f32 %v4098_v25, %v4073_v0  ;;  %v6926_v61 = vld [vmem:[%s10807_s28 + $0x758] sm:$0xff]  ;;  %v6928_v25 = vld [vmem:[%s10807_s28 + $0x768] sm:$0xff] }
 0x993   : > { %v4124_v5 = vmul.f32 %v6901_v42, %v9717_v29  ;;  %v4125_v18 = vmul.f32 %v6902_v10, %v9717_v29  ;;  %v4126_v47 = vmul.f32 %v6903_v43, %v9717_v29  ;;  %v4127_v21 = vmul.f32 %v6904_v41, %v9717_v29  ;;  %v10896_v49 = vld [vmem:[#allocation70_spill] sm:$0xff]  ;;  %v10897_v10 = vld [vmem:[#allocation71_spill] sm:$0xff]  ;;  %v10898_v43 = vld [vmem:[#allocation72_spill] sm:$0xff] }
 0x994   : > { %v4128_v28 = vmul.f32 %v6905_v62, %v9717_v29  ;;  %v4129_v27 = vmul.f32 %v6906_v13, %v9717_v29  ;;  %v4130_v33 = vmul.f32 %v6907_v36, %v9717_v29  ;;  %v4131_v46 = vmul.f32 %v6908_v60, %v9717_v29  ;;  %v10899_v62 = vld [vmem:[#allocation73_spill] sm:$0xff] }
 0x995   : > { %v4132_v9 = vmul.f32 %v6909_v45, %v9717_v29  ;;  %v4133_v44 = vmul.f32 %v6910_v2, %v9717_v29  ;;  %v4134_v56 = vadd.f32 %v4124_v5, %v4099_v37  ;;  %v4135_v14 = vadd.f32 %v4125_v18, %v4100_v7  ;;  %v6925_v29 = vld [vmem:[%s10807_s28 + $0x750] sm:$0xff]  ;;  %v6930_v7 = vld [vmem:[%s10807_s28 + $0x778] sm:$0xff]  ;;  %v6931_v18 = vld [vmem:[%s10807_s28 + $0x780] sm:$0xff] }
 0x996   : > { %v4136_v16 = vadd.f32 %v4126_v47, %v4101_v52  ;;  %v4137_v30 = vadd.f32 %v4127_v21, %v4102_v58  ;;  %v4138_v1 = vadd.f32 %v4128_v28, %v4103_v54  ;;  %v4139_v35 = vadd.f32 %v4129_v27, %v4104_v48  ;;  %v6929_v37 = vld [vmem:[%s10807_s28 + $0x770] sm:$0xff]  ;;  %v10900_v58 = vld [vmem:[#allocation74_spill] sm:$0xff]  ;;  %v10901_v48 = vld [vmem:[#allocation75_spill] sm:$0xff] }
 0x997   : > { %v4140_v17 = vadd.f32 %v4130_v33, %v4105_v6  ;;  %v4141_v32 = vadd.f32 %v4131_v46, %v4106_v38  ;;  %v4142_v34 = vadd.f32 %v4132_v9, %v4107_v20  ;;  %v4143_v0 = vadd.f32 %v4133_v44, %v4108_v55  ;;  %v10903_v60 = vld [vmem:[#allocation77_spill] sm:$0xff]  ;;  %v6932_v33 = vld [vmem:[%s10807_s28 + $0x788] sm:$0xff]  ;;  %v6934_v9 = vld [vmem:[%s10807_s28 + $0x798] sm:$0xff] }
 0x998   : > { %v4169_v59 = vadd.f32 %v9501_v53, %v4134_v56  ;;  %v4170_v11 = vadd.f32 %v9503_v15, %v4135_v14  ;;  %v4171_v42 = vadd.f32 %v10896_v49, %v4136_v16  ;;  %v4172_v40 = vadd.f32 %v10897_v10, %v4137_v30  ;;  %v9795_v53 = vpop.permute.xlu1 %4296  ;;  %v10902_v15 = vld [vmem:[#allocation76_spill] sm:$0xff]  ;;  %v6933_v46 = vld [vmem:[%s10807_s28 + $0x790] sm:$0xff]  ;;  %v6935_v30 = vld [vmem:[%s10807_s28 + $0x7a0] sm:$0xff] }
 0x999   : > { %v4173_v41 = vadd.f32 %v10898_v43, %v4138_v1  ;;  %v4174_v52 = vadd.f32 %v10899_v62, %v4139_v35  ;;  %v4175_v54 = vadd.f32 %v10900_v58, %v4140_v17  ;;  %v4176_v13 = vadd.f32 %v10901_v48, %v4141_v32  ;;  %v6936_v1 = vld [vmem:[%s10807_s28 + $0x7a8] sm:$0xff]  ;;  %v6937_v35 = vld [vmem:[%s10807_s28 + $0x7b0] sm:$0xff] }
 0x99a   : > { %v4177_v36 = vadd.f32 %v10902_v15, %v4142_v34  ;;  %v4178_v6 = vadd.f32 %v10903_v60, %v4143_v0  ;;  %v4194_v38 = vmul.f32 %v6921_v23, %v9743_v57  ;;  %v4195_v20 = vmul.f32 %v6922_v24, %v9743_v57  ;;  %v6938_v0 = vld [vmem:[%s10807_s28 + $0x7b8] sm:$0xff]  ;;  %v6939_v24 = vld [vmem:[%s10807_s28 + $0x7c0] sm:$0xff]  ;;  %v6952_v15 = vld [vmem:[%s10807_s28 + $0x828] sm:$0xff] }
 0x99b   : > { %v4196_v55 = vmul.f32 %v6923_v3, %v9743_v57  ;;  %v4197_v45 = vmul.f32 %v6924_v4, %v9743_v57  ;;  %v4198_v2 = vmul.f32 %v6925_v29, %v9743_v57  ;;  %v4199_v5 = vmul.f32 %v6926_v61, %v9743_v57  ;;  %v6940_v3 = vld [vmem:[%s10807_s28 + $0x7c8] sm:$0xff] }
 0x99c   : > { %v4200_v47 = vmul.f32 %v6927_v39, %v9743_v57  ;;  %v4201_v21 = vmul.f32 %v6928_v25, %v9743_v57  ;;  %v4202_v28 = vmul.f32 %v6929_v37, %v9743_v57  ;;  %v4203_v27 = vmul.f32 %v6930_v7, %v9743_v57  ;;  %v9821_v39 = vpop.permute.xlu1 %4331 }
 0x99d   : > { %v4204_v44 = vadd.f32 %v4194_v38, %v4169_v59  ;;  %v4205_v56 = vadd.f32 %v4195_v20, %v4170_v11  ;;  %v4206_v14 = vadd.f32 %v4196_v55, %v4171_v42  ;;  %v4207_v16 = vadd.f32 %v4197_v45, %v4172_v40  ;;  %v6954_v38 = vld [vmem:[%s10807_s28 + $0x838] sm:$0xff]  ;;  %v6956_v45 = vld [vmem:[%s10807_s28 + $0x848] sm:$0xff] }
 0x99e   : > { %v4208_v23 = vadd.f32 %v4198_v2, %v4173_v41  ;;  %v4209_v17 = vadd.f32 %v4199_v5, %v4174_v52  ;;  %v4210_v32 = vadd.f32 %v4200_v47, %v4175_v54  ;;  %v4211_v34 = vadd.f32 %v4201_v21, %v4176_v13  ;;  %v6951_v13 = vld [vmem:[%s10807_s28 + $0x820] sm:$0xff]  ;;  %v6957_v2 = vld [vmem:[%s10807_s28 + $0x850] sm:$0xff]  ;;  %v6958_v5 = vld [vmem:[%s10807_s28 + $0x858] sm:$0xff] }
 0x99f   : > { %v4212_v57 = vadd.f32 %v4202_v28, %v4177_v36  ;;  %v4213_v4 = vadd.f32 %v4203_v27, %v4178_v6  ;;  %v4229_v29 = vmul.f32 %v6931_v18, %v9769_v8  ;;  %v4230_v61 = vmul.f32 %v6932_v33, %v9769_v8  ;;  %v6953_v6 = vld [vmem:[%s10807_s28 + $0x830] sm:$0xff]  ;;  %v10904_v28 = vld [vmem:[#allocation78_spill] sm:$0xff] }
 0x9a0   : > { %v4231_v59 = vmul.f32 %v6933_v46, %v9769_v8  ;;  %v4232_v11 = vmul.f32 %v6934_v9, %v9769_v8  ;;  %v4233_v49 = vmul.f32 %v6935_v30, %v9769_v8  ;;  %v4234_v42 = vmul.f32 %v6936_v1, %v9769_v8  ;;  %v9845_v33 = vpop.permute.xlu1 %4401  ;;  %v6959_v46 = vld [vmem:[%s10807_s28 + $0x860] sm:$0xff]  ;;  %v6960_v9 = vld [vmem:[%s10807_s28 + $0x868] sm:$0xff]  ;;  %v10908_v30 = vld [vmem:[#allocation82_spill] sm:$0xff] }
 0x9a1   : > { %v4235_v10 = vmul.f32 %v6937_v35, %v9769_v8  ;;  %v4236_v40 = vmul.f32 %v6938_v0, %v9769_v8  ;;  %v4237_v25 = vmul.f32 %v6939_v24, %v9769_v8  ;;  %v4238_v37 = vmul.f32 %v6940_v3, %v9769_v8  ;;  %v6955_v8 = vld [vmem:[%s10807_s28 + $0x840] sm:$0xff]  ;;  %v6961_v0 = vld [vmem:[%s10807_s28 + $0x870] sm:$0xff]  ;;  %v6962_v24 = vld [vmem:[%s10807_s28 + $0x878] sm:$0xff] }
 0x9a2   : > { %v4239_v7 = vadd.f32 %v4229_v29, %v4204_v44  ;;  %v4240_v43 = vadd.f32 %v4230_v61, %v4205_v56  ;;  %v4241_v41 = vadd.f32 %v4231_v59, %v4206_v14  ;;  %v4242_v62 = vadd.f32 %v4232_v11, %v4207_v16  ;;  %v10907_v14 = vld [vmem:[#allocation81_spill] sm:$0xff]  ;;  %v6963_v61 = vld [vmem:[%s10807_s28 + $0x880] sm:$0xff]  ;;  %v6964_v59 = vld [vmem:[%s10807_s28 + $0x888] sm:$0xff] }
 0x9a3   : > { %v4243_v52 = vadd.f32 %v4233_v49, %v4208_v23  ;;  %v4244_v58 = vadd.f32 %v4234_v42, %v4209_v17  ;;  %v4245_v54 = vadd.f32 %v4235_v10, %v4210_v32  ;;  %v4246_v48 = vadd.f32 %v4236_v40, %v4211_v34  ;;  %v6965_v11 = vld [vmem:[%s10807_s28 + $0x890] sm:$0xff] }
 0x9a4   : > { %v4247_v36 = vadd.f32 %v4237_v25, %v4212_v57  ;;  %v4248_v60 = vadd.f32 %v4238_v37, %v4213_v4  ;;  %v4274_v20 = vadd.f32 %v9539_v63, %v4239_v7  ;;  %v4275_v55 = vadd.f32 %v9541_v19, %v4240_v43  ;;  %v10905_v63 = vld [vmem:[#allocation79_spill] sm:$0xff]  ;;  %v10906_v19 = vld [vmem:[#allocation80_spill] sm:$0xff]  ;;  %v6966_v25 = vld [vmem:[%s10807_s28 + $0x898] sm:$0xff] }
 0x9a5   : > { %v4276_v18 = vadd.f32 %v9543_v51, %v4241_v41  ;;  %v4277_v47 = vadd.f32 %v9545_v50, %v4242_v62  ;;  %v4278_v21 = vadd.f32 %v9547_v31, %v4243_v52  ;;  %v4279_v27 = vadd.f32 %v10904_v28, %v4244_v58  ;;  %v6967_v37 = vld [vmem:[%s10807_s28 + $0x8a0] sm:$0xff]  ;;  %v6968_v7 = vld [vmem:[%s10807_s28 + $0x8a8] sm:$0xff]  ;;  %v6969_v58 = vld [vmem:[%s10807_s28 + $0x8b0] sm:$0xff] }
 0x9a6   : > { %v4280_v44 = vadd.f32 %v10905_v63, %v4245_v54  ;;  %v4281_v56 = vadd.f32 %v10906_v19, %v4246_v48  ;;  %v4282_v16 = vadd.f32 %v10907_v14, %v4247_v36  ;;  %v4283_v51 = vadd.f32 %v10908_v30, %v4248_v60  ;;  %v9873_v54 = vpop.permute.xlu1 %4436  ;;  %v6981_v28 = vld [vmem:[%s10807_s28 + $0x910] sm:$0xff]  ;;  %v6983_v19 = vld [vmem:[%s10807_s28 + $0x920] sm:$0xff]  ;;  %v6986_v14 = vld [vmem:[%s10807_s28 + $0x938] sm:$0xff] }
 0x9a7   : > { %v4299_v50 = vmul.f32 %v6951_v13, %v9795_v53  ;;  %v4300_v31 = vmul.f32 %v6952_v15, %v9795_v53  ;;  %v4301_v1 = vmul.f32 %v6953_v6, %v9795_v53  ;;  %v4302_v35 = vmul.f32 %v6954_v38, %v9795_v53 }
 0x9a8   : > { %v4303_v23 = vmul.f32 %v6955_v8, %v9795_v53  ;;  %v4304_v17 = vmul.f32 %v6956_v45, %v9795_v53  ;;  %v4305_v32 = vmul.f32 %v6957_v2, %v9795_v53  ;;  %v4306_v34 = vmul.f32 %v6958_v5, %v9795_v53 }
 0x9a9   : > { %v4307_v3 = vmul.f32 %v6959_v46, %v9795_v53  ;;  %v4308_v57 = vmul.f32 %v6960_v9, %v9795_v53  ;;  %v4309_v4 = vadd.f32 %v4299_v50, %v4274_v20  ;;  %v4310_v29 = vadd.f32 %v4300_v31, %v4275_v55  ;;  %v6970_v53 = vld [vmem:[%s10807_s28 + $0x8b8] sm:$0xff]  ;;  %v10909_v31 = vld [vmem:[#allocation83_spill] sm:$0xff] }
 0x9aa   : > { %v4311_v49 = vadd.f32 %v4301_v1, %v4276_v18  ;;  %v4312_v42 = vadd.f32 %v4302_v35, %v4277_v47  ;;  %v4313_v10 = vadd.f32 %v4303_v23, %v4278_v21  ;;  %v4314_v40 = vadd.f32 %v4304_v17, %v4279_v27  ;;  %v9896_v35 = vpop.permute.xlu1 %4652  ;;  %v6988_v23 = vld [vmem:[%s10807_s28 + $0x948] sm:$0xff]  ;;  %v6989_v17 = vld [vmem:[%s10807_s28 + $0x950] sm:$0xff] }
 0x9ab   : > { %v4315_v43 = vadd.f32 %v4305_v32, %v4280_v44  ;;  %v4316_v41 = vadd.f32 %v4306_v34, %v4281_v56  ;;  %v4317_v62 = vadd.f32 %v4307_v3, %v4282_v16  ;;  %v4318_v52 = vadd.f32 %v4308_v57, %v4283_v51  ;;  %v6982_v44 = vld [vmem:[%s10807_s28 + $0x918] sm:$0xff]  ;;  %v6984_v56 = vld [vmem:[%s10807_s28 + $0x928] sm:$0xff]  ;;  %v6987_v16 = vld [vmem:[%s10807_s28 + $0x940] sm:$0xff] }
 0x9ac   : > { %v4334_v48 = vmul.f32 %v6961_v0, %v9821_v39  ;;  %v4335_v13 = vmul.f32 %v6962_v24, %v9821_v39  ;;  %v4336_v15 = vmul.f32 %v6963_v61, %v9821_v39  ;;  %v4337_v36 = vmul.f32 %v6964_v59, %v9821_v39  ;;  %v6990_v32 = vld [vmem:[%s10807_s28 + $0x958] sm:$0xff]  ;;  %v10910_v34 = vld [vmem:[#allocation84_spill] sm:$0xff]  ;;  %v10911_v24 = vld [vmem:[#allocation85_spill] sm:$0xff] }
 0x9ad   : > { %v4338_v60 = vmul.f32 %v6965_v11, %v9821_v39  ;;  %v4339_v6 = vmul.f32 %v6966_v25, %v9821_v39  ;;  %v4340_v38 = vmul.f32 %v6967_v37, %v9821_v39  ;;  %v4341_v8 = vmul.f32 %v6968_v7, %v9821_v39  ;;  %v10912_v57 = vld [vmem:[#allocation86_spill] sm:$0xff]  ;;  %v10915_v61 = vld [vmem:[#allocation89_spill] sm:$0xff]  ;;  %v6991_v37 = vld [vmem:[%s10807_s28 + $0x960] sm:$0xff] }
 0x9ae   : > { %v4342_v20 = vmul.f32 %v6969_v58, %v9821_v39  ;;  %v4343_v55 = vmul.f32 %v6970_v53, %v9821_v39  ;;  %v4344_v45 = vadd.f32 %v4334_v48, %v4309_v4  ;;  %v4345_v2 = vadd.f32 %v4335_v13, %v4310_v29  ;;  %v6985_v39 = vld [vmem:[%s10807_s28 + $0x930] sm:$0xff]  ;;  %v10914_v29 = vld [vmem:[#allocation88_spill] sm:$0xff]  ;;  %v6994_v53 = vld [vmem:[%s10807_s28 + $0x978] sm:$0xff] }
 0x9af   : > { %v4346_v5 = vadd.f32 %v4336_v15, %v4311_v49  ;;  %v4347_v18 = vadd.f32 %v4337_v36, %v4312_v42  ;;  %v4348_v47 = vadd.f32 %v4338_v60, %v4313_v10  ;;  %v4349_v21 = vadd.f32 %v4339_v6, %v4314_v40  ;;  %v6993_v58 = vld [vmem:[%s10807_s28 + $0x970] sm:$0xff]  ;;  %v6995_v60 = vld [vmem:[%s10807_s28 + $0x980] sm:$0xff]  ;;  %v6996_v6 = vld [vmem:[%s10807_s28 + $0x988] sm:$0xff] }
 0x9b0   : > { %v4350_v27 = vadd.f32 %v4340_v38, %v4315_v43  ;;  %v4351_v46 = vadd.f32 %v4341_v8, %v4316_v41  ;;  %v4352_v9 = vadd.f32 %v4342_v20, %v4317_v62  ;;  %v4353_v63 = vadd.f32 %v4343_v55, %v4318_v52  ;;  %v6992_v52 = vld [vmem:[%s10807_s28 + $0x968] sm:$0xff]  ;;  %v6997_v38 = vld [vmem:[%s10807_s28 + $0x990] sm:$0xff] }
 0x9b1   : > { %v4379_v30 = vadd.f32 %v9599_v22, %v4344_v45  ;;  %v4380_v51 = vadd.f32 %v9601_v26, %v4345_v2  ;;  %v4381_v50 = vadd.f32 %v9603_v12, %v4346_v5  ;;  %v4382_v1 = vadd.f32 %v10909_v31, %v4347_v18  ;;  %v10913_v22 = vld [vmem:[#allocation87_spill] sm:$0xff]  ;;  %v6998_v2 = vld [vmem:[%s10807_s28 + $0x998] sm:$0xff]  ;;  %v7000_v18 = vld [vmem:[%s10807_s28 + $0x9a8] sm:$0xff] }
 0x9b2   : > { %v4383_v0 = vadd.f32 %v10910_v34, %v4348_v47  ;;  %v4384_v3 = vadd.f32 %v10911_v24, %v4349_v21  ;;  %v4385_v4 = vadd.f32 %v10912_v57, %v4350_v27  ;;  %v4386_v26 = vadd.f32 %v10913_v22, %v4351_v46  ;;  %v6999_v5 = vld [vmem:[%s10807_s28 + $0x9a0] sm:$0xff]  ;;  %v10918_v22 = vld [vmem:[#allocation92_spill] sm:$0xff] }
 0x9b3   : > { %v4387_v12 = vadd.f32 %v10914_v29, %v4352_v9  ;;  %v4388_v59 = vadd.f32 %v10915_v61, %v4353_v63  ;;  %v4404_v11 = vmul.f32 %v6981_v28, %v9845_v33  ;;  %v4405_v49 = vmul.f32 %v6982_v44, %v9845_v33  ;;  %v10919_v29 = vld [vmem:[#allocation93_spill] sm:$0xff] }
 0x9b4   : > { %v4406_v42 = vmul.f32 %v6983_v19, %v9845_v33  ;;  %v4407_v10 = vmul.f32 %v6984_v56, %v9845_v33  ;;  %v4408_v40 = vmul.f32 %v6985_v39, %v9845_v33  ;;  %v4409_v25 = vmul.f32 %v6986_v14, %v9845_v33 }
 0x9b5   : > { %v4410_v7 = vmul.f32 %v6987_v16, %v9845_v33  ;;  %v4411_v43 = vmul.f32 %v6988_v23, %v9845_v33  ;;  %v4412_v41 = vmul.f32 %v6989_v17, %v9845_v33  ;;  %v4413_v62 = vmul.f32 %v6990_v32, %v9845_v33  ;;  %v9927_v33 = vpop.permute.xlu1 %4722 }
 0x9b6   : > { %v4414_v48 = vadd.f32 %v4404_v11, %v4379_v30  ;;  %v4415_v13 = vadd.f32 %v4405_v49, %v4380_v51  ;;  %v4416_v15 = vadd.f32 %v4406_v42, %v4381_v50  ;;  %v4417_v36 = vadd.f32 %v4407_v10, %v4382_v1  ;;  %v10922_v49 = vld [vmem:[#allocation96_spill] sm:$0xff]  ;;  %v10923_v10 = vld [vmem:[#allocation97_spill] sm:$0xff] }
 0x9b7   : > { %v4418_v8 = vadd.f32 %v4408_v40, %v4383_v0  ;;  %v4419_v20 = vadd.f32 %v4409_v25, %v4384_v3  ;;  %v4420_v55 = vadd.f32 %v4410_v7, %v4385_v4  ;;  %v4421_v45 = vadd.f32 %v4411_v43, %v4386_v26  ;;  %v10916_v0 = vld [vmem:[#allocation90_spill] sm:$0xff]  ;;  %v10917_v3 = vld [vmem:[#allocation91_spill] sm:$0xff] }
 0x9b8   : > { %v4422_v47 = vadd.f32 %v4412_v41, %v4387_v12  ;;  %v4423_v21 = vadd.f32 %v4413_v62, %v4388_v59  ;;  %v4439_v28 = vmul.f32 %v6991_v37, %v9873_v54  ;;  %v4440_v27 = vmul.f32 %v6992_v52, %v9873_v54  ;;  %v10920_v12 = vld [vmem:[#allocation94_spill] sm:$0xff]  ;;  %v10921_v59 = vld [vmem:[#allocation95_spill] sm:$0xff]  ;;  %v10926_v41 = vld [vmem:[#allocation28_spill] sm:$0xff] }
 0x9b9   : > { %v4441_v46 = vmul.f32 %v6993_v58, %v9873_v54  ;;  %v4442_v9 = vmul.f32 %v6994_v53, %v9873_v54  ;;  %v4443_v63 = vmul.f32 %v6995_v60, %v9873_v54  ;;  %v4444_v44 = vmul.f32 %v6996_v6, %v9873_v54  ;;  %v9941_v4 = vpop.permute.xlu1 %4757  ;;  %v10924_v25 = vld [vmem:[#allocation98_spill] sm:$0xff]  ;;  %v10925_v7 = vld [vmem:[#allocation99_spill] sm:$0xff]  ;;  %v10927_v52 = vld [vmem:[#allocation29_spill] sm:$0xff] }
 0x9ba   : > { %v4445_v19 = vmul.f32 %v6997_v38, %v9873_v54  ;;  %v4446_v56 = vmul.f32 %v6998_v2, %v9873_v54  ;;  %v4447_v39 = vmul.f32 %v6999_v5, %v9873_v54  ;;  %v4448_v14 = vmul.f32 %v7000_v18, %v9873_v54  ;;  %v10928_v53 = vld [vmem:[#allocation30_spill] sm:$0xff]  ;;  %v10931_v6 = vld [vmem:[#allocation33_spill] sm:$0xff]  ;;  %v7041_v2 = vld [vmem:[%s10807_s28 + $0xae8] sm:$0xff] }
 0x9bb   : > { %v4449_v16 = vadd.f32 %v4439_v28, %v4414_v48  ;;  %v4450_v30 = vadd.f32 %v4440_v27, %v4415_v13  ;;  %v4451_v51 = vadd.f32 %v4441_v46, %v4416_v15  ;;  %v4452_v50 = vadd.f32 %v4442_v9, %v4417_v36  ;;  %v10929_v13 = vld [vmem:[#allocation31_spill] sm:$0xff]  ;;  %v10930_v36 = vld [vmem:[#allocation32_spill] sm:$0xff] }
 0x9bc   : > { %v4453_v31 = vadd.f32 %v4443_v63, %v4418_v8  ;;  %v4454_v1 = vadd.f32 %v4444_v44, %v4419_v20  ;;  %v4455_v23 = vadd.f32 %v4445_v19, %v4420_v55  ;;  %v4456_v17 = vadd.f32 %v4446_v56, %v4421_v45  ;;  %v10932_v8 = vld [vmem:[#allocation34_spill] sm:$0xff]  ;;  %v10933_v55 = vld [vmem:[#allocation35_spill] sm:$0xff]  ;;  %v10934_v5 = vld [vmem:[#allocation36_spill] sm:$0xff] }
 0x9bd   : > { %v4457_v32 = vadd.f32 %v4447_v39, %v4422_v47  ;;  %v4458_v34 = vadd.f32 %v4448_v14, %v4423_v21  ;;  %v4484_v24 = vadd.f32 %v10916_v0, %v4449_v16  ;;  %v4485_v57 = vadd.f32 %v10917_v3, %v4450_v30  ;;  %v10935_v47 = vld [vmem:[#allocation38_spill] sm:$0xff]  ;;  %v10936_v28 = vld [vmem:[#allocation39_spill] sm:$0xff]  ;;  %v10937_v46 = vld [vmem:[#allocation40_spill] sm:$0xff] }
 0x9be   : > { %v4486_v26 = vadd.f32 %v10918_v22, %v4451_v51  ;;  %v4487_v54 = vadd.f32 %v10919_v29, %v4452_v50  ;;  %v4488_v61 = vadd.f32 %v10920_v12, %v4453_v31  ;;  %v4489_v11 = vadd.f32 %v10921_v59, %v4454_v1  ;;  %v10938_v63 = vld [vmem:[#allocation41_spill] sm:$0xff]  ;;  %v10939_v19 = vld [vmem:[#allocation42_spill] sm:$0xff]  ;;  %v10940_v39 = vld [vmem:[#allocation43_spill] sm:$0xff]  ;;  %v9968_v51 = vpop.permute.xlu1 %4827 }
 0x9bf   : > { %v4490_v42 = vadd.f32 %v10922_v49, %v4455_v23  ;;  %v4491_v40 = vadd.f32 %v10923_v10, %v4456_v17  ;;  %v4492_v37 = vadd.f32 %v10924_v25, %v4457_v32  ;;  %v4493_v43 = vadd.f32 %v10925_v7, %v4458_v34  ;;  %v10941_v16 = vld [vmem:[#allocation44_spill] sm:$0xff]  ;;  %v7046_v50 = vld [vmem:[%s10807_s28 + $0xb10] sm:$0xff]  ;;  %v7047_v31 = vld [vmem:[%s10807_s28 + $0xb18] sm:$0xff] }
 0x9c0   : > { %v4525_v62 = vadd.f32 %v10926_v41, %v4484_v24  ;;  %v4526_v58 = vadd.f32 %v10927_v52, %v4485_v57  ;;  %v4527_v48 = vadd.f32 %v10928_v53, %v4486_v26  ;;  %v4528_v15 = vadd.f32 %v10929_v13, %v4487_v54  ;;  %v10942_v1 = vld [vmem:[#allocation45_spill] sm:$0xff]  ;;  %v10943_v17 = vld [vmem:[#allocation46_spill] sm:$0xff]  ;;  %v10944_v34 = vld [vmem:[#allocation47_spill] sm:$0xff] }
 0x9c1   : > { %v4529_v60 = vadd.f32 %v10930_v36, %v4488_v61  ;;  %v4530_v38 = vadd.f32 %v10931_v6, %v4489_v11  ;;  %v4531_v20 = vadd.f32 %v10932_v8, %v4490_v42  ;;  %v4532_v45 = vadd.f32 %v10933_v55, %v4491_v40  ;;  %v10945_v24 = vld [vmem:[#allocation48_spill] sm:$0xff]  ;;  %v7048_v57 = vld [vmem:[%s10807_s28 + $0xb20] sm:$0xff]  ;;  %v7050_v26 = vld [vmem:[%s10807_s28 + $0xb30] sm:$0xff] }
 0x9c2   : > { %v4533_v18 = vadd.f32 %v10934_v5, %v4492_v37  ;;  %v4534_v21 = vadd.f32 %v10935_v47, %v4493_v43  ;;  %v4560_v27 = vadd.f32 %v10936_v28, %v4525_v62  ;;  %v4561_v9 = vadd.f32 %v10937_v46, %v4526_v58  ;;  %v7049_v22 = vld [vmem:[%s10807_s28 + $0xb28] sm:$0xff]  ;;  %v10946_v29 = vld [vmem:[#allocation50_spill] sm:$0xff]  ;;  %v10948_v59 = vld [vmem:[#allocation55_spill] sm:$0xff] }
 0x9c3   : > { %v4562_v44 = vadd.f32 %v10938_v63, %v4527_v48  ;;  %v4563_v56 = vadd.f32 %v10939_v19, %v4528_v15  ;;  %v4564_v14 = vadd.f32 %v10940_v39, %v4529_v60  ;;  %v4565_v30 = vadd.f32 %v10941_v16, %v4530_v38  ;;  %v10947_v12 = vld [vmem:[#allocation54_spill] sm:$0xff]  ;;  %v10949_v49 = vld [vmem:[#allocation56_spill] sm:$0xff]  ;;  %v10950_v40 = vld [vmem:[#allocation57_spill] sm:$0xff]  ;;  %v10005_v19 = vpop.permute.xlu1 %4862 }
 0x9c4   : > { %v4566_v23 = vadd.f32 %v10942_v1, %v4531_v20  ;;  %v4567_v32 = vadd.f32 %v10943_v17, %v4532_v45  ;;  %v4568_v0 = vadd.f32 %v10944_v34, %v4533_v18  ;;  %v4569_v3 = vadd.f32 %v10945_v24, %v4534_v21  ;;  %v7051_v10 = vld [vmem:[%s10807_s28 + $0xb38] sm:$0xff]  ;;  %v10952_v43 = vld [vmem:[#allocation59_spill] sm:$0xff]  ;;  %v10953_v62 = vld [vmem:[#allocation60_spill] sm:$0xff] }
 0x9c5   : > { %v4594_v54 = vmul.f32 %v7041_v2, %v10946_v29  ;;  %v4595_v61 = vadd.f32 %v10947_v12, %v4560_v27  ;;  %v4596_v11 = vadd.f32 %v10948_v59, %v4561_v9  ;;  %v4597_v42 = vadd.f32 %v10949_v49, %v4562_v44  ;;  %v10951_v37 = vld [vmem:[#allocation58_spill] sm:$0xff]  ;;  %v10954_v58 = vld [vmem:[#allocation37_spill] sm:$0xff]  ;;  %v7052_v55 = vld [vmem:[%s10807_s28 + $0xb40] sm:$0xff] }
 0x9c6   : > { %v4598_v25 = vadd.f32 %v10950_v40, %v4563_v56  ;;  %v4599_v7 = vadd.f32 %v10951_v37, %v4564_v14  ;;  %v4600_v41 = vadd.f32 %v10952_v43, %v4565_v30  ;;  %v4601_v52 = vadd.f32 %v10953_v62, %v4566_v23  ;;  %v10955_v48 = vld [vmem:[#allocation61_spill] sm:$0xff]  ;;  %v10956_v15 = vld [vmem:[#allocation62_spill] sm:$0xff]  ;;  %v7053_v45 = vld [vmem:[%s10807_s28 + $0xb48] sm:$0xff] }
 0x9c7   : > { %v4624_v53 = vmul.f32 %v7046_v50, %v10954_v58  ;;  %v4602_v13 = vadd.f32 %v10955_v48, %v4567_v32  ;;  %v4603_v36 = vadd.f32 %v10956_v15, %v4568_v0  ;;  %v4604_v60 = vadd.f32 %v4594_v54, %v4569_v3  ;;  %v7054_v2 = vld [vmem:[%s10807_s28 + $0xb50] sm:$0xff]  ;;  %v7055_v18 = vld [vmem:[%s10807_s28 + $0xb58] sm:$0xff]  ;;  %v7056_v47 = vld [vmem:[%s10807_s28 + $0xb60] sm:$0xff] }
 0x9c8   : > { %v4625_v6 = vmul.f32 %v7047_v31, %v10954_v58  ;;  %v4626_v38 = vmul.f32 %v7048_v57, %v10954_v58  ;;  %v4627_v8 = vmul.f32 %v7049_v22, %v10954_v58  ;;  %v4628_v20 = vmul.f32 %v7050_v26, %v10954_v58  ;;  %v7057_v21 = vld [vmem:[%s10807_s28 + $0xb68] sm:$0xff]  ;;  %v10957_v28 = vld [vmem:[#allocation49_spill] sm:$0xff]  ;;  %v10958_v46 = vld [vmem:[#allocation51_spill] sm:$0xff] }
 0x9c9   : > { %v4629_v5 = vmul.f32 %v7051_v10, %v10954_v58  ;;  %v4630_v27 = vadd.f32 %v10957_v28, %v4595_v61  ;;  %v4631_v9 = vadd.f32 %v10958_v46, %v4596_v11  ;;  %v10959_v63 = vld [vmem:[#allocation52_spill] sm:$0xff]  ;;  %v7058_v56 = vld [vmem:[%s10807_s28 + $0xb70] sm:$0xff]  ;;  %v7059_v39 = vld [vmem:[%s10807_s28 + $0xb78] sm:$0xff]  ;;  %v4634_v50 = vadd.f32 %v4624_v53, %v4599_v7 }
 0x9ca   : > { %v4632_v44 = vadd.f32 %v10959_v63, %v4597_v42  ;;  %v7060_v14 = vld [vmem:[%s10807_s28 + $0xb80] sm:$0xff]  ;;  %v10960_v16 = vld [vmem:[#allocation53_spill] sm:$0xff]  ;;  %v4635_v31 = vadd.f32 %v4625_v6, %v4600_v41  ;;  %v4636_v1 = vadd.f32 %v4626_v38, %v4601_v52  ;;  %v7061_v23 = vld [vmem:[%s10807_s28 + $0xb88] sm:$0xff]  ;;  %v4637_v17 = vadd.f32 %v4627_v8, %v4602_v13  ;;  %v4688_v41 = vpop.permute.xlu0 %4687 }
 0x9cb   : > { %v4633_v30 = vadd.f32 %v10960_v16, %v4598_v25  ;;  %v4638_v32 = vadd.f32 %v4628_v20, %v4603_v36  ;;  %v4639_v34 = vadd.f32 %v4629_v5, %v4604_v60  ;;  %v4655_v0 = vmul.f32 %v7052_v55, %v9896_v35  ;;  %v7072_v26 = vld [vmem:[%s10807_s28 + $0xbe0] sm:$0xff]  ;;  %v7073_v59 = vld [vmem:[%s10807_s28 + $0xbe8] sm:$0xff]  ;;  %v7074_v11 = vld [vmem:[%s10807_s28 + $0xbf0] sm:$0xff]  ;;  %v10032_v36 = vpop.permute.xlu1 %4932 }
 0x9cc   : > { %v4656_v24 = vmul.f32 %v7053_v45, %v9896_v35  ;;  %v4657_v3 = vmul.f32 %v7054_v2, %v9896_v35  ;;  %v4658_v57 = vmul.f32 %v7055_v18, %v9896_v35  ;;  %v4659_v22 = vmul.f32 %v7056_v47, %v9896_v35  ;;  %v7062_v49 = vld [vmem:[%s10807_s28 + $0xb90] sm:$0xff]  ;;  %v7063_v37 = vld [vmem:[%s10807_s28 + $0xb98] sm:$0xff]  ;;  %v7064_v7 = vld [vmem:[%s10807_s28 + $0xba0] sm:$0xff] }
 0x9cd   : > { %v4660_v29 = vmul.f32 %v7057_v21, %v9896_v35  ;;  %v4661_v54 = vmul.f32 %v7058_v56, %v9896_v35  ;;  %v4662_v12 = vmul.f32 %v7059_v39, %v9896_v35  ;;  %v4663_v61 = vmul.f32 %v7060_v14, %v9896_v35  ;;  %v7065_v43 = vld [vmem:[%s10807_s28 + $0xba8] sm:$0xff]  ;;  %v7066_v48 = vld [vmem:[%s10807_s28 + $0xbb0] sm:$0xff]  ;;  %v7067_v13 = vld [vmem:[%s10807_s28 + $0xbb8] sm:$0xff] }
 0x9ce   : > { %v4664_v42 = vmul.f32 %v7061_v23, %v9896_v35  ;;  %v4665_v10 = vadd.f32 %v4655_v0, %v4630_v27  ;;  %v4666_v40 = vadd.f32 %v4656_v24, %v4631_v9  ;;  %v4667_v25 = vadd.f32 %v4657_v3, %v4632_v44  ;;  %v7068_v15 = vld [vmem:[%s10807_s28 + $0xbc0] sm:$0xff]  ;;  %v7069_v8 = vld [vmem:[%s10807_s28 + $0xbc8] sm:$0xff]  ;;  %v7070_v20 = vld [vmem:[%s10807_s28 + $0xbd0] sm:$0xff] }
 0x9cf   : > { %v4668_v62 = vadd.f32 %v4658_v57, %v4633_v30  ;;  %v4669_v52 = vadd.f32 %v4659_v22, %v4634_v50  ;;  %v4670_v58 = vadd.f32 %v4660_v29, %v4635_v31  ;;  %v4671_v53 = vadd.f32 %v4661_v54, %v4636_v1  ;;  %v7071_v55 = vld [vmem:[%s10807_s28 + $0xbd8] sm:$0xff]  ;;  %v7076_v9 = vld [vmem:[%s10807_s28 + $0xc00] sm:$0xff]  ;;  %v7077_v63 = vld [vmem:[%s10807_s28 + $0xc08] sm:$0xff]  ;;  %v10048_v57 = vpop.permute.xlu1 %4967 }
 0x9d0   : > { %v4672_v35 = vadd.f32 %v4662_v12, %v4637_v17  ;;  %v4673_v60 = vadd.f32 %v4663_v61, %v4638_v32  ;;  %v4674_v6 = vadd.f32 %v4664_v42, %v4639_v34  ;;  %v4725_v38 = vmul.f32 %v7072_v26, %v9927_v33  ;;  %v7075_v45 = vld [vmem:[%s10807_s28 + $0xbf8] sm:$0xff]  ;;  %v7078_v16 = vld [vmem:[%s10807_s28 + $0xc10] sm:$0xff]  ;;  %v7080_v50 = vld [vmem:[%s10807_s28 + $0xc20] sm:$0xff] }
 0x9d1   : > { %v4726_v2 = vmul.f32 %v7073_v59, %v9927_v33  ;;  %v4727_v5 = vmul.f32 %v7074_v11, %v9927_v33  ;;  %v4690_v18 = vmul.f32 %v7062_v49, %v4688_v41  ;;  %v4691_v47 = vmul.f32 %v7063_v37, %v4688_v41  ;;  %v7079_v30 = vld [vmem:[%s10807_s28 + $0xc18] sm:$0xff]  ;;  %v7081_v32 = vld [vmem:[%s10807_s28 + $0xc28] sm:$0xff]  ;;  %v7082_v49 = vld [vmem:[%s10807_s28 + $0xc30] sm:$0xff] }
 0x9d2   : > { %v4692_v21 = vmul.f32 %v7064_v7, %v4688_v41  ;;  %v4693_v28 = vmul.f32 %v7065_v43, %v4688_v41  ;;  %v4694_v27 = vmul.f32 %v7066_v48, %v4688_v41  ;;  %v4695_v46 = vmul.f32 %v7067_v13, %v4688_v41  ;;  %v7083_v42 = vld [vmem:[%s10807_s28 + $0xc38] sm:$0xff]  ;;  %v7086_v37 = vld [vmem:[%s10807_s28 + $0xc50] sm:$0xff] }
 0x9d3   : > { %v4696_v44 = vmul.f32 %v7068_v15, %v4688_v41  ;;  %v4697_v56 = vmul.f32 %v7069_v8, %v4688_v41  ;;  %v4698_v39 = vmul.f32 %v7070_v20, %v4688_v41  ;;  %v4699_v14 = vmul.f32 %v7071_v55, %v4688_v41  ;;  %v7087_v7 = vld [vmem:[%s10807_s28 + $0xc58] sm:$0xff] }
 0x9d4   : > { %v4728_v31 = vmul.f32 %v7075_v45, %v9927_v33  ;;  %v4700_v1 = vadd.f32 %v4690_v18, %v4665_v10  ;;  %v4701_v23 = vadd.f32 %v4691_v47, %v4666_v40  ;;  %v4702_v17 = vadd.f32 %v4692_v21, %v4667_v25  ;;  %v7084_v10 = vld [vmem:[%s10807_s28 + $0xc40] sm:$0xff]  ;;  %v7085_v25 = vld [vmem:[%s10807_s28 + $0xc48] sm:$0xff]  ;;  %v10072_v18 = vpop.permute.xlu1 %5037 }
 0x9d5   : > { %v4703_v34 = vadd.f32 %v4693_v28, %v4668_v62  ;;  %v4704_v0 = vadd.f32 %v4694_v27, %v4669_v52  ;;  %v4705_v24 = vadd.f32 %v4695_v46, %v4670_v58  ;;  %v4706_v3 = vadd.f32 %v4696_v44, %v4671_v53  ;;  %v7088_v52 = vld [vmem:[%s10807_s28 + $0xc60] sm:$0xff]  ;;  %v7089_v58 = vld [vmem:[%s10807_s28 + $0xc68] sm:$0xff]  ;;  %v7090_v53 = vld [vmem:[%s10807_s28 + $0xc70] sm:$0xff] }
 0x9d6   : > { %v4729_v22 = vmul.f32 %v7076_v9, %v9927_v33  ;;  %v4707_v26 = vadd.f32 %v4697_v56, %v4672_v35  ;;  %v4708_v29 = vadd.f32 %v4698_v39, %v4673_v60  ;;  %v4709_v54 = vadd.f32 %v4699_v14, %v4674_v6  ;;  %v7091_v60 = vld [vmem:[%s10807_s28 + $0xc78] sm:$0xff]  ;;  %v7104_v9 = vld [vmem:[%s10807_s28 + $0xce0] sm:$0xff] }
 0x9d7   : > { %v4730_v12 = vmul.f32 %v7077_v63, %v9927_v33  ;;  %v4731_v61 = vmul.f32 %v7078_v16, %v9927_v33  ;;  %v4732_v59 = vmul.f32 %v7079_v30, %v9927_v33  ;;  %v4733_v11 = vmul.f32 %v7080_v50, %v9927_v33  ;;  %v7103_v46 = vld [vmem:[%s10807_s28 + $0xcd8] sm:$0xff]  ;;  %v7105_v63 = vld [vmem:[%s10807_s28 + $0xce8] sm:$0xff]  ;;  %v7106_v16 = vld [vmem:[%s10807_s28 + $0xcf0] sm:$0xff] }
 0x9d8   : > { %v4734_v40 = vmul.f32 %v7081_v32, %v9927_v33  ;;  %v4735_v43 = vadd.f32 %v4725_v38, %v4700_v1  ;;  %v4736_v41 = vadd.f32 %v4726_v2, %v4701_v23  ;;  %v4737_v62 = vadd.f32 %v4727_v5, %v4702_v17  ;;  %v7102_v5 = vld [vmem:[%s10807_s28 + $0xcd0] sm:$0xff]  ;;  %v7092_v30 = vld [vmem:[%s10807_s28 + $0xc80] sm:$0xff]  ;;  %v7093_v50 = vld [vmem:[%s10807_s28 + $0xc88] sm:$0xff] }
 0x9d9   : > { %v4738_v48 = vadd.f32 %v4728_v31, %v4703_v34  ;;  %v4739_v13 = vadd.f32 %v4729_v22, %v4704_v0  ;;  %v4740_v15 = vadd.f32 %v4730_v12, %v4705_v24  ;;  %v4741_v35 = vadd.f32 %v4731_v61, %v4706_v3  ;;  %v4793_v31 = vpop.permute.xlu0 %4792  ;;  %v7107_v34 = vld [vmem:[%s10807_s28 + $0xcf8] sm:$0xff]  ;;  %v7094_v0 = vld [vmem:[%s10807_s28 + $0xc90] sm:$0xff]  ;;  %v7108_v61 = vld [vmem:[%s10807_s28 + $0xd00] sm:$0xff] }
 0x9da   : > { %v4742_v6 = vadd.f32 %v4732_v59, %v4707_v26  ;;  %v4743_v33 = vadd.f32 %v4733_v11, %v4708_v29  ;;  %v4744_v8 = vadd.f32 %v4734_v40, %v4709_v54  ;;  %v4760_v20 = vmul.f32 %v7082_v49, %v9941_v4  ;;  %v7096_v29 = vld [vmem:[%s10807_s28 + $0xca0] sm:$0xff]  ;;  %v7097_v54 = vld [vmem:[%s10807_s28 + $0xca8] sm:$0xff]  ;;  %v7098_v12 = vld [vmem:[%s10807_s28 + $0xcb0] sm:$0xff] }
 0x9db   : > { %v4761_v38 = vmul.f32 %v7083_v42, %v9941_v4  ;;  %v4762_v55 = vmul.f32 %v7084_v10, %v9941_v4  ;;  %v4763_v45 = vmul.f32 %v7085_v25, %v9941_v4  ;;  %v4764_v2 = vmul.f32 %v7086_v37, %v9941_v4  ;;  %v7099_v49 = vld [vmem:[%s10807_s28 + $0xcb8] sm:$0xff]  ;;  %v7100_v42 = vld [vmem:[%s10807_s28 + $0xcc0] sm:$0xff]  ;;  %v7109_v25 = vld [vmem:[%s10807_s28 + $0xd08] sm:$0xff] }
 0x9dc   : > { %v4765_v47 = vmul.f32 %v7087_v7, %v9941_v4  ;;  %v4766_v21 = vmul.f32 %v7088_v52, %v9941_v4  ;;  %v4767_v28 = vmul.f32 %v7089_v58, %v9941_v4  ;;  %v4768_v27 = vmul.f32 %v7090_v53, %v9941_v4  ;;  %v7110_v37 = vld [vmem:[%s10807_s28 + $0xd10] sm:$0xff]  ;;  %v10111_v58 = vpop.permute.xlu1 %5072  ;;  %v7111_v53 = vld [vmem:[%s10807_s28 + $0xd18] sm:$0xff] }
 0x9dd   : > { %v4769_v44 = vmul.f32 %v7091_v60, %v9941_v4  ;;  %v4770_v56 = vadd.f32 %v4760_v20, %v4735_v43  ;;  %v4771_v39 = vadd.f32 %v4761_v38, %v4736_v41  ;;  %v4772_v14 = vadd.f32 %v4762_v55, %v4737_v62  ;;  %v7095_v4 = vld [vmem:[%s10807_s28 + $0xc98] sm:$0xff]  ;;  %v7101_v62 = vld [vmem:[%s10807_s28 + $0xcc8] sm:$0xff]  ;;  %v10114_v60 = vpop.permute.xlu0 %4897  ;;  %v7112_v38 = vld [vmem:[%s10807_s28 + $0xd20] sm:$0xff] }
 0x9de   : > { %v4773_v1 = vadd.f32 %v4763_v45, %v4738_v48  ;;  %v4774_v23 = vadd.f32 %v4764_v2, %v4739_v13  ;;  %v4775_v17 = vadd.f32 %v4765_v47, %v4740_v15  ;;  %v4776_v32 = vadd.f32 %v4766_v21, %v4741_v35  ;;  %v7113_v55 = vld [vmem:[%s10807_s28 + $0xd28] sm:$0xff]  ;;  %v7114_v21 = vld [vmem:[%s10807_s28 + $0xd30] sm:$0xff] }
 0x9df   : > { %v4777_v24 = vadd.f32 %v4767_v28, %v4742_v6  ;;  %v4778_v3 = vadd.f32 %v4768_v27, %v4743_v33  ;;  %v4779_v22 = vadd.f32 %v4769_v44, %v4744_v8  ;;  %v4830_v26 = vmul.f32 %v7102_v5, %v9968_v51 }
 0x9e0   : > { %v4831_v59 = vmul.f32 %v7103_v46, %v9968_v51  ;;  %v10095_v11 = vmul.f32 %v7104_v9, %v9968_v51  ;;  %v4795_v10 = vmul.f32 %v7092_v30, %v4793_v31  ;;  %v4796_v40 = vmul.f32 %v7093_v50, %v4793_v31  ;;  %v7115_v46 = vld [vmem:[%s10807_s28 + $0xd38] sm:$0xff]  ;;  %v7116_v9 = vld [vmem:[%s10807_s28 + $0xd40] sm:$0xff]  ;;  %v7118_v30 = vld [vmem:[%s10807_s28 + $0xd50] sm:$0xff] }
 0x9e1   : > { %v10102_v7 = vmul.f32 %v7105_v63, %v9968_v51  ;;  %v10105_v43 = vmul.f32 %v7106_v16, %v9968_v51  ;;  %v10108_v41 = vmul.f32 %v7107_v34, %v9968_v51  ;;  %v4797_v52 = vmul.f32 %v7094_v0, %v4793_v31  ;;  %v7117_v63 = vld [vmem:[%s10807_s28 + $0xd48] sm:$0xff]  ;;  %v10145_v34 = vpop.permute.xlu0 %5002 }
 0x9e2   : > { %v4798_v48 = vmul.f32 %v7095_v4, %v4793_v31  ;;  %v4799_v13 = vmul.f32 %v7096_v29, %v4793_v31  ;;  %v4800_v15 = vmul.f32 %v7097_v54, %v4793_v31  ;;  %v4801_v35 = vmul.f32 %v7098_v12, %v4793_v31  ;;  %v7124_v29 = vld [vmem:[%s10807_s28 + $0xd80] sm:$0xff]  ;;  %v7125_v54 = vld [vmem:[%s10807_s28 + $0xd88] sm:$0xff]  ;;  %v10158_v12 = vpop.permute.xlu1 %5142 }
 0x9e3   : > { %v4802_v6 = vmul.f32 %v7099_v49, %v4793_v31  ;;  %v4803_v33 = vmul.f32 %v7100_v42, %v4793_v31  ;;  %v4805_v8 = vadd.f32 %v4795_v10, %v4770_v56  ;;  %v4806_v20 = vadd.f32 %v4796_v40, %v4771_v39  ;;  %v7132_v49 = vld [vmem:[%s10807_s28 + $0xdc0] sm:$0xff] }
 0x9e4   : > { %v10119_v45 = vmul.f32 %v7108_v61, %v9968_v51  ;;  %v10122_v2 = vmul.f32 %v7109_v25, %v9968_v51  ;;  %v10125_v5 = vmul.f32 %v7110_v37, %v9968_v51  ;;  %v4804_v47 = vmul.f32 %v7101_v62, %v4793_v31  ;;  %v7123_v31 = vld [vmem:[%s10807_s28 + $0xd78] sm:$0xff]  ;;  %v7133_v25 = vld [vmem:[%s10807_s28 + $0xdc8] sm:$0xff]  ;;  %v7142_v37 = vld [vmem:[%s10807_s28 + $0xe10] sm:$0xff] }
 0x9e5   : > { %v10129_v28 = vmul.f32 %v7111_v53, %v9968_v51  ;;  %v10131_v27 = vadd.f32 %v4797_v52, %v4772_v14  ;;  %v4840_v44 = vadd.f32 %v4830_v26, %v4805_v8  ;;  %v4841_v56 = vadd.f32 %v4831_v59, %v4806_v20  ;;  %v7122_v14 = vld [vmem:[%s10807_s28 + $0xd70] sm:$0xff]  ;;  %v7119_v26 = vld [vmem:[%s10807_s28 + $0xd58] sm:$0xff] }
 0x9e6   : > { %10961 = vst [vmem:[#allocation63_spill] sm:$0xff] %v10125_v5  ;;  %v10136_v39 = vadd.f32 %v4798_v48, %v4773_v1  ;;  %v10138_v16 = vadd.f32 %v4799_v13, %v4774_v23  ;;  %v4865_v50 = vmul.f32 %v7112_v38, %v10005_v19  ;;  %v4866_v51 = vmul.f32 %v7113_v55, %v10005_v19  ;;  %v7143_v62 = vld [vmem:[%s10807_s28 + $0xe18] sm:$0xff] }
 0x9e7   : > { %10962 = vst [vmem:[#allocation64_spill] sm:$0xff] %v10129_v28  ;;  %v10147_v0 = vadd.f32 %v4800_v15, %v4775_v17  ;;  %v10149_v4 = vadd.f32 %v4801_v35, %v4776_v32  ;;  %v10151_v1 = vadd.f32 %v4802_v6, %v4777_v24  ;;  %v10153_v23 = vadd.f32 %v4803_v33, %v4778_v3  ;;  %v7126_v24 = vld [vmem:[%s10807_s28 + $0xd90] sm:$0xff]  ;;  %v7127_v3 = vld [vmem:[%s10807_s28 + $0xd98] sm:$0xff]  ;;  %v10191_v15 = vpop.permute.xlu0 %5107  ;;  %v7152_v35 = vld [vmem:[%s10807_s28 + $0xe60] sm:$0xff] }
 0x9e8   : > { %v10160_v61 = vadd.f32 %v4804_v47, %v4779_v22  ;;  %v10163_v59 = vmul.f32 %v7114_v21, %v10005_v19  ;;  %v4875_v17 = vadd.f32 %v4865_v50, %v4840_v44  ;;  %v4876_v32 = vadd.f32 %v4866_v51, %v4841_v56  ;;  %v7153_v6 = vld [vmem:[%s10807_s28 + $0xe68] sm:$0xff]  ;;  %v7162_v33 = vld [vmem:[%s10807_s28 + $0xeb0] sm:$0xff]  ;;  %v7163_v47 = vld [vmem:[%s10807_s28 + $0xeb8] sm:$0xff] }
 0x9e9   : > { %10963 = vst [vmem:[#allocation65_spill] sm:$0xff] %v10153_v23  ;;  %v10169_v42 = vmul.f32 %v7115_v46, %v10005_v19  ;;  %v10172_v10 = vmul.f32 %v7116_v9, %v10005_v19  ;;  %v4900_v22 = vmul.f32 %v7122_v14, %v10114_v60  ;;  %v4901_v40 = vmul.f32 %v7123_v31, %v10114_v60  ;;  %v7172_v21 = vld [vmem:[%s10807_s28 + $0xf00] sm:$0xff]  ;;  %v7173_v46 = vld [vmem:[%s10807_s28 + $0xf08] sm:$0xff]  ;;  %v7183_v50 = vld [vmem:[%s10807_s28 + $0xf58] sm:$0xff]  ;;  %v10215_v31 = vpop.permute.xlu1 %5177 }
 0x9ea   : > { %10964 = vst [vmem:[#allocation66_spill] sm:$0xff] %v10160_v61  ;;  %v10180_v52 = vmul.f32 %v7117_v63, %v10005_v19  ;;  %v10183_v53 = vmul.f32 %v7118_v30, %v10005_v19  ;;  %v10186_v48 = vmul.f32 %v7119_v26, %v10005_v19  ;;  %v10189_v13 = vmul.f32 %v7124_v29, %v10114_v60  ;;  %v7182_v30 = vld [vmem:[%s10807_s28 + $0xf50] sm:$0xff]  ;;  %v7192_v51 = vld [vmem:[%s10807_s28 + $0xfa0] sm:$0xff] }
 0x9eb   : > { %v10197_v8 = vmul.f32 %v7125_v54, %v10114_v60  ;;  %v10200_v20 = vmul.f32 %v7126_v24, %v10114_v60  ;;  %v4910_v38 = vadd.f32 %v4900_v22, %v4875_v17  ;;  %v4911_v55 = vadd.f32 %v4901_v40, %v4876_v32  ;;  %v7193_v17 = vld [vmem:[%s10807_s28 + $0xfa8] sm:$0xff]  ;;  %v7202_v32 = vld [vmem:[%s10807_s28 + $0xff0] sm:$0xff]  ;;  %v10222_v24 = vpop.permute.xlu0 %5218  ;;  %v7144_v28 = vld [vmem:[%s10807_s28 + $0xe20] sm:$0xff] }
 0x9ec   : > { %10965 = vst [vmem:[#allocation67_spill] sm:$0xff] %v10183_v53  ;;  %10966 = vst [vmem:[#allocation68_spill] sm:$0xff] %v10186_v48  ;;  %v4935_v9 = vmul.f32 %v7132_v49, %v10032_v36  ;;  %v4936_v63 = vmul.f32 %v7133_v25, %v10032_v36  ;;  %v4970_v44 = vmul.f32 %v7142_v37, %v10048_v57  ;;  %v7203_v25 = vld [vmem:[%s10807_s28 + $0xff8] sm:$0xff]  ;;  %v7212_v37 = vld [vmem:[%s10807_s28 + $0x1040] sm:$0xff] }
 0x9ed   : > { %v4971_v56 = vmul.f32 %v7143_v62, %v10048_v57  ;;  %v10213_v14 = vmul.f32 %v7127_v3, %v10114_v60  ;;  %v5005_v26 = vmul.f32 %v7152_v35, %v10145_v34  ;;  %v5006_v29 = vmul.f32 %v7153_v6, %v10145_v34  ;;  %v7164_v61 = vld [vmem:[%s10807_s28 + $0xec0] sm:$0xff] }
 0x9ee   : > { %v5040_v54 = vmul.f32 %v7162_v33, %v10072_v18  ;;  %v4945_v49 = vadd.f32 %v4935_v9, %v4910_v38  ;;  %v4946_v22 = vadd.f32 %v4936_v63, %v4911_v55  ;;  %v5041_v3 = vmul.f32 %v7163_v47, %v10072_v18  ;;  %v7213_v38 = vld [vmem:[%s10807_s28 + $0x1048] sm:$0xff]  ;;  %v7134_v9 = vld [vmem:[%s10807_s28 + $0xdd0] sm:$0xff]  ;;  %v7204_v23 = vld [vmem:[%s10807_s28 + $0x1000] sm:$0xff] }
 0x9ef   : > { %v5075_v40 = vmul.f32 %v7172_v21, %v10111_v58  ;;  %v5076_v62 = vmul.f32 %v7173_v46, %v10111_v58  ;;  %v5110_v35 = vmul.f32 %v7182_v30, %v10191_v15  ;;  %v5111_v6 = vmul.f32 %v7183_v50, %v10191_v15  ;;  %v7135_v46 = vld [vmem:[%s10807_s28 + $0xdd8] sm:$0xff] }
 0x9f0   : > { %v5145_v33 = vmul.f32 %v7192_v51, %v10158_v12  ;;  %v4980_v55 = vadd.f32 %v4970_v44, %v4945_v49  ;;  %v4981_v63 = vadd.f32 %v4971_v56, %v4946_v22  ;;  %v5146_v47 = vmul.f32 %v7193_v17, %v10158_v12  ;;  %v7145_v51 = vld [vmem:[%s10807_s28 + $0xe28] sm:$0xff]  ;;  %v7154_v17 = vld [vmem:[%s10807_s28 + $0xe70] sm:$0xff] }
 0x9f1   : > { %v10236_v21 = vmul.f32 %v7202_v32, %v10215_v31  ;;  %v10241_v30 = vmul.f32 %v7203_v25, %v10215_v31  ;;  %v10244_v50 = vmul.f32 %v7212_v37, %v10222_v24  ;;  %v4842_v44 = vadd.f32 %v10095_v11, %v10131_v27  ;;  %v7155_v37 = vld [vmem:[%s10807_s28 + $0xe78] sm:$0xff] }
 0x9f2   : > { %v4843_v56 = vadd.f32 %v10102_v7, %v10136_v39  ;;  %v5015_v32 = vadd.f32 %v5005_v26, %v4980_v55  ;;  %v5016_v49 = vadd.f32 %v5006_v29, %v4981_v63  ;;  %v10253_v22 = vmul.f32 %v7213_v38, %v10222_v24  ;;  %v7165_v39 = vld [vmem:[%s10807_s28 + $0xec8] sm:$0xff]  ;;  %v7174_v26 = vld [vmem:[%s10807_s28 + $0xf10] sm:$0xff]  ;;  %v7175_v63 = vld [vmem:[%s10807_s28 + $0xf18] sm:$0xff] }
 0x9f3   : > { %v4937_v25 = vmul.f32 %v7134_v9, %v10032_v36  ;;  %v4877_v5 = vadd.f32 %v10163_v59, %v4842_v44  ;;  %v4938_v7 = vmul.f32 %v7135_v46, %v10032_v36  ;;  %v4972_v27 = vmul.f32 %v7144_v28, %v10048_v57  ;;  %v7184_v59 = vld [vmem:[%s10807_s28 + $0xf60] sm:$0xff] }
 0x9f4   : > { %v4878_v11 = vadd.f32 %v10169_v42, %v4843_v56  ;;  %v5050_v29 = vadd.f32 %v5040_v54, %v5015_v32  ;;  %v5051_v38 = vadd.f32 %v5041_v3, %v5016_v49  ;;  %v4973_v9 = vmul.f32 %v7145_v51, %v10048_v57  ;;  %v7185_v54 = vld [vmem:[%s10807_s28 + $0xf68] sm:$0xff]  ;;  %v7194_v56 = vld [vmem:[%s10807_s28 + $0xfb0] sm:$0xff]  ;;  %v7195_v49 = vld [vmem:[%s10807_s28 + $0xfb8] sm:$0xff] }
 0x9f5   : > { %v5007_v55 = vmul.f32 %v7154_v17, %v10145_v34  ;;  %v4912_v44 = vadd.f32 %v10189_v13, %v4877_v5  ;;  %v5008_v28 = vmul.f32 %v7155_v37, %v10145_v34  ;;  %v5042_v46 = vmul.f32 %v7164_v61, %v10072_v18  ;;  %v7214_v61 = vld [vmem:[%s10807_s28 + $0x1050] sm:$0xff] }
 0x9f6   : > { %v4913_v42 = vadd.f32 %v10197_v8, %v4878_v11  ;;  %v5085_v3 = vadd.f32 %v5075_v40, %v5050_v29  ;;  %v5086_v32 = vadd.f32 %v5076_v62, %v5051_v38  ;;  %v5043_v51 = vmul.f32 %v7165_v39, %v10072_v18  ;;  %v7205_v11 = vld [vmem:[%s10807_s28 + $0x1008] sm:$0xff] }
 0x9f7   : > { %v5077_v17 = vmul.f32 %v7174_v26, %v10111_v58  ;;  %v4947_v5 = vadd.f32 %v4937_v25, %v4912_v44  ;;  %v5078_v8 = vmul.f32 %v7175_v63, %v10111_v58  ;;  %v5112_v37 = vmul.f32 %v7184_v59, %v10191_v15  ;;  %v7137_v38 = vld [vmem:[%s10807_s28 + $0xde8] sm:$0xff] }
 0x9f8   : > { %v4948_v13 = vadd.f32 %v4938_v7, %v4913_v42  ;;  %v5120_v48 = vadd.f32 %v5110_v35, %v5085_v3  ;;  %v5121_v53 = vadd.f32 %v5111_v6, %v5086_v32  ;;  %v5113_v40 = vmul.f32 %v7185_v54, %v10191_v15  ;;  %v7136_v7 = vld [vmem:[%s10807_s28 + $0xde0] sm:$0xff]  ;;  %v7147_v54 = vld [vmem:[%s10807_s28 + $0xe38] sm:$0xff] }
 0x9f9   : > { %v5147_v62 = vmul.f32 %v7194_v56, %v10158_v12  ;;  %v4982_v39 = vadd.f32 %v4972_v27, %v4947_v5  ;;  %v5148_v29 = vmul.f32 %v7195_v49, %v10158_v12  ;;  %v10286_v25 = vmul.f32 %v7204_v23, %v10215_v31  ;;  %v7166_v49 = vld [vmem:[%s10807_s28 + $0xed0] sm:$0xff]  ;;  %v7167_v5 = vld [vmem:[%s10807_s28 + $0xed8] sm:$0xff] }
 0x9fa   : > { %v4983_v26 = vadd.f32 %v4973_v9, %v4948_v13  ;;  %v5155_v63 = vadd.f32 %v5145_v33, %v5120_v48  ;;  %v5156_v59 = vadd.f32 %v5146_v47, %v5121_v53  ;;  %v5183_v35 = vmul.f32 %v7205_v11, %v10215_v31  ;;  %v7146_v9 = vld [vmem:[%s10807_s28 + $0xe30] sm:$0xff] }
 0x9fb   : > { %v10292_v6 = vmul.f32 %v7214_v61, %v10222_v24  ;;  %v5017_v44 = vadd.f32 %v5007_v55, %v4982_v39  ;;  %v4844_v27 = vadd.f32 %v10105_v43, %v10138_v16  ;;  %v4845_v23 = vadd.f32 %v10108_v41, %v10147_v0  ;;  %v7156_v16 = vld [vmem:[%s10807_s28 + $0xe80] sm:$0xff]  ;;  %v7157_v0 = vld [vmem:[%s10807_s28 + $0xe88] sm:$0xff] }
 0x9fc   : > { %v5018_v42 = vadd.f32 %v5008_v28, %v4983_v26  ;;  %v5190_v48 = vadd.f32 %v10236_v21, %v5155_v63  ;;  %v5191_v53 = vadd.f32 %v10241_v30, %v5156_v59  ;;  %v4939_v33 = vmul.f32 %v7136_v7, %v10032_v36  ;;  %v7128_v39 = vld [vmem:[%s10807_s28 + $0xda0] sm:$0xff] }
 0x9fd   : > { %v4940_v47 = vmul.f32 %v7137_v38, %v10032_v36  ;;  %v5052_v55 = vadd.f32 %v5042_v46, %v5017_v44  ;;  %v4879_v43 = vadd.f32 %v10172_v10, %v4844_v27  ;;  %v4880_v41 = vadd.f32 %v10180_v52, %v4845_v23  ;;  %v7176_v7 = vld [vmem:[%s10807_s28 + $0xf20] sm:$0xff]  ;;  %v7177_v38 = vld [vmem:[%s10807_s28 + $0xf28] sm:$0xff] }
 0x9fe   : > { %v5053_v28 = vadd.f32 %v5043_v51, %v5018_v42  ;;  %v5231_v21 = vadd.f32 %v10244_v50, %v5190_v48  ;;  %v5232_v30 = vadd.f32 %v10253_v22, %v5191_v53  ;;  %v4974_v56 = vmul.f32 %v7146_v9, %v10048_v57  ;;  %v7215_v51 = vld [vmem:[%s10807_s28 + $0x1058] sm:$0xff]  ;;  %v7120_v50 = vld [vmem:[%s10807_s28 + $0xd60] sm:$0xff] }
 0x9ff   : > { %v4975_v3 = vmul.f32 %v7147_v54, %v10048_v57  ;;  %v5087_v32 = vadd.f32 %v5077_v17, %v5052_v55  ;;  %v4914_v10 = vadd.f32 %v10200_v20, %v4879_v43  ;;  %v4915_v52 = vadd.f32 %v10213_v14, %v4880_v41  ;;  %v7129_v14 = vld [vmem:[%s10807_s28 + $0xda8] sm:$0xff]  ;;  %v7187_v54 = vld [vmem:[%s10807_s28 + $0xf78] sm:$0xff]  ;;  %v7196_v48 = vld [vmem:[%s10807_s28 + $0xfc0] sm:$0xff] }
 0xa00   : > { %v5088_v46 = vadd.f32 %v5078_v8, %v5053_v28  ;;  %v5241_v13 = vmax.f32 %v5231_v21, 0.0  ;;  %v5242_v11 = vmax.f32 %v5232_v30, 0.0  ;;  %v5009_v22 = vmul.f32 %v7156_v16, %v10145_v34  ;;  %v7197_v16 = vld [vmem:[%s10807_s28 + $0xfc8] sm:$0xff] }
 0xa01   : > { %v5010_v61 = vmul.f32 %v7157_v0, %v10145_v34  ;;  %v5122_v17 = vadd.f32 %v5112_v37, %v5087_v32  ;;  %v4949_v26 = vadd.f32 %v4939_v33, %v4914_v10  ;;  %v4950_v20 = vadd.f32 %v4940_v47, %v4915_v52  ;;  %v7206_v0 = vld [vmem:[%s10807_s28 + $0x1010] sm:$0xff]  ;;  %v7139_v10 = vld [vmem:[%s10807_s28 + $0xdf8] sm:$0xff] }
 0xa02   : > { %v5123_v8 = vadd.f32 %v5113_v40, %v5088_v46  ;;  %v5251_v63 = vpack.c.bf16 %v5242_v11, %v5241_v13  ;;  %v5224_v59 = vmul.f32 %v7215_v51, %v10222_v24  ;;  %v5044_v44 = vmul.f32 %v7166_v49, %v10072_v18  ;;  %v7186_v40 = vld [vmem:[%s10807_s28 + $0xf70] sm:$0xff]  ;;  %v7207_v49 = vld [vmem:[%s10807_s28 + $0x1018] sm:$0xff] }
 0xa03   : > { %v5045_v42 = vmul.f32 %v7167_v5, %v10072_v18  ;;  %v5157_v27 = vadd.f32 %v5147_v62, %v5122_v17  ;;  %v4984_v9 = vadd.f32 %v4974_v56, %v4949_v26  ;;  %v4985_v37 = vadd.f32 %v4975_v3, %v4950_v20  ;;  %v7138_v51 = vld [vmem:[%s10807_s28 + $0xdf0] sm:$0xff]  ;;  %v7149_v17 = vld [vmem:[%s10807_s28 + $0xe48] sm:$0xff]  ;;  %v10968_v20 = vld [vmem:[#allocation67_spill] sm:$0xff] }
 0xa04   : > { %v5158_v23 = vadd.f32 %v5148_v29, %v5123_v8  ;;  %v10331_v53 = vmul.f32 %v7120_v50, %v10005_v19  ;;  %v4906_v33 = vmul.f32 %v7128_v39, %v10114_v60  ;;  %7772 = vmatmul.mubr.msk.bf16.vlgmr.msra.gmra.mrb[84].mxu1 %vm2527_vm7, %v5251_v63  ;;  %v5079_v47 = vmul.f32 %v7176_v7, %v10111_v58  ;;  %v7148_v39 = vld [vmem:[%s10807_s28 + $0xe40] sm:$0xff]  ;;  %v7217_v26 = vld [vmem:[%s10807_s28 + $0x1068] sm:$0xff] }
 0xa05   : > { %v5080_v55 = vmul.f32 %v7177_v38, %v10111_v58  ;;  %v10967_v62 = vmov 0.0   ;;  %v5192_v29 = vadd.f32 %v10286_v25, %v5157_v27  ;;  %v5019_v43 = vadd.f32 %v5009_v22, %v4984_v9  ;;  %v7216_v8 = vld [vmem:[%s10807_s28 + $0x1060] sm:$0xff]  ;;  %v10969_v38 = vld [vmem:[#allocation68_spill] sm:$0xff] }
 0xa06   : > { %7775 = vmatprep.mubr.msk.bf16.mxu1 %vm8285_vm4, %v10967_v62  ;;  %v5193_v28 = vadd.f32 %v5183_v35, %v5158_v23  ;;  %v5020_v41 = vadd.f32 %v5010_v61, %v4985_v37  ;;  %v4907_v21 = vmul.f32 %v7129_v14, %v10114_v60  ;;  %v5114_v30 = vmul.f32 %v7186_v40, %v10191_v15  ;;  %v7121_v27 = vld [vmem:[%s10807_s28 + $0xd68] sm:$0xff]  ;;  %v7130_v23 = vld [vmem:[%s10807_s28 + $0xdb0] sm:$0xff] }
 0xa07   : > { %v5115_v56 = vmul.f32 %v7187_v54, %v10191_v15  ;;  %v5149_v3 = vmul.f32 %v7196_v48, %v10158_v12  ;;  %v5233_v32 = vadd.f32 %v10292_v6, %v5192_v29  ;;  %v5054_v25 = vadd.f32 %v5044_v44, %v5019_v43  ;;  %v7158_v44 = vld [vmem:[%s10807_s28 + $0xe90] sm:$0xff]  ;;  %v7169_v43 = vld [vmem:[%s10807_s28 + $0xee8] sm:$0xff] }
 0xa08   : > { %v5234_v46 = vadd.f32 %v5224_v59, %v5193_v28  ;;  %v5055_v35 = vadd.f32 %v5045_v42, %v5020_v41  ;;  %v5150_v52 = vmul.f32 %v7197_v16, %v10158_v12  ;;  %v5184_v5 = vmul.f32 %v7206_v0, %v10215_v31  ;;  %v7159_v42 = vld [vmem:[%s10807_s28 + $0xe98] sm:$0xff]  ;;  %v7168_v28 = vld [vmem:[%s10807_s28 + $0xee0] sm:$0xff] }
 0xa09   : > { %v4846_v50 = vadd.f32 %v10119_v45, %v10149_v4  ;;  %v4847_v13 = vadd.f32 %v10122_v2, %v10151_v1  ;;  %v5243_v6 = vmax.f32 %v5233_v32, 0.0  ;;  %v5089_v22 = vadd.f32 %v5079_v47, %v5054_v25  ;;  %v7131_v41 = vld [vmem:[%s10807_s28 + $0xdb8] sm:$0xff] }
 0xa0a   : > { %v5244_v11 = vmax.f32 %v5234_v46, 0.0  ;;  %v5090_v61 = vadd.f32 %v5080_v55, %v5055_v35  ;;  %v4941_v45 = vmul.f32 %v7138_v51, %v10032_v36  ;;  %v4942_v2 = vmul.f32 %v7139_v10, %v10032_v36  ;;  %v7179_v25 = vld [vmem:[%s10807_s28 + $0xf38] sm:$0xff]  ;;  %v7188_v35 = vld [vmem:[%s10807_s28 + $0xf80] sm:$0xff] }
 0xa0b   : > { %v4881_v7 = vadd.f32 %v10968_v20, %v4846_v50  ;;  %v4882_v14 = vadd.f32 %v10969_v38, %v4847_v13  ;;  %v5124_v1 = vadd.f32 %v5114_v30, %v5089_v22  ;;  %v5185_v59 = vmul.f32 %v7207_v49, %v10215_v31  ;;  %v7178_v30 = vld [vmem:[%s10807_s28 + $0xf30] sm:$0xff] }
 0xa0c   : > { %v5252_v4 = vpack.c.bf16 %v5244_v11, %v5243_v6  ;;  %v5125_v63 = vadd.f32 %v5115_v56, %v5090_v61  ;;  %v4976_v40 = vmul.f32 %v7148_v39, %v10048_v57  ;;  %v4977_v54 = vmul.f32 %v7149_v17, %v10048_v57  ;;  %v7189_v11 = vld [vmem:[%s10807_s28 + $0xf88] sm:$0xff]  ;;  %v10970_v38 = vld [vmem:[#allocation65_spill] sm:$0xff] }
 0xa0d   : > { %v4916_v9 = vadd.f32 %v4906_v33, %v4881_v7  ;;  %v4917_v37 = vadd.f32 %v4907_v21, %v4882_v14  ;;  %v5159_v48 = vadd.f32 %v5149_v3, %v5124_v1  ;;  %v5225_v55 = vmul.f32 %v7216_v8, %v10222_v24  ;;  %v7141_v8 = vld [vmem:[%s10807_s28 + $0xe08] sm:$0xff]  ;;  %v7199_v7 = vld [vmem:[%s10807_s28 + $0xfd8] sm:$0xff]  ;;  %v10971_v14 = vld [vmem:[#allocation63_spill] sm:$0xff] }
 0xa0e   : > { %7776 = vmatmul.mubr.msk.bf16.gmra.mrb[88].mxu1 %vm2527_vm7, %v5252_v4  ;;  %v5160_v47 = vadd.f32 %v5150_v52, %v5125_v63  ;;  %v5226_v29 = vmul.f32 %v7217_v26, %v10222_v24  ;;  %v5011_v0 = vmul.f32 %v7158_v44, %v10145_v34  ;;  %v5012_v21 = vmul.f32 %v7159_v42, %v10145_v34  ;;  %v10973_v4 = vld [vmem:[#allocation64_spill] sm:$0xff] }
 0xa0f   : > { %7779 = vmatprep.mubr.msk.bf16.mxu1 %vm8285_vm4, %v10967_v62  ;;  %v4951_v33 = vadd.f32 %v4941_v45, %v4916_v9  ;;  %v4952_v16 = vadd.f32 %v4942_v2, %v4917_v37  ;;  %v4874_v56 = vmul.f32 %v7121_v27, %v10005_v19  ;;  %v4908_v3 = vmul.f32 %v7130_v23, %v10114_v60  ;;  %v10972_v2 = vld [vmem:[#allocation66_spill] sm:$0xff]  ;;  %v7150_v27 = vld [vmem:[%s10807_s28 + $0xe50] sm:$0xff]  ;;  %v7208_v37 = vld [vmem:[%s10807_s28 + $0x1020] sm:$0xff] }
 0xa10   : > { %v5194_v32 = vadd.f32 %v5184_v5, %v5159_v48  ;;  %v5195_v46 = vadd.f32 %v5185_v59, %v5160_v47  ;;  %v5046_v52 = vmul.f32 %v7168_v28, %v10072_v18  ;;  %v5047_v49 = vmul.f32 %v7169_v43, %v10072_v18  ;;  %v7140_v5 = vld [vmem:[%s10807_s28 + $0xe00] sm:$0xff]  ;;  %v7151_v23 = vld [vmem:[%s10807_s28 + $0xe58] sm:$0xff] }
 0xa11   : > { %v4986_v51 = vadd.f32 %v4976_v40, %v4951_v33  ;;  %v4987_v10 = vadd.f32 %v4977_v54, %v4952_v16  ;;  %v4909_v50 = vmul.f32 %v7131_v41, %v10114_v60  ;;  %v5081_v19 = vmul.f32 %v7178_v30, %v10111_v58  ;;  %v7198_v60 = vld [vmem:[%s10807_s28 + $0xfd0] sm:$0xff]  ;;  %v7209_v40 = vld [vmem:[%s10807_s28 + $0x1028] sm:$0xff]  ;;  %v7160_v41 = vld [vmem:[%s10807_s28 + $0xea0] sm:$0xff] }
 0xa12   : > { %v5235_v13 = vadd.f32 %v5225_v55, %v5194_v32  ;;  %v5236_v6 = vadd.f32 %v5226_v29, %v5195_v46  ;;  %v5082_v39 = vmul.f32 %v7179_v25, %v10111_v58  ;;  %v5116_v17 = vmul.f32 %v7188_v35, %v10191_v15  ;;  %v7161_v33 = vld [vmem:[%s10807_s28 + $0xea8] sm:$0xff]  ;;  %v7218_v16 = vld [vmem:[%s10807_s28 + $0x1070] sm:$0xff] }
 0xa13   : > { %v5021_v22 = vadd.f32 %v5011_v0, %v4986_v51  ;;  %v5022_v61 = vadd.f32 %v5012_v21, %v4987_v10  ;;  %v4848_v45 = vadd.f32 %v10971_v14, %v10970_v38  ;;  %v4849_v1 = vadd.f32 %v10973_v4, %v10972_v2  ;;  %v7219_v0 = vld [vmem:[%s10807_s28 + $0x1078] sm:$0xff]  ;;  %v7170_v35 = vld [vmem:[%s10807_s28 + $0xef0] sm:$0xff]  ;;  %v7200_v2 = vld [vmem:[%s10807_s28 + $0xfe0] sm:$0xff] }
 0xa14   : > { %v5245_v26 = vmax.f32 %v5235_v13, 0.0  ;;  %v5246_v20 = vmax.f32 %v5236_v6, 0.0  ;;  %v5117_v44 = vmul.f32 %v7189_v11, %v10191_v15  ;;  %v4943_v42 = vmul.f32 %v7140_v5, %v10032_v36  ;;  %v7171_v51 = vld [vmem:[%s10807_s28 + $0xef8] sm:$0xff]  ;;  %v7181_v11 = vld [vmem:[%s10807_s28 + $0xf48] sm:$0xff] }
 0xa15   : > { %v5056_v63 = vadd.f32 %v5046_v52, %v5021_v22  ;;  %v5057_v59 = vadd.f32 %v5047_v49, %v5022_v61  ;;  %v4883_v54 = vadd.f32 %v10331_v53, %v4848_v45  ;;  %v4884_v48 = vadd.f32 %v4874_v56, %v4849_v1  ;;  %v7201_v4 = vld [vmem:[%s10807_s28 + $0xfe8] sm:$0xff] }
 0xa16   : > { %v5253_v9 = vpack.c.bf16 %v5246_v20, %v5245_v26  ;;  %v4944_v47 = vmul.f32 %v7141_v8, %v10032_v36  ;;  %v5151_v28 = vmul.f32 %v7198_v60, %v10158_v12  ;;  %v5152_v43 = vmul.f32 %v7199_v7, %v10158_v12  ;;  %v7190_v26 = vld [vmem:[%s10807_s28 + $0xf90] sm:$0xff] }
 0xa17   : > { %v5091_v55 = vadd.f32 %v5081_v19, %v5056_v63  ;;  %v5092_v29 = vadd.f32 %v5082_v39, %v5057_v59  ;;  %v4918_v21 = vadd.f32 %v4908_v3, %v4883_v54  ;;  %v4919_v30 = vadd.f32 %v4909_v50, %v4884_v48  ;;  %v7180_v19 = vld [vmem:[%s10807_s28 + $0xf40] sm:$0xff] }
 0xa18   : > { %7780 = vmatmul.mubr.msk.bf16.gmra.mrb[92].mxu1 %vm2527_vm7, %v5253_v9  ;;  %v4978_v53 = vmul.f32 %v7150_v27, %v10048_v57  ;;  %v4979_v36 = vmul.f32 %v7151_v23, %v10048_v57  ;;  %v5186_v46 = vmul.f32 %v7208_v37, %v10215_v31  ;;  %v5187_v25 = vmul.f32 %v7209_v40, %v10215_v31  ;;  %v7210_v27 = vld [vmem:[%s10807_s28 + $0x1030] sm:$0xff]  ;;  %v7211_v23 = vld [vmem:[%s10807_s28 + $0x1038] sm:$0xff]  ;;  %v7220_v48 = vld [vmem:[%s10807_s28 + $0x1080] sm:$0xff] }
 0xa19   : > { %7783 = vmatprep.mubr.msk.bf16.mxu1 %vm8285_vm4, %v10967_v62  ;;  %v5126_v56 = vadd.f32 %v5116_v17, %v5091_v55  ;;  %v5127_v32 = vadd.f32 %v5117_v44, %v5092_v29  ;;  %v4953_v10 = vadd.f32 %v4943_v42, %v4918_v21  ;;  %v4954_v3 = vadd.f32 %v4944_v47, %v4919_v30  ;;  %v7221_v47 = vld [vmem:[%s10807_s28 + $0x1088] sm:$0xff] }
 0xa1a   : > { %v5013_v52 = vmul.f32 %v7160_v41, %v10145_v34  ;;  %v5014_v57 = vmul.f32 %v7161_v33, %v10145_v34  ;;  %v5227_v13 = vmul.f32 %v7218_v16, %v10222_v24  ;;  %v5228_v6 = vmul.f32 %v7219_v0, %v10222_v24  ;;  %v7191_v34 = vld [vmem:[%s10807_s28 + $0xf98] sm:$0xff] }
 0xa1b   : > { %v5161_v49 = vadd.f32 %v5151_v28, %v5126_v56  ;;  %v5162_v50 = vadd.f32 %v5152_v43, %v5127_v32  ;;  %v4988_v5 = vadd.f32 %v4978_v53, %v4953_v10  ;;  %v4989_v22 = vadd.f32 %v4979_v36, %v4954_v3  ;;  %v8221_v56 = vld [vmem:[%s10974_s1] sm:$0xff]   ;;  %v8222_v32 = vld [vmem:[%s10974_s1 + $0x8] sm:$0xff]   ;;  %s10976_s1 = sld [smem:[#allocation19_spill]] }
 0xa1c   : > { %v5048_v61 = vmul.f32 %v7170_v35, %v10072_v18  ;;  %v5049_v39 = vmul.f32 %v7171_v51, %v10072_v18  ;;  %v5083_v7 = vmul.f32 %v7180_v19, %v10111_v58  ;;  %v5084_v38 = vmul.f32 %v7181_v11, %v10111_v58  ;;  %7822 = vmatpush3.bf16.msra.mxu1 %v8221_v56 }
 0xa1d   : > { %v5196_v17 = vadd.f32 %v5186_v46, %v5161_v49  ;;  %v5197_v8 = vadd.f32 %v5187_v25, %v5162_v50  ;;  %v5023_v20 = vadd.f32 %v5013_v52, %v4988_v5  ;;  %v5024_v60 = vadd.f32 %v5014_v57, %v4989_v22  ;;  %7823 = vmatprep.subr.bf16.mxu1 %v10967_v62  ;;  %v5261_v25 = vld [vmem:[%s10975_s22 + $0x8] sm:$0xff]  ;;  %v5262_v49 = vld [vmem:[%s10975_s22 + $0x10] sm:$0xff] }
 0xa1e   : > { %v5118_v63 = vmul.f32 %v7190_v26, %v10191_v15  ;;  %v5119_v59 = vmul.f32 %v7191_v34, %v10191_v15  ;;  %v5153_v58 = vmul.f32 %v7200_v2, %v10158_v12  ;;  %v5154_v40 = vmul.f32 %v7201_v4, %v10158_v12  ;;  %v5267_v2 = vld [vmem:[%s10975_s22 + $0x38] sm:$0xff] }
 0xa1f   : > { %v5237_v14 = vadd.f32 %v5227_v13, %v5196_v17  ;;  %v5238_v45 = vadd.f32 %v5228_v6, %v5197_v8  ;;  %v5058_v1 = vadd.f32 %v5048_v61, %v5023_v20  ;;  %v5059_v18 = vadd.f32 %v5049_v39, %v5024_v60  ;;  %v5263_v13 = vld [vmem:[%s10975_s22 + $0x18] sm:$0xff]  ;;  %v5264_v39 = vld [vmem:[%s10975_s22 + $0x20] sm:$0xff]  ;;  %v5265_v8 = vld [vmem:[%s10975_s22 + $0x28] sm:$0xff] }
 0xa20   : > { %v5188_v28 = vmul.f32 %v7210_v27, %v10215_v31  ;;  %v5189_v43 = vmul.f32 %v7211_v23, %v10215_v31  ;;  %v5229_v12 = vmul.f32 %v7220_v48, %v10222_v24  ;;  %v5230_v33 = vmul.f32 %v7221_v47, %v10222_v24  ;;  %7824 = vmatpush3.bf16.msra.mxu1 %v8222_v32  ;;  %v5260_v24 = vld [vmem:[%s10975_s22] sm:$0xff]  ;;  %v5269_v23 = vld [vmem:[%s10975_s22 + $0x48] sm:$0xff] }
 0xa21   : > { %v5247_v44 = vmax.f32 %v5237_v14, 0.0  ;;  %v5248_v42 = vmax.f32 %v5238_v45, 0.0  ;;  %v5093_v9 = vadd.f32 %v5083_v7, %v5058_v1  ;;  %v5094_v37 = vadd.f32 %v5084_v38, %v5059_v18  ;;  %7875 = vmatprep.subr.bf16.mxu1 %v10967_v62  ;;  %v5266_v14 = vld [vmem:[%s10975_s22 + $0x30] sm:$0xff]  ;;  %v10476_v47 = vld [vmem:[%s8729_s0] sm:$0xff]  }
 0xa23   : > { %v5254_v54 = vpack.c.bf16 %v5248_v42, %v5247_v44  ;;  %v5128_v55 = vadd.f32 %v5118_v63, %v5093_v9  ;;  %v5129_v29 = vadd.f32 %v5119_v59, %v5094_v37  ;;  %v5268_v42 = vld [vmem:[%s10975_s22 + $0x40] sm:$0xff] }
 0xa25   : > { %7784 = vmatmul.mubr.msk.bf16.gmra.mrb[96].mxu1 %vm2527_vm7, %v5254_v54  ;;  %v5163_v15 = vadd.f32 %v5153_v58, %v5128_v55  ;;  %v5164_v41 = vadd.f32 %v5154_v40, %v5129_v29  ;;  %v10483_v55 = vld [vmem:[%s8729_s0 + $0x8] sm:$0xff]   ;;  %v10490_v29 = vld [vmem:[%s8729_s0 + $0x10] sm:$0xff]  }
 0xa26   : > { %7787 = vmatprep.mubr.msk.bf16.mxu1 %vm8285_vm4, %v10967_v62 }
 0xa27   : > { %v5198_v16 = vadd.f32 %v5188_v28, %v5163_v15  ;;  %v5199_v0 = vadd.f32 %v5189_v43, %v5164_v41  ;;  %v10497_v28 = vld [vmem:[%s8729_s0 + $0x18] sm:$0xff]   ;;  %v10504_v43 = vld [vmem:[%s8729_s0 + $0x20] sm:$0xff]   ;;  %s10977_s0 = sld [smem:[#allocation22_spill]] }
 0xa28   : > { %v7230_v15 = vld [vmem:[%s10976_s1] ss:$0 sm:$0xff]  ;;  %s10978_s1 = sld [smem:[#allocation21_spill]] }
 0xa29   : > { %v5239_v21 = vadd.f32 %v5229_v12, %v5198_v16  ;;  %v5240_v30 = vadd.f32 %v5230_v33, %v5199_v0 }
 0xa2b   : > { %v5249_v31 = vmax.f32 %v5239_v21, 0.0  ;;  %v5250_v53 = vmax.f32 %v5240_v30, 0.0 }
 0xa2d   : > { %v5255_v36 = vpack.c.bf16 %v5250_v53, %v5249_v31 }
 0xa2f   : > { %7788 = vmatmul.mubr.msk.bf16.gmra.mrb[100].mxu1 %vm2527_vm7, %v5255_v36 }
 0xa30   : > { %7825 = vmatprep.mubr.msk.bf16.mxu1 %vm8285_vm4, %v10967_v62 }
 0xad7   : > { %v5331_v46 = vpop.f32.mrb[84].mxu1 }
 0xad8   : > { %v7773_v35 = vpop.f32.mrb[85].mxu1  ;;  %v5332_v10 = vadd.f32 %v5331_v46, %v5260_v24 }
 0xad9   : > { %v5334_v51 = vpop.f32.mrb[86].mxu1 }
 0xada   : > { %v5335_v3 = vadd.f32 %v5334_v51, %v5261_v25  ;;  %v7774_v52 = vpop.f32.mrb[87].mxu1 }
 0xadc   : > { %v5370_v57 = vpack.c.bf16 %v5335_v3, %v5332_v10 }
 0xade   : > { %7792 = vmatpush3.bf16.msra.mxu0 %v5370_v57 }
 0xadf   : > { %7793 = vmatprep.subr.bf16.mxu0 %v10967_v62 }
 0xae1   : > { %v5339_v50 = vpop.f32.mrb[88].mxu1 }
 0xae2   : > { %v7777_v6 = vpop.f32.mrb[89].mxu1  ;;  %v5340_v11 = vadd.f32 %v5339_v50, %v5262_v49 }
 0xae3   : > { %v5342_v19 = vpop.f32.mrb[90].mxu1 }
 0xae4   : > { %v5343_v5 = vadd.f32 %v5342_v19, %v5263_v13  ;;  %v7778_v22 = vpop.f32.mrb[91].mxu1 }
 0xae6   : > { %v5371_v61 = vpack.c.bf16 %v5343_v5, %v5340_v11 }
 0xae8   : > { %7794 = vmatpush3.bf16.msra.mxu0 %v5371_v61 }
 0xae9   : > { %7795 = vmatprep.subr.bf16.mxu0 %v10967_v62 }
 0xaeb   : > { %v5347_v17 = vpop.f32.mrb[92].mxu1 }
 0xaec   : > { %v7781_v26 = vpop.f32.mrb[93].mxu1  ;;  %v5348_v20 = vadd.f32 %v5347_v17, %v5264_v39 }
 0xaed   : > { %v5350_v34 = vpop.f32.mrb[94].mxu1 }
 0xaee   : > { %v5351_v60 = vadd.f32 %v5350_v34, %v5265_v8  ;;  %v7782_v7 = vpop.f32.mrb[95].mxu1 }
 0xaf0   : > { %v5372_v38 = vpack.c.bf16 %v5351_v60, %v5348_v20 }
 0xaf2   : > { %7796 = vmatpush3.bf16.msra.mxu0 %v5372_v38 }
 0xaf3   : > { %7797 = vmatprep.subr.bf16.mxu0 %v10967_v62 }
 0xaf8   : > { %v5355_v45 = vpop.f32.mrb[96].mxu1 }
 0xaf9   : > { %v7785_v4 = vpop.f32.mrb[97].mxu1  ;;  %v5356_v18 = vadd.f32 %v5355_v45, %v5266_v14 }
 0xafa   : > { %v5358_v1 = vpop.f32.mrb[98].mxu1 }
 0xafb   : > { %v5359_v63 = vadd.f32 %v5358_v1, %v5267_v2  ;;  %v7786_v59 = vpop.f32.mrb[99].mxu1 }
 0xafc   : > { %v8224_v59 = vld [vmem:[%s10977_s0 + $0x8] sm:$0xff]  }
 0xafd   : > { %v5373_v44 = vpack.c.bf16 %v5359_v63, %v5356_v18  ;;  %v8223_v63 = vld [vmem:[%s10977_s0] sm:$0xff]   ;;  %s10980_s0 = sld [smem:[#allocation26_spill]] }
 0xaff   : > { %7798 = vmatpush3.bf16.msra.mxu0 %v5373_v44 }
 0xb00   : > { %7799 = vmatprep.subr.bf16.mxu0 %v10967_v62 }
 0xb02   : > { %v5363_v27 = vpop.f32.mrb[100].mxu1 }
 0xb03   : > { %v7789_v9 = vpop.f32.mrb[101].mxu1  ;;  %v5364_v58 = vadd.f32 %v5363_v27, %v5268_v42 }
 0xb04   : > { %v5366_v37 = vpop.f32.mrb[102].mxu1 }
 0xb05   : > { %v5367_v40 = vadd.f32 %v5366_v37, %v5269_v23  ;;  %v7790_v54 = vpop.f32.mrb[103].mxu1 }
 0xb07   : > { %v5374_v48 = vpack.c.bf16 %v5367_v40, %v5364_v58 }
 0xb09   : > { %7800 = vmatpush3.bf16.msra.mxu0 %v5374_v48 }
 0xb0a   : > { %7845 = vmatprep.subr.bf16.mxu0 %v10967_v62 }
 0xb0c   : > { %7802 = vmatmul.mubr.msk.bf16.vlgmr.msra.gmra.mrb[56].mxu0 %vm2407_vm6, %v10476_v47 }
 0xb0d   : > { %7805 = vmatprep.mubr.msk.bf16.mxu0 %vm8285_vm4, %v10967_v62 }
 0xb14   : > { %7806 = vmatmul.mubr.msk.bf16.gmra.mrb[60].mxu0 %vm2407_vm6, %v10483_v55 }
 0xb15   : > { %7809 = vmatprep.mubr.msk.bf16.mxu0 %vm8285_vm4, %v10967_v62 }
 0xb1c   : > { %7810 = vmatmul.mubr.msk.bf16.gmra.mrb[64].mxu0 %vm2407_vm6, %v10490_v29 }
 0xb1d   : > { %7813 = vmatprep.mubr.msk.bf16.mxu0 %vm8285_vm4, %v10967_v62 }
 0xb24   : > { %7814 = vmatmul.mubr.msk.bf16.gmra.mrb[68].mxu0 %vm2407_vm6, %v10497_v28 }
 0xb25   : > { %7817 = vmatprep.mubr.msk.bf16.mxu0 %vm8285_vm4, %v10967_v62 }
 0xb2c   : > { %7818 = vmatmul.mubr.msk.bf16.gmra.mrb[72].mxu0 %vm2407_vm6, %v10504_v43 }
 0xb2d   : > { %7855 = vmatprep.mubr.msk.bf16.mxu0 %vm8285_vm4, %v10967_v62 }
 0xbdf   : > { %v5416_v41 = vpop.f32.mrb[56].mxu0 }
 0xbe0   : > { %v5417_v12 = vadd.f32 %v7230_v15, %v5416_v41  ;;  %v7803_v33 = vpop.f32.mrb[57].mxu0 }
 0xbe1   : > { %v5419_v16 = vpop.f32.mrb[58].mxu0 }
 0xbe2   : > { %v5420_v0 = vadd.f32 %v7230_v15, %v5419_v16  ;;  %v7804_v21 = vpop.f32.mrb[59].mxu0  ;;  %v5455_v30 = vmax.f32 %v5417_v12, 0.0 }
 0xbe4   : > { %v5456_v31 = vmax.f32 %v5420_v0, 0.0 }
 0xbe6   : > { %v5465_v53 = vpack.c.bf16 %v5456_v31, %v5455_v30 }
 0xbe7   : > { %v5424_v36 = vpop.f32.mrb[60].mxu0 }
 0xbe8   : > { %v5425_v56 = vadd.f32 %v7230_v15, %v5424_v36  ;;  %v7807_v32 = vpop.f32.mrb[61].mxu0  ;;  %7826 = vmatmul.mubr.msk.bf16.vlgmr.msra.gmra.mrb[104].mxu1 %vm2527_vm7, %v5465_v53 }
 0xbe9   : > { %v5427_v24 = vpop.f32.mrb[62].mxu0  ;;  %7829 = vmatprep.mubr.msk.bf16.mxu1 %vm8285_vm4, %v10967_v62  ;;  %7876 = vmatpush3.bf16.msra.mxu1 %v8223_v63 }
 0xbea   : > { %v5428_v46 = vadd.f32 %v7230_v15, %v5427_v24  ;;  %v7808_v25 = vpop.f32.mrb[63].mxu0  ;;  %v5457_v35 = vmax.f32 %v5425_v56, 0.0  ;;  %7877 = vmatprep.subr.bf16.mxu1 %v10967_v62 }
 0xbeb   : > { %v7243_v25 = vld [vmem:[%s10978_s1] ss:$0 sm:$0xff]  ;;  %s10979_s1 = sld [smem:[#allocation24_spill]] }
 0xbec   : > { %v5458_v51 = vmax.f32 %v5428_v46, 0.0 }
 0xbed   : > { %7878 = vmatpush3.bf16.msra.mxu1 %v8224_v59 }
 0xbee   : > { %v5466_v10 = vpack.c.bf16 %v5458_v51, %v5457_v35 }
 0xbef   : > { %v5432_v3 = vpop.f32.mrb[64].mxu0 }
 0xbf0   : > { %v5433_v52 = vadd.f32 %v7230_v15, %v5432_v3  ;;  %v7811_v57 = vpop.f32.mrb[65].mxu0  ;;  %7830 = vmatmul.mubr.msk.bf16.gmra.mrb[108].mxu1 %vm2527_vm7, %v5466_v10 }
 0xbf1   : > { %v5435_v49 = vpop.f32.mrb[66].mxu0  ;;  %7833 = vmatprep.mubr.msk.bf16.mxu1 %vm8285_vm4, %v10967_v62 }
 0xbf2   : > { %v5436_v50 = vadd.f32 %v7230_v15, %v5435_v49  ;;  %v7812_v13 = vpop.f32.mrb[67].mxu0  ;;  %v5459_v6 = vmax.f32 %v5433_v52, 0.0 }
 0xbf4   : > { %v5460_v19 = vmax.f32 %v5436_v50, 0.0 }
 0xbf6   : > { %v5467_v11 = vpack.c.bf16 %v5460_v19, %v5459_v6 }
 0xbf7   : > { %v5440_v5 = vpop.f32.mrb[68].mxu0 }
 0xbf8   : > { %v5441_v22 = vadd.f32 %v7230_v15, %v5440_v5  ;;  %v7815_v61 = vpop.f32.mrb[69].mxu0  ;;  %7834 = vmatmul.mubr.msk.bf16.gmra.mrb[112].mxu1 %vm2527_vm7, %v5467_v11 }
 0xbf9   : > { %v5443_v39 = vpop.f32.mrb[70].mxu0  ;;  %7837 = vmatprep.mubr.msk.bf16.mxu1 %vm8285_vm4, %v10967_v62 }
 0xbfa   : > { %v5444_v17 = vadd.f32 %v7230_v15, %v5443_v39  ;;  %v7816_v8 = vpop.f32.mrb[71].mxu0  ;;  %v5461_v26 = vmax.f32 %v5441_v22, 0.0 }
 0xbfc   : > { %v5462_v34 = vmax.f32 %v5444_v17, 0.0 }
 0xbfe   : > { %v5468_v20 = vpack.c.bf16 %v5462_v34, %v5461_v26 }
 0xbff   : > { %v5448_v60 = vpop.f32.mrb[72].mxu0 }
 0xc00   : > { %v5449_v7 = vadd.f32 %v7230_v15, %v5448_v60  ;;  %v7819_v38 = vpop.f32.mrb[73].mxu0  ;;  %7838 = vmatmul.mubr.msk.bf16.gmra.mrb[116].mxu1 %vm2527_vm7, %v5468_v20 }
 0xc01   : > { %v5451_v14 = vpop.f32.mrb[74].mxu0  ;;  %7841 = vmatprep.mubr.msk.bf16.mxu1 %vm8285_vm4, %v10967_v62 }
 0xc02   : > { %v5452_v45 = vadd.f32 %v7230_v15, %v5451_v14  ;;  %v7820_v2 = vpop.f32.mrb[75].mxu0  ;;  %v5463_v4 = vmax.f32 %v5449_v7, 0.0 }
 0xc04   : > { %v5464_v1 = vmax.f32 %v5452_v45, 0.0 }
 0xc06   : > { %v5469_v18 = vpack.c.bf16 %v5464_v1, %v5463_v4 }
 0xc08   : > { %7842 = vmatmul.mubr.msk.bf16.gmra.mrb[120].mxu1 %vm2527_vm7, %v5469_v18 }
 0xc09   : > { %7879 = vmatprep.mubr.msk.bf16.mxu1 %vm8285_vm4, %v10967_v62 }
 0xcbb   : > { %v5535_v44 = vpop.f32.mrb[104].mxu1 }
 0xcbc   : > { %v7827_v42 = vpop.f32.mrb[105].mxu1 }
 0xcbd   : > { %v5538_v27 = vpop.f32.mrb[106].mxu1 }
 0xcbe   : > { %v5574_v23 = vpack.c.bf16 %v5538_v27, %v5535_v44  ;;  %v7828_v9 = vpop.f32.mrb[107].mxu1 }
 0xcc0   : > { %7846 = vmatpush3.bf16.msra.mxu0 %v5574_v23 }
 0xcc1   : > { %7847 = vmatprep.subr.bf16.mxu0 %v10967_v62 }
 0xcc3   : > { %v5543_v37 = vpop.f32.mrb[108].mxu1 }
 0xcc4   : > { %v7831_v58 = vpop.f32.mrb[109].mxu1 }
 0xcc5   : > { %v5546_v40 = vpop.f32.mrb[110].mxu1 }
 0xcc6   : > { %v5575_v54 = vpack.c.bf16 %v5546_v40, %v5543_v37  ;;  %v7832_v48 = vpop.f32.mrb[111].mxu1 }
 0xcc8   : > { %7848 = vmatpush3.bf16.msra.mxu0 %v5575_v54 }
 0xcc9   : > { %7849 = vmatprep.subr.bf16.mxu0 %v10967_v62 }
 0xccb   : > { %v5551_v15 = vpop.f32.mrb[112].mxu1 }
 0xccc   : > { %v7835_v41 = vpop.f32.mrb[113].mxu1 }
 0xccd   : > { %v5554_v12 = vpop.f32.mrb[114].mxu1 }
 0xcce   : > { %v5576_v33 = vpack.c.bf16 %v5554_v12, %v5551_v15  ;;  %v7836_v16 = vpop.f32.mrb[115].mxu1 }
 0xccf   : > { %v5876_v16 = vld [vmem:[%s10979_s1 + $0x18] sm:$0xff] }
 0xcd0   : > { %7850 = vmatpush3.bf16.msra.mxu0 %v5576_v33  ;;  %v5874_v33 = vld [vmem:[%s10979_s1 + $0x8] sm:$0xff] }
 0xcd1   : > { %7851 = vmatprep.subr.bf16.mxu0 %v10967_v62 }
 0xcd3   : > { %v5559_v0 = vpop.f32.mrb[116].mxu1 }
 0xcd4   : > { %v7839_v21 = vpop.f32.mrb[117].mxu1 }
 0xcd5   : > { %v5562_v30 = vpop.f32.mrb[118].mxu1  ;;  %v7982_v21 = vpack.c.bf16 %v5876_v16, %v5874_v33  ;;  %v6087_v33 = vld [vmem:[%s8523_s29 + $0x78] sm:$0xff] }
 0xcd6   : > { %v5577_v31 = vpack.c.bf16 %v5562_v30, %v5559_v0  ;;  %v7840_v53 = vpop.f32.mrb[119].mxu1  ;;  %v5873_v0 = vld [vmem:[%s10979_s1] sm:$0xff]  ;;  %v5875_v30 = vld [vmem:[%s10979_s1 + $0x10] sm:$0xff] }
 0xcd7   : > { %v5880_v53 = vld [vmem:[%s10979_s1 + $0x38] sm:$0xff]  ;;  %7983 = vmatprep.subr.bf16.mxu1 %v7982_v21  ;;  %v6089_v21 = vld [vmem:[%s8523_s29 + $0x88] sm:$0xff] }
 0xcd8   : > { %7852 = vmatpush3.bf16.msra.mxu0 %v5577_v31  ;;  %v5878_v31 = vld [vmem:[%s10979_s1 + $0x28] sm:$0xff] }
 0xcd9   : > { %7853 = vmatprep.subr.bf16.mxu0 %v10967_v62 }
 0xcdb   : > { %v5567_v36 = vpop.f32.mrb[120].mxu1 }
 0xcdc   : > { %v7843_v56 = vpop.f32.mrb[121].mxu1 }
 0xcdd   : > { %v5570_v32 = vpop.f32.mrb[122].mxu1  ;;  %v7986_v56 = vpack.c.bf16 %v5880_v53, %v5878_v31  ;;  %v6090_v31 = vld [vmem:[%s8523_s29 + $0x90] sm:$0xff]  ;;  %v6091_v53 = vld [vmem:[%s8523_s29 + $0x98] sm:$0xff] }
 0xcde   : > { %v5578_v24 = vpack.c.bf16 %v5570_v32, %v5567_v36  ;;  %v7844_v46 = vpop.f32.mrb[123].mxu1  ;;  %v7984_v36 = vpack.c.bf16 %v5875_v30, %v5873_v0  ;;  %v5877_v32 = vld [vmem:[%s10979_s1 + $0x20] sm:$0xff] }
 0xcdf   : > { %v6088_v0 = vld [vmem:[%s8523_s29 + $0x80] sm:$0xff] }
 0xce0   : > { %7854 = vmatpush3.bf16.msra.mxu0 %v5578_v24  ;;  %v5879_v24 = vld [vmem:[%s10979_s1 + $0x30] sm:$0xff]  ;;  %s10982_s1 = sld [smem:[#allocation23_spill]]  ;;  %v8015_v30 = vpack.c.bf16 %v6089_v21, %v6088_v0 }
 0xce1   : > { %7899 = vmatprep.subr.bf16.mxu0 %v10967_v62  ;;  %v7988_v46 = vpack.c.bf16 %v5879_v24, %v5877_v32  ;;  %v6070_v24 = vld [vmem:[%s10980_s0 + $0x10] sm:$0xff] }
 0xce3   : > { %7856 = vmatmul.mubr.msk.bf16.vlgmr.msra.gmra.mrb[76].mxu0 %vm2407_vm6, %v10476_v47 }
 0xce4   : > { %7859 = vmatprep.mubr.msk.bf16.mxu0 %vm8285_vm4, %v10967_v62 }
 0xceb   : > { %7860 = vmatmul.mubr.msk.bf16.gmra.mrb[80].mxu0 %vm2407_vm6, %v10483_v55 }
 0xcec   : > { %7863 = vmatprep.mubr.msk.bf16.mxu0 %vm8285_vm4, %v10967_v62 }
 0xcf3   : > { %7864 = vmatmul.mubr.msk.bf16.gmra.mrb[84].mxu0 %vm2407_vm6, %v10490_v29 }
 0xcf4   : > { %7867 = vmatprep.mubr.msk.bf16.mxu0 %vm8285_vm4, %v10967_v62 }
 0xcfb   : > { %7868 = vmatmul.mubr.msk.bf16.gmra.mrb[88].mxu0 %vm2407_vm6, %v10497_v28 }
 0xcfc   : > { %7871 = vmatprep.mubr.msk.bf16.mxu0 %vm8285_vm4, %v10967_v62 }
 0xd03   : > { %7872 = vmatmul.mubr.msk.bf16.gmra.mrb[92].mxu0 %vm2407_vm6, %v10504_v43 }
 0xd04   : > { %7909 = vmatprep.mubr.msk.bf16.mxu0 %vm8285_vm4, %v10967_v62 }
 0xdb6   : > { %v5620_v35 = vpop.f32.mrb[76].mxu0 }
 0xdb7   : > { %v5621_v51 = vadd.f32 %v7243_v25, %v5620_v35  ;;  %v7857_v10 = vpop.f32.mrb[77].mxu0 }
 0xdb8   : > { %v5623_v3 = vpop.f32.mrb[78].mxu0 }
 0xdb9   : > { %v5624_v52 = vadd.f32 %v7243_v25, %v5623_v3  ;;  %v7858_v57 = vpop.f32.mrb[79].mxu0  ;;  %v5659_v49 = vmax.f32 %v5621_v51, 0.0 }
 0xdbb   : > { %v5660_v50 = vmax.f32 %v5624_v52, 0.0 }
 0xdbd   : > { %v5669_v13 = vpack.c.bf16 %v5660_v50, %v5659_v49 }
 0xdbe   : > { %v5628_v6 = vpop.f32.mrb[80].mxu0 }
 0xdbf   : > { %v5629_v19 = vadd.f32 %v7243_v25, %v5628_v6  ;;  %v7861_v11 = vpop.f32.mrb[81].mxu0  ;;  %7880 = vmatmul.mubr.msk.bf16.vlgmr.msra.gmra.mrb[124].mxu1 %vm2527_vm7, %v5669_v13 }
 0xdc0   : > { %v5631_v5 = vpop.f32.mrb[82].mxu0  ;;  %7883 = vmatprep.mubr.msk.bf16.mxu1 %vm8285_vm4, %v10967_v62  ;;  %7985 = vmatpush1.bf16.msra.mxu1 %v7984_v36  ;;  %v8018_v36 = vpack.c.bf16 %v6091_v53, %v6090_v31 }
 0xdc1   : > { %v5632_v22 = vadd.f32 %v7243_v25, %v5631_v5  ;;  %v7862_v61 = vpop.f32.mrb[83].mxu0  ;;  %v5661_v39 = vmax.f32 %v5629_v19, 0.0  ;;  %7987 = vmatprep.subr.bf16.mxu1 %v7986_v56  ;;  %v7256_v56 = vld [vmem:[%s10982_s1] ss:$0 sm:$0xff]  ;;  %s10983_s1 = sld [smem:[#allocation25_spill]] }
 0xdc3   : > { %v5662_v17 = vmax.f32 %v5632_v22, 0.0 }
 0xdc4   : > { %7989 = vmatpush1.bf16.msra.mxu1 %v7988_v46  ;;  %v6071_v46 = vld [vmem:[%s10980_s0 + $0x18] sm:$0xff] }
 0xdc5   : > { %v5670_v8 = vpack.c.bf16 %v5662_v17, %v5661_v39 }
 0xdc6   : > { %v5636_v26 = vpop.f32.mrb[84].mxu0 }
 0xdc7   : > { %v5637_v34 = vadd.f32 %v7243_v25, %v5636_v26  ;;  %v7865_v20 = vpop.f32.mrb[85].mxu0  ;;  %7884 = vmatmul.mubr.msk.bf16.gmra.mrb[128].mxu1 %vm2527_vm7, %v5670_v8 }
 0xdc8   : > { %v5639_v60 = vpop.f32.mrb[86].mxu0  ;;  %7887 = vmatprep.mubr.msk.bf16.mxu1 %vm8285_vm4, %v10967_v62 }
 0xdc9   : > { %v5640_v7 = vadd.f32 %v7243_v25, %v5639_v60  ;;  %v7866_v38 = vpop.f32.mrb[87].mxu0  ;;  %v5663_v14 = vmax.f32 %v5637_v34, 0.0 }
 0xdcb   : > { %v5664_v45 = vmax.f32 %v5640_v7, 0.0 }
 0xdcd   : > { %v5671_v2 = vpack.c.bf16 %v5664_v45, %v5663_v14  ;;  %v10981_v14 = vmov 0.0|0.0  }
 0xdce   : > { %v5644_v4 = vpop.f32.mrb[88].mxu0 }
 0xdcf   : > { %v5645_v1 = vadd.f32 %v7243_v25, %v5644_v4  ;;  %v7869_v18 = vpop.f32.mrb[89].mxu0  ;;  %7888 = vmatmul.mubr.msk.bf16.gmra.mrb[132].mxu1 %vm2527_vm7, %v5671_v2  ;;  %v6073_v2 = vld [vmem:[%s8523_s29 + $0x8] sm:$0xff]  ;;  %v6074_v4 = vld [vmem:[%s8523_s29 + $0x10] sm:$0xff] }
 0xdd0   : > { %v5647_v63 = vpop.f32.mrb[90].mxu0  ;;  %7891 = vmatprep.mubr.msk.bf16.mxu1 %vm8285_vm4, %v10967_v62 }
 0xdd1   : > { %v5648_v59 = vadd.f32 %v7243_v25, %v5647_v63  ;;  %v7870_v44 = vpop.f32.mrb[91].mxu0  ;;  %v5665_v42 = vmax.f32 %v5645_v1, 0.0  ;;  %v6075_v1 = vld [vmem:[%s8523_s29 + $0x18] sm:$0xff]  ;;  %v6077_v63 = vld [vmem:[%s8523_s29 + $0x28] sm:$0xff] }
 0xdd2   : > { %v7994_v18 = vpack.c.bf16 %v6075_v1, %v6074_v4  ;;  %v6078_v44 = vld [vmem:[%s8523_s29 + $0x30] sm:$0xff] }
 0xdd3   : > { %v5666_v27 = vmax.f32 %v5648_v59, 0.0 }
 0xdd5   : > { %v5672_v23 = vpack.c.bf16 %v5666_v27, %v5665_v42  ;;  %v6079_v42 = vld [vmem:[%s8523_s29 + $0x38] sm:$0xff] }
 0xdd6   : > { %v5652_v9 = vpop.f32.mrb[92].mxu0  ;;  %v8000_v27 = vpack.c.bf16 %v6079_v42, %v6078_v44 }
 0xdd7   : > { %v5653_v37 = vadd.f32 %v7243_v25, %v5652_v9  ;;  %v7873_v58 = vpop.f32.mrb[93].mxu0  ;;  %7892 = vmatmul.mubr.msk.bf16.gmra.mrb[136].mxu1 %vm2527_vm7, %v5672_v23  ;;  %v6080_v23 = vld [vmem:[%s8523_s29 + $0x40] sm:$0xff]  ;;  %v6081_v9 = vld [vmem:[%s8523_s29 + $0x48] sm:$0xff] }
 0xdd8   : > { %v5655_v40 = vpop.f32.mrb[94].mxu0  ;;  %7895 = vmatprep.mubr.msk.bf16.mxu1 %vm8285_vm4, %v10967_v62  ;;  %v6082_v58 = vld [vmem:[%s8523_s29 + $0x50] sm:$0xff] }
 0xdd9   : > { %v5656_v54 = vadd.f32 %v7243_v25, %v5655_v40  ;;  %v7874_v48 = vpop.f32.mrb[95].mxu0  ;;  %v5667_v15 = vmax.f32 %v5653_v37, 0.0  ;;  %v8003_v37 = vpack.c.bf16 %v6081_v9, %v6080_v23  ;;  %v6083_v40 = vld [vmem:[%s8523_s29 + $0x58] sm:$0xff]  ;;  %v6093_v23 = vld [vmem:[%s8523_s29 + $0xa8] sm:$0xff] }
 0xdda   : > { %v6084_v48 = vld [vmem:[%s8523_s29 + $0x60] sm:$0xff] }
 0xddb   : > { %v5668_v41 = vmax.f32 %v5656_v54, 0.0  ;;  %v8006_v54 = vpack.c.bf16 %v6083_v40, %v6082_v58  ;;  %v6095_v58 = vld [vmem:[%s8523_s29 + $0xb8] sm:$0xff] }
 0xddd   : > { %v5673_v12 = vpack.c.bf16 %v5668_v41, %v5667_v15  ;;  %v6085_v15 = vld [vmem:[%s8523_s29 + $0x68] sm:$0xff] }
 0xdde   : > { %v8009_v41 = vpack.c.bf16 %v6085_v15, %v6084_v48  ;;  %v10984_v48 = vld [vmem:[#allocation27_spill] sm:$0xff] }
 0xddf   : > { %7896 = vmatmul.mubr.msk.bf16.gmra.mrb[140].mxu1 %vm2527_vm7, %v5673_v12  ;;  %v6086_v12 = vld [vmem:[%s8523_s29 + $0x70] sm:$0xff]  ;;  %v5889_v15 = vsub.s32 1, %v10984_v48 }
 0xde0   : > { %5987 = vmatprep.mubr.f32.mxu1 %v10967_v62  ;;  %v8012_v16 = vpack.c.bf16 %v6087_v33, %v6086_v12 }
 0xe92   : > { %v5739_v25 = vpop.f32.mrb[124].mxu1 }
 0xe93   : > { %v7881_v35 = vpop.f32.mrb[125].mxu1 }
 0xe94   : > { %v5742_v51 = vpop.f32.mrb[126].mxu1 }
 0xe95   : > { %v5778_v10 = vpack.c.bf16 %v5742_v51, %v5739_v25  ;;  %v7882_v3 = vpop.f32.mrb[127].mxu1 }
 0xe97   : > { %7900 = vmatpush3.bf16.msra.mxu0 %v5778_v10 }
 0xe98   : > { %7901 = vmatprep.subr.bf16.mxu0 %v10967_v62 }
 0xe9a   : > { %v5747_v52 = vpop.f32.mrb[128].mxu1 }
 0xe9b   : > { %v7885_v57 = vpop.f32.mrb[129].mxu1 }
 0xe9c   : > { %v5750_v49 = vpop.f32.mrb[130].mxu1  ;;  %v8030_v57 = vpack.c.bf16 %v6071_v46, %v6070_v24 }
 0xe9d   : > { %v5779_v50 = vpack.c.bf16 %v5750_v49, %v5747_v52  ;;  %v7886_v13 = vpop.f32.mrb[131].mxu1 }
 0xe9f   : > { %7902 = vmatpush3.bf16.msra.mxu0 %v5779_v50 }
 0xea0   : > { %7903 = vmatprep.subr.bf16.mxu0 %v10967_v62 }
 0xea2   : > { %v5755_v6 = vpop.f32.mrb[132].mxu1 }
 0xea3   : > { %v7889_v19 = vpop.f32.mrb[133].mxu1 }
 0xea4   : > { %v5758_v11 = vpop.f32.mrb[134].mxu1 }
 0xea5   : > { %v5780_v5 = vpack.c.bf16 %v5758_v11, %v5755_v6  ;;  %v7890_v22 = vpop.f32.mrb[135].mxu1 }
 0xea7   : > { %7904 = vmatpush3.bf16.msra.mxu0 %v5780_v5 }
 0xea8   : > { %7905 = vmatprep.subr.bf16.mxu0 %v10967_v62 }
 0xeaa   : > { %v5763_v61 = vpop.f32.mrb[136].mxu1 }
 0xeab   : > { %v7893_v39 = vpop.f32.mrb[137].mxu1 }
 0xeac   : > { %v5766_v17 = vpop.f32.mrb[138].mxu1 }
 0xead   : > { %v5781_v8 = vpack.c.bf16 %v5766_v17, %v5763_v61  ;;  %v7894_v26 = vpop.f32.mrb[139].mxu1 }
 0xeaf   : > { %7906 = vmatpush3.bf16.msra.mxu0 %v5781_v8 }
 0xeb0   : > { %7907 = vmatprep.subr.bf16.mxu0 %v10967_v62 }
 0xeb2   : > { %v5771_v34 = vpop.f32.mrb[140].mxu1 }
 0xeb3   : > { %v7897_v20 = vpop.f32.mrb[141].mxu1 }
 0xeb4   : > { %v5774_v60 = vpop.f32.mrb[142].mxu1 }
 0xeb5   : > { %v5782_v7 = vpack.c.bf16 %v5774_v60, %v5771_v34  ;;  %v7898_v38 = vpop.f32.mrb[143].mxu1 }
 0xeb7   : > { %7908 = vmatpush3.bf16.msra.mxu0 %v5782_v7 }
 0xeb8   : > { %7990 = vmatprep.subr.bf16.mxu0 %v10981_v14 }
 0xeba   : > { %7910 = vmatmul.mubr.msk.bf16.vlgmr.msra.gmra.mrb[96].mxu0 %vm2407_vm6, %v10476_v47  ;;  %v6068_v47 = vld [vmem:[%s10980_s0] sm:$0xff] }
 0xebb   : > { %7913 = vmatprep.mubr.msk.bf16.mxu0 %vm8285_vm4, %v10967_v62 }
 0xec2   : > { %7914 = vmatmul.mubr.msk.bf16.gmra.mrb[100].mxu0 %vm2407_vm6, %v10483_v55  ;;  %v6069_v55 = vld [vmem:[%s10980_s0 + $0x8] sm:$0xff] }
 0xec3   : > { %7917 = vmatprep.mubr.msk.bf16.mxu0 %vm8285_vm4, %v10967_v62  ;;  %v10602_v45 = vpack.c.bf16 %v6069_v55, %v6068_v47 }
 0xec5   : > { %8027 = vmatprep.subr.bf16.mxu1 %v10602_v45 }
 0xeca   : > { %7918 = vmatmul.mubr.msk.bf16.gmra.mrb[104].mxu0 %vm2407_vm6, %v10490_v29  ;;  %v6072_v29 = vld [vmem:[%s8523_s29] sm:$0xff] }
 0xecb   : > { %7921 = vmatprep.mubr.msk.bf16.mxu0 %vm8285_vm4, %v10967_v62 }
 0xed2   : > { %7922 = vmatmul.mubr.msk.bf16.gmra.mrb[108].mxu0 %vm2407_vm6, %v10497_v28  ;;  %v7991_v28 = vpack.c.bf16 %v6073_v2, %v6072_v29 }
 0xed3   : > { %7925 = vmatprep.mubr.msk.bf16.mxu0 %vm8285_vm4, %v10967_v62 }
 0xed4   : > { %7992 = vmatpush1.bf16.msra.mxu0 %v7991_v28 }
 0xed5   : > { %7993 = vmatprep.subr.bf16.mxu0 %v10981_v14 }
 0xed8   : > { %7995 = vmatpush1.bf16.msra.mxu0 %v7994_v18 }
 0xed9   : > { %7996 = vmatprep.subr.bf16.mxu0 %v10981_v14 }
 0xeda   : > { %7926 = vmatmul.mubr.msk.bf16.gmra.mrb[112].mxu0 %vm2407_vm6, %v10504_v43  ;;  %v6076_v43 = vld [vmem:[%s8523_s29 + $0x20] sm:$0xff] }
 0xedb   : > { %v7997_v59 = vpack.c.bf16 %v6077_v63, %v6076_v43 }
 0xedd   : > { %7998 = vmatpush1.bf16.msra.mxu0 %v7997_v59 }
 0xede   : > { %7999 = vmatprep.subr.bf16.mxu0 %v10981_v14 }
 0xee1   : > { %8001 = vmatpush1.bf16.msra.mxu0 %v8000_v27 }
 0xee2   : > { %8002 = vmatprep.subr.bf16.mxu0 %v10981_v14 }
 0xee5   : > { %8004 = vmatpush1.bf16.msra.mxu0 %v8003_v37  ;;  %v6094_v37 = vld [vmem:[%s8523_s29 + $0xb0] sm:$0xff] }
 0xee6   : > { %8005 = vmatprep.subr.bf16.mxu0 %v10981_v14  ;;  %v8024_v40 = vpack.c.bf16 %v6095_v58, %v6094_v37 }
 0xee9   : > { %8007 = vmatpush1.bf16.msra.mxu0 %v8006_v54  ;;  %v5881_v54 = vld [vmem:[%s10983_s1] sm:$0x3]  ;;  %s10717_s1 = scalar_lea.vmem %s8533_s4, %s8558_s18 }
 0xeea   : > { %8008 = vmatprep.subr.bf16.mxu0 %v10981_v14  ;;  %v10682_v33 = vrot.slane %v5881_v54, %v5889_v15 }
 0xeed   : > { %8010 = vmatpush1.bf16.msra.mxu0 %v8009_v41  ;;  %v10985_v41 = vsub.s32 0, %v10984_v48 }
 0xeee   : > { %8011 = vmatprep.subr.bf16.mxu0 %v10981_v14 }
 0xeef   : > { %v10680_v12 = vrot.slane %v5881_v54, %v10985_v41 }
 0xef1   : > { %8013 = vmatpush1.bf16.msra.mxu0 %v8012_v16 }
 0xef2   : > { %8014 = vmatprep.subr.bf16.mxu0 %v10981_v14 }
 0xef5   : > { %8016 = vmatpush1.bf16.msra.mxu0 %v8015_v30 }
 0xef6   : > { %8017 = vmatprep.subr.bf16.mxu0 %v10981_v14 }
 0xef9   : > { %8019 = vmatpush1.bf16.msra.mxu0 %v8018_v36 }
 0xefa   : > { %8020 = vmatprep.subr.bf16.mxu0 %v10981_v14 }
 0xf8d   : > { %v5824_v32 = vpop.f32.mrb[96].mxu0 }
 0xf8e   : > { %v10638_v25 = vadd.f32 %v7256_v56, %v5824_v32  ;;  %v7911_v35 = vpop.f32.mrb[97].mxu0 }
 0xf8f   : > { %v5827_v51 = vpop.f32.mrb[98].mxu0 }
 0xf90   : > { %v5863_v10 = vmax.f32 %v10638_v25, 0.0  ;;  %v5828_v3 = vadd.f32 %v7256_v56, %v5827_v51  ;;  %v7912_v52 = vpop.f32.mrb[99].mxu0 }
 0xf92   : > { %7262 = vmatmul.mubr.msk.f32.vlgmr.msra.gmra.mrb[82].mxu1 %vm2527_vm7, %v5863_v10  ;;  %v5864_v49 = vmax.f32 %v5828_v3, 0.0 }
 0xf93   : > { %5993 = vmatprep.mubr.f32.mxu1 %v10967_v62  ;;  %8029 = vmatpush3.bf16.msra.mxu1 %v10602_v45 }
 0xf94   : > { %8031 = vmatprep.subr.bf16.mxu1 %v8030_v57 }
 0xf95   : > { %v5832_v50 = vpop.f32.mrb[100].mxu0 }
 0xf96   : > { %v5833_v13 = vadd.f32 %v7256_v56, %v5832_v50  ;;  %7263 = vmatmul.mubr.msk.f32.gmra.mrb[144].mxu1 %vm2527_vm7, %v5864_v49  ;;  %v7915_v6 = vpop.f32.mrb[101].mxu0 }
 0xf97   : > { %v5835_v19 = vpop.f32.mrb[102].mxu0  ;;  %5999 = vmatprep.mubr.f32.mxu1 %v10967_v62  ;;  %8033 = vmatpush3.bf16.msra.mxu1 %v8030_v57 }
 0xf98   : > { %v5865_v11 = vmax.f32 %v5833_v13, 0.0  ;;  %v5836_v5 = vadd.f32 %v7256_v56, %v5835_v19  ;;  %v7916_v22 = vpop.f32.mrb[103].mxu0 }
 0xf9a   : > { %7264 = vmatmul.mubr.msk.f32.gmra.mrb[146].mxu1 %vm2527_vm7, %v5865_v11  ;;  %v5866_v61 = vmax.f32 %v5836_v5, 0.0 }
 0xf9b   : > { %6005 = vmatprep.mubr.f32.mxu1 %v10967_v62 }
 0xf9d   : > { %v5840_v39 = vpop.f32.mrb[104].mxu0 }
 0xf9e   : > { %v5841_v17 = vadd.f32 %v7256_v56, %v5840_v39  ;;  %7265 = vmatmul.mubr.msk.f32.gmra.mrb[148].mxu1 %vm2527_vm7, %v5866_v61  ;;  %v7919_v8 = vpop.f32.mrb[105].mxu0 }
 0xf9f   : > { %v5843_v26 = vpop.f32.mrb[106].mxu0  ;;  %6011 = vmatprep.mubr.f32.mxu1 %v10967_v62 }
 0xfa0   : > { %v5867_v34 = vmax.f32 %v5841_v17, 0.0  ;;  %v5844_v20 = vadd.f32 %v7256_v56, %v5843_v26  ;;  %v7920_v60 = vpop.f32.mrb[107].mxu0 }
 0xfa2   : > { %7266 = vmatmul.mubr.msk.f32.gmra.mrb[150].mxu1 %vm2527_vm7, %v5867_v34  ;;  %v5868_v7 = vmax.f32 %v5844_v20, 0.0 }
 0xfa3   : > { %6017 = vmatprep.mubr.f32.mxu1 %v10967_v62 }
 0xfa5   : > { %v5848_v38 = vpop.f32.mrb[108].mxu0 }
 0xfa6   : > { %v5849_v47 = vadd.f32 %v7256_v56, %v5848_v38  ;;  %7267 = vmatmul.mubr.msk.f32.gmra.mrb[152].mxu1 %vm2527_vm7, %v5868_v7  ;;  %v7923_v55 = vpop.f32.mrb[109].mxu0 }
 0xfa7   : > { %v5851_v45 = vpop.f32.mrb[110].mxu0  ;;  %6023 = vmatprep.mubr.f32.mxu1 %v10967_v62 }
 0xfa8   : > { %v5869_v29 = vmax.f32 %v5849_v47, 0.0  ;;  %v5852_v2 = vadd.f32 %v7256_v56, %v5851_v45  ;;  %v7924_v4 = vpop.f32.mrb[111].mxu0 }
 0xfaa   : > { %7268 = vmatmul.mubr.msk.f32.gmra.mrb[154].mxu1 %vm2527_vm7, %v5869_v29  ;;  %v5870_v28 = vmax.f32 %v5852_v2, 0.0 }
 0xfab   : > { %6029 = vmatprep.mubr.f32.mxu1 %v10967_v62 }
 0xfad   : > { %v5856_v1 = vpop.f32.mrb[112].mxu0 }
 0xfae   : > { %v5857_v18 = vadd.f32 %v7256_v56, %v5856_v1  ;;  %7269 = vmatmul.mubr.msk.f32.gmra.mrb[156].mxu1 %vm2527_vm7, %v5870_v28  ;;  %v7927_v43 = vpop.f32.mrb[113].mxu0 }
 0xfaf   : > { %v5859_v63 = vpop.f32.mrb[114].mxu0  ;;  %6035 = vmatprep.mubr.f32.mxu1 %v10967_v62 }
 0xfb0   : > { %v5871_v59 = vmax.f32 %v5857_v18, 0.0  ;;  %v5860_v44 = vadd.f32 %v7256_v56, %v5859_v63  ;;  %v7928_v42 = vpop.f32.mrb[115].mxu0 }
 0xfb2   : > { %7270 = vmatmul.mubr.msk.f32.gmra.mrb[158].mxu1 %vm2527_vm7, %v5871_v59  ;;  %v5872_v27 = vmax.f32 %v5860_v44, 0.0 }
 0xfb3   : > { %6041 = vmatprep.mubr.f32.mxu1 %v10967_v62  ;;  %v6092_v62 = vld [vmem:[%s8523_s29 + $0xa0] sm:$0xff] }
 0xfb4   : > { %v8021_v9 = vpack.c.bf16 %v6093_v23, %v6092_v62 }
 0xfb6   : > { %7271 = vmatmul.mubr.msk.f32.gmra.mrb[160].mxu1 %vm2527_vm7, %v5872_v27  ;;  %8022 = vmatpush1.bf16.msra.mxu0 %v8021_v9 }
 0xfb7   : > { %7937 = vmatprep.mubr.msk.f32.mxu1 %vm2527_vm7, %v5863_v10  ;;  %8023 = vmatprep.subr.bf16.mxu0 %v10981_v14 }
 0xfba   : > { %7938 = vmatmul.mubr.msk.f32.vlgmr.msra.gmra.mrb[162].mxu1 %vm2527_vm7, %v5864_v49  ;;  %8025 = vmatpush1.bf16.msra.mxu0 %v8024_v40 }
 0xfbb   : > { %7940 = vmatprep.mubr.msk.f32.mxu1 %vm2527_vm7, %v5865_v11 }
 0xfbe   : > { %7941 = vmatmul.mubr.msk.f32.gmra.mrb[164].mxu1 %vm2527_vm7, %v5866_v61 }
 0xfbf   : > { %7943 = vmatprep.mubr.msk.f32.mxu1 %vm2527_vm7, %v5867_v34 }
 0xfc2   : > { %7944 = vmatmul.mubr.msk.f32.gmra.mrb[166].mxu1 %vm2527_vm7, %v5868_v7 }
 0xfc3   : > { %7946 = vmatprep.mubr.msk.f32.mxu1 %vm2527_vm7, %v5869_v29 }
 0xfc6   : > { %7947 = vmatmul.mubr.msk.f32.gmra.mrb[168].mxu1 %vm2527_vm7, %v5870_v28 }
 0xfc7   : > { %7949 = vmatprep.mubr.msk.f32.mxu1 %vm2527_vm7, %v5871_v59 }
 0xfca   : > { %7950 = vmatmul.mubr.msk.f32.gmra.mrb[170].mxu1 %vm2527_vm7, %v5872_v27 }
0x1065   : > { %v5989_v16 = vpop.f32.mrb[82].mxu1 }
0x1066   : > { %v5990_v0 = vadd.f32 %v5989_v16, %v10680_v12  ;;  %v5991_v21 = vpop.f32.mrb[83].mxu1 }
0x1067   : > { %v5992_v30 = vadd.f32 %v5991_v21, %v10682_v33 }
0x1068   : > { %v6048_v53 = vmax.f32 %v5990_v0, 0.0 }
0x1069   : > { %v6049_v14 = vmax.f32 %v5992_v30, 0.0  ;;  %v5995_v31 = vpop.f32.mrb[144].mxu1 }
0x106a   : > { %v5996_v36 = vadd.f32 %v5995_v31, %v10680_v12  ;;  %v5997_v56 = vpop.f32.mrb[145].mxu1 }
0x106b   : > { %v5998_v32 = vadd.f32 %v5997_v56, %v10682_v33  ;;  %7272 = vmatprep.mubr.msk.f32.mxu0 %vm2281_vm5, %v6049_v14 }
0x106c   : > { %6191 = vmatmul.mubr.f32.vlgmr.msra.gmra.mrb[116].mxu0 %v6048_v53  ;;  %v6050_v25 = vmax.f32 %v5996_v36, 0.0  ;;  %v7292_v36 = vld [vmem:[%s8528_s25] ss:$0 sm:$0xff] }
0x106d   : > { %v6051_v24 = vmax.f32 %v5998_v32, 0.0  ;;  %v6001_v46 = vpop.f32.mrb[146].mxu1 }
0x106e   : > { %v6002_v35 = vadd.f32 %v6001_v46, %v10680_v12  ;;  %v6003_v51 = vpop.f32.mrb[147].mxu1 }
0x106f   : > { %v6004_v10 = vadd.f32 %v6003_v51, %v10682_v33  ;;  %7273 = vmatprep.mubr.msk.f32.mxu0 %vm2281_vm5, %v6051_v24 }
0x1070   : > { %6196 = vmatmul.mubr.f32.gmra.mrb[118].mxu0 %v6050_v25  ;;  %v6052_v57 = vmax.f32 %v6002_v35, 0.0 }
0x1071   : > { %v6053_v3 = vmax.f32 %v6004_v10, 0.0  ;;  %v6007_v52 = vpop.f32.mrb[148].mxu1 }
0x1072   : > { %v6008_v49 = vadd.f32 %v6007_v52, %v10680_v12  ;;  %v6009_v50 = vpop.f32.mrb[149].mxu1 }
0x1073   : > { %v6010_v13 = vadd.f32 %v6009_v50, %v10682_v33  ;;  %7274 = vmatprep.mubr.msk.f32.mxu0 %vm2281_vm5, %v6053_v3 }
0x1074   : > { %6201 = vmatmul.mubr.f32.gmra.mrb[120].mxu0 %v6052_v57  ;;  %v6054_v11 = vmax.f32 %v6008_v49, 0.0 }
0x1075   : > { %v6055_v6 = vmax.f32 %v6010_v13, 0.0  ;;  %v6013_v19 = vpop.f32.mrb[150].mxu1 }
0x1076   : > { %v6014_v5 = vadd.f32 %v6013_v19, %v10680_v12  ;;  %v6015_v22 = vpop.f32.mrb[151].mxu1 }
0x1077   : > { %v6016_v61 = vadd.f32 %v6015_v22, %v10682_v33  ;;  %7275 = vmatprep.mubr.msk.f32.mxu0 %vm2281_vm5, %v6055_v6 }
0x1078   : > { %6206 = vmatmul.mubr.f32.gmra.mrb[122].mxu0 %v6054_v11  ;;  %v6056_v8 = vmax.f32 %v6014_v5, 0.0 }
0x1079   : > { %v6057_v39 = vmax.f32 %v6016_v61, 0.0  ;;  %v6019_v17 = vpop.f32.mrb[152].mxu1 }
0x107a   : > { %v6020_v26 = vadd.f32 %v6019_v17, %v10680_v12  ;;  %v6021_v34 = vpop.f32.mrb[153].mxu1 }
0x107b   : > { %v6022_v20 = vadd.f32 %v6021_v34, %v10682_v33  ;;  %7276 = vmatprep.mubr.msk.f32.mxu0 %vm2281_vm5, %v6057_v39 }
0x107c   : > { %6211 = vmatmul.mubr.f32.gmra.mrb[124].mxu0 %v6056_v8  ;;  %v6058_v38 = vmax.f32 %v6020_v26, 0.0 }
0x107d   : > { %v6059_v60 = vmax.f32 %v6022_v20, 0.0  ;;  %v6025_v7 = vpop.f32.mrb[154].mxu1 }
0x107e   : > { %v6026_v47 = vadd.f32 %v6025_v7, %v10680_v12  ;;  %v6027_v55 = vpop.f32.mrb[155].mxu1 }
0x107f   : > { %v6028_v45 = vadd.f32 %v6027_v55, %v10682_v33  ;;  %7277 = vmatprep.mubr.msk.f32.mxu0 %vm2281_vm5, %v6059_v60 }
0x1080   : > { %6216 = vmatmul.mubr.f32.gmra.mrb[126].mxu0 %v6058_v38  ;;  %v6060_v4 = vmax.f32 %v6026_v47, 0.0 }
0x1081   : > { %v6061_v29 = vmax.f32 %v6028_v45, 0.0  ;;  %v6031_v2 = vpop.f32.mrb[156].mxu1 }
0x1082   : > { %v6032_v28 = vadd.f32 %v6031_v2, %v10680_v12  ;;  %v6033_v1 = vpop.f32.mrb[157].mxu1 }
0x1083   : > { %v6034_v18 = vadd.f32 %v6033_v1, %v10682_v33  ;;  %7278 = vmatprep.mubr.msk.f32.mxu0 %vm2281_vm5, %v6061_v29 }
0x1084   : > { %6221 = vmatmul.mubr.f32.gmra.mrb[128].mxu0 %v6060_v4  ;;  %v6062_v59 = vmax.f32 %v6032_v28, 0.0 }
0x1085   : > { %v6063_v43 = vmax.f32 %v6034_v18, 0.0  ;;  %v6037_v63 = vpop.f32.mrb[158].mxu1 }
0x1086   : > { %v6038_v44 = vadd.f32 %v6037_v63, %v10680_v12  ;;  %v6039_v42 = vpop.f32.mrb[159].mxu1 }
0x1087   : > { %v6040_v27 = vadd.f32 %v6039_v42, %v10682_v33  ;;  %7279 = vmatprep.mubr.msk.f32.mxu0 %vm2281_vm5, %v6063_v43 }
0x1088   : > { %6226 = vmatmul.mubr.f32.gmra.mrb[130].mxu0 %v6062_v59  ;;  %v6064_v9 = vmax.f32 %v6038_v44, 0.0 }
0x1089   : > { %v6065_v62 = vmax.f32 %v6040_v27, 0.0  ;;  %v6043_v23 = vpop.f32.mrb[160].mxu1 }
0x108a   : > { %v6044_v37 = vadd.f32 %v6043_v23, %v10680_v12  ;;  %v6045_v58 = vpop.f32.mrb[161].mxu1 }
0x108b   : > { %v6046_v40 = vadd.f32 %v6045_v58, %v10682_v33  ;;  %7280 = vmatprep.mubr.msk.f32.mxu0 %vm2281_vm5, %v6065_v62 }
0x108c   : > { %6231 = vmatmul.mubr.f32.gmra.mrb[132].mxu0 %v6064_v9  ;;  %v6066_v15 = vmax.f32 %v6044_v37, 0.0 }
0x108d   : > { %v6067_v54 = vmax.f32 %v6046_v40, 0.0  ;;  %v7939_v48 = vpop.f32.mrb[162].mxu1 }
0x108e   : > { %v6307_v41 = vpop.f32.mrb[163].mxu1 }
0x108f   : > { %7281 = vmatprep.mubr.msk.f32.mxu0 %vm2281_vm5, %v6067_v54 }
0x1090   : > { %6236 = vmatmul.mubr.f32.gmra.mrb[134].mxu0 %v6066_v15 }
0x1091   : > { %v7942_v16 = vpop.f32.mrb[164].mxu1 }
0x1092   : > { %v6317_v0 = vpop.f32.mrb[165].mxu1 }
0x1095   : > { %v7945_v21 = vpop.f32.mrb[166].mxu1 }
0x1096   : > { %v6327_v12 = vpop.f32.mrb[167].mxu1 }
0x1099   : > { %v7948_v30 = vpop.f32.mrb[168].mxu1 }
0x109a   : > { %v6337_v14 = vpop.f32.mrb[169].mxu1 }
0x109d   : > { %v7951_v33 = vpop.f32.mrb[170].mxu1 }
0x109e   : > { %v6347_v31 = vpop.f32.mrb[171].mxu1 }
0x113f   : > { %v6192_v53 = vpop.f32.mrb[116].mxu0 }
0x1140   : > { %v6308_v56 = vadd.f32 %v6307_v41, %v6192_v53  ;;  %v6194_v32 = vpop.f32.mrb[117].mxu0 }
0x1142   : > { %v6363_v24 = vadd.f32 %v7292_v36, %v6308_v56 }
0x1143   : > { %v6197_v46 = vpop.f32.mrb[118].mxu0 }
0x1144   : > { %6373 = vst [vmem:[%s10717_s1] sm:$0xff] %v6363_v24  ;;  %v6313_v25 = vadd.f32 %v7939_v48, %v6197_v46  ;;  %v6199_v35 = vpop.f32.mrb[119].mxu0 }
0x1146   : > { %v6364_v51 = vadd.f32 %v7292_v36, %v6313_v25 }
0x1147   : > { %v6202_v10 = vpop.f32.mrb[120].mxu0 }
0x1148   : > { %6374 = vst [vmem:[%s10717_s1 + $0x8] sm:$0xff] %v6364_v51  ;;  %v6318_v3 = vadd.f32 %v6317_v0, %v6202_v10  ;;  %v6204_v52 = vpop.f32.mrb[121].mxu0 }
0x114a   : > { %v6365_v57 = vadd.f32 %v7292_v36, %v6318_v3 }
0x114b   : > { %v6207_v49 = vpop.f32.mrb[122].mxu0 }
0x114c   : > { %6375 = vst [vmem:[%s10717_s1 + $0x10] sm:$0xff] %v6365_v57  ;;  %v6323_v50 = vadd.f32 %v7942_v16, %v6207_v49  ;;  %v6209_v13 = vpop.f32.mrb[123].mxu0 }
0x114e   : > { %v6366_v6 = vadd.f32 %v7292_v36, %v6323_v50 }
0x114f   : > { %v6212_v19 = vpop.f32.mrb[124].mxu0 }
0x1150   : > { %6376 = vst [vmem:[%s10717_s1 + $0x18] sm:$0xff] %v6366_v6  ;;  %v6328_v11 = vadd.f32 %v6327_v12, %v6212_v19  ;;  %v6214_v5 = vpop.f32.mrb[125].mxu0 }
0x1152   : > { %v6367_v22 = vadd.f32 %v7292_v36, %v6328_v11 }
0x1153   : > { %v6217_v61 = vpop.f32.mrb[126].mxu0 }
0x1154   : > { %6377 = vst [vmem:[%s10717_s1 + $0x20] sm:$0xff] %v6367_v22  ;;  %v6333_v39 = vadd.f32 %v7945_v21, %v6217_v61  ;;  %v6219_v17 = vpop.f32.mrb[127].mxu0 }
0x1156   : > { %v6368_v8 = vadd.f32 %v7292_v36, %v6333_v39 }
0x1157   : > { %v6222_v26 = vpop.f32.mrb[128].mxu0 }
0x1158   : > { %6378 = vst [vmem:[%s10717_s1 + $0x28] sm:$0xff] %v6368_v8  ;;  %v6338_v34 = vadd.f32 %v6337_v14, %v6222_v26  ;;  %v6224_v20 = vpop.f32.mrb[129].mxu0 }
0x115a   : > { %v6369_v60 = vadd.f32 %v7292_v36, %v6338_v34 }
0x115b   : > { %v6227_v7 = vpop.f32.mrb[130].mxu0 }
0x115c   : > { %6379 = vst [vmem:[%s10717_s1 + $0x30] sm:$0xff] %v6369_v60  ;;  %v6343_v38 = vadd.f32 %v7948_v30, %v6227_v7  ;;  %v6229_v47 = vpop.f32.mrb[131].mxu0 }
0x115e   : > { %v6370_v55 = vadd.f32 %v7292_v36, %v6343_v38 }
0x115f   : > { %v6232_v45 = vpop.f32.mrb[132].mxu0 }
0x1160   : > { %6380 = vst [vmem:[%s10717_s1 + $0x38] sm:$0xff] %v6370_v55  ;;  %v6348_v29 = vadd.f32 %v6347_v31, %v6232_v45  ;;  %v6234_v2 = vpop.f32.mrb[133].mxu0 }
0x1162   : > { %v6371_v4 = vadd.f32 %v7292_v36, %v6348_v29 }
0x1163   : > { %v6237_v28 = vpop.f32.mrb[134].mxu0 }
0x1164   : > { %6381 = vst [vmem:[%s10717_s1 + $0x40] sm:$0xff] %v6371_v4  ;;  %v6353_v1 = vadd.f32 %v7951_v33, %v6237_v28  ;;  %v6239_v18 = vpop.f32.mrb[135].mxu0 }
0x1166   : > { %v6372_v43 = vadd.f32 %v7292_v36, %v6353_v1 }
0x1168   : > { %6382 = vst [vmem:[%s10717_s1 + $0x48] sm:$0xff] %v6372_v43 }
0x1169 PF: > { %s96_s15 = sadd.s32 1, %s8239_s15  }
0x116a   : > { %p93_p5 = scmp.ge.s32.totalorder %s96_s15, 4  }
0x116c   :  { %95 = sbr.rel (!%p93_p5) target bundleno = 81 (0x51), region = 344 }

</bundles_post_ra>
